<compile_context>
chip_gen: v6e
topology: v6e:2x2x1
jax: 0.10.0
libtpu: 0.0.40
codegen_flags: <defaults>
</compile_context>

<pallas_src>
import functools

import jax
import jax.numpy as jnp
from jax import lax
from jax.experimental import pallas as pl
from jax.experimental.pallas import tpu as pltpu


# ------------------------------ Pallas kernel -------------------------------

def _conv_same_kernel(x_ref, a_ref, b_ref, o_ref, *, d_out, h_out, w_pad,
                      k_d, k_h, k_w):
    """One batch element of a 3x3x3 'same' Conv3d as shifted-slab GEMMs.

    x_ref : (1, Cin_p, D_pad, Hp*Wp)    f32  zero-padded input, H/W merged
    a_ref : (k_d, Cout, k_h*k_w*Cin_p)  bf16 GEMM weights, one matrix per depth tap
    b_ref : (Cout, 1)                   f32  bias
    o_ref : (1, Cout, D_out, h_out*Wp)  f32  (2 seam cols / row trimmed by caller)
    """
    lanes = h_out * w_pad
    cout = o_ref.shape[1]
    for do in range(d_out):                       # static unrolled loop
        acc = jnp.zeros((cout, lanes), jnp.float32)
        for kd in range(k_d):
            # Assemble K = k_h*k_w*Cin_p rows of the column matrix from
            # contiguous lane-slabs of the merged (H*W) axis.  Every slab is
            # Cin_p (multiple of 8) sublanes -> aligned concatenation.
            cols = [x_ref[0, :, do + kd, pl.ds(kh * w_pad + kw, lanes)]
                    for kh in range(k_h) for kw in range(k_w)]
            xcols = jnp.concatenate(cols, axis=0).astype(jnp.bfloat16)
            acc = acc + jnp.dot(a_ref[kd], xcols,
                                preferred_element_type=jnp.float32)
        o_ref[0, :, do, :] = acc + b_ref[...]     # lane-dense (Cout, 288) store


# --------------------------------- wrapper ----------------------------------

def blue_block_forward(x, weight, bias):
    """PyTorch BlueBlock.forward: Conv3d(Cin, Cout, k=(3,3,3), stride=1, pad=1).

    x: (N, Cin, D, H, W) f32 NCDHW, weight: (Cout, Cin, 3, 3, 3), bias: (Cout,).
    Returns (N, Cout, D, H, W) f32 NCDHW.
    """
    n, cin, d, h, w = x.shape
    cout, cin_w, k_d, k_h, k_w = weight.shape
    assert cin_w == cin and (k_d, k_h, k_w) == (3, 3, 3)
    pad = 1                                       # 'same' for k=3, stride=1

    # Channels padded to a multiple of 8 (zero weights for the pad channels).
    cin_p = ((cin + 7) // 8) * 8
    # Spatial zero padding = the conv's own padding; H gets one extra bottom
    # row so shifted slabs of length H*Wp stay inside the merged axis.
    extra_h = 1 if k_w > 1 else 0
    wp, hp, dp = w + 2 * pad, h + 2 * pad + extra_h, d + 2 * pad
    xp = jnp.pad(x, ((0, 0), (0, cin_p - cin), (pad, pad),
                     (pad, pad + extra_h), (pad, pad)))
    xp = xp.reshape(n, cin_p, dp, hp * wp)        # contiguous merge of (H, W)

    # GEMM weights: (k_d, Cout, k_h*k_w*Cin_p), K ordered (kh, kw, cin); bf16.
    wpad = jnp.pad(weight, ((0, 0), (0, cin_p - cin), (0, 0), (0, 0), (0, 0)))
    a = jnp.transpose(wpad, (2, 0, 3, 4, 1)).reshape(k_d, cout, k_h * k_w * cin_p)
    a = a.astype(jnp.bfloat16)
    b = bias.reshape(cout, 1).astype(jnp.float32)

    lanes = h * wp
    kernel = functools.partial(_conv_same_kernel, d_out=d, h_out=h, w_pad=wp,
                               k_d=k_d, k_h=k_h, k_w=k_w)
    out_m = pl.pallas_call(
        kernel,
        out_shape=jax.ShapeDtypeStruct((n, cout, d, lanes), jnp.float32),
        grid=(n,),                                # 2 parallel steps (v7x: both TCs)
        in_specs=[
            pl.BlockSpec((1, cin_p, dp, hp * wp), lambda i: (i, 0, 0, 0)),
            pl.BlockSpec((k_d, cout, k_h * k_w * cin_p), lambda i: (0, 0, 0)),
            pl.BlockSpec((cout, 1), lambda i: (0, 0)),
        ],
        out_specs=pl.BlockSpec((1, cout, d, lanes), lambda i: (i, 0, 0, 0)),
        compiler_params=pltpu.CompilerParams(dimension_semantics=("parallel",)),
    )(xp, a, b)

    # Trim the 2 seam columns per output row (Wp -> W); already NCDHW.
    return out_m.reshape(n, cout, d, h, wp)[..., :w]


# ----------------------- pure-JAX reference (same precision) ----------------

def conv3d_reference(x, weight, bias):
    # bf16 operands with f32 accumulation -- matches the kernel's MXU precision.
    y = lax.conv_general_dilated(
        x.astype(jnp.bfloat16), weight.astype(jnp.bfloat16),
        window_strides=(1, 1, 1), padding=((1, 1), (1, 1), (1, 1)),
        dimension_numbers=("NCDHW", "OIDHW", "NCDHW"),
        preferred_element_type=jnp.float32)
    return y + bias.reshape(1, -1, 1, 1, 1).astype(jnp.float32)


# ----------------------------------- main ------------------------------------

if __name__ == "__main__":
    key = jax.random.PRNGKey(0)
    kx, kw_key, kb_key = jax.random.split(key, 3)

    N, CIN, D, H, W, COUT = 2, 4, 8, 16, 16, 32
    x = jax.random.normal(kx, (N, CIN, D, H, W), jnp.float32)

    # PyTorch default Conv3d init: U(-1/sqrt(fan_in), 1/sqrt(fan_in)).
    fan_in = CIN * 3 * 3 * 3
    bound = 1.0 / (fan_in ** 0.5)
    weight = jax.random.uniform(kw_key, (COUT, CIN, 3, 3, 3), jnp.float32,
                                -bound, bound)
    bias = jax.random.uniform(kb_key, (COUT,), jnp.float32, -bound, bound)

    fwd = jax.jit(blue_block_forward)
    out = fwd(x, weight, bias)
    jax.block_until_ready(out)

    assert out.shape == (N, COUT, D, H, W), out.shape
    assert bool(jnp.all(jnp.isfinite(out)))

    ref = conv3d_reference(x, weight, bias)
    err = float(jnp.max(jnp.abs(out - ref)))
    assert err < 1e-2, f"max |kernel - reference| = {err}"

    print("KERNEL_OK")
</pallas_src>

<mosaic_0001>
module attributes {stable_mosaic.version = 11 : i64} {
  func.func @_conv_same_kernel(%arg0: i32, %arg1: memref<1x8x10x342xf32, #tpu.memory_space<vmem>>, %arg2: memref<3x32x72xbf16, #tpu.memory_space<vmem>>, %arg3: memref<32x1xf32, #tpu.memory_space<vmem>>, %arg4: memref<1x32x8x288xf32, #tpu.memory_space<vmem>>) attributes {dimension_semantics = [#tpu.dimension_semantics<parallel>], iteration_bounds = array<i64: 2>, scalar_prefetch = 0 : i64, scratch_operands = 0 : i64, tpu.core_type = #tpu.core_type<tc>, window_params = [{transform_indices = @transform_0, window_bounds = array<i64: 1, 8, 10, 342>}, {pipeline_mode = #tpu.pipeline_mode<synchronous>, transform_indices = @transform_1, window_bounds = array<i64: 3, 32, 72>}, {pipeline_mode = #tpu.pipeline_mode<synchronous>, transform_indices = @transform_2, window_bounds = array<i64: 32, 1>}, {transform_indices = @transform_3, window_bounds = array<i64: 1, 32, 8, 288>}]} {
    %cst = arith.constant 0.000000e+00 : f32
    %0 = vector.broadcast %cst : f32 to vector<32x288xf32>
    %c0 = arith.constant 0 : index
    %c0_0 = arith.constant 0 : index
    %c0_1 = arith.constant 0 : index
    %c0_2 = arith.constant 0 : index
    %1 = vector.load %arg1[%c0, %c0_0, %c0_1, %c0_2] : memref<1x8x10x342xf32, #tpu.memory_space<vmem>>, vector<1x8x1x288xf32>
    %2 = vector.shape_cast %1 : vector<1x8x1x288xf32> to vector<8x288xf32>
    %c0_3 = arith.constant 0 : index
    %c0_4 = arith.constant 0 : index
    %c0_5 = arith.constant 0 : index
    %c1 = arith.constant 1 : index
    %3 = vector.load %arg1[%c0_3, %c0_4, %c0_5, %c1] : memref<1x8x10x342xf32, #tpu.memory_space<vmem>>, vector<1x8x1x288xf32>
    %4 = vector.shape_cast %3 : vector<1x8x1x288xf32> to vector<8x288xf32>
    %c0_6 = arith.constant 0 : index
    %c0_7 = arith.constant 0 : index
    %c0_8 = arith.constant 0 : index
    %c2 = arith.constant 2 : index
    %5 = vector.load %arg1[%c0_6, %c0_7, %c0_8, %c2] : memref<1x8x10x342xf32, #tpu.memory_space<vmem>>, vector<1x8x1x288xf32>
    %6 = vector.shape_cast %5 : vector<1x8x1x288xf32> to vector<8x288xf32>
    %c0_9 = arith.constant 0 : index
    %c0_10 = arith.constant 0 : index
    %c0_11 = arith.constant 0 : index
    %c18 = arith.constant 18 : index
    %7 = vector.load %arg1[%c0_9, %c0_10, %c0_11, %c18] : memref<1x8x10x342xf32, #tpu.memory_space<vmem>>, vector<1x8x1x288xf32>
    %8 = vector.shape_cast %7 : vector<1x8x1x288xf32> to vector<8x288xf32>
    %c0_12 = arith.constant 0 : index
    %c0_13 = arith.constant 0 : index
    %c0_14 = arith.constant 0 : index
    %c19 = arith.constant 19 : index
    %9 = vector.load %arg1[%c0_12, %c0_13, %c0_14, %c19] : memref<1x8x10x342xf32, #tpu.memory_space<vmem>>, vector<1x8x1x288xf32>
    %10 = vector.shape_cast %9 : vector<1x8x1x288xf32> to vector<8x288xf32>
    %c0_15 = arith.constant 0 : index
    %c0_16 = arith.constant 0 : index
    %c0_17 = arith.constant 0 : index
    %c20 = arith.constant 20 : index
    %11 = vector.load %arg1[%c0_15, %c0_16, %c0_17, %c20] : memref<1x8x10x342xf32, #tpu.memory_space<vmem>>, vector<1x8x1x288xf32>
    %12 = vector.shape_cast %11 : vector<1x8x1x288xf32> to vector<8x288xf32>
    %c0_18 = arith.constant 0 : index
    %c0_19 = arith.constant 0 : index
    %c0_20 = arith.constant 0 : index
    %c36 = arith.constant 36 : index
    %13 = vector.load %arg1[%c0_18, %c0_19, %c0_20, %c36] : memref<1x8x10x342xf32, #tpu.memory_space<vmem>>, vector<1x8x1x288xf32>
    %14 = vector.shape_cast %13 : vector<1x8x1x288xf32> to vector<8x288xf32>
    %c0_21 = arith.constant 0 : index
    %c0_22 = arith.constant 0 : index
    %c0_23 = arith.constant 0 : index
    %c37 = arith.constant 37 : index
    %15 = vector.load %arg1[%c0_21, %c0_22, %c0_23, %c37] : memref<1x8x10x342xf32, #tpu.memory_space<vmem>>, vector<1x8x1x288xf32>
    %16 = vector.shape_cast %15 : vector<1x8x1x288xf32> to vector<8x288xf32>
    %c0_24 = arith.constant 0 : index
    %c0_25 = arith.constant 0 : index
    %c0_26 = arith.constant 0 : index
    %c38 = arith.constant 38 : index
    %17 = vector.load %arg1[%c0_24, %c0_25, %c0_26, %c38] : memref<1x8x10x342xf32, #tpu.memory_space<vmem>>, vector<1x8x1x288xf32>
    %18 = vector.shape_cast %17 : vector<1x8x1x288xf32> to vector<8x288xf32>
    %19 = tpu.concatenate %2, %4, %6, %8, %10, %12, %14, %16, %18 in 0 : vector<8x288xf32>, vector<8x288xf32>, vector<8x288xf32>, vector<8x288xf32>, vector<8x288xf32>, vector<8x288xf32>, vector<8x288xf32>, vector<8x288xf32>, vector<8x288xf32> -> vector<72x288xf32>
    %20 = arith.truncf %19 : vector<72x288xf32> to vector<72x288xbf16>
    %c0_27 = arith.constant 0 : index
    %c0_28 = arith.constant 0 : index
    %c0_29 = arith.constant 0 : index
    %21 = vector.load %arg2[%c0_27, %c0_28, %c0_29] : memref<3x32x72xbf16, #tpu.memory_space<vmem>>, vector<1x32x72xbf16>
    %22 = vector.shape_cast %21 : vector<1x32x72xbf16> to vector<32x72xbf16>
    %cst_30 = arith.constant dense<0.000000e+00> : vector<32x288xf32>
    %23 = tpu.matmul %22, %20, %cst_30 {dimension_numbers = #tpu.dot_dimension_numbers<[1], [0], [0], [1], [0, 0, 1, 1], [], []>} : vector<32x72xbf16>, vector<72x288xbf16>, vector<32x288xf32> -> vector<32x288xf32>
    %24 = arith.addf %0, %23 : vector<32x288xf32>
    %c0_31 = arith.constant 0 : index
    %c0_32 = arith.constant 0 : index
    %c1_33 = arith.constant 1 : index
    %c0_34 = arith.constant 0 : index
    %25 = vector.load %arg1[%c0_31, %c0_32, %c1_33, %c0_34] : memref<1x8x10x342xf32, #tpu.memory_space<vmem>>, vector<1x8x1x288xf32>
    %26 = vector.shape_cast %25 : vector<1x8x1x288xf32> to vector<8x288xf32>
    %c0_35 = arith.constant 0 : index
    %c0_36 = arith.constant 0 : index
    %c1_37 = arith.constant 1 : index
    %c1_38 = arith.constant 1 : index
    %27 = vector.load %arg1[%c0_35, %c0_36, %c1_37, %c1_38] : memref<1x8x10x342xf32, #tpu.memory_space<vmem>>, vector<1x8x1x288xf32>
    %28 = vector.shape_cast %27 : vector<1x8x1x288xf32> to vector<8x288xf32>
    %c0_39 = arith.constant 0 : index
    %c0_40 = arith.constant 0 : index
    %c1_41 = arith.constant 1 : index
    %c2_42 = arith.constant 2 : index
    %29 = vector.load %arg1[%c0_39, %c0_40, %c1_41, %c2_42] : memref<1x8x10x342xf32, #tpu.memory_space<vmem>>, vector<1x8x1x288xf32>
    %30 = vector.shape_cast %29 : vector<1x8x1x288xf32> to vector<8x288xf32>
    %c0_43 = arith.constant 0 : index
    %c0_44 = arith.constant 0 : index
    %c1_45 = arith.constant 1 : index
    %c18_46 = arith.constant 18 : index
    %31 = vector.load %arg1[%c0_43, %c0_44, %c1_45, %c18_46] : memref<1x8x10x342xf32, #tpu.memory_space<vmem>>, vector<1x8x1x288xf32>
    %32 = vector.shape_cast %31 : vector<1x8x1x288xf32> to vector<8x288xf32>
    %c0_47 = arith.constant 0 : index
    %c0_48 = arith.constant 0 : index
    %c1_49 = arith.constant 1 : index
    %c19_50 = arith.constant 19 : index
    %33 = vector.load %arg1[%c0_47, %c0_48, %c1_49, %c19_50] : memref<1x8x10x342xf32, #tpu.memory_space<vmem>>, vector<1x8x1x288xf32>
    %34 = vector.shape_cast %33 : vector<1x8x1x288xf32> to vector<8x288xf32>
    %c0_51 = arith.constant 0 : index
    %c0_52 = arith.constant 0 : index
    %c1_53 = arith.constant 1 : index
    %c20_54 = arith.constant 20 : index
    %35 = vector.load %arg1[%c0_51, %c0_52, %c1_53, %c20_54] : memref<1x8x10x342xf32, #tpu.memory_space<vmem>>, vector<1x8x1x288xf32>
    %36 = vector.shape_cast %35 : vector<1x8x1x288xf32> to vector<8x288xf32>
    %c0_55 = arith.constant 0 : index
    %c0_56 = arith.constant 0 : index
    %c1_57 = arith.constant 1 : index
    %c36_58 = arith.constant 36 : index
    %37 = vector.load %arg1[%c0_55, %c0_56, %c1_57, %c36_58] : memref<1x8x10x342xf32, #tpu.memory_space<vmem>>, vector<1x8x1x288xf32>
    %38 = vector.shape_cast %37 : vector<1x8x1x288xf32> to vector<8x288xf32>
    %c0_59 = arith.constant 0 : index
    %c0_60 = arith.constant 0 : index
    %c1_61 = arith.constant 1 : index
    %c37_62 = arith.constant 37 : index
    %39 = vector.load %arg1[%c0_59, %c0_60, %c1_61, %c37_62] : memref<1x8x10x342xf32, #tpu.memory_space<vmem>>, vector<1x8x1x288xf32>
    %40 = vector.shape_cast %39 : vector<1x8x1x288xf32> to vector<8x288xf32>
    %c0_63 = arith.constant 0 : index
    %c0_64 = arith.constant 0 : index
    %c1_65 = arith.constant 1 : index
    %c38_66 = arith.constant 38 : index
    %41 = vector.load %arg1[%c0_63, %c0_64, %c1_65, %c38_66] : memref<1x8x10x342xf32, #tpu.memory_space<vmem>>, vector<1x8x1x288xf32>
    %42 = vector.shape_cast %41 : vector<1x8x1x288xf32> to vector<8x288xf32>
    %43 = tpu.concatenate %26, %28, %30, %32, %34, %36, %38, %40, %42 in 0 : vector<8x288xf32>, vector<8x288xf32>, vector<8x288xf32>, vector<8x288xf32>, vector<8x288xf32>, vector<8x288xf32>, vector<8x288xf32>, vector<8x288xf32>, vector<8x288xf32> -> vector<72x288xf32>
    %44 = arith.truncf %43 : vector<72x288xf32> to vector<72x288xbf16>
    %c1_67 = arith.constant 1 : index
    %c0_68 = arith.constant 0 : index
    %c0_69 = arith.constant 0 : index
    %45 = vector.load %arg2[%c1_67, %c0_68, %c0_69] : memref<3x32x72xbf16, #tpu.memory_space<vmem>>, vector<1x32x72xbf16>
    %46 = vector.shape_cast %45 : vector<1x32x72xbf16> to vector<32x72xbf16>
    %cst_70 = arith.constant dense<0.000000e+00> : vector<32x288xf32>
    %47 = tpu.matmul %46, %44, %cst_70 {dimension_numbers = #tpu.dot_dimension_numbers<[1], [0], [0], [1], [0, 0, 1, 1], [], []>} : vector<32x72xbf16>, vector<72x288xbf16>, vector<32x288xf32> -> vector<32x288xf32>
    %48 = arith.addf %24, %47 : vector<32x288xf32>
    %c0_71 = arith.constant 0 : index
    %c0_72 = arith.constant 0 : index
    %c2_73 = arith.constant 2 : index
    %c0_74 = arith.constant 0 : index
    %49 = vector.load %arg1[%c0_71, %c0_72, %c2_73, %c0_74] : memref<1x8x10x342xf32, #tpu.memory_space<vmem>>, vector<1x8x1x288xf32>
    %50 = vector.shape_cast %49 : vector<1x8x1x288xf32> to vector<8x288xf32>
    %c0_75 = arith.constant 0 : index
    %c0_76 = arith.constant 0 : index
    %c2_77 = arith.constant 2 : index
    %c1_78 = arith.constant 1 : index
    %51 = vector.load %arg1[%c0_75, %c0_76, %c2_77, %c1_78] : memref<1x8x10x342xf32, #tpu.memory_space<vmem>>, vector<1x8x1x288xf32>
    %52 = vector.shape_cast %51 : vector<1x8x1x288xf32> to vector<8x288xf32>
    %c0_79 = arith.constant 0 : index
    %c0_80 = arith.constant 0 : index
    %c2_81 = arith.constant 2 : index
    %c2_82 = arith.constant 2 : index
    %53 = vector.load %arg1[%c0_79, %c0_80, %c2_81, %c2_82] : memref<1x8x10x342xf32, #tpu.memory_space<vmem>>, vector<1x8x1x288xf32>
    %54 = vector.shape_cast %53 : vector<1x8x1x288xf32> to vector<8x288xf32>
    %c0_83 = arith.constant 0 : index
    %c0_84 = arith.constant 0 : index
    %c2_85 = arith.constant 2 : index
    %c18_86 = arith.constant 18 : index
    %55 = vector.load %arg1[%c0_83, %c0_84, %c2_85, %c18_86] : memref<1x8x10x342xf32, #tpu.memory_space<vmem>>, vector<1x8x1x288xf32>
    %56 = vector.shape_cast %55 : vector<1x8x1x288xf32> to vector<8x288xf32>
    %c0_87 = arith.constant 0 : index
    %c0_88 = arith.constant 0 : index
    %c2_89 = arith.constant 2 : index
    %c19_90 = arith.constant 19 : index
    %57 = vector.load %arg1[%c0_87, %c0_88, %c2_89, %c19_90] : memref<1x8x10x342xf32, #tpu.memory_space<vmem>>, vector<1x8x1x288xf32>
    %58 = vector.shape_cast %57 : vector<1x8x1x288xf32> to vector<8x288xf32>
    %c0_91 = arith.constant 0 : index
    %c0_92 = arith.constant 0 : index
    %c2_93 = arith.constant 2 : index
    %c20_94 = arith.constant 20 : index
    %59 = vector.load %arg1[%c0_91, %c0_92, %c2_93, %c20_94] : memref<1x8x10x342xf32, #tpu.memory_space<vmem>>, vector<1x8x1x288xf32>
    %60 = vector.shape_cast %59 : vector<1x8x1x288xf32> to vector<8x288xf32>
    %c0_95 = arith.constant 0 : index
    %c0_96 = arith.constant 0 : index
    %c2_97 = arith.constant 2 : index
    %c36_98 = arith.constant 36 : index
    %61 = vector.load %arg1[%c0_95, %c0_96, %c2_97, %c36_98] : memref<1x8x10x342xf32, #tpu.memory_space<vmem>>, vector<1x8x1x288xf32>
    %62 = vector.shape_cast %61 : vector<1x8x1x288xf32> to vector<8x288xf32>
    %c0_99 = arith.constant 0 : index
    %c0_100 = arith.constant 0 : index
    %c2_101 = arith.constant 2 : index
    %c37_102 = arith.constant 37 : index
    %63 = vector.load %arg1[%c0_99, %c0_100, %c2_101, %c37_102] : memref<1x8x10x342xf32, #tpu.memory_space<vmem>>, vector<1x8x1x288xf32>
    %64 = vector.shape_cast %63 : vector<1x8x1x288xf32> to vector<8x288xf32>
    %c0_103 = arith.constant 0 : index
    %c0_104 = arith.constant 0 : index
    %c2_105 = arith.constant 2 : index
    %c38_106 = arith.constant 38 : index
    %65 = vector.load %arg1[%c0_103, %c0_104, %c2_105, %c38_106] : memref<1x8x10x342xf32, #tpu.memory_space<vmem>>, vector<1x8x1x288xf32>
    %66 = vector.shape_cast %65 : vector<1x8x1x288xf32> to vector<8x288xf32>
    %67 = tpu.concatenate %50, %52, %54, %56, %58, %60, %62, %64, %66 in 0 : vector<8x288xf32>, vector<8x288xf32>, vector<8x288xf32>, vector<8x288xf32>, vector<8x288xf32>, vector<8x288xf32>, vector<8x288xf32>, vector<8x288xf32>, vector<8x288xf32> -> vector<72x288xf32>
    %68 = arith.truncf %67 : vector<72x288xf32> to vector<72x288xbf16>
    %c2_107 = arith.constant 2 : index
    %c0_108 = arith.constant 0 : index
    %c0_109 = arith.constant 0 : index
    %69 = vector.load %arg2[%c2_107, %c0_108, %c0_109] : memref<3x32x72xbf16, #tpu.memory_space<vmem>>, vector<1x32x72xbf16>
    %70 = vector.shape_cast %69 : vector<1x32x72xbf16> to vector<32x72xbf16>
    %cst_110 = arith.constant dense<0.000000e+00> : vector<32x288xf32>
    %71 = tpu.matmul %70, %68, %cst_110 {dimension_numbers = #tpu.dot_dimension_numbers<[1], [0], [0], [1], [0, 0, 1, 1], [], []>} : vector<32x72xbf16>, vector<72x288xbf16>, vector<32x288xf32> -> vector<32x288xf32>
    %72 = arith.addf %48, %71 : vector<32x288xf32>
    %c0_111 = arith.constant 0 : index
    %c0_112 = arith.constant 0 : index
    %73 = vector.load %arg3[%c0_111, %c0_112] : memref<32x1xf32, #tpu.memory_space<vmem>>, vector<32x1xf32>
    %74 = vector.broadcast %73 : vector<32x1xf32> to vector<32x288xf32>
    %75 = arith.addf %72, %74 : vector<32x288xf32>
    %c0_113 = arith.constant 0 : index
    %c0_114 = arith.constant 0 : index
    %c0_115 = arith.constant 0 : index
    %c0_116 = arith.constant 0 : index
    %76 = vector.load %arg4[%c0_113, %c0_114, %c0_115, %c0_116] : memref<1x32x8x288xf32, #tpu.memory_space<vmem>>, vector<1x32x1x288xf32>
    %77 = vector.shape_cast %76 : vector<1x32x1x288xf32> to vector<32x288xf32>
    %78 = vector.shape_cast %75 : vector<32x288xf32> to vector<1x32x1x288xf32>
    tpu.vector_store %arg4[%c0_113, %c0_114, %c0_115, %c0_116], %78 {strides = array<i32>} : memref<1x32x8x288xf32, #tpu.memory_space<vmem>>, vector<1x32x1x288xf32>,
    %cst_117 = arith.constant 0.000000e+00 : f32
    %79 = vector.broadcast %cst_117 : f32 to vector<32x288xf32>
    %c0_118 = arith.constant 0 : index
    %c0_119 = arith.constant 0 : index
    %c1_120 = arith.constant 1 : index
    %c0_121 = arith.constant 0 : index
    %80 = vector.load %arg1[%c0_118, %c0_119, %c1_120, %c0_121] : memref<1x8x10x342xf32, #tpu.memory_space<vmem>>, vector<1x8x1x288xf32>
    %81 = vector.shape_cast %80 : vector<1x8x1x288xf32> to vector<8x288xf32>
    %c0_122 = arith.constant 0 : index
    %c0_123 = arith.constant 0 : index
    %c1_124 = arith.constant 1 : index
    %c1_125 = arith.constant 1 : index
    %82 = vector.load %arg1[%c0_122, %c0_123, %c1_124, %c1_125] : memref<1x8x10x342xf32, #tpu.memory_space<vmem>>, vector<1x8x1x288xf32>
    %83 = vector.shape_cast %82 : vector<1x8x1x288xf32> to vector<8x288xf32>
    %c0_126 = arith.constant 0 : index
    %c0_127 = arith.constant 0 : index
    %c1_128 = arith.constant 1 : index
    %c2_129 = arith.constant 2 : index
    %84 = vector.load %arg1[%c0_126, %c0_127, %c1_128, %c2_129] : memref<1x8x10x342xf32, #tpu.memory_space<vmem>>, vector<1x8x1x288xf32>
    %85 = vector.shape_cast %84 : vector<1x8x1x288xf32> to vector<8x288xf32>
    %c0_130 = arith.constant 0 : index
    %c0_131 = arith.constant 0 : index
    %c1_132 = arith.constant 1 : index
    %c18_133 = arith.constant 18 : index
    %86 = vector.load %arg1[%c0_130, %c0_131, %c1_132, %c18_133] : memref<1x8x10x342xf32, #tpu.memory_space<vmem>>, vector<1x8x1x288xf32>
    %87 = vector.shape_cast %86 : vector<1x8x1x288xf32> to vector<8x288xf32>
    %c0_134 = arith.constant 0 : index
    %c0_135 = arith.constant 0 : index
    %c1_136 = arith.constant 1 : index
    %c19_137 = arith.constant 19 : index
    %88 = vector.load %arg1[%c0_134, %c0_135, %c1_136, %c19_137] : memref<1x8x10x342xf32, #tpu.memory_space<vmem>>, vector<1x8x1x288xf32>
    %89 = vector.shape_cast %88 : vector<1x8x1x288xf32> to vector<8x288xf32>
    %c0_138 = arith.constant 0 : index
    %c0_139 = arith.constant 0 : index
    %c1_140 = arith.constant 1 : index
    %c20_141 = arith.constant 20 : index
    %90 = vector.load %arg1[%c0_138, %c0_139, %c1_140, %c20_141] : memref<1x8x10x342xf32, #tpu.memory_space<vmem>>, vector<1x8x1x288xf32>
    %91 = vector.shape_cast %90 : vector<1x8x1x288xf32> to vector<8x288xf32>
    %c0_142 = arith.constant 0 : index
    %c0_143 = arith.constant 0 : index
    %c1_144 = arith.constant 1 : index
    %c36_145 = arith.constant 36 : index
    %92 = vector.load %arg1[%c0_142, %c0_143, %c1_144, %c36_145] : memref<1x8x10x342xf32, #tpu.memory_space<vmem>>, vector<1x8x1x288xf32>
    %93 = vector.shape_cast %92 : vector<1x8x1x288xf32> to vector<8x288xf32>
    %c0_146 = arith.constant 0 : index
    %c0_147 = arith.constant 0 : index
    %c1_148 = arith.constant 1 : index
    %c37_149 = arith.constant 37 : index
    %94 = vector.load %arg1[%c0_146, %c0_147, %c1_148, %c37_149] : memref<1x8x10x342xf32, #tpu.memory_space<vmem>>, vector<1x8x1x288xf32>
    %95 = vector.shape_cast %94 : vector<1x8x1x288xf32> to vector<8x288xf32>
    %c0_150 = arith.constant 0 : index
    %c0_151 = arith.constant 0 : index
    %c1_152 = arith.constant 1 : index
    %c38_153 = arith.constant 38 : index
    %96 = vector.load %arg1[%c0_150, %c0_151, %c1_152, %c38_153] : memref<1x8x10x342xf32, #tpu.memory_space<vmem>>, vector<1x8x1x288xf32>
    %97 = vector.shape_cast %96 : vector<1x8x1x288xf32> to vector<8x288xf32>
    %98 = tpu.concatenate %81, %83, %85, %87, %89, %91, %93, %95, %97 in 0 : vector<8x288xf32>, vector<8x288xf32>, vector<8x288xf32>, vector<8x288xf32>, vector<8x288xf32>, vector<8x288xf32>, vector<8x288xf32>, vector<8x288xf32>, vector<8x288xf32> -> vector<72x288xf32>
    %99 = arith.truncf %98 : vector<72x288xf32> to vector<72x288xbf16>
    %c0_154 = arith.constant 0 : index
    %c0_155 = arith.constant 0 : index
    %c0_156 = arith.constant 0 : index
    %100 = vector.load %arg2[%c0_154, %c0_155, %c0_156] : memref<3x32x72xbf16, #tpu.memory_space<vmem>>, vector<1x32x72xbf16>
    %101 = vector.shape_cast %100 : vector<1x32x72xbf16> to vector<32x72xbf16>
    %cst_157 = arith.constant dense<0.000000e+00> : vector<32x288xf32>
    %102 = tpu.matmul %101, %99, %cst_157 {dimension_numbers = #tpu.dot_dimension_numbers<[1], [0], [0], [1], [0, 0, 1, 1], [], []>} : vector<32x72xbf16>, vector<72x288xbf16>, vector<32x288xf32> -> vector<32x288xf32>
    %103 = arith.addf %79, %102 : vector<32x288xf32>
    %c0_158 = arith.constant 0 : index
    %c0_159 = arith.constant 0 : index
    %c2_160 = arith.constant 2 : index
    %c0_161 = arith.constant 0 : index
    %104 = vector.load %arg1[%c0_158, %c0_159, %c2_160, %c0_161] : memref<1x8x10x342xf32, #tpu.memory_space<vmem>>, vector<1x8x1x288xf32>
    %105 = vector.shape_cast %104 : vector<1x8x1x288xf32> to vector<8x288xf32>
    %c0_162 = arith.constant 0 : index
    %c0_163 = arith.constant 0 : index
    %c2_164 = arith.constant 2 : index
    %c1_165 = arith.constant 1 : index
    %106 = vector.load %arg1[%c0_162, %c0_163, %c2_164, %c1_165] : memref<1x8x10x342xf32, #tpu.memory_space<vmem>>, vector<1x8x1x288xf32>
    %107 = vector.shape_cast %106 : vector<1x8x1x288xf32> to vector<8x288xf32>
    %c0_166 = arith.constant 0 : index
    %c0_167 = arith.constant 0 : index
    %c2_168 = arith.constant 2 : index
    %c2_169 = arith.constant 2 : index
    %108 = vector.load %arg1[%c0_166, %c0_167, %c2_168, %c2_169] : memref<1x8x10x342xf32, #tpu.memory_space<vmem>>, vector<1x8x1x288xf32>
    %109 = vector.shape_cast %108 : vector<1x8x1x288xf32> to vector<8x288xf32>
    %c0_170 = arith.constant 0 : index
    %c0_171 = arith.constant 0 : index
    %c2_172 = arith.constant 2 : index
    %c18_173 = arith.constant 18 : index
    %110 = vector.load %arg1[%c0_170, %c0_171, %c2_172, %c18_173] : memref<1x8x10x342xf32, #tpu.memory_space<vmem>>, vector<1x8x1x288xf32>
    %111 = vector.shape_cast %110 : vector<1x8x1x288xf32> to vector<8x288xf32>
    %c0_174 = arith.constant 0 : index
    %c0_175 = arith.constant 0 : index
    %c2_176 = arith.constant 2 : index
    %c19_177 = arith.constant 19 : index
    %112 = vector.load %arg1[%c0_174, %c0_175, %c2_176, %c19_177] : memref<1x8x10x342xf32, #tpu.memory_space<vmem>>, vector<1x8x1x288xf32>
    %113 = vector.shape_cast %112 : vector<1x8x1x288xf32> to vector<8x288xf32>
    %c0_178 = arith.constant 0 : index
    %c0_179 = arith.constant 0 : index
    %c2_180 = arith.constant 2 : index
    %c20_181 = arith.constant 20 : index
    %114 = vector.load %arg1[%c0_178, %c0_179, %c2_180, %c20_181] : memref<1x8x10x342xf32, #tpu.memory_space<vmem>>, vector<1x8x1x288xf32>
    %115 = vector.shape_cast %114 : vector<1x8x1x288xf32> to vector<8x288xf32>
    %c0_182 = arith.constant 0 : index
    %c0_183 = arith.constant 0 : index
    %c2_184 = arith.constant 2 : index
    %c36_185 = arith.constant 36 : index
    %116 = vector.load %arg1[%c0_182, %c0_183, %c2_184, %c36_185] : memref<1x8x10x342xf32, #tpu.memory_space<vmem>>, vector<1x8x1x288xf32>
    %117 = vector.shape_cast %116 : vector<1x8x1x288xf32> to vector<8x288xf32>
    %c0_186 = arith.constant 0 : index
    %c0_187 = arith.constant 0 : index
    %c2_188 = arith.constant 2 : index
    %c37_189 = arith.constant 37 : index
    %118 = vector.load %arg1[%c0_186, %c0_187, %c2_188, %c37_189] : memref<1x8x10x342xf32, #tpu.memory_space<vmem>>, vector<1x8x1x288xf32>
    %119 = vector.shape_cast %118 : vector<1x8x1x288xf32> to vector<8x288xf32>
    %c0_190 = arith.constant 0 : index
    %c0_191 = arith.constant 0 : index
    %c2_192 = arith.constant 2 : index
    %c38_193 = arith.constant 38 : index
    %120 = vector.load %arg1[%c0_190, %c0_191, %c2_192, %c38_193] : memref<1x8x10x342xf32, #tpu.memory_space<vmem>>, vector<1x8x1x288xf32>
    %121 = vector.shape_cast %120 : vector<1x8x1x288xf32> to vector<8x288xf32>
    %122 = tpu.concatenate %105, %107, %109, %111, %113, %115, %117, %119, %121 in 0 : vector<8x288xf32>, vector<8x288xf32>, vector<8x288xf32>, vector<8x288xf32>, vector<8x288xf32>, vector<8x288xf32>, vector<8x288xf32>, vector<8x288xf32>, vector<8x288xf32> -> vector<72x288xf32>
    %123 = arith.truncf %122 : vector<72x288xf32> to vector<72x288xbf16>
    %c1_194 = arith.constant 1 : index
    %c0_195 = arith.constant 0 : index
    %c0_196 = arith.constant 0 : index
    %124 = vector.load %arg2[%c1_194, %c0_195, %c0_196] : memref<3x32x72xbf16, #tpu.memory_space<vmem>>, vector<1x32x72xbf16>
    %125 = vector.shape_cast %124 : vector<1x32x72xbf16> to vector<32x72xbf16>
    %cst_197 = arith.constant dense<0.000000e+00> : vector<32x288xf32>
    %126 = tpu.matmul %125, %123, %cst_197 {dimension_numbers = #tpu.dot_dimension_numbers<[1], [0], [0], [1], [0, 0, 1, 1], [], []>} : vector<32x72xbf16>, vector<72x288xbf16>, vector<32x288xf32> -> vector<32x288xf32>
    %127 = arith.addf %103, %126 : vector<32x288xf32>
    %c0_198 = arith.constant 0 : index
    %c0_199 = arith.constant 0 : index
    %c3 = arith.constant 3 : index
    %c0_200 = arith.constant 0 : index
    %128 = vector.load %arg1[%c0_198, %c0_199, %c3, %c0_200] : memref<1x8x10x342xf32, #tpu.memory_space<vmem>>, vector<1x8x1x288xf32>
    %129 = vector.shape_cast %128 : vector<1x8x1x288xf32> to vector<8x288xf32>
    %c0_201 = arith.constant 0 : index
    %c0_202 = arith.constant 0 : index
    %c3_203 = arith.constant 3 : index
    %c1_204 = arith.constant 1 : index
    %130 = vector.load %arg1[%c0_201, %c0_202, %c3_203, %c1_204] : memref<1x8x10x342xf32, #tpu.memory_space<vmem>>, vector<1x8x1x288xf32>
    %131 = vector.shape_cast %130 : vector<1x8x1x288xf32> to vector<8x288xf32>
    %c0_205 = arith.constant 0 : index
    %c0_206 = arith.constant 0 : index
    %c3_207 = arith.constant 3 : index
    %c2_208 = arith.constant 2 : index
    %132 = vector.load %arg1[%c0_205, %c0_206, %c3_207, %c2_208] : memref<1x8x10x342xf32, #tpu.memory_space<vmem>>, vector<1x8x1x288xf32>
    %133 = vector.shape_cast %132 : vector<1x8x1x288xf32> to vector<8x288xf32>
    %c0_209 = arith.constant 0 : index
    %c0_210 = arith.constant 0 : index
    %c3_211 = arith.constant 3 : index
    %c18_212 = arith.constant 18 : index
    %134 = vector.load %arg1[%c0_209, %c0_210, %c3_211, %c18_212] : memref<1x8x10x342xf32, #tpu.memory_space<vmem>>, vector<1x8x1x288xf32>
    %135 = vector.shape_cast %134 : vector<1x8x1x288xf32> to vector<8x288xf32>
    %c0_213 = arith.constant 0 : index
    %c0_214 = arith.constant 0 : index
    %c3_215 = arith.constant 3 : index
    %c19_216 = arith.constant 19 : index
    %136 = vector.load %arg1[%c0_213, %c0_214, %c3_215, %c19_216] : memref<1x8x10x342xf32, #tpu.memory_space<vmem>>, vector<1x8x1x288xf32>
    %137 = vector.shape_cast %136 : vector<1x8x1x288xf32> to vector<8x288xf32>
    %c0_217 = arith.constant 0 : index
    %c0_218 = arith.constant 0 : index
    %c3_219 = arith.constant 3 : index
    %c20_220 = arith.constant 20 : index
    %138 = vector.load %arg1[%c0_217, %c0_218, %c3_219, %c20_220] : memref<1x8x10x342xf32, #tpu.memory_space<vmem>>, vector<1x8x1x288xf32>
    %139 = vector.shape_cast %138 : vector<1x8x1x288xf32> to vector<8x288xf32>
    %c0_221 = arith.constant 0 : index
    %c0_222 = arith.constant 0 : index
    %c3_223 = arith.constant 3 : index
    %c36_224 = arith.constant 36 : index
    %140 = vector.load %arg1[%c0_221, %c0_222, %c3_223, %c36_224] : memref<1x8x10x342xf32, #tpu.memory_space<vmem>>, vector<1x8x1x288xf32>
    %141 = vector.shape_cast %140 : vector<1x8x1x288xf32> to vector<8x288xf32>
    %c0_225 = arith.constant 0 : index
    %c0_226 = arith.constant 0 : index
    %c3_227 = arith.constant 3 : index
    %c37_228 = arith.constant 37 : index
    %142 = vector.load %arg1[%c0_225, %c0_226, %c3_227, %c37_228] : memref<1x8x10x342xf32, #tpu.memory_space<vmem>>, vector<1x8x1x288xf32>
    %143 = vector.shape_cast %142 : vector<1x8x1x288xf32> to vector<8x288xf32>
    %c0_229 = arith.constant 0 : index
    %c0_230 = arith.constant 0 : index
    %c3_231 = arith.constant 3 : index
    %c38_232 = arith.constant 38 : index
    %144 = vector.load %arg1[%c0_229, %c0_230, %c3_231, %c38_232] : memref<1x8x10x342xf32, #tpu.memory_space<vmem>>, vector<1x8x1x288xf32>
    %145 = vector.shape_cast %144 : vector<1x8x1x288xf32> to vector<8x288xf32>
    %146 = tpu.concatenate %129, %131, %133, %135, %137, %139, %141, %143, %145 in 0 : vector<8x288xf32>, vector<8x288xf32>, vector<8x288xf32>, vector<8x288xf32>, vector<8x288xf32>, vector<8x288xf32>, vector<8x288xf32>, vector<8x288xf32>, vector<8x288xf32> -> vector<72x288xf32>
    %147 = arith.truncf %146 : vector<72x288xf32> to vector<72x288xbf16>
    %c2_233 = arith.constant 2 : index
    %c0_234 = arith.constant 0 : index
    %c0_235 = arith.constant 0 : index
    %148 = vector.load %arg2[%c2_233, %c0_234, %c0_235] : memref<3x32x72xbf16, #tpu.memory_space<vmem>>, vector<1x32x72xbf16>
    %149 = vector.shape_cast %148 : vector<1x32x72xbf16> to vector<32x72xbf16>
    %cst_236 = arith.constant dense<0.000000e+00> : vector<32x288xf32>
    %150 = tpu.matmul %149, %147, %cst_236 {dimension_numbers = #tpu.dot_dimension_numbers<[1], [0], [0], [1], [0, 0, 1, 1], [], []>} : vector<32x72xbf16>, vector<72x288xbf16>, vector<32x288xf32> -> vector<32x288xf32>
    %151 = arith.addf %127, %150 : vector<32x288xf32>
    %c0_237 = arith.constant 0 : index
    %c0_238 = arith.constant 0 : index
    %152 = vector.load %arg3[%c0_237, %c0_238] : memref<32x1xf32, #tpu.memory_space<vmem>>, vector<32x1xf32>
    %153 = vector.broadcast %152 : vector<32x1xf32> to vector<32x288xf32>
    %154 = arith.addf %151, %153 : vector<32x288xf32>
    %c0_239 = arith.constant 0 : index
    %c0_240 = arith.constant 0 : index
    %c1_241 = arith.constant 1 : index
    %c0_242 = arith.constant 0 : index
    %155 = vector.load %arg4[%c0_239, %c0_240, %c1_241, %c0_242] : memref<1x32x8x288xf32, #tpu.memory_space<vmem>>, vector<1x32x1x288xf32>
    %156 = vector.shape_cast %155 : vector<1x32x1x288xf32> to vector<32x288xf32>
    %157 = vector.shape_cast %154 : vector<32x288xf32> to vector<1x32x1x288xf32>
    tpu.vector_store %arg4[%c0_239, %c0_240, %c1_241, %c0_242], %157 {strides = array<i32>} : memref<1x32x8x288xf32, #tpu.memory_space<vmem>>, vector<1x32x1x288xf32>,
    %cst_243 = arith.constant 0.000000e+00 : f32
    %158 = vector.broadcast %cst_243 : f32 to vector<32x288xf32>
    %c0_244 = arith.constant 0 : index
    %c0_245 = arith.constant 0 : index
    %c2_246 = arith.constant 2 : index
    %c0_247 = arith.constant 0 : index
    %159 = vector.load %arg1[%c0_244, %c0_245, %c2_246, %c0_247] : memref<1x8x10x342xf32, #tpu.memory_space<vmem>>, vector<1x8x1x288xf32>
    %160 = vector.shape_cast %159 : vector<1x8x1x288xf32> to vector<8x288xf32>
    %c0_248 = arith.constant 0 : index
    %c0_249 = arith.constant 0 : index
    %c2_250 = arith.constant 2 : index
    %c1_251 = arith.constant 1 : index
    %161 = vector.load %arg1[%c0_248, %c0_249, %c2_250, %c1_251] : memref<1x8x10x342xf32, #tpu.memory_space<vmem>>, vector<1x8x1x288xf32>
    %162 = vector.shape_cast %161 : vector<1x8x1x288xf32> to vector<8x288xf32>
    %c0_252 = arith.constant 0 : index
    %c0_253 = arith.constant 0 : index
    %c2_254 = arith.constant 2 : index
    %c2_255 = arith.constant 2 : index
    %163 = vector.load %arg1[%c0_252, %c0_253, %c2_254, %c2_255] : memref<1x8x10x342xf32, #tpu.memory_space<vmem>>, vector<1x8x1x288xf32>
    %164 = vector.shape_cast %163 : vector<1x8x1x288xf32> to vector<8x288xf32>
    %c0_256 = arith.constant 0 : index
    %c0_257 = arith.constant 0 : index
    %c2_258 = arith.constant 2 : index
    %c18_259 = arith.constant 18 : index
    %165 = vector.load %arg1[%c0_256, %c0_257, %c2_258, %c18_259] : memref<1x8x10x342xf32, #tpu.memory_space<vmem>>, vector<1x8x1x288xf32>
    %166 = vector.shape_cast %165 : vector<1x8x1x288xf32> to vector<8x288xf32>
    %c0_260 = arith.constant 0 : index
    %c0_261 = arith.constant 0 : index
    %c2_262 = arith.constant 2 : index
    %c19_263 = arith.constant 19 : index
    %167 = vector.load %arg1[%c0_260, %c0_261, %c2_262, %c19_263] : memref<1x8x10x342xf32, #tpu.memory_space<vmem>>, vector<1x8x1x288xf32>
    %168 = vector.shape_cast %167 : vector<1x8x1x288xf32> to vector<8x288xf32>
    %c0_264 = arith.constant 0 : index
    %c0_265 = arith.constant 0 : index
    %c2_266 = arith.constant 2 : index
    %c20_267 = arith.constant 20 : index
    %169 = vector.load %arg1[%c0_264, %c0_265, %c2_266, %c20_267] : memref<1x8x10x342xf32, #tpu.memory_space<vmem>>, vector<1x8x1x288xf32>
    %170 = vector.shape_cast %169 : vector<1x8x1x288xf32> to vector<8x288xf32>
    %c0_268 = arith.constant 0 : index
    %c0_269 = arith.constant 0 : index
    %c2_270 = arith.constant 2 : index
    %c36_271 = arith.constant 36 : index
    %171 = vector.load %arg1[%c0_268, %c0_269, %c2_270, %c36_271] : memref<1x8x10x342xf32, #tpu.memory_space<vmem>>, vector<1x8x1x288xf32>
    %172 = vector.shape_cast %171 : vector<1x8x1x288xf32> to vector<8x288xf32>
    %c0_272 = arith.constant 0 : index
    %c0_273 = arith.constant 0 : index
    %c2_274 = arith.constant 2 : index
    %c37_275 = arith.constant 37 : index
    %173 = vector.load %arg1[%c0_272, %c0_273, %c2_274, %c37_275] : memref<1x8x10x342xf32, #tpu.memory_space<vmem>>, vector<1x8x1x288xf32>
    %174 = vector.shape_cast %173 : vector<1x8x1x288xf32> to vector<8x288xf32>
    %c0_276 = arith.constant 0 : index
    %c0_277 = arith.constant 0 : index
    %c2_278 = arith.constant 2 : index
    %c38_279 = arith.constant 38 : index
    %175 = vector.load %arg1[%c0_276, %c0_277, %c2_278, %c38_279] : memref<1x8x10x342xf32, #tpu.memory_space<vmem>>, vector<1x8x1x288xf32>
    %176 = vector.shape_cast %175 : vector<1x8x1x288xf32> to vector<8x288xf32>
    %177 = tpu.concatenate %160, %162, %164, %166, %168, %170, %172, %174, %176 in 0 : vector<8x288xf32>, vector<8x288xf32>, vector<8x288xf32>, vector<8x288xf32>, vector<8x288xf32>, vector<8x288xf32>, vector<8x288xf32>, vector<8x288xf32>, vector<8x288xf32> -> vector<72x288xf32>
    %178 = arith.truncf %177 : vector<72x288xf32> to vector<72x288xbf16>
    %c0_280 = arith.constant 0 : index
    %c0_281 = arith.constant 0 : index
    %c0_282 = arith.constant 0 : index
    %179 = vector.load %arg2[%c0_280, %c0_281, %c0_282] : memref<3x32x72xbf16, #tpu.memory_space<vmem>>, vector<1x32x72xbf16>
    %180 = vector.shape_cast %179 : vector<1x32x72xbf16> to vector<32x72xbf16>
    %cst_283 = arith.constant dense<0.000000e+00> : vector<32x288xf32>
    %181 = tpu.matmul %180, %178, %cst_283 {dimension_numbers = #tpu.dot_dimension_numbers<[1], [0], [0], [1], [0, 0, 1, 1], [], []>} : vector<32x72xbf16>, vector<72x288xbf16>, vector<32x288xf32> -> vector<32x288xf32>
    %182 = arith.addf %158, %181 : vector<32x288xf32>
    %c0_284 = arith.constant 0 : index
    %c0_285 = arith.constant 0 : index
    %c3_286 = arith.constant 3 : index
    %c0_287 = arith.constant 0 : index
    %183 = vector.load %arg1[%c0_284, %c0_285, %c3_286, %c0_287] : memref<1x8x10x342xf32, #tpu.memory_space<vmem>>, vector<1x8x1x288xf32>
    %184 = vector.shape_cast %183 : vector<1x8x1x288xf32> to vector<8x288xf32>
    %c0_288 = arith.constant 0 : index
    %c0_289 = arith.constant 0 : index
    %c3_290 = arith.constant 3 : index
    %c1_291 = arith.constant 1 : index
    %185 = vector.load %arg1[%c0_288, %c0_289, %c3_290, %c1_291] : memref<1x8x10x342xf32, #tpu.memory_space<vmem>>, vector<1x8x1x288xf32>
    %186 = vector.shape_cast %185 : vector<1x8x1x288xf32> to vector<8x288xf32>
    %c0_292 = arith.constant 0 : index
    %c0_293 = arith.constant 0 : index
    %c3_294 = arith.constant 3 : index
    %c2_295 = arith.constant 2 : index
    %187 = vector.load %arg1[%c0_292, %c0_293, %c3_294, %c2_295] : memref<1x8x10x342xf32, #tpu.memory_space<vmem>>, vector<1x8x1x288xf32>
    %188 = vector.shape_cast %187 : vector<1x8x1x288xf32> to vector<8x288xf32>
    %c0_296 = arith.constant 0 : index
    %c0_297 = arith.constant 0 : index
    %c3_298 = arith.constant 3 : index
    %c18_299 = arith.constant 18 : index
    %189 = vector.load %arg1[%c0_296, %c0_297, %c3_298, %c18_299] : memref<1x8x10x342xf32, #tpu.memory_space<vmem>>, vector<1x8x1x288xf32>
    %190 = vector.shape_cast %189 : vector<1x8x1x288xf32> to vector<8x288xf32>
    %c0_300 = arith.constant 0 : index
    %c0_301 = arith.constant 0 : index
    %c3_302 = arith.constant 3 : index
    %c19_303 = arith.constant 19 : index
    %191 = vector.load %arg1[%c0_300, %c0_301, %c3_302, %c19_303] : memref<1x8x10x342xf32, #tpu.memory_space<vmem>>, vector<1x8x1x288xf32>
    %192 = vector.shape_cast %191 : vector<1x8x1x288xf32> to vector<8x288xf32>
    %c0_304 = arith.constant 0 : index
    %c0_305 = arith.constant 0 : index
    %c3_306 = arith.constant 3 : index
    %c20_307 = arith.constant 20 : index
    %193 = vector.load %arg1[%c0_304, %c0_305, %c3_306, %c20_307] : memref<1x8x10x342xf32, #tpu.memory_space<vmem>>, vector<1x8x1x288xf32>
    %194 = vector.shape_cast %193 : vector<1x8x1x288xf32> to vector<8x288xf32>
    %c0_308 = arith.constant 0 : index
    %c0_309 = arith.constant 0 : index
    %c3_310 = arith.constant 3 : index
    %c36_311 = arith.constant 36 : index
    %195 = vector.load %arg1[%c0_308, %c0_309, %c3_310, %c36_311] : memref<1x8x10x342xf32, #tpu.memory_space<vmem>>, vector<1x8x1x288xf32>
    %196 = vector.shape_cast %195 : vector<1x8x1x288xf32> to vector<8x288xf32>
    %c0_312 = arith.constant 0 : index
    %c0_313 = arith.constant 0 : index
    %c3_314 = arith.constant 3 : index
    %c37_315 = arith.constant 37 : index
    %197 = vector.load %arg1[%c0_312, %c0_313, %c3_314, %c37_315] : memref<1x8x10x342xf32, #tpu.memory_space<vmem>>, vector<1x8x1x288xf32>
    %198 = vector.shape_cast %197 : vector<1x8x1x288xf32> to vector<8x288xf32>
    %c0_316 = arith.constant 0 : index
    %c0_317 = arith.constant 0 : index
    %c3_318 = arith.constant 3 : index
    %c38_319 = arith.constant 38 : index
    %199 = vector.load %arg1[%c0_316, %c0_317, %c3_318, %c38_319] : memref<1x8x10x342xf32, #tpu.memory_space<vmem>>, vector<1x8x1x288xf32>
    %200 = vector.shape_cast %199 : vector<1x8x1x288xf32> to vector<8x288xf32>
    %201 = tpu.concatenate %184, %186, %188, %190, %192, %194, %196, %198, %200 in 0 : vector<8x288xf32>, vector<8x288xf32>, vector<8x288xf32>, vector<8x288xf32>, vector<8x288xf32>, vector<8x288xf32>, vector<8x288xf32>, vector<8x288xf32>, vector<8x288xf32> -> vector<72x288xf32>
    %202 = arith.truncf %201 : vector<72x288xf32> to vector<72x288xbf16>
    %c1_320 = arith.constant 1 : index
    %c0_321 = arith.constant 0 : index
    %c0_322 = arith.constant 0 : index
    %203 = vector.load %arg2[%c1_320, %c0_321, %c0_322] : memref<3x32x72xbf16, #tpu.memory_space<vmem>>, vector<1x32x72xbf16>
    %204 = vector.shape_cast %203 : vector<1x32x72xbf16> to vector<32x72xbf16>
    %cst_323 = arith.constant dense<0.000000e+00> : vector<32x288xf32>
    %205 = tpu.matmul %204, %202, %cst_323 {dimension_numbers = #tpu.dot_dimension_numbers<[1], [0], [0], [1], [0, 0, 1, 1], [], []>} : vector<32x72xbf16>, vector<72x288xbf16>, vector<32x288xf32> -> vector<32x288xf32>
    %206 = arith.addf %182, %205 : vector<32x288xf32>
    %c0_324 = arith.constant 0 : index
    %c0_325 = arith.constant 0 : index
    %c4 = arith.constant 4 : index
    %c0_326 = arith.constant 0 : index
    %207 = vector.load %arg1[%c0_324, %c0_325, %c4, %c0_326] : memref<1x8x10x342xf32, #tpu.memory_space<vmem>>, vector<1x8x1x288xf32>
    %208 = vector.shape_cast %207 : vector<1x8x1x288xf32> to vector<8x288xf32>
    %c0_327 = arith.constant 0 : index
    %c0_328 = arith.constant 0 : index
    %c4_329 = arith.constant 4 : index
    %c1_330 = arith.constant 1 : index
    %209 = vector.load %arg1[%c0_327, %c0_328, %c4_329, %c1_330] : memref<1x8x10x342xf32, #tpu.memory_space<vmem>>, vector<1x8x1x288xf32>
    %210 = vector.shape_cast %209 : vector<1x8x1x288xf32> to vector<8x288xf32>
    %c0_331 = arith.constant 0 : index
    %c0_332 = arith.constant 0 : index
    %c4_333 = arith.constant 4 : index
    %c2_334 = arith.constant 2 : index
    %211 = vector.load %arg1[%c0_331, %c0_332, %c4_333, %c2_334] : memref<1x8x10x342xf32, #tpu.memory_space<vmem>>, vector<1x8x1x288xf32>
    %212 = vector.shape_cast %211 : vector<1x8x1x288xf32> to vector<8x288xf32>
    %c0_335 = arith.constant 0 : index
    %c0_336 = arith.constant 0 : index
    %c4_337 = arith.constant 4 : index
    %c18_338 = arith.constant 18 : index
    %213 = vector.load %arg1[%c0_335, %c0_336, %c4_337, %c18_338] : memref<1x8x10x342xf32, #tpu.memory_space<vmem>>, vector<1x8x1x288xf32>
    %214 = vector.shape_cast %213 : vector<1x8x1x288xf32> to vector<8x288xf32>
    %c0_339 = arith.constant 0 : index
    %c0_340 = arith.constant 0 : index
    %c4_341 = arith.constant 4 : index
    %c19_342 = arith.constant 19 : index
    %215 = vector.load %arg1[%c0_339, %c0_340, %c4_341, %c19_342] : memref<1x8x10x342xf32, #tpu.memory_space<vmem>>, vector<1x8x1x288xf32>
    %216 = vector.shape_cast %215 : vector<1x8x1x288xf32> to vector<8x288xf32>
    %c0_343 = arith.constant 0 : index
    %c0_344 = arith.constant 0 : index
    %c4_345 = arith.constant 4 : index
    %c20_346 = arith.constant 20 : index
    %217 = vector.load %arg1[%c0_343, %c0_344, %c4_345, %c20_346] : memref<1x8x10x342xf32, #tpu.memory_space<vmem>>, vector<1x8x1x288xf32>
    %218 = vector.shape_cast %217 : vector<1x8x1x288xf32> to vector<8x288xf32>
    %c0_347 = arith.constant 0 : index
    %c0_348 = arith.constant 0 : index
    %c4_349 = arith.constant 4 : index
    %c36_350 = arith.constant 36 : index
    %219 = vector.load %arg1[%c0_347, %c0_348, %c4_349, %c36_350] : memref<1x8x10x342xf32, #tpu.memory_space<vmem>>, vector<1x8x1x288xf32>
    %220 = vector.shape_cast %219 : vector<1x8x1x288xf32> to vector<8x288xf32>
    %c0_351 = arith.constant 0 : index
    %c0_352 = arith.constant 0 : index
    %c4_353 = arith.constant 4 : index
    %c37_354 = arith.constant 37 : index
    %221 = vector.load %arg1[%c0_351, %c0_352, %c4_353, %c37_354] : memref<1x8x10x342xf32, #tpu.memory_space<vmem>>, vector<1x8x1x288xf32>
    %222 = vector.shape_cast %221 : vector<1x8x1x288xf32> to vector<8x288xf32>
    %c0_355 = arith.constant 0 : index
    %c0_356 = arith.constant 0 : index
    %c4_357 = arith.constant 4 : index
    %c38_358 = arith.constant 38 : index
    %223 = vector.load %arg1[%c0_355, %c0_356, %c4_357, %c38_358] : memref<1x8x10x342xf32, #tpu.memory_space<vmem>>, vector<1x8x1x288xf32>
    %224 = vector.shape_cast %223 : vector<1x8x1x288xf32> to vector<8x288xf32>
    %225 = tpu.concatenate %208, %210, %212, %214, %216, %218, %220, %222, %224 in 0 : vector<8x288xf32>, vector<8x288xf32>, vector<8x288xf32>, vector<8x288xf32>, vector<8x288xf32>, vector<8x288xf32>, vector<8x288xf32>, vector<8x288xf32>, vector<8x288xf32> -> vector<72x288xf32>
    %226 = arith.truncf %225 : vector<72x288xf32> to vector<72x288xbf16>
    %c2_359 = arith.constant 2 : index
    %c0_360 = arith.constant 0 : index
    %c0_361 = arith.constant 0 : index
    %227 = vector.load %arg2[%c2_359, %c0_360, %c0_361] : memref<3x32x72xbf16, #tpu.memory_space<vmem>>, vector<1x32x72xbf16>
    %228 = vector.shape_cast %227 : vector<1x32x72xbf16> to vector<32x72xbf16>
    %cst_362 = arith.constant dense<0.000000e+00> : vector<32x288xf32>
    %229 = tpu.matmul %228, %226, %cst_362 {dimension_numbers = #tpu.dot_dimension_numbers<[1], [0], [0], [1], [0, 0, 1, 1], [], []>} : vector<32x72xbf16>, vector<72x288xbf16>, vector<32x288xf32> -> vector<32x288xf32>
    %230 = arith.addf %206, %229 : vector<32x288xf32>
    %c0_363 = arith.constant 0 : index
    %c0_364 = arith.constant 0 : index
    %231 = vector.load %arg3[%c0_363, %c0_364] : memref<32x1xf32, #tpu.memory_space<vmem>>, vector<32x1xf32>
    %232 = vector.broadcast %231 : vector<32x1xf32> to vector<32x288xf32>
    %233 = arith.addf %230, %232 : vector<32x288xf32>
    %c0_365 = arith.constant 0 : index
    %c0_366 = arith.constant 0 : index
    %c2_367 = arith.constant 2 : index
    %c0_368 = arith.constant 0 : index
    %234 = vector.load %arg4[%c0_365, %c0_366, %c2_367, %c0_368] : memref<1x32x8x288xf32, #tpu.memory_space<vmem>>, vector<1x32x1x288xf32>
    %235 = vector.shape_cast %234 : vector<1x32x1x288xf32> to vector<32x288xf32>
    %236 = vector.shape_cast %233 : vector<32x288xf32> to vector<1x32x1x288xf32>
    tpu.vector_store %arg4[%c0_365, %c0_366, %c2_367, %c0_368], %236 {strides = array<i32>} : memref<1x32x8x288xf32, #tpu.memory_space<vmem>>, vector<1x32x1x288xf32>,
    %cst_369 = arith.constant 0.000000e+00 : f32
    %237 = vector.broadcast %cst_369 : f32 to vector<32x288xf32>
    %c0_370 = arith.constant 0 : index
    %c0_371 = arith.constant 0 : index
    %c3_372 = arith.constant 3 : index
    %c0_373 = arith.constant 0 : index
    %238 = vector.load %arg1[%c0_370, %c0_371, %c3_372, %c0_373] : memref<1x8x10x342xf32, #tpu.memory_space<vmem>>, vector<1x8x1x288xf32>
    %239 = vector.shape_cast %238 : vector<1x8x1x288xf32> to vector<8x288xf32>
    %c0_374 = arith.constant 0 : index
    %c0_375 = arith.constant 0 : index
    %c3_376 = arith.constant 3 : index
    %c1_377 = arith.constant 1 : index
    %240 = vector.load %arg1[%c0_374, %c0_375, %c3_376, %c1_377] : memref<1x8x10x342xf32, #tpu.memory_space<vmem>>, vector<1x8x1x288xf32>
    %241 = vector.shape_cast %240 : vector<1x8x1x288xf32> to vector<8x288xf32>
    %c0_378 = arith.constant 0 : index
    %c0_379 = arith.constant 0 : index
    %c3_380 = arith.constant 3 : index
    %c2_381 = arith.constant 2 : index
    %242 = vector.load %arg1[%c0_378, %c0_379, %c3_380, %c2_381] : memref<1x8x10x342xf32, #tpu.memory_space<vmem>>, vector<1x8x1x288xf32>
    %243 = vector.shape_cast %242 : vector<1x8x1x288xf32> to vector<8x288xf32>
    %c0_382 = arith.constant 0 : index
    %c0_383 = arith.constant 0 : index
    %c3_384 = arith.constant 3 : index
    %c18_385 = arith.constant 18 : index
    %244 = vector.load %arg1[%c0_382, %c0_383, %c3_384, %c18_385] : memref<1x8x10x342xf32, #tpu.memory_space<vmem>>, vector<1x8x1x288xf32>
    %245 = vector.shape_cast %244 : vector<1x8x1x288xf32> to vector<8x288xf32>
    %c0_386 = arith.constant 0 : index
    %c0_387 = arith.constant 0 : index
    %c3_388 = arith.constant 3 : index
    %c19_389 = arith.constant 19 : index
    %246 = vector.load %arg1[%c0_386, %c0_387, %c3_388, %c19_389] : memref<1x8x10x342xf32, #tpu.memory_space<vmem>>, vector<1x8x1x288xf32>
    %247 = vector.shape_cast %246 : vector<1x8x1x288xf32> to vector<8x288xf32>
    %c0_390 = arith.constant 0 : index
    %c0_391 = arith.constant 0 : index
    %c3_392 = arith.constant 3 : index
    %c20_393 = arith.constant 20 : index
    %248 = vector.load %arg1[%c0_390, %c0_391, %c3_392, %c20_393] : memref<1x8x10x342xf32, #tpu.memory_space<vmem>>, vector<1x8x1x288xf32>
    %249 = vector.shape_cast %248 : vector<1x8x1x288xf32> to vector<8x288xf32>
    %c0_394 = arith.constant 0 : index
    %c0_395 = arith.constant 0 : index
    %c3_396 = arith.constant 3 : index
    %c36_397 = arith.constant 36 : index
    %250 = vector.load %arg1[%c0_394, %c0_395, %c3_396, %c36_397] : memref<1x8x10x342xf32, #tpu.memory_space<vmem>>, vector<1x8x1x288xf32>
    %251 = vector.shape_cast %250 : vector<1x8x1x288xf32> to vector<8x288xf32>
    %c0_398 = arith.constant 0 : index
    %c0_399 = arith.constant 0 : index
    %c3_400 = arith.constant 3 : index
    %c37_401 = arith.constant 37 : index
    %252 = vector.load %arg1[%c0_398, %c0_399, %c3_400, %c37_401] : memref<1x8x10x342xf32, #tpu.memory_space<vmem>>, vector<1x8x1x288xf32>
    %253 = vector.shape_cast %252 : vector<1x8x1x288xf32> to vector<8x288xf32>
    %c0_402 = arith.constant 0 : index
    %c0_403 = arith.constant 0 : index
    %c3_404 = arith.constant 3 : index
    %c38_405 = arith.constant 38 : index
    %254 = vector.load %arg1[%c0_402, %c0_403, %c3_404, %c38_405] : memref<1x8x10x342xf32, #tpu.memory_space<vmem>>, vector<1x8x1x288xf32>
    %255 = vector.shape_cast %254 : vector<1x8x1x288xf32> to vector<8x288xf32>
    %256 = tpu.concatenate %239, %241, %243, %245, %247, %249, %251, %253, %255 in 0 : vector<8x288xf32>, vector<8x288xf32>, vector<8x288xf32>, vector<8x288xf32>, vector<8x288xf32>, vector<8x288xf32>, vector<8x288xf32>, vector<8x288xf32>, vector<8x288xf32> -> vector<72x288xf32>
    %257 = arith.truncf %256 : vector<72x288xf32> to vector<72x288xbf16>
    %c0_406 = arith.constant 0 : index
    %c0_407 = arith.constant 0 : index
    %c0_408 = arith.constant 0 : index
    %258 = vector.load %arg2[%c0_406, %c0_407, %c0_408] : memref<3x32x72xbf16, #tpu.memory_space<vmem>>, vector<1x32x72xbf16>
    %259 = vector.shape_cast %258 : vector<1x32x72xbf16> to vector<32x72xbf16>
    %cst_409 = arith.constant dense<0.000000e+00> : vector<32x288xf32>
    %260 = tpu.matmul %259, %257, %cst_409 {dimension_numbers = #tpu.dot_dimension_numbers<[1], [0], [0], [1], [0, 0, 1, 1], [], []>} : vector<32x72xbf16>, vector<72x288xbf16>, vector<32x288xf32> -> vector<32x288xf32>
    %261 = arith.addf %237, %260 : vector<32x288xf32>
    %c0_410 = arith.constant 0 : index
    %c0_411 = arith.constant 0 : index
    %c4_412 = arith.constant 4 : index
    %c0_413 = arith.constant 0 : index
    %262 = vector.load %arg1[%c0_410, %c0_411, %c4_412, %c0_413] : memref<1x8x10x342xf32, #tpu.memory_space<vmem>>, vector<1x8x1x288xf32>
    %263 = vector.shape_cast %262 : vector<1x8x1x288xf32> to vector<8x288xf32>
    %c0_414 = arith.constant 0 : index
    %c0_415 = arith.constant 0 : index
    %c4_416 = arith.constant 4 : index
    %c1_417 = arith.constant 1 : index
    %264 = vector.load %arg1[%c0_414, %c0_415, %c4_416, %c1_417] : memref<1x8x10x342xf32, #tpu.memory_space<vmem>>, vector<1x8x1x288xf32>
    %265 = vector.shape_cast %264 : vector<1x8x1x288xf32> to vector<8x288xf32>
    %c0_418 = arith.constant 0 : index
    %c0_419 = arith.constant 0 : index
    %c4_420 = arith.constant 4 : index
    %c2_421 = arith.constant 2 : index
    %266 = vector.load %arg1[%c0_418, %c0_419, %c4_420, %c2_421] : memref<1x8x10x342xf32, #tpu.memory_space<vmem>>, vector<1x8x1x288xf32>
    %267 = vector.shape_cast %266 : vector<1x8x1x288xf32> to vector<8x288xf32>
    %c0_422 = arith.constant 0 : index
    %c0_423 = arith.constant 0 : index
    %c4_424 = arith.constant 4 : index
    %c18_425 = arith.constant 18 : index
    %268 = vector.load %arg1[%c0_422, %c0_423, %c4_424, %c18_425] : memref<1x8x10x342xf32, #tpu.memory_space<vmem>>, vector<1x8x1x288xf32>
    %269 = vector.shape_cast %268 : vector<1x8x1x288xf32> to vector<8x288xf32>
    %c0_426 = arith.constant 0 : index
    %c0_427 = arith.constant 0 : index
    %c4_428 = arith.constant 4 : index
    %c19_429 = arith.constant 19 : index
    %270 = vector.load %arg1[%c0_426, %c0_427, %c4_428, %c19_429] : memref<1x8x10x342xf32, #tpu.memory_space<vmem>>, vector<1x8x1x288xf32>
    %271 = vector.shape_cast %270 : vector<1x8x1x288xf32> to vector<8x288xf32>
    %c0_430 = arith.constant 0 : index
    %c0_431 = arith.constant 0 : index
    %c4_432 = arith.constant 4 : index
    %c20_433 = arith.constant 20 : index
    %272 = vector.load %arg1[%c0_430, %c0_431, %c4_432, %c20_433] : memref<1x8x10x342xf32, #tpu.memory_space<vmem>>, vector<1x8x1x288xf32>
    %273 = vector.shape_cast %272 : vector<1x8x1x288xf32> to vector<8x288xf32>
    %c0_434 = arith.constant 0 : index
    %c0_435 = arith.constant 0 : index
    %c4_436 = arith.constant 4 : index
    %c36_437 = arith.constant 36 : index
    %274 = vector.load %arg1[%c0_434, %c0_435, %c4_436, %c36_437] : memref<1x8x10x342xf32, #tpu.memory_space<vmem>>, vector<1x8x1x288xf32>
    %275 = vector.shape_cast %274 : vector<1x8x1x288xf32> to vector<8x288xf32>
    %c0_438 = arith.constant 0 : index
    %c0_439 = arith.constant 0 : index
    %c4_440 = arith.constant 4 : index
    %c37_441 = arith.constant 37 : index
    %276 = vector.load %arg1[%c0_438, %c0_439, %c4_440, %c37_441] : memref<1x8x10x342xf32, #tpu.memory_space<vmem>>, vector<1x8x1x288xf32>
    %277 = vector.shape_cast %276 : vector<1x8x1x288xf32> to vector<8x288xf32>
    %c0_442 = arith.constant 0 : index
    %c0_443 = arith.constant 0 : index
    %c4_444 = arith.constant 4 : index
    %c38_445 = arith.constant 38 : index
    %278 = vector.load %arg1[%c0_442, %c0_443, %c4_444, %c38_445] : memref<1x8x10x342xf32, #tpu.memory_space<vmem>>, vector<1x8x1x288xf32>
    %279 = vector.shape_cast %278 : vector<1x8x1x288xf32> to vector<8x288xf32>
    %280 = tpu.concatenate %263, %265, %267, %269, %271, %273, %275, %277, %279 in 0 : vector<8x288xf32>, vector<8x288xf32>, vector<8x288xf32>, vector<8x288xf32>, vector<8x288xf32>, vector<8x288xf32>, vector<8x288xf32>, vector<8x288xf32>, vector<8x288xf32> -> vector<72x288xf32>
    %281 = arith.truncf %280 : vector<72x288xf32> to vector<72x288xbf16>
    %c1_446 = arith.constant 1 : index
    %c0_447 = arith.constant 0 : index
    %c0_448 = arith.constant 0 : index
    %282 = vector.load %arg2[%c1_446, %c0_447, %c0_448] : memref<3x32x72xbf16, #tpu.memory_space<vmem>>, vector<1x32x72xbf16>
    %283 = vector.shape_cast %282 : vector<1x32x72xbf16> to vector<32x72xbf16>
    %cst_449 = arith.constant dense<0.000000e+00> : vector<32x288xf32>
    %284 = tpu.matmul %283, %281, %cst_449 {dimension_numbers = #tpu.dot_dimension_numbers<[1], [0], [0], [1], [0, 0, 1, 1], [], []>} : vector<32x72xbf16>, vector<72x288xbf16>, vector<32x288xf32> -> vector<32x288xf32>
    %285 = arith.addf %261, %284 : vector<32x288xf32>
    %c0_450 = arith.constant 0 : index
    %c0_451 = arith.constant 0 : index
    %c5 = arith.constant 5 : index
    %c0_452 = arith.constant 0 : index
    %286 = vector.load %arg1[%c0_450, %c0_451, %c5, %c0_452] : memref<1x8x10x342xf32, #tpu.memory_space<vmem>>, vector<1x8x1x288xf32>
    %287 = vector.shape_cast %286 : vector<1x8x1x288xf32> to vector<8x288xf32>
    %c0_453 = arith.constant 0 : index
    %c0_454 = arith.constant 0 : index
    %c5_455 = arith.constant 5 : index
    %c1_456 = arith.constant 1 : index
    %288 = vector.load %arg1[%c0_453, %c0_454, %c5_455, %c1_456] : memref<1x8x10x342xf32, #tpu.memory_space<vmem>>, vector<1x8x1x288xf32>
    %289 = vector.shape_cast %288 : vector<1x8x1x288xf32> to vector<8x288xf32>
    %c0_457 = arith.constant 0 : index
    %c0_458 = arith.constant 0 : index
    %c5_459 = arith.constant 5 : index
    %c2_460 = arith.constant 2 : index
    %290 = vector.load %arg1[%c0_457, %c0_458, %c5_459, %c2_460] : memref<1x8x10x342xf32, #tpu.memory_space<vmem>>, vector<1x8x1x288xf32>
    %291 = vector.shape_cast %290 : vector<1x8x1x288xf32> to vector<8x288xf32>
    %c0_461 = arith.constant 0 : index
    %c0_462 = arith.constant 0 : index
    %c5_463 = arith.constant 5 : index
    %c18_464 = arith.constant 18 : index
    %292 = vector.load %arg1[%c0_461, %c0_462, %c5_463, %c18_464] : memref<1x8x10x342xf32, #tpu.memory_space<vmem>>, vector<1x8x1x288xf32>
    %293 = vector.shape_cast %292 : vector<1x8x1x288xf32> to vector<8x288xf32>
    %c0_465 = arith.constant 0 : index
    %c0_466 = arith.constant 0 : index
    %c5_467 = arith.constant 5 : index
    %c19_468 = arith.constant 19 : index
    %294 = vector.load %arg1[%c0_465, %c0_466, %c5_467, %c19_468] : memref<1x8x10x342xf32, #tpu.memory_space<vmem>>, vector<1x8x1x288xf32>
    %295 = vector.shape_cast %294 : vector<1x8x1x288xf32> to vector<8x288xf32>
    %c0_469 = arith.constant 0 : index
    %c0_470 = arith.constant 0 : index
    %c5_471 = arith.constant 5 : index
    %c20_472 = arith.constant 20 : index
    %296 = vector.load %arg1[%c0_469, %c0_470, %c5_471, %c20_472] : memref<1x8x10x342xf32, #tpu.memory_space<vmem>>, vector<1x8x1x288xf32>
    %297 = vector.shape_cast %296 : vector<1x8x1x288xf32> to vector<8x288xf32>
    %c0_473 = arith.constant 0 : index
    %c0_474 = arith.constant 0 : index
    %c5_475 = arith.constant 5 : index
    %c36_476 = arith.constant 36 : index
    %298 = vector.load %arg1[%c0_473, %c0_474, %c5_475, %c36_476] : memref<1x8x10x342xf32, #tpu.memory_space<vmem>>, vector<1x8x1x288xf32>
    %299 = vector.shape_cast %298 : vector<1x8x1x288xf32> to vector<8x288xf32>
    %c0_477 = arith.constant 0 : index
    %c0_478 = arith.constant 0 : index
    %c5_479 = arith.constant 5 : index
    %c37_480 = arith.constant 37 : index
    %300 = vector.load %arg1[%c0_477, %c0_478, %c5_479, %c37_480] : memref<1x8x10x342xf32, #tpu.memory_space<vmem>>, vector<1x8x1x288xf32>
    %301 = vector.shape_cast %300 : vector<1x8x1x288xf32> to vector<8x288xf32>
    %c0_481 = arith.constant 0 : index
    %c0_482 = arith.constant 0 : index
    %c5_483 = arith.constant 5 : index
    %c38_484 = arith.constant 38 : index
    %302 = vector.load %arg1[%c0_481, %c0_482, %c5_483, %c38_484] : memref<1x8x10x342xf32, #tpu.memory_space<vmem>>, vector<1x8x1x288xf32>
    %303 = vector.shape_cast %302 : vector<1x8x1x288xf32> to vector<8x288xf32>
    %304 = tpu.concatenate %287, %289, %291, %293, %295, %297, %299, %301, %303 in 0 : vector<8x288xf32>, vector<8x288xf32>, vector<8x288xf32>, vector<8x288xf32>, vector<8x288xf32>, vector<8x288xf32>, vector<8x288xf32>, vector<8x288xf32>, vector<8x288xf32> -> vector<72x288xf32>
    %305 = arith.truncf %304 : vector<72x288xf32> to vector<72x288xbf16>
    %c2_485 = arith.constant 2 : index
    %c0_486 = arith.constant 0 : index
    %c0_487 = arith.constant 0 : index
    %306 = vector.load %arg2[%c2_485, %c0_486, %c0_487] : memref<3x32x72xbf16, #tpu.memory_space<vmem>>, vector<1x32x72xbf16>
    %307 = vector.shape_cast %306 : vector<1x32x72xbf16> to vector<32x72xbf16>
    %cst_488 = arith.constant dense<0.000000e+00> : vector<32x288xf32>
    %308 = tpu.matmul %307, %305, %cst_488 {dimension_numbers = #tpu.dot_dimension_numbers<[1], [0], [0], [1], [0, 0, 1, 1], [], []>} : vector<32x72xbf16>, vector<72x288xbf16>, vector<32x288xf32> -> vector<32x288xf32>
    %309 = arith.addf %285, %308 : vector<32x288xf32>
    %c0_489 = arith.constant 0 : index
    %c0_490 = arith.constant 0 : index
    %310 = vector.load %arg3[%c0_489, %c0_490] : memref<32x1xf32, #tpu.memory_space<vmem>>, vector<32x1xf32>
    %311 = vector.broadcast %310 : vector<32x1xf32> to vector<32x288xf32>
    %312 = arith.addf %309, %311 : vector<32x288xf32>
    %c0_491 = arith.constant 0 : index
    %c0_492 = arith.constant 0 : index
    %c3_493 = arith.constant 3 : index
    %c0_494 = arith.constant 0 : index
    %313 = vector.load %arg4[%c0_491, %c0_492, %c3_493, %c0_494] : memref<1x32x8x288xf32, #tpu.memory_space<vmem>>, vector<1x32x1x288xf32>
    %314 = vector.shape_cast %313 : vector<1x32x1x288xf32> to vector<32x288xf32>
    %315 = vector.shape_cast %312 : vector<32x288xf32> to vector<1x32x1x288xf32>
    tpu.vector_store %arg4[%c0_491, %c0_492, %c3_493, %c0_494], %315 {strides = array<i32>} : memref<1x32x8x288xf32, #tpu.memory_space<vmem>>, vector<1x32x1x288xf32>,
    %cst_495 = arith.constant 0.000000e+00 : f32
    %316 = vector.broadcast %cst_495 : f32 to vector<32x288xf32>
    %c0_496 = arith.constant 0 : index
    %c0_497 = arith.constant 0 : index
    %c4_498 = arith.constant 4 : index
    %c0_499 = arith.constant 0 : index
    %317 = vector.load %arg1[%c0_496, %c0_497, %c4_498, %c0_499] : memref<1x8x10x342xf32, #tpu.memory_space<vmem>>, vector<1x8x1x288xf32>
    %318 = vector.shape_cast %317 : vector<1x8x1x288xf32> to vector<8x288xf32>
    %c0_500 = arith.constant 0 : index
    %c0_501 = arith.constant 0 : index
    %c4_502 = arith.constant 4 : index
    %c1_503 = arith.constant 1 : index
    %319 = vector.load %arg1[%c0_500, %c0_501, %c4_502, %c1_503] : memref<1x8x10x342xf32, #tpu.memory_space<vmem>>, vector<1x8x1x288xf32>
    %320 = vector.shape_cast %319 : vector<1x8x1x288xf32> to vector<8x288xf32>
    %c0_504 = arith.constant 0 : index
    %c0_505 = arith.constant 0 : index
    %c4_506 = arith.constant 4 : index
    %c2_507 = arith.constant 2 : index
    %321 = vector.load %arg1[%c0_504, %c0_505, %c4_506, %c2_507] : memref<1x8x10x342xf32, #tpu.memory_space<vmem>>, vector<1x8x1x288xf32>
    %322 = vector.shape_cast %321 : vector<1x8x1x288xf32> to vector<8x288xf32>
    %c0_508 = arith.constant 0 : index
    %c0_509 = arith.constant 0 : index
    %c4_510 = arith.constant 4 : index
    %c18_511 = arith.constant 18 : index
    %323 = vector.load %arg1[%c0_508, %c0_509, %c4_510, %c18_511] : memref<1x8x10x342xf32, #tpu.memory_space<vmem>>, vector<1x8x1x288xf32>
    %324 = vector.shape_cast %323 : vector<1x8x1x288xf32> to vector<8x288xf32>
    %c0_512 = arith.constant 0 : index
    %c0_513 = arith.constant 0 : index
    %c4_514 = arith.constant 4 : index
    %c19_515 = arith.constant 19 : index
    %325 = vector.load %arg1[%c0_512, %c0_513, %c4_514, %c19_515] : memref<1x8x10x342xf32, #tpu.memory_space<vmem>>, vector<1x8x1x288xf32>
    %326 = vector.shape_cast %325 : vector<1x8x1x288xf32> to vector<8x288xf32>
    %c0_516 = arith.constant 0 : index
    %c0_517 = arith.constant 0 : index
    %c4_518 = arith.constant 4 : index
    %c20_519 = arith.constant 20 : index
    %327 = vector.load %arg1[%c0_516, %c0_517, %c4_518, %c20_519] : memref<1x8x10x342xf32, #tpu.memory_space<vmem>>, vector<1x8x1x288xf32>
    %328 = vector.shape_cast %327 : vector<1x8x1x288xf32> to vector<8x288xf32>
    %c0_520 = arith.constant 0 : index
    %c0_521 = arith.constant 0 : index
    %c4_522 = arith.constant 4 : index
    %c36_523 = arith.constant 36 : index
    %329 = vector.load %arg1[%c0_520, %c0_521, %c4_522, %c36_523] : memref<1x8x10x342xf32, #tpu.memory_space<vmem>>, vector<1x8x1x288xf32>
    %330 = vector.shape_cast %329 : vector<1x8x1x288xf32> to vector<8x288xf32>
    %c0_524 = arith.constant 0 : index
    %c0_525 = arith.constant 0 : index
    %c4_526 = arith.constant 4 : index
    %c37_527 = arith.constant 37 : index
    %331 = vector.load %arg1[%c0_524, %c0_525, %c4_526, %c37_527] : memref<1x8x10x342xf32, #tpu.memory_space<vmem>>, vector<1x8x1x288xf32>
    %332 = vector.shape_cast %331 : vector<1x8x1x288xf32> to vector<8x288xf32>
    %c0_528 = arith.constant 0 : index
    %c0_529 = arith.constant 0 : index
    %c4_530 = arith.constant 4 : index
    %c38_531 = arith.constant 38 : index
    %333 = vector.load %arg1[%c0_528, %c0_529, %c4_530, %c38_531] : memref<1x8x10x342xf32, #tpu.memory_space<vmem>>, vector<1x8x1x288xf32>
    %334 = vector.shape_cast %333 : vector<1x8x1x288xf32> to vector<8x288xf32>
    %335 = tpu.concatenate %318, %320, %322, %324, %326, %328, %330, %332, %334 in 0 : vector<8x288xf32>, vector<8x288xf32>, vector<8x288xf32>, vector<8x288xf32>, vector<8x288xf32>, vector<8x288xf32>, vector<8x288xf32>, vector<8x288xf32>, vector<8x288xf32> -> vector<72x288xf32>
    %336 = arith.truncf %335 : vector<72x288xf32> to vector<72x288xbf16>
    %c0_532 = arith.constant 0 : index
    %c0_533 = arith.constant 0 : index
    %c0_534 = arith.constant 0 : index
    %337 = vector.load %arg2[%c0_532, %c0_533, %c0_534] : memref<3x32x72xbf16, #tpu.memory_space<vmem>>, vector<1x32x72xbf16>
    %338 = vector.shape_cast %337 : vector<1x32x72xbf16> to vector<32x72xbf16>
    %cst_535 = arith.constant dense<0.000000e+00> : vector<32x288xf32>
    %339 = tpu.matmul %338, %336, %cst_535 {dimension_numbers = #tpu.dot_dimension_numbers<[1], [0], [0], [1], [0, 0, 1, 1], [], []>} : vector<32x72xbf16>, vector<72x288xbf16>, vector<32x288xf32> -> vector<32x288xf32>
    %340 = arith.addf %316, %339 : vector<32x288xf32>
    %c0_536 = arith.constant 0 : index
    %c0_537 = arith.constant 0 : index
    %c5_538 = arith.constant 5 : index
    %c0_539 = arith.constant 0 : index
    %341 = vector.load %arg1[%c0_536, %c0_537, %c5_538, %c0_539] : memref<1x8x10x342xf32, #tpu.memory_space<vmem>>, vector<1x8x1x288xf32>
    %342 = vector.shape_cast %341 : vector<1x8x1x288xf32> to vector<8x288xf32>
    %c0_540 = arith.constant 0 : index
    %c0_541 = arith.constant 0 : index
    %c5_542 = arith.constant 5 : index
    %c1_543 = arith.constant 1 : index
    %343 = vector.load %arg1[%c0_540, %c0_541, %c5_542, %c1_543] : memref<1x8x10x342xf32, #tpu.memory_space<vmem>>, vector<1x8x1x288xf32>
    %344 = vector.shape_cast %343 : vector<1x8x1x288xf32> to vector<8x288xf32>
    %c0_544 = arith.constant 0 : index
    %c0_545 = arith.constant 0 : index
    %c5_546 = arith.constant 5 : index
    %c2_547 = arith.constant 2 : index
    %345 = vector.load %arg1[%c0_544, %c0_545, %c5_546, %c2_547] : memref<1x8x10x342xf32, #tpu.memory_space<vmem>>, vector<1x8x1x288xf32>
    %346 = vector.shape_cast %345 : vector<1x8x1x288xf32> to vector<8x288xf32>
    %c0_548 = arith.constant 0 : index
    %c0_549 = arith.constant 0 : index
    %c5_550 = arith.constant 5 : index
    %c18_551 = arith.constant 18 : index
    %347 = vector.load %arg1[%c0_548, %c0_549, %c5_550, %c18_551] : memref<1x8x10x342xf32, #tpu.memory_space<vmem>>, vector<1x8x1x288xf32>
    %348 = vector.shape_cast %347 : vector<1x8x1x288xf32> to vector<8x288xf32>
    %c0_552 = arith.constant 0 : index
    %c0_553 = arith.constant 0 : index
    %c5_554 = arith.constant 5 : index
    %c19_555 = arith.constant 19 : index
    %349 = vector.load %arg1[%c0_552, %c0_553, %c5_554, %c19_555] : memref<1x8x10x342xf32, #tpu.memory_space<vmem>>, vector<1x8x1x288xf32>
    %350 = vector.shape_cast %349 : vector<1x8x1x288xf32> to vector<8x288xf32>
    %c0_556 = arith.constant 0 : index
    %c0_557 = arith.constant 0 : index
    %c5_558 = arith.constant 5 : index
    %c20_559 = arith.constant 20 : index
    %351 = vector.load %arg1[%c0_556, %c0_557, %c5_558, %c20_559] : memref<1x8x10x342xf32, #tpu.memory_space<vmem>>, vector<1x8x1x288xf32>
    %352 = vector.shape_cast %351 : vector<1x8x1x288xf32> to vector<8x288xf32>
    %c0_560 = arith.constant 0 : index
    %c0_561 = arith.constant 0 : index
    %c5_562 = arith.constant 5 : index
    %c36_563 = arith.constant 36 : index
    %353 = vector.load %arg1[%c0_560, %c0_561, %c5_562, %c36_563] : memref<1x8x10x342xf32, #tpu.memory_space<vmem>>, vector<1x8x1x288xf32>
    %354 = vector.shape_cast %353 : vector<1x8x1x288xf32> to vector<8x288xf32>
    %c0_564 = arith.constant 0 : index
    %c0_565 = arith.constant 0 : index
    %c5_566 = arith.constant 5 : index
    %c37_567 = arith.constant 37 : index
    %355 = vector.load %arg1[%c0_564, %c0_565, %c5_566, %c37_567] : memref<1x8x10x342xf32, #tpu.memory_space<vmem>>, vector<1x8x1x288xf32>
    %356 = vector.shape_cast %355 : vector<1x8x1x288xf32> to vector<8x288xf32>
    %c0_568 = arith.constant 0 : index
    %c0_569 = arith.constant 0 : index
    %c5_570 = arith.constant 5 : index
    %c38_571 = arith.constant 38 : index
    %357 = vector.load %arg1[%c0_568, %c0_569, %c5_570, %c38_571] : memref<1x8x10x342xf32, #tpu.memory_space<vmem>>, vector<1x8x1x288xf32>
    %358 = vector.shape_cast %357 : vector<1x8x1x288xf32> to vector<8x288xf32>
    %359 = tpu.concatenate %342, %344, %346, %348, %350, %352, %354, %356, %358 in 0 : vector<8x288xf32>, vector<8x288xf32>, vector<8x288xf32>, vector<8x288xf32>, vector<8x288xf32>, vector<8x288xf32>, vector<8x288xf32>, vector<8x288xf32>, vector<8x288xf32> -> vector<72x288xf32>
    %360 = arith.truncf %359 : vector<72x288xf32> to vector<72x288xbf16>
    %c1_572 = arith.constant 1 : index
    %c0_573 = arith.constant 0 : index
    %c0_574 = arith.constant 0 : index
    %361 = vector.load %arg2[%c1_572, %c0_573, %c0_574] : memref<3x32x72xbf16, #tpu.memory_space<vmem>>, vector<1x32x72xbf16>
    %362 = vector.shape_cast %361 : vector<1x32x72xbf16> to vector<32x72xbf16>
    %cst_575 = arith.constant dense<0.000000e+00> : vector<32x288xf32>
    %363 = tpu.matmul %362, %360, %cst_575 {dimension_numbers = #tpu.dot_dimension_numbers<[1], [0], [0], [1], [0, 0, 1, 1], [], []>} : vector<32x72xbf16>, vector<72x288xbf16>, vector<32x288xf32> -> vector<32x288xf32>
    %364 = arith.addf %340, %363 : vector<32x288xf32>
    %c0_576 = arith.constant 0 : index
    %c0_577 = arith.constant 0 : index
    %c6 = arith.constant 6 : index
    %c0_578 = arith.constant 0 : index
    %365 = vector.load %arg1[%c0_576, %c0_577, %c6, %c0_578] : memref<1x8x10x342xf32, #tpu.memory_space<vmem>>, vector<1x8x1x288xf32>
    %366 = vector.shape_cast %365 : vector<1x8x1x288xf32> to vector<8x288xf32>
    %c0_579 = arith.constant 0 : index
    %c0_580 = arith.constant 0 : index
    %c6_581 = arith.constant 6 : index
    %c1_582 = arith.constant 1 : index
    %367 = vector.load %arg1[%c0_579, %c0_580, %c6_581, %c1_582] : memref<1x8x10x342xf32, #tpu.memory_space<vmem>>, vector<1x8x1x288xf32>
    %368 = vector.shape_cast %367 : vector<1x8x1x288xf32> to vector<8x288xf32>
    %c0_583 = arith.constant 0 : index
    %c0_584 = arith.constant 0 : index
    %c6_585 = arith.constant 6 : index
    %c2_586 = arith.constant 2 : index
    %369 = vector.load %arg1[%c0_583, %c0_584, %c6_585, %c2_586] : memref<1x8x10x342xf32, #tpu.memory_space<vmem>>, vector<1x8x1x288xf32>
    %370 = vector.shape_cast %369 : vector<1x8x1x288xf32> to vector<8x288xf32>
    %c0_587 = arith.constant 0 : index
    %c0_588 = arith.constant 0 : index
    %c6_589 = arith.constant 6 : index
    %c18_590 = arith.constant 18 : index
    %371 = vector.load %arg1[%c0_587, %c0_588, %c6_589, %c18_590] : memref<1x8x10x342xf32, #tpu.memory_space<vmem>>, vector<1x8x1x288xf32>
    %372 = vector.shape_cast %371 : vector<1x8x1x288xf32> to vector<8x288xf32>
    %c0_591 = arith.constant 0 : index
    %c0_592 = arith.constant 0 : index
    %c6_593 = arith.constant 6 : index
    %c19_594 = arith.constant 19 : index
    %373 = vector.load %arg1[%c0_591, %c0_592, %c6_593, %c19_594] : memref<1x8x10x342xf32, #tpu.memory_space<vmem>>, vector<1x8x1x288xf32>
    %374 = vector.shape_cast %373 : vector<1x8x1x288xf32> to vector<8x288xf32>
    %c0_595 = arith.constant 0 : index
    %c0_596 = arith.constant 0 : index
    %c6_597 = arith.constant 6 : index
    %c20_598 = arith.constant 20 : index
    %375 = vector.load %arg1[%c0_595, %c0_596, %c6_597, %c20_598] : memref<1x8x10x342xf32, #tpu.memory_space<vmem>>, vector<1x8x1x288xf32>
    %376 = vector.shape_cast %375 : vector<1x8x1x288xf32> to vector<8x288xf32>
    %c0_599 = arith.constant 0 : index
    %c0_600 = arith.constant 0 : index
    %c6_601 = arith.constant 6 : index
    %c36_602 = arith.constant 36 : index
    %377 = vector.load %arg1[%c0_599, %c0_600, %c6_601, %c36_602] : memref<1x8x10x342xf32, #tpu.memory_space<vmem>>, vector<1x8x1x288xf32>
    %378 = vector.shape_cast %377 : vector<1x8x1x288xf32> to vector<8x288xf32>
    %c0_603 = arith.constant 0 : index
    %c0_604 = arith.constant 0 : index
    %c6_605 = arith.constant 6 : index
    %c37_606 = arith.constant 37 : index
    %379 = vector.load %arg1[%c0_603, %c0_604, %c6_605, %c37_606] : memref<1x8x10x342xf32, #tpu.memory_space<vmem>>, vector<1x8x1x288xf32>
    %380 = vector.shape_cast %379 : vector<1x8x1x288xf32> to vector<8x288xf32>
    %c0_607 = arith.constant 0 : index
    %c0_608 = arith.constant 0 : index
    %c6_609 = arith.constant 6 : index
    %c38_610 = arith.constant 38 : index
    %381 = vector.load %arg1[%c0_607, %c0_608, %c6_609, %c38_610] : memref<1x8x10x342xf32, #tpu.memory_space<vmem>>, vector<1x8x1x288xf32>
    %382 = vector.shape_cast %381 : vector<1x8x1x288xf32> to vector<8x288xf32>
    %383 = tpu.concatenate %366, %368, %370, %372, %374, %376, %378, %380, %382 in 0 : vector<8x288xf32>, vector<8x288xf32>, vector<8x288xf32>, vector<8x288xf32>, vector<8x288xf32>, vector<8x288xf32>, vector<8x288xf32>, vector<8x288xf32>, vector<8x288xf32> -> vector<72x288xf32>
    %384 = arith.truncf %383 : vector<72x288xf32> to vector<72x288xbf16>
    %c2_611 = arith.constant 2 : index
    %c0_612 = arith.constant 0 : index
    %c0_613 = arith.constant 0 : index
    %385 = vector.load %arg2[%c2_611, %c0_612, %c0_613] : memref<3x32x72xbf16, #tpu.memory_space<vmem>>, vector<1x32x72xbf16>
    %386 = vector.shape_cast %385 : vector<1x32x72xbf16> to vector<32x72xbf16>
    %cst_614 = arith.constant dense<0.000000e+00> : vector<32x288xf32>
    %387 = tpu.matmul %386, %384, %cst_614 {dimension_numbers = #tpu.dot_dimension_numbers<[1], [0], [0], [1], [0, 0, 1, 1], [], []>} : vector<32x72xbf16>, vector<72x288xbf16>, vector<32x288xf32> -> vector<32x288xf32>
    %388 = arith.addf %364, %387 : vector<32x288xf32>
    %c0_615 = arith.constant 0 : index
    %c0_616 = arith.constant 0 : index
    %389 = vector.load %arg3[%c0_615, %c0_616] : memref<32x1xf32, #tpu.memory_space<vmem>>, vector<32x1xf32>
    %390 = vector.broadcast %389 : vector<32x1xf32> to vector<32x288xf32>
    %391 = arith.addf %388, %390 : vector<32x288xf32>
    %c0_617 = arith.constant 0 : index
    %c0_618 = arith.constant 0 : index
    %c4_619 = arith.constant 4 : index
    %c0_620 = arith.constant 0 : index
    %392 = vector.load %arg4[%c0_617, %c0_618, %c4_619, %c0_620] : memref<1x32x8x288xf32, #tpu.memory_space<vmem>>, vector<1x32x1x288xf32>
    %393 = vector.shape_cast %392 : vector<1x32x1x288xf32> to vector<32x288xf32>
    %394 = vector.shape_cast %391 : vector<32x288xf32> to vector<1x32x1x288xf32>
    tpu.vector_store %arg4[%c0_617, %c0_618, %c4_619, %c0_620], %394 {strides = array<i32>} : memref<1x32x8x288xf32, #tpu.memory_space<vmem>>, vector<1x32x1x288xf32>,
    %cst_621 = arith.constant 0.000000e+00 : f32
    %395 = vector.broadcast %cst_621 : f32 to vector<32x288xf32>
    %c0_622 = arith.constant 0 : index
    %c0_623 = arith.constant 0 : index
    %c5_624 = arith.constant 5 : index
    %c0_625 = arith.constant 0 : index
    %396 = vector.load %arg1[%c0_622, %c0_623, %c5_624, %c0_625] : memref<1x8x10x342xf32, #tpu.memory_space<vmem>>, vector<1x8x1x288xf32>
    %397 = vector.shape_cast %396 : vector<1x8x1x288xf32> to vector<8x288xf32>
    %c0_626 = arith.constant 0 : index
    %c0_627 = arith.constant 0 : index
    %c5_628 = arith.constant 5 : index
    %c1_629 = arith.constant 1 : index
    %398 = vector.load %arg1[%c0_626, %c0_627, %c5_628, %c1_629] : memref<1x8x10x342xf32, #tpu.memory_space<vmem>>, vector<1x8x1x288xf32>
    %399 = vector.shape_cast %398 : vector<1x8x1x288xf32> to vector<8x288xf32>
    %c0_630 = arith.constant 0 : index
    %c0_631 = arith.constant 0 : index
    %c5_632 = arith.constant 5 : index
    %c2_633 = arith.constant 2 : index
    %400 = vector.load %arg1[%c0_630, %c0_631, %c5_632, %c2_633] : memref<1x8x10x342xf32, #tpu.memory_space<vmem>>, vector<1x8x1x288xf32>
    %401 = vector.shape_cast %400 : vector<1x8x1x288xf32> to vector<8x288xf32>
    %c0_634 = arith.constant 0 : index
    %c0_635 = arith.constant 0 : index
    %c5_636 = arith.constant 5 : index
    %c18_637 = arith.constant 18 : index
    %402 = vector.load %arg1[%c0_634, %c0_635, %c5_636, %c18_637] : memref<1x8x10x342xf32, #tpu.memory_space<vmem>>, vector<1x8x1x288xf32>
    %403 = vector.shape_cast %402 : vector<1x8x1x288xf32> to vector<8x288xf32>
    %c0_638 = arith.constant 0 : index
    %c0_639 = arith.constant 0 : index
    %c5_640 = arith.constant 5 : index
    %c19_641 = arith.constant 19 : index
    %404 = vector.load %arg1[%c0_638, %c0_639, %c5_640, %c19_641] : memref<1x8x10x342xf32, #tpu.memory_space<vmem>>, vector<1x8x1x288xf32>
    %405 = vector.shape_cast %404 : vector<1x8x1x288xf32> to vector<8x288xf32>
    %c0_642 = arith.constant 0 : index
    %c0_643 = arith.constant 0 : index
    %c5_644 = arith.constant 5 : index
    %c20_645 = arith.constant 20 : index
    %406 = vector.load %arg1[%c0_642, %c0_643, %c5_644, %c20_645] : memref<1x8x10x342xf32, #tpu.memory_space<vmem>>, vector<1x8x1x288xf32>
    %407 = vector.shape_cast %406 : vector<1x8x1x288xf32> to vector<8x288xf32>
    %c0_646 = arith.constant 0 : index
    %c0_647 = arith.constant 0 : index
    %c5_648 = arith.constant 5 : index
    %c36_649 = arith.constant 36 : index
    %408 = vector.load %arg1[%c0_646, %c0_647, %c5_648, %c36_649] : memref<1x8x10x342xf32, #tpu.memory_space<vmem>>, vector<1x8x1x288xf32>
    %409 = vector.shape_cast %408 : vector<1x8x1x288xf32> to vector<8x288xf32>
    %c0_650 = arith.constant 0 : index
    %c0_651 = arith.constant 0 : index
    %c5_652 = arith.constant 5 : index
    %c37_653 = arith.constant 37 : index
    %410 = vector.load %arg1[%c0_650, %c0_651, %c5_652, %c37_653] : memref<1x8x10x342xf32, #tpu.memory_space<vmem>>, vector<1x8x1x288xf32>
    %411 = vector.shape_cast %410 : vector<1x8x1x288xf32> to vector<8x288xf32>
    %c0_654 = arith.constant 0 : index
    %c0_655 = arith.constant 0 : index
    %c5_656 = arith.constant 5 : index
    %c38_657 = arith.constant 38 : index
    %412 = vector.load %arg1[%c0_654, %c0_655, %c5_656, %c38_657] : memref<1x8x10x342xf32, #tpu.memory_space<vmem>>, vector<1x8x1x288xf32>
    %413 = vector.shape_cast %412 : vector<1x8x1x288xf32> to vector<8x288xf32>
    %414 = tpu.concatenate %397, %399, %401, %403, %405, %407, %409, %411, %413 in 0 : vector<8x288xf32>, vector<8x288xf32>, vector<8x288xf32>, vector<8x288xf32>, vector<8x288xf32>, vector<8x288xf32>, vector<8x288xf32>, vector<8x288xf32>, vector<8x288xf32> -> vector<72x288xf32>
    %415 = arith.truncf %414 : vector<72x288xf32> to vector<72x288xbf16>
    %c0_658 = arith.constant 0 : index
    %c0_659 = arith.constant 0 : index
    %c0_660 = arith.constant 0 : index
    %416 = vector.load %arg2[%c0_658, %c0_659, %c0_660] : memref<3x32x72xbf16, #tpu.memory_space<vmem>>, vector<1x32x72xbf16>
    %417 = vector.shape_cast %416 : vector<1x32x72xbf16> to vector<32x72xbf16>
    %cst_661 = arith.constant dense<0.000000e+00> : vector<32x288xf32>
    %418 = tpu.matmul %417, %415, %cst_661 {dimension_numbers = #tpu.dot_dimension_numbers<[1], [0], [0], [1], [0, 0, 1, 1], [], []>} : vector<32x72xbf16>, vector<72x288xbf16>, vector<32x288xf32> -> vector<32x288xf32>
    %419 = arith.addf %395, %418 : vector<32x288xf32>
    %c0_662 = arith.constant 0 : index
    %c0_663 = arith.constant 0 : index
    %c6_664 = arith.constant 6 : index
    %c0_665 = arith.constant 0 : index
    %420 = vector.load %arg1[%c0_662, %c0_663, %c6_664, %c0_665] : memref<1x8x10x342xf32, #tpu.memory_space<vmem>>, vector<1x8x1x288xf32>
    %421 = vector.shape_cast %420 : vector<1x8x1x288xf32> to vector<8x288xf32>
    %c0_666 = arith.constant 0 : index
    %c0_667 = arith.constant 0 : index
    %c6_668 = arith.constant 6 : index
    %c1_669 = arith.constant 1 : index
    %422 = vector.load %arg1[%c0_666, %c0_667, %c6_668, %c1_669] : memref<1x8x10x342xf32, #tpu.memory_space<vmem>>, vector<1x8x1x288xf32>
    %423 = vector.shape_cast %422 : vector<1x8x1x288xf32> to vector<8x288xf32>
    %c0_670 = arith.constant 0 : index
    %c0_671 = arith.constant 0 : index
    %c6_672 = arith.constant 6 : index
    %c2_673 = arith.constant 2 : index
    %424 = vector.load %arg1[%c0_670, %c0_671, %c6_672, %c2_673] : memref<1x8x10x342xf32, #tpu.memory_space<vmem>>, vector<1x8x1x288xf32>
    %425 = vector.shape_cast %424 : vector<1x8x1x288xf32> to vector<8x288xf32>
    %c0_674 = arith.constant 0 : index
    %c0_675 = arith.constant 0 : index
    %c6_676 = arith.constant 6 : index
    %c18_677 = arith.constant 18 : index
    %426 = vector.load %arg1[%c0_674, %c0_675, %c6_676, %c18_677] : memref<1x8x10x342xf32, #tpu.memory_space<vmem>>, vector<1x8x1x288xf32>
    %427 = vector.shape_cast %426 : vector<1x8x1x288xf32> to vector<8x288xf32>
    %c0_678 = arith.constant 0 : index
    %c0_679 = arith.constant 0 : index
    %c6_680 = arith.constant 6 : index
    %c19_681 = arith.constant 19 : index
    %428 = vector.load %arg1[%c0_678, %c0_679, %c6_680, %c19_681] : memref<1x8x10x342xf32, #tpu.memory_space<vmem>>, vector<1x8x1x288xf32>
    %429 = vector.shape_cast %428 : vector<1x8x1x288xf32> to vector<8x288xf32>
    %c0_682 = arith.constant 0 : index
    %c0_683 = arith.constant 0 : index
    %c6_684 = arith.constant 6 : index
    %c20_685 = arith.constant 20 : index
    %430 = vector.load %arg1[%c0_682, %c0_683, %c6_684, %c20_685] : memref<1x8x10x342xf32, #tpu.memory_space<vmem>>, vector<1x8x1x288xf32>
    %431 = vector.shape_cast %430 : vector<1x8x1x288xf32> to vector<8x288xf32>
    %c0_686 = arith.constant 0 : index
    %c0_687 = arith.constant 0 : index
    %c6_688 = arith.constant 6 : index
    %c36_689 = arith.constant 36 : index
    %432 = vector.load %arg1[%c0_686, %c0_687, %c6_688, %c36_689] : memref<1x8x10x342xf32, #tpu.memory_space<vmem>>, vector<1x8x1x288xf32>
    %433 = vector.shape_cast %432 : vector<1x8x1x288xf32> to vector<8x288xf32>
    %c0_690 = arith.constant 0 : index
    %c0_691 = arith.constant 0 : index
    %c6_692 = arith.constant 6 : index
    %c37_693 = arith.constant 37 : index
    %434 = vector.load %arg1[%c0_690, %c0_691, %c6_692, %c37_693] : memref<1x8x10x342xf32, #tpu.memory_space<vmem>>, vector<1x8x1x288xf32>
    %435 = vector.shape_cast %434 : vector<1x8x1x288xf32> to vector<8x288xf32>
    %c0_694 = arith.constant 0 : index
    %c0_695 = arith.constant 0 : index
    %c6_696 = arith.constant 6 : index
    %c38_697 = arith.constant 38 : index
    %436 = vector.load %arg1[%c0_694, %c0_695, %c6_696, %c38_697] : memref<1x8x10x342xf32, #tpu.memory_space<vmem>>, vector<1x8x1x288xf32>
    %437 = vector.shape_cast %436 : vector<1x8x1x288xf32> to vector<8x288xf32>
    %438 = tpu.concatenate %421, %423, %425, %427, %429, %431, %433, %435, %437 in 0 : vector<8x288xf32>, vector<8x288xf32>, vector<8x288xf32>, vector<8x288xf32>, vector<8x288xf32>, vector<8x288xf32>, vector<8x288xf32>, vector<8x288xf32>, vector<8x288xf32> -> vector<72x288xf32>
    %439 = arith.truncf %438 : vector<72x288xf32> to vector<72x288xbf16>
    %c1_698 = arith.constant 1 : index
    %c0_699 = arith.constant 0 : index
    %c0_700 = arith.constant 0 : index
    %440 = vector.load %arg2[%c1_698, %c0_699, %c0_700] : memref<3x32x72xbf16, #tpu.memory_space<vmem>>, vector<1x32x72xbf16>
    %441 = vector.shape_cast %440 : vector<1x32x72xbf16> to vector<32x72xbf16>
    %cst_701 = arith.constant dense<0.000000e+00> : vector<32x288xf32>
    %442 = tpu.matmul %441, %439, %cst_701 {dimension_numbers = #tpu.dot_dimension_numbers<[1], [0], [0], [1], [0, 0, 1, 1], [], []>} : vector<32x72xbf16>, vector<72x288xbf16>, vector<32x288xf32> -> vector<32x288xf32>
    %443 = arith.addf %419, %442 : vector<32x288xf32>
    %c0_702 = arith.constant 0 : index
    %c0_703 = arith.constant 0 : index
    %c7 = arith.constant 7 : index
    %c0_704 = arith.constant 0 : index
    %444 = vector.load %arg1[%c0_702, %c0_703, %c7, %c0_704] : memref<1x8x10x342xf32, #tpu.memory_space<vmem>>, vector<1x8x1x288xf32>
    %445 = vector.shape_cast %444 : vector<1x8x1x288xf32> to vector<8x288xf32>
    %c0_705 = arith.constant 0 : index
    %c0_706 = arith.constant 0 : index
    %c7_707 = arith.constant 7 : index
    %c1_708 = arith.constant 1 : index
    %446 = vector.load %arg1[%c0_705, %c0_706, %c7_707, %c1_708] : memref<1x8x10x342xf32, #tpu.memory_space<vmem>>, vector<1x8x1x288xf32>
    %447 = vector.shape_cast %446 : vector<1x8x1x288xf32> to vector<8x288xf32>
    %c0_709 = arith.constant 0 : index
    %c0_710 = arith.constant 0 : index
    %c7_711 = arith.constant 7 : index
    %c2_712 = arith.constant 2 : index
    %448 = vector.load %arg1[%c0_709, %c0_710, %c7_711, %c2_712] : memref<1x8x10x342xf32, #tpu.memory_space<vmem>>, vector<1x8x1x288xf32>
    %449 = vector.shape_cast %448 : vector<1x8x1x288xf32> to vector<8x288xf32>
    %c0_713 = arith.constant 0 : index
    %c0_714 = arith.constant 0 : index
    %c7_715 = arith.constant 7 : index
    %c18_716 = arith.constant 18 : index
    %450 = vector.load %arg1[%c0_713, %c0_714, %c7_715, %c18_716] : memref<1x8x10x342xf32, #tpu.memory_space<vmem>>, vector<1x8x1x288xf32>
    %451 = vector.shape_cast %450 : vector<1x8x1x288xf32> to vector<8x288xf32>
    %c0_717 = arith.constant 0 : index
    %c0_718 = arith.constant 0 : index
    %c7_719 = arith.constant 7 : index
    %c19_720 = arith.constant 19 : index
    %452 = vector.load %arg1[%c0_717, %c0_718, %c7_719, %c19_720] : memref<1x8x10x342xf32, #tpu.memory_space<vmem>>, vector<1x8x1x288xf32>
    %453 = vector.shape_cast %452 : vector<1x8x1x288xf32> to vector<8x288xf32>
    %c0_721 = arith.constant 0 : index
    %c0_722 = arith.constant 0 : index
    %c7_723 = arith.constant 7 : index
    %c20_724 = arith.constant 20 : index
    %454 = vector.load %arg1[%c0_721, %c0_722, %c7_723, %c20_724] : memref<1x8x10x342xf32, #tpu.memory_space<vmem>>, vector<1x8x1x288xf32>
    %455 = vector.shape_cast %454 : vector<1x8x1x288xf32> to vector<8x288xf32>
    %c0_725 = arith.constant 0 : index
    %c0_726 = arith.constant 0 : index
    %c7_727 = arith.constant 7 : index
    %c36_728 = arith.constant 36 : index
    %456 = vector.load %arg1[%c0_725, %c0_726, %c7_727, %c36_728] : memref<1x8x10x342xf32, #tpu.memory_space<vmem>>, vector<1x8x1x288xf32>
    %457 = vector.shape_cast %456 : vector<1x8x1x288xf32> to vector<8x288xf32>
    %c0_729 = arith.constant 0 : index
    %c0_730 = arith.constant 0 : index
    %c7_731 = arith.constant 7 : index
    %c37_732 = arith.constant 37 : index
    %458 = vector.load %arg1[%c0_729, %c0_730, %c7_731, %c37_732] : memref<1x8x10x342xf32, #tpu.memory_space<vmem>>, vector<1x8x1x288xf32>
    %459 = vector.shape_cast %458 : vector<1x8x1x288xf32> to vector<8x288xf32>
    %c0_733 = arith.constant 0 : index
    %c0_734 = arith.constant 0 : index
    %c7_735 = arith.constant 7 : index
    %c38_736 = arith.constant 38 : index
    %460 = vector.load %arg1[%c0_733, %c0_734, %c7_735, %c38_736] : memref<1x8x10x342xf32, #tpu.memory_space<vmem>>, vector<1x8x1x288xf32>
    %461 = vector.shape_cast %460 : vector<1x8x1x288xf32> to vector<8x288xf32>
    %462 = tpu.concatenate %445, %447, %449, %451, %453, %455, %457, %459, %461 in 0 : vector<8x288xf32>, vector<8x288xf32>, vector<8x288xf32>, vector<8x288xf32>, vector<8x288xf32>, vector<8x288xf32>, vector<8x288xf32>, vector<8x288xf32>, vector<8x288xf32> -> vector<72x288xf32>
    %463 = arith.truncf %462 : vector<72x288xf32> to vector<72x288xbf16>
    %c2_737 = arith.constant 2 : index
    %c0_738 = arith.constant 0 : index
    %c0_739 = arith.constant 0 : index
    %464 = vector.load %arg2[%c2_737, %c0_738, %c0_739] : memref<3x32x72xbf16, #tpu.memory_space<vmem>>, vector<1x32x72xbf16>
    %465 = vector.shape_cast %464 : vector<1x32x72xbf16> to vector<32x72xbf16>
    %cst_740 = arith.constant dense<0.000000e+00> : vector<32x288xf32>
    %466 = tpu.matmul %465, %463, %cst_740 {dimension_numbers = #tpu.dot_dimension_numbers<[1], [0], [0], [1], [0, 0, 1, 1], [], []>} : vector<32x72xbf16>, vector<72x288xbf16>, vector<32x288xf32> -> vector<32x288xf32>
    %467 = arith.addf %443, %466 : vector<32x288xf32>
    %c0_741 = arith.constant 0 : index
    %c0_742 = arith.constant 0 : index
    %468 = vector.load %arg3[%c0_741, %c0_742] : memref<32x1xf32, #tpu.memory_space<vmem>>, vector<32x1xf32>
    %469 = vector.broadcast %468 : vector<32x1xf32> to vector<32x288xf32>
    %470 = arith.addf %467, %469 : vector<32x288xf32>
    %c0_743 = arith.constant 0 : index
    %c0_744 = arith.constant 0 : index
    %c5_745 = arith.constant 5 : index
    %c0_746 = arith.constant 0 : index
    %471 = vector.load %arg4[%c0_743, %c0_744, %c5_745, %c0_746] : memref<1x32x8x288xf32, #tpu.memory_space<vmem>>, vector<1x32x1x288xf32>
    %472 = vector.shape_cast %471 : vector<1x32x1x288xf32> to vector<32x288xf32>
    %473 = vector.shape_cast %470 : vector<32x288xf32> to vector<1x32x1x288xf32>
    tpu.vector_store %arg4[%c0_743, %c0_744, %c5_745, %c0_746], %473 {strides = array<i32>} : memref<1x32x8x288xf32, #tpu.memory_space<vmem>>, vector<1x32x1x288xf32>,
    %cst_747 = arith.constant 0.000000e+00 : f32
    %474 = vector.broadcast %cst_747 : f32 to vector<32x288xf32>
    %c0_748 = arith.constant 0 : index
    %c0_749 = arith.constant 0 : index
    %c6_750 = arith.constant 6 : index
    %c0_751 = arith.constant 0 : index
    %475 = vector.load %arg1[%c0_748, %c0_749, %c6_750, %c0_751] : memref<1x8x10x342xf32, #tpu.memory_space<vmem>>, vector<1x8x1x288xf32>
    %476 = vector.shape_cast %475 : vector<1x8x1x288xf32> to vector<8x288xf32>
    %c0_752 = arith.constant 0 : index
    %c0_753 = arith.constant 0 : index
    %c6_754 = arith.constant 6 : index
    %c1_755 = arith.constant 1 : index
    %477 = vector.load %arg1[%c0_752, %c0_753, %c6_754, %c1_755] : memref<1x8x10x342xf32, #tpu.memory_space<vmem>>, vector<1x8x1x288xf32>
    %478 = vector.shape_cast %477 : vector<1x8x1x288xf32> to vector<8x288xf32>
    %c0_756 = arith.constant 0 : index
    %c0_757 = arith.constant 0 : index
    %c6_758 = arith.constant 6 : index
    %c2_759 = arith.constant 2 : index
    %479 = vector.load %arg1[%c0_756, %c0_757, %c6_758, %c2_759] : memref<1x8x10x342xf32, #tpu.memory_space<vmem>>, vector<1x8x1x288xf32>
    %480 = vector.shape_cast %479 : vector<1x8x1x288xf32> to vector<8x288xf32>
    %c0_760 = arith.constant 0 : index
    %c0_761 = arith.constant 0 : index
    %c6_762 = arith.constant 6 : index
    %c18_763 = arith.constant 18 : index
    %481 = vector.load %arg1[%c0_760, %c0_761, %c6_762, %c18_763] : memref<1x8x10x342xf32, #tpu.memory_space<vmem>>, vector<1x8x1x288xf32>
    %482 = vector.shape_cast %481 : vector<1x8x1x288xf32> to vector<8x288xf32>
    %c0_764 = arith.constant 0 : index
    %c0_765 = arith.constant 0 : index
    %c6_766 = arith.constant 6 : index
    %c19_767 = arith.constant 19 : index
    %483 = vector.load %arg1[%c0_764, %c0_765, %c6_766, %c19_767] : memref<1x8x10x342xf32, #tpu.memory_space<vmem>>, vector<1x8x1x288xf32>
    %484 = vector.shape_cast %483 : vector<1x8x1x288xf32> to vector<8x288xf32>
    %c0_768 = arith.constant 0 : index
    %c0_769 = arith.constant 0 : index
    %c6_770 = arith.constant 6 : index
    %c20_771 = arith.constant 20 : index
    %485 = vector.load %arg1[%c0_768, %c0_769, %c6_770, %c20_771] : memref<1x8x10x342xf32, #tpu.memory_space<vmem>>, vector<1x8x1x288xf32>
    %486 = vector.shape_cast %485 : vector<1x8x1x288xf32> to vector<8x288xf32>
    %c0_772 = arith.constant 0 : index
    %c0_773 = arith.constant 0 : index
    %c6_774 = arith.constant 6 : index
    %c36_775 = arith.constant 36 : index
    %487 = vector.load %arg1[%c0_772, %c0_773, %c6_774, %c36_775] : memref<1x8x10x342xf32, #tpu.memory_space<vmem>>, vector<1x8x1x288xf32>
    %488 = vector.shape_cast %487 : vector<1x8x1x288xf32> to vector<8x288xf32>
    %c0_776 = arith.constant 0 : index
    %c0_777 = arith.constant 0 : index
    %c6_778 = arith.constant 6 : index
    %c37_779 = arith.constant 37 : index
    %489 = vector.load %arg1[%c0_776, %c0_777, %c6_778, %c37_779] : memref<1x8x10x342xf32, #tpu.memory_space<vmem>>, vector<1x8x1x288xf32>
    %490 = vector.shape_cast %489 : vector<1x8x1x288xf32> to vector<8x288xf32>
    %c0_780 = arith.constant 0 : index
    %c0_781 = arith.constant 0 : index
    %c6_782 = arith.constant 6 : index
    %c38_783 = arith.constant 38 : index
    %491 = vector.load %arg1[%c0_780, %c0_781, %c6_782, %c38_783] : memref<1x8x10x342xf32, #tpu.memory_space<vmem>>, vector<1x8x1x288xf32>
    %492 = vector.shape_cast %491 : vector<1x8x1x288xf32> to vector<8x288xf32>
    %493 = tpu.concatenate %476, %478, %480, %482, %484, %486, %488, %490, %492 in 0 : vector<8x288xf32>, vector<8x288xf32>, vector<8x288xf32>, vector<8x288xf32>, vector<8x288xf32>, vector<8x288xf32>, vector<8x288xf32>, vector<8x288xf32>, vector<8x288xf32> -> vector<72x288xf32>
    %494 = arith.truncf %493 : vector<72x288xf32> to vector<72x288xbf16>
    %c0_784 = arith.constant 0 : index
    %c0_785 = arith.constant 0 : index
    %c0_786 = arith.constant 0 : index
    %495 = vector.load %arg2[%c0_784, %c0_785, %c0_786] : memref<3x32x72xbf16, #tpu.memory_space<vmem>>, vector<1x32x72xbf16>
    %496 = vector.shape_cast %495 : vector<1x32x72xbf16> to vector<32x72xbf16>
    %cst_787 = arith.constant dense<0.000000e+00> : vector<32x288xf32>
    %497 = tpu.matmul %496, %494, %cst_787 {dimension_numbers = #tpu.dot_dimension_numbers<[1], [0], [0], [1], [0, 0, 1, 1], [], []>} : vector<32x72xbf16>, vector<72x288xbf16>, vector<32x288xf32> -> vector<32x288xf32>
    %498 = arith.addf %474, %497 : vector<32x288xf32>
    %c0_788 = arith.constant 0 : index
    %c0_789 = arith.constant 0 : index
    %c7_790 = arith.constant 7 : index
    %c0_791 = arith.constant 0 : index
    %499 = vector.load %arg1[%c0_788, %c0_789, %c7_790, %c0_791] : memref<1x8x10x342xf32, #tpu.memory_space<vmem>>, vector<1x8x1x288xf32>
    %500 = vector.shape_cast %499 : vector<1x8x1x288xf32> to vector<8x288xf32>
    %c0_792 = arith.constant 0 : index
    %c0_793 = arith.constant 0 : index
    %c7_794 = arith.constant 7 : index
    %c1_795 = arith.constant 1 : index
    %501 = vector.load %arg1[%c0_792, %c0_793, %c7_794, %c1_795] : memref<1x8x10x342xf32, #tpu.memory_space<vmem>>, vector<1x8x1x288xf32>
    %502 = vector.shape_cast %501 : vector<1x8x1x288xf32> to vector<8x288xf32>
    %c0_796 = arith.constant 0 : index
    %c0_797 = arith.constant 0 : index
    %c7_798 = arith.constant 7 : index
    %c2_799 = arith.constant 2 : index
    %503 = vector.load %arg1[%c0_796, %c0_797, %c7_798, %c2_799] : memref<1x8x10x342xf32, #tpu.memory_space<vmem>>, vector<1x8x1x288xf32>
    %504 = vector.shape_cast %503 : vector<1x8x1x288xf32> to vector<8x288xf32>
    %c0_800 = arith.constant 0 : index
    %c0_801 = arith.constant 0 : index
    %c7_802 = arith.constant 7 : index
    %c18_803 = arith.constant 18 : index
    %505 = vector.load %arg1[%c0_800, %c0_801, %c7_802, %c18_803] : memref<1x8x10x342xf32, #tpu.memory_space<vmem>>, vector<1x8x1x288xf32>
    %506 = vector.shape_cast %505 : vector<1x8x1x288xf32> to vector<8x288xf32>
    %c0_804 = arith.constant 0 : index
    %c0_805 = arith.constant 0 : index
    %c7_806 = arith.constant 7 : index
    %c19_807 = arith.constant 19 : index
    %507 = vector.load %arg1[%c0_804, %c0_805, %c7_806, %c19_807] : memref<1x8x10x342xf32, #tpu.memory_space<vmem>>, vector<1x8x1x288xf32>
    %508 = vector.shape_cast %507 : vector<1x8x1x288xf32> to vector<8x288xf32>
    %c0_808 = arith.constant 0 : index
    %c0_809 = arith.constant 0 : index
    %c7_810 = arith.constant 7 : index
    %c20_811 = arith.constant 20 : index
    %509 = vector.load %arg1[%c0_808, %c0_809, %c7_810, %c20_811] : memref<1x8x10x342xf32, #tpu.memory_space<vmem>>, vector<1x8x1x288xf32>
    %510 = vector.shape_cast %509 : vector<1x8x1x288xf32> to vector<8x288xf32>
    %c0_812 = arith.constant 0 : index
    %c0_813 = arith.constant 0 : index
    %c7_814 = arith.constant 7 : index
    %c36_815 = arith.constant 36 : index
    %511 = vector.load %arg1[%c0_812, %c0_813, %c7_814, %c36_815] : memref<1x8x10x342xf32, #tpu.memory_space<vmem>>, vector<1x8x1x288xf32>
    %512 = vector.shape_cast %511 : vector<1x8x1x288xf32> to vector<8x288xf32>
    %c0_816 = arith.constant 0 : index
    %c0_817 = arith.constant 0 : index
    %c7_818 = arith.constant 7 : index
    %c37_819 = arith.constant 37 : index
    %513 = vector.load %arg1[%c0_816, %c0_817, %c7_818, %c37_819] : memref<1x8x10x342xf32, #tpu.memory_space<vmem>>, vector<1x8x1x288xf32>
    %514 = vector.shape_cast %513 : vector<1x8x1x288xf32> to vector<8x288xf32>
    %c0_820 = arith.constant 0 : index
    %c0_821 = arith.constant 0 : index
    %c7_822 = arith.constant 7 : index
    %c38_823 = arith.constant 38 : index
    %515 = vector.load %arg1[%c0_820, %c0_821, %c7_822, %c38_823] : memref<1x8x10x342xf32, #tpu.memory_space<vmem>>, vector<1x8x1x288xf32>
    %516 = vector.shape_cast %515 : vector<1x8x1x288xf32> to vector<8x288xf32>
    %517 = tpu.concatenate %500, %502, %504, %506, %508, %510, %512, %514, %516 in 0 : vector<8x288xf32>, vector<8x288xf32>, vector<8x288xf32>, vector<8x288xf32>, vector<8x288xf32>, vector<8x288xf32>, vector<8x288xf32>, vector<8x288xf32>, vector<8x288xf32> -> vector<72x288xf32>
    %518 = arith.truncf %517 : vector<72x288xf32> to vector<72x288xbf16>
    %c1_824 = arith.constant 1 : index
    %c0_825 = arith.constant 0 : index
    %c0_826 = arith.constant 0 : index
    %519 = vector.load %arg2[%c1_824, %c0_825, %c0_826] : memref<3x32x72xbf16, #tpu.memory_space<vmem>>, vector<1x32x72xbf16>
    %520 = vector.shape_cast %519 : vector<1x32x72xbf16> to vector<32x72xbf16>
    %cst_827 = arith.constant dense<0.000000e+00> : vector<32x288xf32>
    %521 = tpu.matmul %520, %518, %cst_827 {dimension_numbers = #tpu.dot_dimension_numbers<[1], [0], [0], [1], [0, 0, 1, 1], [], []>} : vector<32x72xbf16>, vector<72x288xbf16>, vector<32x288xf32> -> vector<32x288xf32>
    %522 = arith.addf %498, %521 : vector<32x288xf32>
    %c0_828 = arith.constant 0 : index
    %c0_829 = arith.constant 0 : index
    %c8 = arith.constant 8 : index
    %c0_830 = arith.constant 0 : index
    %523 = vector.load %arg1[%c0_828, %c0_829, %c8, %c0_830] : memref<1x8x10x342xf32, #tpu.memory_space<vmem>>, vector<1x8x1x288xf32>
    %524 = vector.shape_cast %523 : vector<1x8x1x288xf32> to vector<8x288xf32>
    %c0_831 = arith.constant 0 : index
    %c0_832 = arith.constant 0 : index
    %c8_833 = arith.constant 8 : index
    %c1_834 = arith.constant 1 : index
    %525 = vector.load %arg1[%c0_831, %c0_832, %c8_833, %c1_834] : memref<1x8x10x342xf32, #tpu.memory_space<vmem>>, vector<1x8x1x288xf32>
    %526 = vector.shape_cast %525 : vector<1x8x1x288xf32> to vector<8x288xf32>
    %c0_835 = arith.constant 0 : index
    %c0_836 = arith.constant 0 : index
    %c8_837 = arith.constant 8 : index
    %c2_838 = arith.constant 2 : index
    %527 = vector.load %arg1[%c0_835, %c0_836, %c8_837, %c2_838] : memref<1x8x10x342xf32, #tpu.memory_space<vmem>>, vector<1x8x1x288xf32>
    %528 = vector.shape_cast %527 : vector<1x8x1x288xf32> to vector<8x288xf32>
    %c0_839 = arith.constant 0 : index
    %c0_840 = arith.constant 0 : index
    %c8_841 = arith.constant 8 : index
    %c18_842 = arith.constant 18 : index
    %529 = vector.load %arg1[%c0_839, %c0_840, %c8_841, %c18_842] : memref<1x8x10x342xf32, #tpu.memory_space<vmem>>, vector<1x8x1x288xf32>
    %530 = vector.shape_cast %529 : vector<1x8x1x288xf32> to vector<8x288xf32>
    %c0_843 = arith.constant 0 : index
    %c0_844 = arith.constant 0 : index
    %c8_845 = arith.constant 8 : index
    %c19_846 = arith.constant 19 : index
    %531 = vector.load %arg1[%c0_843, %c0_844, %c8_845, %c19_846] : memref<1x8x10x342xf32, #tpu.memory_space<vmem>>, vector<1x8x1x288xf32>
    %532 = vector.shape_cast %531 : vector<1x8x1x288xf32> to vector<8x288xf32>
    %c0_847 = arith.constant 0 : index
    %c0_848 = arith.constant 0 : index
    %c8_849 = arith.constant 8 : index
    %c20_850 = arith.constant 20 : index
    %533 = vector.load %arg1[%c0_847, %c0_848, %c8_849, %c20_850] : memref<1x8x10x342xf32, #tpu.memory_space<vmem>>, vector<1x8x1x288xf32>
    %534 = vector.shape_cast %533 : vector<1x8x1x288xf32> to vector<8x288xf32>
    %c0_851 = arith.constant 0 : index
    %c0_852 = arith.constant 0 : index
    %c8_853 = arith.constant 8 : index
    %c36_854 = arith.constant 36 : index
    %535 = vector.load %arg1[%c0_851, %c0_852, %c8_853, %c36_854] : memref<1x8x10x342xf32, #tpu.memory_space<vmem>>, vector<1x8x1x288xf32>
    %536 = vector.shape_cast %535 : vector<1x8x1x288xf32> to vector<8x288xf32>
    %c0_855 = arith.constant 0 : index
    %c0_856 = arith.constant 0 : index
    %c8_857 = arith.constant 8 : index
    %c37_858 = arith.constant 37 : index
    %537 = vector.load %arg1[%c0_855, %c0_856, %c8_857, %c37_858] : memref<1x8x10x342xf32, #tpu.memory_space<vmem>>, vector<1x8x1x288xf32>
    %538 = vector.shape_cast %537 : vector<1x8x1x288xf32> to vector<8x288xf32>
    %c0_859 = arith.constant 0 : index
    %c0_860 = arith.constant 0 : index
    %c8_861 = arith.constant 8 : index
    %c38_862 = arith.constant 38 : index
    %539 = vector.load %arg1[%c0_859, %c0_860, %c8_861, %c38_862] : memref<1x8x10x342xf32, #tpu.memory_space<vmem>>, vector<1x8x1x288xf32>
    %540 = vector.shape_cast %539 : vector<1x8x1x288xf32> to vector<8x288xf32>
    %541 = tpu.concatenate %524, %526, %528, %530, %532, %534, %536, %538, %540 in 0 : vector<8x288xf32>, vector<8x288xf32>, vector<8x288xf32>, vector<8x288xf32>, vector<8x288xf32>, vector<8x288xf32>, vector<8x288xf32>, vector<8x288xf32>, vector<8x288xf32> -> vector<72x288xf32>
    %542 = arith.truncf %541 : vector<72x288xf32> to vector<72x288xbf16>
    %c2_863 = arith.constant 2 : index
    %c0_864 = arith.constant 0 : index
    %c0_865 = arith.constant 0 : index
    %543 = vector.load %arg2[%c2_863, %c0_864, %c0_865] : memref<3x32x72xbf16, #tpu.memory_space<vmem>>, vector<1x32x72xbf16>
    %544 = vector.shape_cast %543 : vector<1x32x72xbf16> to vector<32x72xbf16>
    %cst_866 = arith.constant dense<0.000000e+00> : vector<32x288xf32>
    %545 = tpu.matmul %544, %542, %cst_866 {dimension_numbers = #tpu.dot_dimension_numbers<[1], [0], [0], [1], [0, 0, 1, 1], [], []>} : vector<32x72xbf16>, vector<72x288xbf16>, vector<32x288xf32> -> vector<32x288xf32>
    %546 = arith.addf %522, %545 : vector<32x288xf32>
    %c0_867 = arith.constant 0 : index
    %c0_868 = arith.constant 0 : index
    %547 = vector.load %arg3[%c0_867, %c0_868] : memref<32x1xf32, #tpu.memory_space<vmem>>, vector<32x1xf32>
    %548 = vector.broadcast %547 : vector<32x1xf32> to vector<32x288xf32>
    %549 = arith.addf %546, %548 : vector<32x288xf32>
    %c0_869 = arith.constant 0 : index
    %c0_870 = arith.constant 0 : index
    %c6_871 = arith.constant 6 : index
    %c0_872 = arith.constant 0 : index
    %550 = vector.load %arg4[%c0_869, %c0_870, %c6_871, %c0_872] : memref<1x32x8x288xf32, #tpu.memory_space<vmem>>, vector<1x32x1x288xf32>
    %551 = vector.shape_cast %550 : vector<1x32x1x288xf32> to vector<32x288xf32>
    %552 = vector.shape_cast %549 : vector<32x288xf32> to vector<1x32x1x288xf32>
    tpu.vector_store %arg4[%c0_869, %c0_870, %c6_871, %c0_872], %552 {strides = array<i32>} : memref<1x32x8x288xf32, #tpu.memory_space<vmem>>, vector<1x32x1x288xf32>,
    %cst_873 = arith.constant 0.000000e+00 : f32
    %553 = vector.broadcast %cst_873 : f32 to vector<32x288xf32>
    %c0_874 = arith.constant 0 : index
    %c0_875 = arith.constant 0 : index
    %c7_876 = arith.constant 7 : index
    %c0_877 = arith.constant 0 : index
    %554 = vector.load %arg1[%c0_874, %c0_875, %c7_876, %c0_877] : memref<1x8x10x342xf32, #tpu.memory_space<vmem>>, vector<1x8x1x288xf32>
    %555 = vector.shape_cast %554 : vector<1x8x1x288xf32> to vector<8x288xf32>
    %c0_878 = arith.constant 0 : index
    %c0_879 = arith.constant 0 : index
    %c7_880 = arith.constant 7 : index
    %c1_881 = arith.constant 1 : index
    %556 = vector.load %arg1[%c0_878, %c0_879, %c7_880, %c1_881] : memref<1x8x10x342xf32, #tpu.memory_space<vmem>>, vector<1x8x1x288xf32>
    %557 = vector.shape_cast %556 : vector<1x8x1x288xf32> to vector<8x288xf32>
    %c0_882 = arith.constant 0 : index
    %c0_883 = arith.constant 0 : index
    %c7_884 = arith.constant 7 : index
    %c2_885 = arith.constant 2 : index
    %558 = vector.load %arg1[%c0_882, %c0_883, %c7_884, %c2_885] : memref<1x8x10x342xf32, #tpu.memory_space<vmem>>, vector<1x8x1x288xf32>
    %559 = vector.shape_cast %558 : vector<1x8x1x288xf32> to vector<8x288xf32>
    %c0_886 = arith.constant 0 : index
    %c0_887 = arith.constant 0 : index
    %c7_888 = arith.constant 7 : index
    %c18_889 = arith.constant 18 : index
    %560 = vector.load %arg1[%c0_886, %c0_887, %c7_888, %c18_889] : memref<1x8x10x342xf32, #tpu.memory_space<vmem>>, vector<1x8x1x288xf32>
    %561 = vector.shape_cast %560 : vector<1x8x1x288xf32> to vector<8x288xf32>
    %c0_890 = arith.constant 0 : index
    %c0_891 = arith.constant 0 : index
    %c7_892 = arith.constant 7 : index
    %c19_893 = arith.constant 19 : index
    %562 = vector.load %arg1[%c0_890, %c0_891, %c7_892, %c19_893] : memref<1x8x10x342xf32, #tpu.memory_space<vmem>>, vector<1x8x1x288xf32>
    %563 = vector.shape_cast %562 : vector<1x8x1x288xf32> to vector<8x288xf32>
    %c0_894 = arith.constant 0 : index
    %c0_895 = arith.constant 0 : index
    %c7_896 = arith.constant 7 : index
    %c20_897 = arith.constant 20 : index
    %564 = vector.load %arg1[%c0_894, %c0_895, %c7_896, %c20_897] : memref<1x8x10x342xf32, #tpu.memory_space<vmem>>, vector<1x8x1x288xf32>
    %565 = vector.shape_cast %564 : vector<1x8x1x288xf32> to vector<8x288xf32>
    %c0_898 = arith.constant 0 : index
    %c0_899 = arith.constant 0 : index
    %c7_900 = arith.constant 7 : index
    %c36_901 = arith.constant 36 : index
    %566 = vector.load %arg1[%c0_898, %c0_899, %c7_900, %c36_901] : memref<1x8x10x342xf32, #tpu.memory_space<vmem>>, vector<1x8x1x288xf32>
    %567 = vector.shape_cast %566 : vector<1x8x1x288xf32> to vector<8x288xf32>
    %c0_902 = arith.constant 0 : index
    %c0_903 = arith.constant 0 : index
    %c7_904 = arith.constant 7 : index
    %c37_905 = arith.constant 37 : index
    %568 = vector.load %arg1[%c0_902, %c0_903, %c7_904, %c37_905] : memref<1x8x10x342xf32, #tpu.memory_space<vmem>>, vector<1x8x1x288xf32>
    %569 = vector.shape_cast %568 : vector<1x8x1x288xf32> to vector<8x288xf32>
    %c0_906 = arith.constant 0 : index
    %c0_907 = arith.constant 0 : index
    %c7_908 = arith.constant 7 : index
    %c38_909 = arith.constant 38 : index
    %570 = vector.load %arg1[%c0_906, %c0_907, %c7_908, %c38_909] : memref<1x8x10x342xf32, #tpu.memory_space<vmem>>, vector<1x8x1x288xf32>
    %571 = vector.shape_cast %570 : vector<1x8x1x288xf32> to vector<8x288xf32>
    %572 = tpu.concatenate %555, %557, %559, %561, %563, %565, %567, %569, %571 in 0 : vector<8x288xf32>, vector<8x288xf32>, vector<8x288xf32>, vector<8x288xf32>, vector<8x288xf32>, vector<8x288xf32>, vector<8x288xf32>, vector<8x288xf32>, vector<8x288xf32> -> vector<72x288xf32>
    %573 = arith.truncf %572 : vector<72x288xf32> to vector<72x288xbf16>
    %c0_910 = arith.constant 0 : index
    %c0_911 = arith.constant 0 : index
    %c0_912 = arith.constant 0 : index
    %574 = vector.load %arg2[%c0_910, %c0_911, %c0_912] : memref<3x32x72xbf16, #tpu.memory_space<vmem>>, vector<1x32x72xbf16>
    %575 = vector.shape_cast %574 : vector<1x32x72xbf16> to vector<32x72xbf16>
    %cst_913 = arith.constant dense<0.000000e+00> : vector<32x288xf32>
    %576 = tpu.matmul %575, %573, %cst_913 {dimension_numbers = #tpu.dot_dimension_numbers<[1], [0], [0], [1], [0, 0, 1, 1], [], []>} : vector<32x72xbf16>, vector<72x288xbf16>, vector<32x288xf32> -> vector<32x288xf32>
    %577 = arith.addf %553, %576 : vector<32x288xf32>
    %c0_914 = arith.constant 0 : index
    %c0_915 = arith.constant 0 : index
    %c8_916 = arith.constant 8 : index
    %c0_917 = arith.constant 0 : index
    %578 = vector.load %arg1[%c0_914, %c0_915, %c8_916, %c0_917] : memref<1x8x10x342xf32, #tpu.memory_space<vmem>>, vector<1x8x1x288xf32>
    %579 = vector.shape_cast %578 : vector<1x8x1x288xf32> to vector<8x288xf32>
    %c0_918 = arith.constant 0 : index
    %c0_919 = arith.constant 0 : index
    %c8_920 = arith.constant 8 : index
    %c1_921 = arith.constant 1 : index
    %580 = vector.load %arg1[%c0_918, %c0_919, %c8_920, %c1_921] : memref<1x8x10x342xf32, #tpu.memory_space<vmem>>, vector<1x8x1x288xf32>
    %581 = vector.shape_cast %580 : vector<1x8x1x288xf32> to vector<8x288xf32>
    %c0_922 = arith.constant 0 : index
    %c0_923 = arith.constant 0 : index
    %c8_924 = arith.constant 8 : index
    %c2_925 = arith.constant 2 : index
    %582 = vector.load %arg1[%c0_922, %c0_923, %c8_924, %c2_925] : memref<1x8x10x342xf32, #tpu.memory_space<vmem>>, vector<1x8x1x288xf32>
    %583 = vector.shape_cast %582 : vector<1x8x1x288xf32> to vector<8x288xf32>
    %c0_926 = arith.constant 0 : index
    %c0_927 = arith.constant 0 : index
    %c8_928 = arith.constant 8 : index
    %c18_929 = arith.constant 18 : index
    %584 = vector.load %arg1[%c0_926, %c0_927, %c8_928, %c18_929] : memref<1x8x10x342xf32, #tpu.memory_space<vmem>>, vector<1x8x1x288xf32>
    %585 = vector.shape_cast %584 : vector<1x8x1x288xf32> to vector<8x288xf32>
    %c0_930 = arith.constant 0 : index
    %c0_931 = arith.constant 0 : index
    %c8_932 = arith.constant 8 : index
    %c19_933 = arith.constant 19 : index
    %586 = vector.load %arg1[%c0_930, %c0_931, %c8_932, %c19_933] : memref<1x8x10x342xf32, #tpu.memory_space<vmem>>, vector<1x8x1x288xf32>
    %587 = vector.shape_cast %586 : vector<1x8x1x288xf32> to vector<8x288xf32>
    %c0_934 = arith.constant 0 : index
    %c0_935 = arith.constant 0 : index
    %c8_936 = arith.constant 8 : index
    %c20_937 = arith.constant 20 : index
    %588 = vector.load %arg1[%c0_934, %c0_935, %c8_936, %c20_937] : memref<1x8x10x342xf32, #tpu.memory_space<vmem>>, vector<1x8x1x288xf32>
    %589 = vector.shape_cast %588 : vector<1x8x1x288xf32> to vector<8x288xf32>
    %c0_938 = arith.constant 0 : index
    %c0_939 = arith.constant 0 : index
    %c8_940 = arith.constant 8 : index
    %c36_941 = arith.constant 36 : index
    %590 = vector.load %arg1[%c0_938, %c0_939, %c8_940, %c36_941] : memref<1x8x10x342xf32, #tpu.memory_space<vmem>>, vector<1x8x1x288xf32>
    %591 = vector.shape_cast %590 : vector<1x8x1x288xf32> to vector<8x288xf32>
    %c0_942 = arith.constant 0 : index
    %c0_943 = arith.constant 0 : index
    %c8_944 = arith.constant 8 : index
    %c37_945 = arith.constant 37 : index
    %592 = vector.load %arg1[%c0_942, %c0_943, %c8_944, %c37_945] : memref<1x8x10x342xf32, #tpu.memory_space<vmem>>, vector<1x8x1x288xf32>
    %593 = vector.shape_cast %592 : vector<1x8x1x288xf32> to vector<8x288xf32>
    %c0_946 = arith.constant 0 : index
    %c0_947 = arith.constant 0 : index
    %c8_948 = arith.constant 8 : index
    %c38_949 = arith.constant 38 : index
    %594 = vector.load %arg1[%c0_946, %c0_947, %c8_948, %c38_949] : memref<1x8x10x342xf32, #tpu.memory_space<vmem>>, vector<1x8x1x288xf32>
    %595 = vector.shape_cast %594 : vector<1x8x1x288xf32> to vector<8x288xf32>
    %596 = tpu.concatenate %579, %581, %583, %585, %587, %589, %591, %593, %595 in 0 : vector<8x288xf32>, vector<8x288xf32>, vector<8x288xf32>, vector<8x288xf32>, vector<8x288xf32>, vector<8x288xf32>, vector<8x288xf32>, vector<8x288xf32>, vector<8x288xf32> -> vector<72x288xf32>
    %597 = arith.truncf %596 : vector<72x288xf32> to vector<72x288xbf16>
    %c1_950 = arith.constant 1 : index
    %c0_951 = arith.constant 0 : index
    %c0_952 = arith.constant 0 : index
    %598 = vector.load %arg2[%c1_950, %c0_951, %c0_952] : memref<3x32x72xbf16, #tpu.memory_space<vmem>>, vector<1x32x72xbf16>
    %599 = vector.shape_cast %598 : vector<1x32x72xbf16> to vector<32x72xbf16>
    %cst_953 = arith.constant dense<0.000000e+00> : vector<32x288xf32>
    %600 = tpu.matmul %599, %597, %cst_953 {dimension_numbers = #tpu.dot_dimension_numbers<[1], [0], [0], [1], [0, 0, 1, 1], [], []>} : vector<32x72xbf16>, vector<72x288xbf16>, vector<32x288xf32> -> vector<32x288xf32>
    %601 = arith.addf %577, %600 : vector<32x288xf32>
    %c0_954 = arith.constant 0 : index
    %c0_955 = arith.constant 0 : index
    %c9 = arith.constant 9 : index
    %c0_956 = arith.constant 0 : index
    %602 = vector.load %arg1[%c0_954, %c0_955, %c9, %c0_956] : memref<1x8x10x342xf32, #tpu.memory_space<vmem>>, vector<1x8x1x288xf32>
    %603 = vector.shape_cast %602 : vector<1x8x1x288xf32> to vector<8x288xf32>
    %c0_957 = arith.constant 0 : index
    %c0_958 = arith.constant 0 : index
    %c9_959 = arith.constant 9 : index
    %c1_960 = arith.constant 1 : index
    %604 = vector.load %arg1[%c0_957, %c0_958, %c9_959, %c1_960] : memref<1x8x10x342xf32, #tpu.memory_space<vmem>>, vector<1x8x1x288xf32>
    %605 = vector.shape_cast %604 : vector<1x8x1x288xf32> to vector<8x288xf32>
    %c0_961 = arith.constant 0 : index
    %c0_962 = arith.constant 0 : index
    %c9_963 = arith.constant 9 : index
    %c2_964 = arith.constant 2 : index
    %606 = vector.load %arg1[%c0_961, %c0_962, %c9_963, %c2_964] : memref<1x8x10x342xf32, #tpu.memory_space<vmem>>, vector<1x8x1x288xf32>
    %607 = vector.shape_cast %606 : vector<1x8x1x288xf32> to vector<8x288xf32>
    %c0_965 = arith.constant 0 : index
    %c0_966 = arith.constant 0 : index
    %c9_967 = arith.constant 9 : index
    %c18_968 = arith.constant 18 : index
    %608 = vector.load %arg1[%c0_965, %c0_966, %c9_967, %c18_968] : memref<1x8x10x342xf32, #tpu.memory_space<vmem>>, vector<1x8x1x288xf32>
    %609 = vector.shape_cast %608 : vector<1x8x1x288xf32> to vector<8x288xf32>
    %c0_969 = arith.constant 0 : index
    %c0_970 = arith.constant 0 : index
    %c9_971 = arith.constant 9 : index
    %c19_972 = arith.constant 19 : index
    %610 = vector.load %arg1[%c0_969, %c0_970, %c9_971, %c19_972] : memref<1x8x10x342xf32, #tpu.memory_space<vmem>>, vector<1x8x1x288xf32>
    %611 = vector.shape_cast %610 : vector<1x8x1x288xf32> to vector<8x288xf32>
    %c0_973 = arith.constant 0 : index
    %c0_974 = arith.constant 0 : index
    %c9_975 = arith.constant 9 : index
    %c20_976 = arith.constant 20 : index
    %612 = vector.load %arg1[%c0_973, %c0_974, %c9_975, %c20_976] : memref<1x8x10x342xf32, #tpu.memory_space<vmem>>, vector<1x8x1x288xf32>
    %613 = vector.shape_cast %612 : vector<1x8x1x288xf32> to vector<8x288xf32>
    %c0_977 = arith.constant 0 : index
    %c0_978 = arith.constant 0 : index
    %c9_979 = arith.constant 9 : index
    %c36_980 = arith.constant 36 : index
    %614 = vector.load %arg1[%c0_977, %c0_978, %c9_979, %c36_980] : memref<1x8x10x342xf32, #tpu.memory_space<vmem>>, vector<1x8x1x288xf32>
    %615 = vector.shape_cast %614 : vector<1x8x1x288xf32> to vector<8x288xf32>
    %c0_981 = arith.constant 0 : index
    %c0_982 = arith.constant 0 : index
    %c9_983 = arith.constant 9 : index
    %c37_984 = arith.constant 37 : index
    %616 = vector.load %arg1[%c0_981, %c0_982, %c9_983, %c37_984] : memref<1x8x10x342xf32, #tpu.memory_space<vmem>>, vector<1x8x1x288xf32>
    %617 = vector.shape_cast %616 : vector<1x8x1x288xf32> to vector<8x288xf32>
    %c0_985 = arith.constant 0 : index
    %c0_986 = arith.constant 0 : index
    %c9_987 = arith.constant 9 : index
    %c38_988 = arith.constant 38 : index
    %618 = vector.load %arg1[%c0_985, %c0_986, %c9_987, %c38_988] : memref<1x8x10x342xf32, #tpu.memory_space<vmem>>, vector<1x8x1x288xf32>
    %619 = vector.shape_cast %618 : vector<1x8x1x288xf32> to vector<8x288xf32>
    %620 = tpu.concatenate %603, %605, %607, %609, %611, %613, %615, %617, %619 in 0 : vector<8x288xf32>, vector<8x288xf32>, vector<8x288xf32>, vector<8x288xf32>, vector<8x288xf32>, vector<8x288xf32>, vector<8x288xf32>, vector<8x288xf32>, vector<8x288xf32> -> vector<72x288xf32>
    %621 = arith.truncf %620 : vector<72x288xf32> to vector<72x288xbf16>
    %c2_989 = arith.constant 2 : index
    %c0_990 = arith.constant 0 : index
    %c0_991 = arith.constant 0 : index
    %622 = vector.load %arg2[%c2_989, %c0_990, %c0_991] : memref<3x32x72xbf16, #tpu.memory_space<vmem>>, vector<1x32x72xbf16>
    %623 = vector.shape_cast %622 : vector<1x32x72xbf16> to vector<32x72xbf16>
    %cst_992 = arith.constant dense<0.000000e+00> : vector<32x288xf32>
    %624 = tpu.matmul %623, %621, %cst_992 {dimension_numbers = #tpu.dot_dimension_numbers<[1], [0], [0], [1], [0, 0, 1, 1], [], []>} : vector<32x72xbf16>, vector<72x288xbf16>, vector<32x288xf32> -> vector<32x288xf32>
    %625 = arith.addf %601, %624 : vector<32x288xf32>
    %c0_993 = arith.constant 0 : index
    %c0_994 = arith.constant 0 : index
    %626 = vector.load %arg3[%c0_993, %c0_994] : memref<32x1xf32, #tpu.memory_space<vmem>>, vector<32x1xf32>
    %627 = vector.broadcast %626 : vector<32x1xf32> to vector<32x288xf32>
    %628 = arith.addf %625, %627 : vector<32x288xf32>
    %c0_995 = arith.constant 0 : index
    %c0_996 = arith.constant 0 : index
    %c7_997 = arith.constant 7 : index
    %c0_998 = arith.constant 0 : index
    %629 = vector.load %arg4[%c0_995, %c0_996, %c7_997, %c0_998] : memref<1x32x8x288xf32, #tpu.memory_space<vmem>>, vector<1x32x1x288xf32>
    %630 = vector.shape_cast %629 : vector<1x32x1x288xf32> to vector<32x288xf32>
    %631 = vector.shape_cast %628 : vector<32x288xf32> to vector<1x32x1x288xf32>
    tpu.vector_store %arg4[%c0_995, %c0_996, %c7_997, %c0_998], %631 {strides = array<i32>} : memref<1x32x8x288xf32, #tpu.memory_space<vmem>>, vector<1x32x1x288xf32>,
    return
  }
  func.func @transform_0(%arg0: i32) -> (i32, i32, i32, i32) {
    %c0_i32 = arith.constant 0 : i32
    %c0_i32_0 = arith.constant 0 : i32
    %c0_i32_1 = arith.constant 0 : i32
    %c0_i32_2 = arith.constant 0 : i32
    return %arg0, %c0_i32, %c0_i32_0, %c0_i32_1 : i32, i32, i32, i32
  }
  func.func @transform_1(%arg0: i32) -> (i32, i32, i32) {
    %c0_i32 = arith.constant 0 : i32
    %c0_i32_0 = arith.constant 0 : i32
    %c0_i32_1 = arith.constant 0 : i32
    %c0_i32_2 = arith.constant 0 : i32
    return %c0_i32, %c0_i32_0, %c0_i32_1 : i32, i32, i32
  }
  func.func @transform_2(%arg0: i32) -> (i32, i32) {
    %c0_i32 = arith.constant 0 : i32
    %c0_i32_0 = arith.constant 0 : i32
    %c0_i32_1 = arith.constant 0 : i32
    return %c0_i32, %c0_i32_0 : i32, i32
  }
  func.func @transform_3(%arg0: i32) -> (i32, i32, i32, i32) {
    %c0_i32 = arith.constant 0 : i32
    %c0_i32_0 = arith.constant 0 : i32
    %c0_i32_1 = arith.constant 0 : i32
    %c0_i32_2 = arith.constant 0 : i32
    return %arg0, %c0_i32, %c0_i32_0, %c0_i32_1 : i32, i32, i32, i32
  }
}

</mosaic_0001>

<bundles_post_ra>
// kernel: blue_block_forward.1
= control target key start
LH: loop header
LB: loop body
LE: loop exit
PB: predicated region body
PF: predicated region fallthrough
CT: control target
= control target key end

     0   :  { %s14392_s12 = smov 0   ;;  %s21387_s0 = inlined_call_operand.vmem [shape: f32[2,8,10,342], index: 0, kind: input, shape index: {}]   ;;  %s21388_s1 = inlined_call_operand.vmem [shape: bf16[3,32,72], index: 1, kind: input, shape index: {}]   ;;  %s21389_s2 = inlined_call_operand.vmem [shape: f32[32,1], index: 2, kind: input, shape index: {}]   ;;  %s21390_s3 = inlined_call_operand.vmem [shape: f32[2,32,8,288], index: 3, kind: output, shape index: {}]  }
   0x1 LB: > { %s11649_s13 = sadd.s32 4294967295, %s14360_s12   ;;  %p11653_p0 = scmp.ge.s32.totalorder %s14360_s12, 1  ;;  %s14360_s12 = sphi %s14392_s12, %s13_s12  }
   0x2   : > { %p137_p1 = scmp.lt.s32.totalorder %s14360_s12, 3 }
   0x4   : > { %p138_p2 = pnand %p11653_p0, %p137_p1 }
   0x6   : > { %141 = sbr.rel (%p138_p2) target bundleno = 1074 (0x432), region = 32 }
   0xb   : > { %p161_p3 = scmp.lt.s32.totalorder %s11649_s13, 1  ;;  %v21391_v0 = vlaneseq  ;;  %v14362_v1 = vmov 1966171168   ;;  %v21392_v3 = vmov 0   ;;  %s14364_s18 = smov 126   ;;  %vm592_vm0 = vcmask 588800  }
   0xc   : > { %v200_v2 = vunpack.c.l.s4 %v14362_v1  ;;  %13085 = vset.pattern.permute.xlu1 %v21392_v3  ;;  %13084 = vset.pattern.permute.xlu0 %v21392_v3  ;;  %s14365_s19 = smov 127   ;;  %s14366_s20 = smov 110   ;;  %vm343_vm1 = vcmask 744448   ;;  %vm599_vm2 = vcmask 1043456   ;;  %vm331_vm3 = vcmask 752640  }
   0xd   : > { %s22409_s13 = smov (!%p161_p3, %s11649_s13), 1  ;;  %v203_v4 = vshrl.u32 %v21391_v0, 7  ;;  %641 = vmatprep.mubr.bf16.mxu0 %v21392_v3  ;;  %s14367_s21 = smov 109   ;;  %vm355_vm4 = vcmask 736256   ;;  %vm319_vm5 = vcmask 883712   ;;  %vm307_vm6 = vcmask 891904  }
   0xe   : > { %v201_v5 = vunpack.c.0.s8 %v200_v2  ;;  %s12864_s14 = smul.u32 384, %s22409_s13  ;;  %s14368_s22 = smov 108   ;;  %vm295_vm7 = vcmask 900096   ;;  %vm283_vm8 = vcmask 1031168   ;;  %vm271_vm9 = vcmask 1039360  }
   0xf   : > { %s14369_s23 = smov 92   ;;  %s14370_s24 = smov 91  }
  0x10   : > { %s14410_s17 = scalar_lea.vmem %s21387_s0, %s12864_s14  ;;  %v14412_v6 = vsub.s32 %v201_v5, %v203_v4  ;;  %s14371_s25 = smov 90  }
  0x11   : > { %v172_v7 = vld [vmem:[%s14410_s17] ss:$8 sm:$0x7]  ;;  %v11663_v21 = vld [vmem:[%s14410_s17 + $0x1] ss:$8 sm:$0x7] }
  0x12   : > { %21673 = vst [vmem:[#allocation2_spill] sm:$0xff] %v14412_v6  ;;  %v11656_v8 = vld [vmem:[%s14410_s17 + $0x30] ss:$8 sm:$0x7]  ;;  %s12865_s15 = smul.u32 768, %s22409_s13 }
  0x13   : > { %v11657_v9 = vld [vmem:[%s14410_s17 + $0x60] ss:$8 sm:$0x7]  ;;  %v195_v11 = vcombine.low %v172_v7, %v11656_v8  ;;  %v11664_v22 = vld [vmem:[%s14410_s17 + $0x31] ss:$8 sm:$0x7] }
  0x14   : > { %v11658_v10 = vld [vmem:[%s14410_s17 + $0x90] ss:$8 sm:$0x7]  ;;  %v11665_v24 = vld [vmem:[%s14410_s17 + $0x61] ss:$8 sm:$0x7]  ;;  %v404_v26 = vcombine.low %v11663_v21, %v11664_v22  ;;  %s17063_s26 = scalar_lea.vmem %s21390_s3, %s12865_s15 }
  0x15   : > { %v11659_v12 = vld [vmem:[%s14410_s17 + $0xc0] ss:$8 sm:$0x7]  ;;  %v196_v14 = vcombine.low %v11657_v9, %v11658_v10  ;;  %v205_v18 = vrot.slane %v195_v11, %v14412_v6  ;;  %v11666_v25 = vld [vmem:[%s14410_s17 + $0x91] ss:$8 sm:$0x7] }
  0x16   : > { %v11660_v13 = vld [vmem:[%s14410_s17 + $0xf0] ss:$8 sm:$0x7]  ;;  %v11667_v30 = vld [vmem:[%s14410_s17 + $0xc1] ss:$8 sm:$0x7]  ;;  %v405_v32 = vcombine.low %v11665_v24, %v11666_v25  ;;  %v414_v36 = vrot.slane %v404_v26, %v14412_v6 }
  0x17   : > { %v11661_v15 = vld [vmem:[%s14410_s17 + $0x120] ss:$8 sm:$0x7]  ;;  %v197_v17 = vcombine.low %v11659_v12, %v11660_v13  ;;  %v212_v20 = vrot.slane %v196_v14, %v14412_v6  ;;  %v11668_v31 = vld [vmem:[%s14410_s17 + $0xf1] ss:$8 sm:$0x7] }
  0x18   : > { %v11662_v16 = vld [vmem:[%s14410_s17 + $0x150] ss:$8 sm:$0x7]  ;;  %v11669_v33 = vld [vmem:[%s14410_s17 + $0x121] ss:$8 sm:$0x7]  ;;  %v406_v35 = vcombine.low %v11667_v30, %v11668_v31  ;;  %v421_v42 = vrot.slane %v405_v32, %v14412_v6 }
  0x19   : > { %v198_v19 = vcombine.low %v11661_v15, %v11662_v16  ;;  %v219_v23 = vrot.slane %v197_v17, %v14412_v6  ;;  %v227_v28 = vcombine.low %v205_v18, %v212_v20  ;;  %v228_v29 = vcombine.high %v205_v18, %v212_v20  ;;  %v11670_v34 = vld [vmem:[%s14410_s17 + $0x151] ss:$8 sm:$0x7]  ;;  %v11689_v59 = vld [vmem:[%s14410_s17 + $0x2] ss:$8 sm:$0x7] }
  0x1a   : > { %v407_v41 = vcombine.low %v11669_v33, %v11670_v34  ;;  %v428_v43 = vrot.slane %v406_v35, %v14412_v6  ;;  %v436_v47 = vcombine.low %v414_v36, %v421_v42  ;;  %v437_v57 = vcombine.high %v414_v36, %v421_v42  ;;  %v11690_v60 = vld [vmem:[%s14410_s17 + $0x32] ss:$8 sm:$0x7]  ;;  %v11739_v5 = vld [vmem:[%s14410_s17 + $0x1] ss:$8 sm:$0x7] }
  0x1b   : > { %v226_v27 = vrot.slane %v198_v19, %v14412_v6  ;;  %v237_v39 = vrot.slane %v227_v28, %v14412_v6  ;;  %v244_v40 = vrot.slane %v228_v29, %v14412_v6  ;;  %v11691_v61 = vld [vmem:[%s14410_s17 + $0x62] ss:$8 sm:$0x7]  ;;  %v11740_v7 = vld [vmem:[%s14410_s17 + $0x31] ss:$8 sm:$0x7]  ;;  %v862_v14 = vcombine.low %v11689_v59, %v11690_v60 }
  0x1c   : > { %v435_v46 = vrot.slane %v407_v41, %v14412_v6  ;;  %v446_v51 = vrot.slane %v436_v47, %v14412_v6  ;;  %v11692_v62 = vld [vmem:[%s14410_s17 + $0x92] ss:$8 sm:$0x7]  ;;  %v11741_v8 = vld [vmem:[%s14410_s17 + $0x61] ss:$8 sm:$0x7]  ;;  %v453_v9 = vrot.slane %v437_v57, %v14412_v6  ;;  %v1642_v22 = vcombine.low %v11739_v5, %v11740_v7 }
  0x1d   : > { %v229_v37 = vcombine.low %v219_v23, %v226_v27  ;;  %v230_v38 = vcombine.high %v219_v23, %v226_v27  ;;  %v11693_v63 = vld [vmem:[%s14410_s17 + $0xc2] ss:$8 sm:$0x7]  ;;  %v11742_v11 = vld [vmem:[%s14410_s17 + $0x91] ss:$8 sm:$0x7]  ;;  %v863_v17 = vcombine.low %v11691_v61, %v11692_v62  ;;  %v872_v26 = vrot.slane %v862_v14, %v14412_v6 }
  0x1e   : > { %v438_v50 = vcombine.low %v428_v43, %v435_v46  ;;  %v439_v58 = vcombine.high %v428_v43, %v435_v46  ;;  %v11694_v1 = vld [vmem:[%s14410_s17 + $0xf2] ss:$8 sm:$0x7]  ;;  %v11743_v12 = vld [vmem:[%s14410_s17 + $0xc1] ss:$8 sm:$0x7]  ;;  %v1643_v23 = vcombine.low %v11741_v8, %v11742_v11  ;;  %v14508_v31 = vrot.slane %v1642_v22, %v14412_v6 }
  0x1f   : > { %v251_v44 = vrot.slane %v229_v37, %v14412_v6  ;;  %v258_v45 = vrot.slane %v230_v38, %v14412_v6  ;;  %v11695_v2 = vld [vmem:[%s14410_s17 + $0x122] ss:$8 sm:$0x7]  ;;  %v11744_v13 = vld [vmem:[%s14410_s17 + $0xf1] ss:$8 sm:$0x7]  ;;  %v864_v18 = vcombine.low %v11693_v63, %v11694_v1  ;;  %v879_v27 = vrot.slane %v863_v17, %v14412_v6 }
  0x20   : > { %v460_v54 = vrot.slane %v438_v50, %v14412_v6  ;;  %v11696_v4 = vld [vmem:[%s14410_s17 + $0x152] ss:$8 sm:$0x7]  ;;  %v467_v10 = vrot.slane %v439_v58, %v14412_v6  ;;  %v11745_v15 = vld [vmem:[%s14410_s17 + $0x121] ss:$8 sm:$0x7]  ;;  %v1644_v24 = vcombine.low %v11743_v12, %v11744_v13  ;;  %v1659_v32 = vrot.slane %v1643_v23, %v14412_v6 }
  0x21   : > { %v14442_v48 = vcombine.low %v237_v39, %v251_v44  ;;  %v14444_v49 = vcombine.low %v244_v40, %v258_v45  ;;  %v14451_v53 = vcombine.high %v237_v39, %v251_v44  ;;  %v11746_v16 = vld [vmem:[%s14410_s17 + $0x151] ss:$8 sm:$0x7]  ;;  %v865_v19 = vcombine.low %v11695_v2, %v11696_v4  ;;  %v11747_v60 = vld [vmem:[%s14410_s17 + $0x2] ss:$8 sm:$0x7] }
  0x22   : > { %v14458_v55 = vcombine.low %v446_v51, %v460_v54  ;;  %v14494_v20 = vcombine.high %v446_v51, %v460_v54  ;;  %v14496_v21 = vcombine.low %v453_v9, %v467_v10  ;;  %v1645_v25 = vcombine.low %v11745_v15, %v11746_v16  ;;  %v14550_v57 = vld [vmem:[%s21388_s1 + $0x10] sm:$0xff]   ;;  %v14578_v9 = vld [vmem:[%s21389_s2 + $0x8] sm:$0xff]  ;;  %v14583_v10 = vld [vmem:[%s21389_s2] sm:$0xff] }
  0x23   : > { %v14449_v52 = vpack.i.bf16 %v14444_v49, %v14442_v48  ;;  %v886_v28 = vrot.slane %v864_v18, %v14412_v6  ;;  %v893_v30 = vrot.slane %v865_v19, %v14412_v6  ;;  %v1666_v33 = vrot.slane %v1644_v24, %v14412_v6  ;;  %12514 = vmatprep.mubr.msk.bf16.mxu1 %vm592_vm0, %v14550_v57  ;;  %v11748_v61 = vld [vmem:[%s14410_s17 + $0x32] ss:$8 sm:$0x7]  ;;  %v11773_v7 = vld [vmem:[%s14410_s17 + $0x3] ss:$8 sm:$0x7] }
  0x24   : > { %v12899_v56 = vpack.i.bf16 %v14458_v55, %v14451_v53  ;;  %v12969_v29 = vpack.i.bf16 %v14494_v20, %v14496_v21  ;;  %v1673_v34 = vrot.slane %v1645_v25, %v14412_v6  ;;  %v894_v35 = vcombine.low %v872_v26, %v879_v27  ;;  %v11749_v62 = vld [vmem:[%s14410_s17 + $0x62] ss:$8 sm:$0x7]  ;;  %v11774_v8 = vld [vmem:[%s14410_s17 + $0x33] ss:$8 sm:$0x7] }
  0x25   : > { %12895 = vrot.lane.b32.xlu1 %v14449_v52, %s14364_s18  ;;  %12885 = vrot.lane.b32.xlu0 %v14449_v52, %s14365_s19  ;;  %v896_v36 = vcombine.low %v886_v28, %v893_v30  ;;  %v895_v37 = vcombine.high %v872_v26, %v879_v27  ;;  %v1674_v38 = vcombine.low %v14508_v31, %v1659_v32  ;;  %v11750_v63 = vld [vmem:[%s14410_s17 + $0x92] ss:$8 sm:$0x7]  ;;  %v11775_v13 = vld [vmem:[%s14410_s17 + $0x63] ss:$8 sm:$0x7] }
  0x26   : > { %v1676_v39 = vcombine.low %v1666_v33, %v1673_v34  ;;  %v897_v40 = vcombine.high %v886_v28, %v893_v30  ;;  %v904_v41 = vrot.slane %v894_v35, %v14412_v6  ;;  %v1675_v58 = vcombine.high %v14508_v31, %v1659_v32  ;;  %v11751_v1 = vld [vmem:[%s14410_s17 + $0xc2] ss:$8 sm:$0x7]  ;;  %v11776_v14 = vld [vmem:[%s14410_s17 + $0x93] ss:$8 sm:$0x7] }
  0x27   : > { %v918_v42 = vrot.slane %v896_v36, %v14412_v6  ;;  %v911_v43 = vrot.slane %v895_v37, %v14412_v6  ;;  %v1684_v44 = vrot.slane %v1674_v38, %v14412_v6  ;;  %v1677_v59 = vcombine.high %v1666_v33, %v1673_v34  ;;  %v11752_v2 = vld [vmem:[%s14410_s17 + $0xf2] ss:$8 sm:$0x7]  ;;  %v11777_v15 = vld [vmem:[%s14410_s17 + $0xc3] ss:$8 sm:$0x7] }
  0x28   : > { %v1698_v45 = vrot.slane %v1676_v39, %v14412_v6  ;;  %v925_v46 = vrot.slane %v897_v40, %v14412_v6  ;;  %v11753_v4 = vld [vmem:[%s14410_s17 + $0x122] ss:$8 sm:$0x7]  ;;  %v1691_v11 = vrot.slane %v1675_v58, %v14412_v6  ;;  %v11778_v16 = vld [vmem:[%s14410_s17 + $0xf3] ss:$8 sm:$0x7]  ;;  %v1835_v19 = vcombine.low %v11747_v60, %v11748_v61 }
  0x29   : > { %12900 = vrot.lane.b32.xlu1 %v12899_v56, %s14364_s18  ;;  %12890 = vrot.lane.b32.xlu0 %v12899_v56, %s14365_s19  ;;  %v14527_v47 = vcombine.high %v904_v41, %v918_v42  ;;  %v14533_v51 = vcombine.low %v904_v41, %v918_v42  ;;  %v11754_v5 = vld [vmem:[%s14410_s17 + $0x152] ss:$8 sm:$0x7]  ;;  %v1705_v12 = vrot.slane %v1677_v59, %v14412_v6  ;;  %v11779_v17 = vld [vmem:[%s14410_s17 + $0x123] ss:$8 sm:$0x7] }
  0x2a   : > { %v14531_v50 = vcombine.low %v1684_v44, %v1698_v45  ;;  %v11780_v18 = vld [vmem:[%s14410_s17 + $0x153] ss:$8 sm:$0x7]  ;;  %v1836_v22 = vcombine.low %v11749_v62, %v11750_v63  ;;  %v1837_v23 = vcombine.low %v11751_v1, %v11752_v2  ;;  %v14595_v24 = vcombine.high %v1684_v44, %v1698_v45 }
  0x2b   : > { %21674 = vst [vmem:[#allocation3_spill] sm:$0xff] %v14527_v47  ;;  %21676 = vst [vmem:[#allocation5_spill] sm:$0xff] %v14533_v51  ;;  %v14597_v25 = vcombine.low %v1691_v11, %v1705_v12  ;;  %v1838_v26 = vcombine.low %v11753_v4, %v11754_v5  ;;  %v2290_v27 = vcombine.low %v11773_v7, %v11774_v8  ;;  %v14604_v31 = vld [vmem:[%s21389_s2 + $0x10] sm:$0xff]  ;;  %v14609_v32 = vld [vmem:[%s21389_s2 + $0x18] sm:$0xff] }
  0x2c   : > { %21675 = vst [vmem:[#allocation4_spill] sm:$0xff] %v14531_v50  ;;  %v13009_v54 = vpack.i.bf16 %v14531_v50, %v14527_v47  ;;  %21678 = vst [vmem:[#allocation7_spill] sm:$0xff] %v14595_v24  ;;  %v2291_v28 = vcombine.low %v11775_v13, %v11776_v14  ;;  %v2293_v30 = vcombine.low %v11779_v17, %v11780_v18 }
  0x2d   : > { %12910 = vrot.lane.b32.xlu1 %v12899_v56, %s14366_s20  ;;  %12905 = vrot.lane.b32.xlu0 %v14449_v52, %s14366_s20  ;;  %21679 = vst [vmem:[#allocation8_spill] sm:$0xff] %v14597_v25  ;;  %v1845_v33 = vrot.slane %v1835_v19, %v14412_v6  ;;  %v1852_v34 = vrot.slane %v1836_v22, %v14412_v6 }
  0x2e   : > { %v1859_v35 = vrot.slane %v1837_v23, %v14412_v6  ;;  %v13086_v36 = vpack.i.bf16 %v14595_v24, %v14597_v25  ;;  %v1866_v37 = vrot.slane %v1838_v26, %v14412_v6  ;;  %v2300_v38 = vrot.slane %v2290_v27, %v14412_v6  ;;  %v11824_v26 = vld [vmem:[%s14410_s17 + $0x2] ss:$8 sm:$0x7]  ;;  %v11915_v24 = vld [vmem:[%s14410_s17 + $0x123] ss:$8 sm:$0x7] }
  0x2f   : > { %v2307_v39 = vrot.slane %v2291_v28, %v14412_v6  ;;  %v2321_v41 = vrot.slane %v2293_v30, %v14412_v6  ;;  %v1867_v42 = vcombine.low %v1845_v33, %v1852_v34  ;;  %v11825_v27 = vld [vmem:[%s14410_s17 + $0x32] ss:$8 sm:$0x7] }
  0x30   : > { %v1869_v44 = vcombine.low %v1859_v35, %v1866_v37  ;;  %v1870_v45 = vcombine.high %v1859_v35, %v1866_v37  ;;  %v11826_v28 = vld [vmem:[%s14410_s17 + $0x62] ss:$8 sm:$0x7] }
  0x31   : > { %12920 = vrot.lane.b32.xlu1 %v12899_v56, %s14367_s21  ;;  %12915 = vrot.lane.b32.xlu0 %v14449_v52, %s14367_s21  ;;  %v2323_v14 = vcombine.high %v2300_v38, %v2307_v39  ;;  %v11828_v30 = vld [vmem:[%s14410_s17 + $0xc2] ss:$8 sm:$0x7] }
  0x32   : > { %v1891_v59 = vrot.slane %v1869_v44, %v14412_v6  ;;  %v1898_v60 = vrot.slane %v1870_v45, %v14412_v6  ;;  %v11831_v37 = vld [vmem:[%s14410_s17 + $0x152] ss:$8 sm:$0x7]  ;;  %v11836_v44 = vld [vmem:[%s14410_s17 + $0xc3] ss:$8 sm:$0x7] }
  0x33   : > { %v2339_v18 = vrot.slane %v2323_v14, %v14412_v6  ;;  %v11837_v45 = vld [vmem:[%s14410_s17 + $0xf3] ss:$8 sm:$0x7] }
  0x35   : > { %12930 = vrot.lane.b32.xlu1 %v12899_v56, %s14368_s22  ;;  %12925 = vrot.lane.b32.xlu0 %v14449_v52, %s14368_s22 }
  0x39   : > { %12940 = vrot.lane.b32.xlu1 %v12899_v56, %s14369_s23  ;;  %12935 = vrot.lane.b32.xlu0 %v14449_v52, %s14369_s23 }
  0x3d   : > { %12950 = vrot.lane.b32.xlu1 %v12899_v56, %s14370_s24  ;;  %12945 = vrot.lane.b32.xlu0 %v14449_v52, %s14370_s24 }
  0x41   : > { %12960 = vrot.lane.b32.xlu1 %v12899_v56, %s14371_s25  ;;  %12955 = vrot.lane.b32.xlu0 %v14449_v52, %s14371_s25  ;;  %v14535_v52 = vcombine.low %v911_v43, %v925_v46  ;;  %v1868_v43 = vcombine.high %v1845_v33, %v1852_v34  ;;  %v2322_v46 = vcombine.low %v2300_v38, %v2307_v39  ;;  %v11829_v33 = vld [vmem:[%s14410_s17 + $0xf2] ss:$8 sm:$0x7]  ;;  %v11832_v38 = vld [vmem:[%s14410_s17 + $0x3] ss:$8 sm:$0x7] }
  0x42   : > { %v11833_v39 = vld [vmem:[%s14410_s17 + $0x33] ss:$8 sm:$0x7] }
  0x43   : > { %21677 = vst [vmem:[#allocation6_spill] sm:$0xff] %v14535_v52  ;;  %v13004_v56 = vpack.i.bf16 %v14535_v52, %v14533_v51  ;;  %v1884_v58 = vrot.slane %v1868_v43, %v14412_v6  ;;  %v2332_v61 = vrot.slane %v2322_v46, %v14412_v6  ;;  %v3066_v46 = vcombine.low %v11824_v26, %v11825_v27  ;;  %v11916_v51 = vld [vmem:[%s14410_s17 + $0x153] ss:$8 sm:$0x7] }
  0x44   : > { %v4493_v47 = vcombine.low %v11915_v24, %v11916_v51 }
  0x45   : > { %12970 = vrot.lane.b32.xlu1 %v12969_v29, %s14364_s18  ;;  %12965 = vrot.lane.b32.xlu0 %v12969_v29, %s14365_s19  ;;  %v14637_v1 = vcombine.low %v1884_v58, %v1898_v60  ;;  %v11838_v58 = vld [vmem:[%s14410_s17 + $0x123] ss:$8 sm:$0x7]  ;;  %v3076_v27 = vrot.slane %v3066_v46, %v14412_v6 }
  0x47   : > { %21681 = vst [vmem:[#allocation10_spill] sm:$0xff] %v14637_v1 }
  0x49   : > { %12980 = vrot.lane.b32.xlu1 %v12969_v29, %s14367_s21  ;;  %12975 = vrot.lane.b32.xlu0 %v12969_v29, %s14366_s20 }
  0x4d   : > { %12990 = vrot.lane.b32.xlu1 %v12969_v29, %s14369_s23  ;;  %12985 = vrot.lane.b32.xlu0 %v12969_v29, %s14368_s22 }
  0x51   : > { %13000 = vrot.lane.b32.xlu1 %v12969_v29, %s14371_s25  ;;  %12995 = vrot.lane.b32.xlu0 %v12969_v29, %s14370_s24  ;;  %v2292_v29 = vcombine.low %v11777_v15, %v11778_v16 }
  0x53   : > { %v2314_v40 = vrot.slane %v2292_v29, %v14412_v6  ;;  %v11827_v29 = vld [vmem:[%s14410_s17 + $0x92] ss:$8 sm:$0x7] }
  0x55   : > { %13010 = vrot.lane.b32.xlu1 %v13009_v54, %s14365_s19  ;;  %13005 = vrot.lane.b32.xlu0 %v13004_v56, %s14365_s19  ;;  %v2325_v15 = vcombine.high %v2314_v40, %v2321_v41 }
  0x57   : > { %v2353_v19 = vrot.slane %v2325_v15, %v14412_v6  ;;  %v3259_v15 = vcombine.low %v11832_v38, %v11833_v39 }
  0x59   : > { %13020 = vrot.lane.b32.xlu1 %v13009_v54, %s14364_s18  ;;  %13015 = vrot.lane.b32.xlu0 %v13004_v56, %s14364_s18  ;;  %v14689_v35 = vcombine.low %v2339_v18, %v2353_v19  ;;  %v3261_v19 = vcombine.low %v11836_v44, %v11837_v45 }
  0x5b   : > { %21685 = vst [vmem:[#allocation14_spill] sm:$0xff] %v14689_v35 }
  0x5d   : > { %13030 = vrot.lane.b32.xlu1 %v13009_v54, %s14366_s20  ;;  %13025 = vrot.lane.b32.xlu0 %v13004_v56, %s14366_s20 }
  0x61   : > { %13040 = vrot.lane.b32.xlu1 %v13009_v54, %s14367_s21  ;;  %13035 = vrot.lane.b32.xlu0 %v13004_v56, %s14367_s21 }
  0x65   : > { %13050 = vrot.lane.b32.xlu1 %v13009_v54, %s14368_s22  ;;  %13045 = vrot.lane.b32.xlu0 %v13004_v56, %s14368_s22 }
  0x69   : > { %13060 = vrot.lane.b32.xlu1 %v13009_v54, %s14369_s23  ;;  %13055 = vrot.lane.b32.xlu0 %v13004_v56, %s14369_s23 }
  0x6d   : > { %13070 = vrot.lane.b32.xlu1 %v13009_v54, %s14370_s24  ;;  %13065 = vrot.lane.b32.xlu0 %v13004_v56, %s14370_s24 }
  0x71   : > { %13080 = vrot.lane.b32.xlu1 %v13009_v54, %s14371_s25  ;;  %13075 = vrot.lane.b32.xlu0 %v13004_v56, %s14371_s25  ;;  %v2324_v54 = vcombine.low %v2314_v40, %v2321_v41  ;;  %v1877_v56 = vrot.slane %v1867_v42, %v14412_v6  ;;  %v11834_v40 = vld [vmem:[%s14410_s17 + $0x63] ss:$8 sm:$0x7] }
  0x72   : > { %v11835_v41 = vld [vmem:[%s14410_s17 + $0x93] ss:$8 sm:$0x7] }
  0x73   : > { %v2346_v62 = vrot.slane %v2324_v54, %v14412_v6  ;;  %v14633_v63 = vcombine.low %v1877_v56, %v1891_v59  ;;  %v14639_v2 = vcombine.high %v1877_v56, %v1891_v59  ;;  %v3067_v54 = vcombine.low %v11826_v28, %v11827_v29  ;;  %v11839_v59 = vld [vmem:[%s14410_s17 + $0x153] ss:$8 sm:$0x7] }
  0x74   : > { %v3068_v56 = vcombine.low %v11828_v30, %v11829_v33  ;;  %v3260_v18 = vcombine.low %v11834_v40, %v11835_v41  ;;  %v3262_v26 = vcombine.low %v11838_v58, %v11839_v59  ;;  %v3269_v33 = vrot.slane %v3259_v15, %v14412_v6 }
  0x75   : > { %1190 = vperm.xlu1 %13085, %v14578_v9   ;;  %1185 = vperm.xlu0 %13084, %v14583_v10   ;;  %21680 = vst [vmem:[#allocation9_spill] sm:$0xff] %v14633_v63  ;;  %21682 = vst [vmem:[#allocation11_spill] sm:$0xff] %v14639_v2  ;;  %v14641_v4 = vcombine.low %v2332_v61, %v2346_v62  ;;  %v13126_v5 = vpack.i.bf16 %v14637_v1, %v14633_v63  ;;  %v11864_v63 = vld [vmem:[%s14410_s17 + $0x124] ss:$8 sm:$0x7] }
  0x76   : > { %v14687_v34 = vcombine.high %v2332_v61, %v2346_v62  ;;  %v3083_v28 = vrot.slane %v3067_v54, %v14412_v6  ;;  %v3290_v38 = vrot.slane %v3262_v26, %v14412_v6 }
  0x77   : > { %21683 = vst [vmem:[#allocation12_spill] sm:$0xff] %v14641_v4  ;;  %v13131_v7 = vpack.i.bf16 %v14641_v4, %v14639_v2 }
  0x78   : > { %21684 = vst [vmem:[#allocation13_spill] sm:$0xff] %v14687_v34  ;;  %v13206_v60 = vpack.i.bf16 %v14687_v34, %v14689_v35  ;;  %v3098_v39 = vcombine.low %v3076_v27, %v3083_v28  ;;  %v3099_v40 = vcombine.high %v3076_v27, %v3083_v28 }
  0x79   : > { %1195 = vperm.xlu1 %13085, %v14604_v31   ;;  %1200 = vperm.xlu0 %13084, %v14609_v32  }
  0x7a   : > { %v3108_v58 = vrot.slane %v3098_v39, %v14412_v6  ;;  %v3115_v59 = vrot.slane %v3099_v40, %v14412_v6 }
  0x7d   : > { %13087 = vrot.lane.b32.xlu1 %v13086_v36, %s14365_s19  ;;  %13092 = vrot.lane.b32.xlu0 %v13086_v36, %s14364_s18 }
  0x81   : > { %13097 = vrot.lane.b32.xlu1 %v13086_v36, %s14366_s20  ;;  %13102 = vrot.lane.b32.xlu0 %v13086_v36, %s14367_s21 }
  0x85   : > { %13107 = vrot.lane.b32.xlu1 %v13086_v36, %s14368_s22  ;;  %13112 = vrot.lane.b32.xlu0 %v13086_v36, %s14369_s23 }
  0x89   : > { %13117 = vrot.lane.b32.xlu1 %v13086_v36, %s14370_s24  ;;  %13122 = vrot.lane.b32.xlu0 %v13086_v36, %s14371_s25  ;;  %v11830_v36 = vld [vmem:[%s14410_s17 + $0x122] ss:$8 sm:$0x7] }
  0x8a   : > { %v3069_v61 = vcombine.low %v11830_v36, %v11831_v37  ;;  %v3276_v36 = vrot.slane %v3260_v18, %v14412_v6  ;;  %v3283_v37 = vrot.slane %v3261_v19, %v14412_v6 }
  0x8c   : > { %v3291_v54 = vcombine.low %v3269_v33, %v3276_v36  ;;  %v3292_v18 = vcombine.high %v3269_v33, %v3276_v36  ;;  %v3294_v19 = vcombine.high %v3283_v37, %v3290_v38 }
  0x8d   : > { %13127 = vrot.lane.b32.xlu1 %v13126_v5, %s14365_s19  ;;  %13132 = vrot.lane.b32.xlu0 %v13131_v7, %s14365_s19 }
  0x8e   : > { %v3301_v28 = vrot.slane %v3291_v54, %v14412_v6  ;;  %v3308_v40 = vrot.slane %v3292_v18, %v14412_v6  ;;  %v3322_v33 = vrot.slane %v3294_v19, %v14412_v6  ;;  %v11861_v18 = vld [vmem:[%s14410_s17 + $0x94] ss:$8 sm:$0x7] }
  0x90   : > { %v14769_v54 = vcombine.low %v3308_v40, %v3322_v33 }
  0x91   : > { %13137 = vrot.lane.b32.xlu1 %v13126_v5, %s14364_s18  ;;  %13142 = vrot.lane.b32.xlu0 %v13131_v7, %s14364_s18 }
  0x92   : > { %21691 = vst [vmem:[#allocation20_spill] sm:$0xff] %v14769_v54 }
  0x95   : > { %13147 = vrot.lane.b32.xlu1 %v13126_v5, %s14366_s20  ;;  %13152 = vrot.lane.b32.xlu0 %v13131_v7, %s14366_s20 }
  0x97   : > { %v14655_v8 = vpop.permute.xlu1 %12895  ;;  %v14657_v11 = vpop.permute.xlu0 %12885 }
  0x99   : > { %13157 = vrot.lane.b32.xlu1 %v13126_v5, %s14367_s21  ;;  %13162 = vrot.lane.b32.xlu0 %v13131_v7, %s14367_s21 }
  0x9b   : > { %v14661_v12 = vpop.permute.xlu1 %12900  ;;  %v14663_v13 = vpop.permute.xlu0 %12890 }
  0x9d   : > { %13167 = vrot.lane.b32.xlu1 %v13126_v5, %s14368_s22  ;;  %13172 = vrot.lane.b32.xlu0 %v13131_v7, %s14368_s22 }
  0x9f   : > { %v14667_v16 = vpop.permute.xlu1 %12910  ;;  %v14669_v17 = vpop.permute.xlu0 %12905 }
  0xa1   : > { %13177 = vrot.lane.b32.xlu1 %v13126_v5, %s14369_s23  ;;  %13182 = vrot.lane.b32.xlu0 %v13131_v7, %s14369_s23 }
  0xa3   : > { %v14675_v22 = vpop.permute.xlu1 %12920  ;;  %v14677_v23 = vpop.permute.xlu0 %12915 }
  0xa5   : > { %13187 = vrot.lane.b32.xlu1 %v13126_v5, %s14370_s24  ;;  %13192 = vrot.lane.b32.xlu0 %v13131_v7, %s14370_s24 }
  0xa7   : > { %v14697_v42 = vpop.permute.xlu1 %12930  ;;  %v14699_v43 = vpop.permute.xlu0 %12925 }
  0xa9   : > { %13197 = vrot.lane.b32.xlu1 %v13126_v5, %s14371_s25  ;;  %13202 = vrot.lane.b32.xlu0 %v13131_v7, %s14371_s25  ;;  %v3090_v5 = vrot.slane %v3068_v56, %v14412_v6  ;;  %v3097_v7 = vrot.slane %v3069_v61, %v14412_v6  ;;  %v3293_v56 = vcombine.low %v3283_v37, %v3290_v38 }
  0xab   : > { %v14709_v62 = vpop.permute.xlu1 %12940  ;;  %v14711_v14 = vpop.permute.xlu0 %12935  ;;  %v3100_v41 = vcombine.low %v3090_v5, %v3097_v7  ;;  %v3101_v44 = vcombine.high %v3090_v5, %v3097_v7  ;;  %v3315_v5 = vrot.slane %v3293_v56, %v14412_v6 }
  0xad   : > { %13207 = vrot.lane.b32.xlu1 %v13206_v60, %s14365_s19  ;;  %13212 = vrot.lane.b32.xlu0 %v13206_v60, %s14364_s18  ;;  %v3122_v61 = vrot.slane %v3100_v41, %v14412_v6  ;;  %v3129_v15 = vrot.slane %v3101_v44, %v14412_v6  ;;  %v14759_v41 = vcombine.low %v3301_v28, %v3315_v5 }
  0xae   : > { %v14767_v44 = vcombine.high %v3301_v28, %v3315_v5 }
  0xaf   : > { %v14719_v29 = vpop.permute.xlu1 %12950  ;;  %v14721_v30 = vpop.permute.xlu0 %12945  ;;  %v14747_v7 = vcombine.low %v3108_v58, %v3122_v61  ;;  %v14749_v39 = vcombine.low %v3115_v59, %v3129_v15  ;;  %v14757_v38 = vcombine.high %v3108_v58, %v3122_v61  ;;  %21689 = vst [vmem:[#allocation18_spill] sm:$0xff] %v14759_v41  ;;  %v14783_v59 = vld [vmem:[%s14410_s17 + $0x34] ss:$8 sm:$0x7] }
  0xb0   : > { %21690 = vst [vmem:[#allocation19_spill] sm:$0xff] %v14767_v44  ;;  %v14789_v61 = vpack.i.bf16 %v14767_v44, %v14769_v54  ;;  %v14792_v15 = vld [vmem:[%s14410_s17 + $0x64] ss:$8 sm:$0x7] }
  0xb1   : > { %13217 = vrot.lane.b32.xlu1 %v13206_v60, %s14366_s20  ;;  %13222 = vrot.lane.b32.xlu0 %v13206_v60, %s14367_s21  ;;  %21686 = vst [vmem:[#allocation15_spill] sm:$0xff] %v14747_v7  ;;  %21687 = vst [vmem:[#allocation16_spill] sm:$0xff] %v14749_v39  ;;  %v14805_v54 = vld [vmem:[%s14410_s17 + $0xc4] ss:$8 sm:$0x7] }
  0xb2   : > { %21688 = vst [vmem:[#allocation17_spill] sm:$0xff] %v14757_v38 }
  0xb3   : > { %v14729_v45 = vpop.permute.xlu1 %12960  ;;  %v14731_v46 = vpop.permute.xlu0 %12955 }
  0xb4   : > { %v12963_v19 = vunpack.i.h.bf16 %v14729_v45 }
  0xb5   : > { %13227 = vrot.lane.b32.xlu1 %v13206_v60, %s14368_s22  ;;  %13232 = vrot.lane.b32.xlu0 %v13206_v60, %s14369_s23 }
  0xb7   : > { %v14739_v26 = vpop.permute.xlu1 %12970  ;;  %v14741_v27 = vpop.permute.xlu0 %12965 }
  0xb9   : > { %13237 = vrot.lane.b32.xlu1 %v13206_v60, %s14370_s24  ;;  %13242 = vrot.lane.b32.xlu0 %v13206_v60, %s14371_s25  ;;  %v14765_v60 = vpack.i.bf16 %v14749_v39, %v14747_v7 }
  0xbb   : > { %v14753_v36 = vpop.permute.xlu1 %12980  ;;  %v14755_v37 = vpop.permute.xlu0 %12975 }
  0xbc   : > { %v12983_v1 = vunpack.i.h.bf16 %v14753_v36 }
  0xbd   : > { %2612 = vperm.xlu1 %13085, %v14583_v10   ;;  %2617 = vperm.xlu0 %13084, %v14578_v9   ;;  %v14777_v10 = vpack.i.bf16 %v14759_v41, %v14757_v38  ;;  %v14780_v9 = vld [vmem:[%s14410_s17 + $0x4] ss:$8 sm:$0x7] }
  0xbf   : > { %v14771_v56 = vpop.permute.xlu1 %12990  ;;  %v14773_v58 = vpop.permute.xlu0 %12985 }
  0xc0   : > { %v12993_v3 = vunpack.i.h.bf16 %v14771_v56  ;;  %v12992_v41 = vunpack.i.l.bf16 %v14771_v56  ;;  %v12987_v7 = vunpack.i.l.bf16 %v14773_v58 }
  0xc1   : > { %2622 = vperm.xlu1 %13085, %v14604_v31   ;;  %2627 = vperm.xlu0 %13084, %v14609_v32   ;;  %v3714_v31 = vcombine.low %v14780_v9, %v14783_v59  ;;  %v14808_v9 = vld [vmem:[%s14410_s17 + $0xf4] ss:$8 sm:$0x7]  ;;  %v3715_v59 = vcombine.low %v14792_v15, %v11861_v18  ;;  %v12953_v18 = vunpack.i.h.bf16 %v14719_v29 }
  0xc2   : > { %v11865_v15 = vld [vmem:[%s14410_s17 + $0x154] ss:$8 sm:$0x7] }
  0xc3   : > { %v13001_v28 = vpop.permute.xlu1 %13000  ;;  %v12996_v5 = vpop.permute.xlu0 %12995  ;;  %v14846_v2 = vrot.slane %v3714_v31, %v14412_v6 }
  0xc4   : > { %v13002_v32 = vunpack.i.l.bf16 %v13001_v28  ;;  %v12998_v40 = vunpack.i.h.bf16 %v12996_v5  ;;  %v12997_v33 = vunpack.i.l.bf16 %v12996_v5  ;;  %v13003_v0 = vunpack.i.h.bf16 %v13001_v28 }
  0xc5   : > { %13247 = vrot.lane.b32.xlu1 %v14765_v60, %s14365_s19  ;;  %13252 = vrot.lane.b32.xlu0 %v14777_v10, %s14365_s19  ;;  %v12988_v28 = vunpack.i.h.bf16 %v14773_v58  ;;  %v3716_v58 = vcombine.low %v14805_v54, %v14808_v9 }
  0xc6   : > { %v576_v5 = vpack.c.bf16 %v13003_v0, %v13003_v0  ;;  %v558_v56 = vsel %vm355_vm4, %v13002_v32, %v13003_v0  ;;  %v557_v44 = vsel %vm355_vm4, %v12963_v19, %v13002_v32  ;;  %v547_v34 = vsel %vm343_vm1, %v12997_v33, %v12998_v40 }
  0xc7   : > { %v14815_v39 = vpop.permute.xlu1 %13010  ;;  %v14817_v38 = vpop.permute.xlu0 %13005  ;;  %v575_v4 = vpack.c.bf16 %v558_v56, %v558_v56  ;;  %v574_v35 = vpack.c.bf16 %v557_v44, %v557_v44  ;;  %v12982_v0 = vunpack.i.l.bf16 %v14753_v36  ;;  %v573_v32 = vpack.c.bf16 %v12998_v40, %v12993_v3 }
  0xc8   : > { %12840 = vmatprep.subr.msk.bf16.mxu1 %vm599_vm2, %v576_v5  ;;  %v607_v44 = vsel %vm599_vm2, %v576_v5, 0  ;;  %v536_v56 = vsel %vm331_vm3, %v12992_v41, %v12993_v3  ;;  %v12943_v36 = vunpack.i.h.bf16 %v14709_v62  ;;  %v546_v9 = vsel %vm343_vm1, %v12953_v18, %v12997_v33  ;;  %v14858_v18 = vld [vmem:[%s14410_s17 + $0x33] ss:$8 sm:$0x7] }
  0xc9   : > { %13257 = vrot.lane.b32.xlu1 %v14765_v60, %s14364_s18  ;;  %11677 = vmatprep.subr.msk.bf16.mxu0 %vm599_vm2, %v575_v4  ;;  %v601_v19 = vsel %vm599_vm2, %v574_v35, 0  ;;  %v572_v54 = vpack.c.bf16 %v547_v34, %v536_v56  ;;  %v3717_v4 = vcombine.low %v11864_v63, %v11865_v15  ;;  %v12978_v5 = vunpack.i.h.bf16 %v14755_v37  ;;  %v14855_v15 = vld [vmem:[%s14410_s17 + $0x3] ss:$8 sm:$0x7] }
  0xca   : > { %12505 = vmatpush3.bf16.msra.mxu1 %v607_v44  ;;  %13262 = vrot.lane.b32.xlu0 %v14777_v10, %s14364_s18  ;;  %v12977_v35 = vunpack.i.l.bf16 %v14755_v37  ;;  %v525_v44 = vsel %vm319_vm5, %v12987_v7, %v12988_v28  ;;  %v12933_v34 = vunpack.i.h.bf16 %v14697_v42  ;;  %v12973_v33 = vunpack.i.h.bf16 %v14739_v26 }
  0xcb   : > { %616 = vmatpush1.bf16.msra.mxu0 %v601_v19  ;;  %12506 = vmatprep.subr.bf16.mxu1 %v573_v32  ;;  %v14840_v3 = vpop.permute.xlu1 %13020  ;;  %v14842_v40 = vpop.permute.xlu0 %13015  ;;  %v535_v63 = vsel %vm331_vm3, %v12943_v36, %v12992_v41  ;;  %v14852_v37 = vrot.slane %v3715_v59, %v14412_v6  ;;  %v12972_v19 = vunpack.i.l.bf16 %v14739_v26  ;;  %v570_v56 = vpack.c.bf16 %v12988_v28, %v12983_v1 }
  0xcc   : > { %617 = vmatprep.subr.bf16.mxu0 %v572_v54  ;;  %v571_v31 = vpack.c.bf16 %v546_v9, %v535_v63  ;;  %v514_v25 = vsel %vm307_vm6, %v12982_v0, %v12983_v1  ;;  %v12923_v54 = vunpack.i.h.bf16 %v14675_v22  ;;  %v524_v59 = vsel %vm319_vm5, %v12933_v34, %v12987_v7  ;;  %v11911_v63 = vld [vmem:[%s14410_s17 + $0x63] ss:$8 sm:$0x7] }
  0xcd   : > { %13267 = vrot.lane.b32.xlu1 %v14765_v60, %s14366_s20  ;;  %v569_v41 = vpack.c.bf16 %v525_v44, %v514_v25  ;;  %v12968_v26 = vunpack.i.h.bf16 %v14741_v27  ;;  %v503_v1 = vsel %vm295_vm7, %v12977_v35, %v12978_v5  ;;  %v14875_v9 = vrot.slane %v3716_v58, %v14412_v6 }
  0xce   : > { %13272 = vrot.lane.b32.xlu0 %v14777_v10, %s14366_s20  ;;  %12507 = vmatpush3.bf16.msra.mxu1 %v573_v32  ;;  %v4490_v25 = vcombine.low %v14855_v15, %v14858_v18  ;;  %v12913_v7 = vunpack.i.h.bf16 %v14667_v16  ;;  %v513_v32 = vsel %vm307_vm6, %v12923_v54, %v12982_v0  ;;  %v14882_v44 = vrot.slane %v3717_v4, %v14412_v6  ;;  %v11913_v0 = vld [vmem:[%s14410_s17 + $0xc3] ss:$8 sm:$0x7] }
  0xcf   : > { %618 = vmatpush1.bf16.msra.mxu0 %v571_v31  ;;  %12508 = vmatprep.subr.bf16.mxu1 %v570_v56  ;;  %v14869_v36 = vpop.permute.xlu1 %13030  ;;  %v14871_v28 = vpop.permute.xlu0 %13025  ;;  %v11912_v31 = vld [vmem:[%s14410_s17 + $0x93] ss:$8 sm:$0x7]  ;;  %v12967_v58 = vunpack.i.l.bf16 %v14741_v27  ;;  %v568_v15 = vpack.c.bf16 %v524_v59, %v513_v32  ;;  %v567_v18 = vpack.c.bf16 %v12978_v5, %v12973_v33  ;;  %v12903_v4 = vunpack.i.h.bf16 %v14661_v12 }
  0xd0   : > { %619 = vmatprep.subr.bf16.mxu0 %v569_v41  ;;  %v492_v41 = vsel %vm283_vm8, %v12972_v19, %v12973_v33  ;;  %v11914_v54 = vld [vmem:[%s14410_s17 + $0xf3] ss:$8 sm:$0x7]  ;;  %v502_v50 = vsel %vm295_vm7, %v12913_v7, %v12977_v35  ;;  %v3747_v27 = vcombine.high %v14846_v2, %v14852_v37  ;;  %v12962_v5 = vunpack.i.l.bf16 %v14729_v45 }
  0xd1   : > { %13277 = vrot.lane.b32.xlu1 %v14765_v60, %s14367_s21  ;;  %v566_v34 = vpack.c.bf16 %v503_v1, %v492_v41  ;;  %v12958_v33 = vunpack.i.h.bf16 %v14731_v46  ;;  %v4491_v1 = vcombine.low %v11911_v63, %v11912_v31  ;;  %v12893_v35 = vunpack.i.h.bf16 %v14663_v13 }
  0xd2   : > { %13282 = vrot.lane.b32.xlu0 %v14777_v10, %s14367_s21  ;;  %12509 = vmatpush3.bf16.msra.mxu1 %v570_v56  ;;  %v481_v56 = vsel %vm271_vm9, %v12967_v58, %v12968_v26  ;;  %v12957_v7 = vunpack.i.l.bf16 %v14731_v46  ;;  %v491_v41 = vsel %vm283_vm8, %v12903_v4, %v12972_v19  ;;  %v4492_v52 = vcombine.low %v11913_v0, %v11914_v54 }
  0xd3   : > { %620 = vmatpush1.bf16.msra.mxu0 %v568_v15  ;;  %12510 = vmatprep.subr.bf16.mxu1 %v567_v18  ;;  %v14904_v59 = vpop.permute.xlu1 %13040  ;;  %v14906_v32 = vpop.permute.xlu0 %13035  ;;  %v565_v45 = vpack.c.bf16 %v502_v50, %v491_v41  ;;  %v564_v15 = vpack.c.bf16 %v12968_v26, %v14494_v20  ;;  %v563_v63 = vpack.c.bf16 %v481_v56, %v14496_v21  ;;  %v12952_v21 = vunpack.i.l.bf16 %v14719_v29 }
  0xd4   : > { %621 = vmatprep.subr.bf16.mxu0 %v566_v34  ;;  %v480_v31 = vsel %vm271_vm9, %v12893_v35, %v12967_v58  ;;  %v14920_v46 = vrot.slane %v4490_v25, %v14412_v6  ;;  %v357_v20 = vsel %vm355_vm4, %v12958_v33, %v12962_v5  ;;  %v3748_v51 = vcombine.low %v14875_v9, %v14882_v44 }
  0xd5   : > { %13287 = vrot.lane.b32.xlu1 %v14765_v60, %s14368_s22  ;;  %v3749_v24 = vcombine.high %v14875_v9, %v14882_v44  ;;  %v12948_v26 = vunpack.i.h.bf16 %v14721_v30  ;;  %v356_v25 = vsel %vm355_vm4, %v12957_v7, %v12958_v33  ;;  %v14935_v34 = vrot.slane %v4491_v1, %v14412_v6  ;;  %v14943_v9 = vld [vmem:[%s21388_s1 + $0x18] sm:$0xff]  }
  0xd6   : > { %13292 = vrot.lane.b32.xlu0 %v14777_v10, %s14368_s22  ;;  %12511 = vmatpush3.bf16.msra.mxu1 %v567_v18  ;;  %v375_v58 = vpack.c.bf16 %v12962_v5, %v12962_v5  ;;  %v562_v18 = vpack.c.bf16 %v480_v31, %v14458_v55  ;;  %v14946_v29 = vrot.slane %v4492_v52, %v14412_v6  ;;  %v12942_v0 = vunpack.i.l.bf16 %v14709_v62 }
  0xd7   : > { %622 = vmatpush1.bf16.msra.mxu0 %v565_v45  ;;  %12512 = vmatprep.subr.bf16.mxu1 %v564_v15  ;;  %v14922_v19 = vpop.permute.xlu1 %13050  ;;  %v14924_v50 = vpop.permute.xlu0 %13045  ;;  %v14949_v44 = vrot.slane %v4493_v47, %v14412_v6  ;;  %v12938_v54 = vunpack.i.h.bf16 %v14711_v14  ;;  %v374_v55 = vpack.c.bf16 %v357_v20, %v357_v20  ;;  %v21692_v4 = vcombine.low %v14846_v2, %v14852_v37 }
  0xd8   : > { %623 = vmatprep.subr.bf16.mxu0 %v563_v63  ;;  %v12937_v52 = vunpack.i.l.bf16 %v14711_v14  ;;  %v12947_v47 = vunpack.i.l.bf16 %v14721_v30  ;;  %v373_v56 = vpack.c.bf16 %v356_v25, %v356_v25  ;;  %v3763_v1 = vrot.slane %v3747_v27, %v14412_v6  ;;  %v15001_v25 = vld [vmem:[%s21388_s1] sm:$0xff]  }
  0xd9   : > { %13297 = vrot.lane.b32.xlu1 %v14765_v60, %s14369_s23  ;;  %v14959_v5 = vrot.slane %v21692_v4, %v14412_v6  ;;  %v12932_v35 = vunpack.i.l.bf16 %v14697_v42  ;;  %v12928_v2 = vunpack.i.h.bf16 %v14699_v43  ;;  %v345_v14 = vsel %vm343_vm1, %v12948_v26, %v12952_v21 }
  0xda   : > { %13302 = vrot.lane.b32.xlu0 %v14777_v10, %s14369_s23  ;;  %12513 = vmatpush3.bf16.msra.mxu1 %v564_v15  ;;  %v4522_v30 = vcombine.low %v14920_v46, %v14935_v34  ;;  %v12922_v37 = vunpack.i.l.bf16 %v14675_v22  ;;  %v734_v27 = vsel %vm599_vm2, %v375_v58, 0  ;;  %v372_v42 = vpack.c.bf16 %v12952_v21, %v12942_v0 }
  0xdb   : > { %624 = vmatpush1.bf16.msra.mxu0 %v562_v18  ;;  %12841 = vmatprep.subr.msk.bf16.mxu1 %vm599_vm2, %v375_v58  ;;  %v14964_v62 = vpop.permute.xlu1 %13060  ;;  %v14966_v33 = vpop.permute.xlu0 %13055  ;;  %v4524_v7 = vcombine.low %v14946_v29, %v14949_v44  ;;  %v12918_v41 = vunpack.i.h.bf16 %v14677_v23  ;;  %v12917_v45 = vunpack.i.l.bf16 %v14677_v23  ;;  %v12927_v15 = vunpack.i.l.bf16 %v14699_v43 }
  0xdc   : > { %11684 = vmatprep.subr.msk.bf16.mxu0 %vm599_vm2, %v374_v55  ;;  %v333_v22 = vsel %vm331_vm3, %v12938_v54, %v12942_v0  ;;  %v332_v63 = vsel %vm331_vm3, %v12937_v52, %v12938_v54  ;;  %v344_v31 = vsel %vm343_vm1, %v12947_v47, %v12948_v26  ;;  %v728_v20 = vsel %vm599_vm2, %v373_v56, 0 }
  0xdd   : > { %13307 = vrot.lane.b32.xlu1 %v14765_v60, %s14370_s24  ;;  %12515 = vmatmul.mubr.msk.bf16.vlgmr.msra.gmra.mxu1 %vm592_vm0, %v14943_v9  ;;  %v371_v43 = vpack.c.bf16 %v345_v14, %v333_v22  ;;  %v12912_v58 = vunpack.i.l.bf16 %v14667_v16  ;;  %v12908_v26 = vunpack.i.h.bf16 %v14669_v17  ;;  %v21693_v18 = vmov 0  }
  0xde   : > { %13312 = vrot.lane.b32.xlu0 %v14777_v10, %s14370_s24  ;;  %12519 = vmatpush3.bf16.msra.mxu1 %v734_v27  ;;  %v3770_v0 = vrot.slane %v3748_v51, %v14412_v6  ;;  %v369_v54 = vpack.c.bf16 %v12932_v35, %v12922_v37  ;;  %v3777_v55 = vrot.slane %v3749_v24, %v14412_v6  ;;  %v12902_v16 = vunpack.i.l.bf16 %v14661_v12 }
  0xdf   : > { %11678 = vmatmul.mubr.msk.bf16.vlgmr.msra.gmra.mxu0 %vm592_vm0, %v14550_v57  ;;  %12520 = vmatprep.subr.bf16.mxu1 %v372_v42  ;;  %v14994_v21 = vpop.permute.xlu1 %13070  ;;  %v14996_v23 = vpop.permute.xlu0 %13065  ;;  %v321_v57 = vsel %vm319_vm5, %v12928_v2, %v12932_v35  ;;  %v15012_v4 = vrot.slane %v4522_v30, %v14412_v6  ;;  %v370_v52 = vpack.c.bf16 %v344_v31, %v332_v63  ;;  %v12898_v12 = vunpack.i.h.bf16 %v14655_v8 }
  0xe0   : > { %743 = vmatpush1.bf16.msra.mxu0 %v728_v20  ;;  %651 = vmatprep.mubr.bf16.mxu0 %v21693_v18  ;;  %v309_v47 = vsel %vm307_vm6, %v12918_v41, %v12922_v37  ;;  %v15019_v51 = vrot.slane %v4524_v7, %v14412_v6  ;;  %v308_v56 = vsel %vm307_vm6, %v12917_v45, %v12918_v41  ;;  %v12892_v14 = vunpack.i.l.bf16 %v14663_v13 }
  0xe1   : > { %744 = vmatprep.subr.bf16.mxu0 %v371_v43  ;;  %13317 = vrot.lane.b32.xlu1 %v14765_v60, %s14371_s25  ;;  %v12907_v60 = vunpack.i.l.bf16 %v14669_v17  ;;  %v320_v24 = vsel %vm319_vm5, %v12927_v15, %v12928_v2  ;;  %v368_v35 = vpack.c.bf16 %v321_v57, %v309_v47  ;;  %v297_v30 = vsel %vm295_vm7, %v12908_v26, %v12912_v58 }
  0xe2   : > { %13322 = vrot.lane.b32.xlu0 %v14777_v10, %s14371_s25  ;;  %12521 = vmatpush3.bf16.msra.mxu1 %v372_v42  ;;  %v12888_v10 = vunpack.i.h.bf16 %v14657_v11  ;;  %v12897_v17 = vunpack.i.l.bf16 %v14655_v8  ;;  %v366_v2 = vpack.c.bf16 %v12912_v58, %v12902_v16  ;;  %v15036_v42 = vcombine.low %v14959_v5, %v3770_v0 }
  0xe3   : > { %12522 = vmatprep.subr.bf16.mxu1 %v369_v54  ;;  %12528 = vmatprep.mubr.msk.bf16.mxu1 %vm592_vm0, %v15001_v25  ;;  %v15031_v37 = vpop.permute.xlu1 %13080  ;;  %v13076_v27 = vpop.permute.xlu0 %13075  ;;  %v15038_v7 = vcombine.low %v3763_v1, %v3777_v55  ;;  %v367_v13 = vpack.c.bf16 %v320_v24, %v308_v56  ;;  %v285_v8 = vsel %vm283_vm8, %v12898_v12, %v12902_v16  ;;  %v12887_v45 = vunpack.i.l.bf16 %v14657_v11  ;;  %v15087_v56 = vld [vmem:[%s21388_s1 + $0x8] sm:$0xff]  }
  0xe4   : > { %745 = vmatpush1.bf16.msra.mxu0 %v370_v52  ;;  %21694 = vst [vmem:[#allocation21_spill] sm:$0xff] %v15036_v42  ;;  %v15044_v41 = vcombine.high %v14959_v5, %v3770_v0  ;;  %v296_v15 = vsel %vm295_vm7, %v12907_v60, %v12908_v26  ;;  %v365_v22 = vpack.c.bf16 %v297_v30, %v285_v8  ;;  %v13082_v63 = vunpack.i.l.bf16 %v15031_v37  ;;  %v15108_v8 = vld [vmem:[%s14410_s17 + $0x4] ss:$8 sm:$0x7] }
  0xe5   : > { %746 = vmatprep.subr.bf16.mxu0 %v368_v35  ;;  %13327 = vrot.lane.b32.xlu1 %v14789_v61, %s14365_s19  ;;  %21695 = vst [vmem:[#allocation22_spill] sm:$0xff] %v15038_v7  ;;  %v15052_v1 = vcombine.low %v15012_v4, %v15019_v51  ;;  %v13078_v31 = vunpack.i.h.bf16 %v13076_v27  ;;  %v13077_v20 = vunpack.i.l.bf16 %v13076_v27  ;;  %v273_v5 = vsel %vm271_vm9, %v12888_v10, %v12892_v14 }
  0xe6   : > { %13332 = vrot.lane.b32.xlu0 %v14789_v61, %s14364_s18  ;;  %12523 = vmatpush3.bf16.msra.mxu1 %v369_v54  ;;  %21696 = vst [vmem:[#allocation23_spill] sm:$0xff] %v15044_v41  ;;  %v284_v11 = vsel %vm283_vm8, %v12897_v17, %v12898_v12  ;;  %v15065_v58 = vpack.i.bf16 %v15038_v7, %v15036_v42  ;;  %v13068_v54 = vunpack.i.h.bf16 %v14996_v23  ;;  %v13058_v47 = vunpack.i.h.bf16 %v14966_v33 }
  0xe7   : > { %12524 = vmatprep.subr.bf16.mxu1 %v366_v2  ;;  %11679 = vmatmul.mubr.msk.bf16.gmra.mxu0 %vm592_vm0, %v14943_v9  ;;  %21697 = vst [vmem:[#allocation24_spill] sm:$0xff] %v15052_v1  ;;  %v363_v9 = vpack.c.bf16 %v12892_v14, %v14451_v53  ;;  %v364_v43 = vpack.c.bf16 %v296_v15, %v284_v11  ;;  %v13072_v53 = vunpack.i.l.bf16 %v14994_v21  ;;  %v13057_v24 = vunpack.i.l.bf16 %v14966_v33 }
  0xe8   : > { %747 = vmatpush1.bf16.msra.mxu0 %v367_v13  ;;  %768 = vmatprep.mubr.bf16.mxu0 %v21693_v18  ;;  %v272_v26 = vsel %vm271_vm9, %v12887_v45, %v12888_v10  ;;  %v362_v57 = vpack.c.bf16 %v273_v5, %v14444_v49  ;;  %v15071_v0 = vpack.i.bf16 %v15052_v1, %v15044_v41  ;;  %v13062_v49 = vunpack.i.l.bf16 %v14964_v62  ;;  %v15134_v5 = vld [vmem:[%s14410_s17 + $0x94] ss:$8 sm:$0x7] }
  0xe9   : > { %748 = vmatprep.subr.bf16.mxu0 %v365_v22  ;;  %13337 = vrot.lane.b32.xlu1 %v14789_v61, %s14366_s20  ;;  %v1016_v55 = vsel %vm355_vm4, %v13078_v31, %v13082_v63  ;;  %v1015_v16 = vsel %vm355_vm4, %v13077_v20, %v13078_v31  ;;  %v1034_v52 = vpack.c.bf16 %v13082_v63, %v13082_v63  ;;  %v13067_v35 = vunpack.i.l.bf16 %v14996_v23  ;;  %v15118_v63 = vld [vmem:[%s14410_s17 + $0x34] ss:$8 sm:$0x7] }
  0xea   : > { %13342 = vrot.lane.b32.xlu0 %v14789_v61, %s14367_s21  ;;  %12525 = vmatpush3.bf16.msra.mxu1 %v366_v2  ;;  %v361_v60 = vpack.c.bf16 %v272_v26, %v14442_v48  ;;  %v1033_v12 = vpack.c.bf16 %v1016_v55, %v1016_v55  ;;  %v1032_v10 = vpack.c.bf16 %v1015_v16, %v1015_v16  ;;  %v13052_v14 = vunpack.i.l.bf16 %v14922_v19  ;;  %v15128_v31 = vld [vmem:[%s21388_s1 + $0x20] sm:$0xff]  }
  0xeb   : > { %12526 = vmatprep.subr.bf16.mxu1 %v363_v9  ;;  %v13048_v30 = vunpack.i.h.bf16 %v14924_v50  ;;  %v1005_v27 = vsel %vm343_vm1, %v13068_v54, %v13072_v53  ;;  %v13042_v33 = vunpack.i.l.bf16 %v14904_v59  ;;  %v13038_v23 = vunpack.i.h.bf16 %v14906_v32  ;;  %v15131_v20 = vld [vmem:[%s14410_s17 + $0x64] ss:$8 sm:$0x7] }
  0xec   : > { %749 = vmatpush1.bf16.msra.mxu0 %v364_v43  ;;  %v13037_v2 = vunpack.i.l.bf16 %v14906_v32  ;;  %v4523_v13 = vcombine.high %v14920_v46, %v14935_v34  ;;  %v13047_v45 = vunpack.i.l.bf16 %v14924_v50  ;;  %v1063_v32 = vsel %vm599_vm2, %v1034_v52, 0 }
  0xed   : > { %750 = vmatprep.subr.bf16.mxu0 %v362_v57  ;;  %13347 = vrot.lane.b32.xlu1 %v14789_v61, %s14368_s22  ;;  %v1031_v15 = vpack.c.bf16 %v13072_v53, %v13062_v49  ;;  %v994_v22 = vsel %vm331_vm3, %v13058_v47, %v13062_v49  ;;  %v993_v46 = vsel %vm331_vm3, %v13057_v24, %v13058_v47  ;;  %v13032_v11 = vunpack.i.l.bf16 %v14869_v36  ;;  %v15146_v53 = vld [vmem:[%s14410_s17 + $0xc4] ss:$8 sm:$0x7] }
  0xee   : > { %13352 = vrot.lane.b32.xlu0 %v14789_v61, %s14369_s23  ;;  %12527 = vmatpush3.bf16.msra.mxu1 %v363_v9  ;;  %v1004_v34 = vsel %vm343_vm1, %v13067_v35, %v13068_v54  ;;  %v1030_v50 = vpack.c.bf16 %v1005_v27, %v994_v22  ;;  %v13028_v9 = vunpack.i.h.bf16 %v14871_v28  ;;  %v983_v26 = vsel %vm319_vm5, %v13048_v30, %v13052_v14  ;;  %v15149_v54 = vld [vmem:[%s14410_s17 + $0xf4] ss:$8 sm:$0x7]  ;;  %v11943_v27 = vld [vmem:[%s14410_s17 + $0x5] ss:$8 sm:$0x7] }
  0xef   : > { %12842 = vmatprep.subr.msk.bf16.mxu1 %vm599_vm2, %v1034_v52  ;;  %v13022_v55 = vunpack.i.l.bf16 %v14840_v3  ;;  %v13018_v16 = vunpack.i.h.bf16 %v14842_v40  ;;  %v15156_v52 = vrot.slane %v4523_v13, %v14412_v6  ;;  %v15159_v49 = vld [vmem:[%s14410_s17 + $0x124] ss:$8 sm:$0x7]  ;;  %v13017_v24 = vunpack.i.l.bf16 %v14842_v40  ;;  %v11944_v13 = vld [vmem:[%s14410_s17 + $0x35] ss:$8 sm:$0x7] }
  0xf0   : > { %751 = vmatpush1.bf16.msra.mxu0 %v361_v60  ;;  %v15094_v48 = vpop.permute.xlu1 %1190  ;;  %v15096_v17 = vpop.permute.xlu0 %1185  ;;  %v15162_v47 = vld [vmem:[%s14410_s17 + $0x154] ss:$8 sm:$0x7]  ;;  %v4683_v60 = vcombine.low %v15108_v8, %v15118_v63  ;;  %v1029_v35 = vpack.c.bf16 %v1004_v34, %v993_v46  ;;  %v971_v22 = vsel %vm307_vm6, %v13037_v2, %v13038_v23  ;;  %v982_v8 = vsel %vm319_vm5, %v13047_v45, %v13048_v30  ;;  %v11947_v45 = vld [vmem:[%s14410_s17 + $0xc5] ss:$8 sm:$0x7] }
  0xf1   : > { %21698 = vst [vmem:[#allocation25_spill] sm:$0xff] %v15094_v48  ;;  %21699 = vst [vmem:[#allocation26_spill] sm:$0xff] %v15096_v17  ;;  %11703 = vmatprep.subr.msk.bf16.mxu0 %vm599_vm2, %v1033_v12  ;;  %13357 = vrot.lane.b32.xlu1 %v14789_v61, %s14370_s24  ;;  %v1028_v12 = vpack.c.bf16 %v13052_v14, %v13042_v33  ;;  %v11945_v14 = vld [vmem:[%s14410_s17 + $0x65] ss:$8 sm:$0x7]  ;;  %v13012_v63 = vunpack.i.l.bf16 %v14815_v39  ;;  %v13008_v46 = vunpack.i.h.bf16 %v14817_v38  ;;  %v13007_v57 = vunpack.i.l.bf16 %v14817_v38 }
  0xf2   : > { %13362 = vrot.lane.b32.xlu0 %v14789_v61, %s14371_s25  ;;  %12529 = vmatmul.mubr.msk.bf16.vlgmr.msra.gmra.mxu1 %vm592_vm0, %v15087_v56  ;;  %v1057_v61 = vsel %vm599_vm2, %v1032_v10, 0  ;;  %v972_v10 = vsel %vm307_vm6, %v13038_v23, %v13042_v33  ;;  %v11946_v33 = vld [vmem:[%s14410_s17 + $0x95] ss:$8 sm:$0x7]  ;;  %v961_v30 = vsel %vm295_vm7, %v13028_v9, %v13032_v11  ;;  %v4684_v2 = vcombine.low %v15131_v20, %v15134_v5 }
  0xf3   : > { %12533 = vmatpush3.bf16.msra.mxu1 %v1063_v32  ;;  %11685 = vmatmul.mubr.msk.bf16.vlgmr.msra.gmra.mxu0 %vm592_vm0, %v15001_v25  ;;  %v13027_v32 = vunpack.i.l.bf16 %v14871_v28  ;;  %v1027_v40 = vpack.c.bf16 %v983_v26, %v972_v10  ;;  %v4685_v34 = vcombine.low %v15146_v53, %v15149_v54  ;;  %v11950_v26 = vld [vmem:[%s14410_s17 + $0x155] ss:$8 sm:$0x7]  ;;  %v1026_v10 = vpack.c.bf16 %v982_v8, %v971_v22 }
  0xf4   : > { %1072 = vmatpush1.bf16.msra.mxu0 %v1057_v61  ;;  %12534 = vmatprep.subr.bf16.mxu1 %v1031_v15  ;;  %v15138_v25 = vpop.permute.xlu1 %1195  ;;  %v15140_v43 = vpop.permute.xlu0 %1200  ;;  %v4686_v61 = vcombine.low %v15159_v49, %v15162_v47  ;;  %v1025_v20 = vpack.c.bf16 %v13032_v11, %v13022_v55  ;;  %v950_v5 = vsel %vm283_vm8, %v13018_v16, %v13022_v55  ;;  %v21704_v8 = vld [vmem:[#allocation6_spill] sm:$0xff] }
  0xf5   : > { %21700 = vst [vmem:[#allocation27_spill] sm:$0xff] %v15138_v25  ;;  %21701 = vst [vmem:[#allocation28_spill] sm:$0xff] %v15140_v43  ;;  %1073 = vmatprep.subr.bf16.mxu0 %v1030_v50  ;;  %13367 = vrot.lane.b32.xlu1 %v15065_v58, %s14365_s19  ;;  %v11949_v50 = vld [vmem:[%s14410_s17 + $0x125] ss:$8 sm:$0x7]  ;;  %v949_v43 = vsel %vm283_vm8, %v13017_v24, %v13018_v16  ;;  %v960_v53 = vsel %vm295_vm7, %v13027_v32, %v13028_v9 }
  0xf6   : > { %13372 = vrot.lane.b32.xlu0 %v15071_v0, %s14365_s19  ;;  %778 = vmatprep.mubr.bf16.mxu0 %v21693_v18  ;;  %v1024_v54 = vpack.c.bf16 %v961_v30, %v950_v5  ;;  %v939_v11 = vsel %vm271_vm9, %v13008_v46, %v13012_v63  ;;  %v21702_v38 = vcombine.high %v14946_v29, %v14949_v44  ;;  %v11995_v5 = vld [vmem:[%s14410_s17 + $0x34] ss:$8 sm:$0x7] }
  0xf7   : > { %12535 = vmatpush3.bf16.msra.mxu1 %v1031_v15  ;;  %12542 = vmatprep.mubr.msk.bf16.mxu1 %vm592_vm0, %v15128_v31  ;;  %v11948_v15 = vld [vmem:[%s14410_s17 + $0xf5] ss:$8 sm:$0x7]  ;;  %v4700_v16 = vrot.slane %v4684_v2, %v14412_v6  ;;  %v1023_v24 = vpack.c.bf16 %v960_v53, %v949_v43  ;;  %v4707_v32 = vrot.slane %v4685_v34, %v14412_v6  ;;  %v15252_v2 = vld [vmem:[%s21388_s1 + $0x28] sm:$0xff]  }
  0xf8   : > { %1074 = vmatpush1.bf16.msra.mxu0 %v1029_v35  ;;  %12536 = vmatprep.subr.bf16.mxu1 %v1028_v12  ;;  %v15182_v28 = vpop.permute.xlu1 %13087  ;;  %v15184_v23 = vpop.permute.xlu0 %13092  ;;  %v5138_v35 = vcombine.low %v11943_v27, %v11944_v13  ;;  %v5140_v55 = vcombine.low %v11947_v45, %v11948_v15  ;;  %v5141_v27 = vcombine.low %v11949_v50, %v11950_v26  ;;  %v11997_v53 = vld [vmem:[%s14410_s17 + $0x94] ss:$8 sm:$0x7] }
  0xf9   : > { %1075 = vmatprep.subr.bf16.mxu0 %v1027_v40  ;;  %13377 = vrot.lane.b32.xlu1 %v15065_v58, %s14364_s18  ;;  %v5139_v40 = vcombine.low %v11945_v14, %v11946_v33  ;;  %v4553_v9 = vrot.slane %v21702_v38, %v14412_v6  ;;  %v938_v22 = vsel %vm271_vm9, %v13007_v57, %v13008_v46  ;;  %v21705_v46 = vld [vmem:[#allocation5_spill] sm:$0xff]  ;;  %v12002_v38 = vld [vmem:[%s14410_s17 + $0x5] ss:$8 sm:$0x7] }
  0xfa   : > { %13382 = vrot.lane.b32.xlu0 %v15071_v0, %s14364_s18  ;;  %v1021_v29 = vpack.c.bf16 %v939_v11, %v21704_v8  ;;  %v4714_v44 = vrot.slane %v4686_v61, %v14412_v6  ;;  %v15242_v57 = vrot.slane %v5141_v27, %v14412_v6  ;;  %v1020_v30 = vpack.c.bf16 %v938_v22, %v21705_v46  ;;  %v11999_v11 = vld [vmem:[%s14410_s17 + $0xf4] ss:$8 sm:$0x7]  ;;  %v12009_v46 = vld [vmem:[%s14410_s17 + $0x155] ss:$8 sm:$0x7] }
  0xfb   : > { %12537 = vmatpush3.bf16.msra.mxu1 %v1028_v12  ;;  %11686 = vmatmul.mubr.msk.bf16.gmra.mxu0 %vm592_vm0, %v15087_v56  ;;  %v4693_v56 = vrot.slane %v4683_v60, %v14412_v6  ;;  %v21703_v12 = vld [vmem:[#allocation3_spill] sm:$0xff]  ;;  %v15229_v60 = vrot.slane %v5138_v35, %v14412_v6  ;;  %v15236_v33 = vrot.slane %v5139_v40, %v14412_v6  ;;  %v15264_v35 = vld [vmem:[%s21388_s1 + $0x10] sm:$0xff]  }
  0xfc   : > { %1076 = vmatpush1.bf16.msra.mxu0 %v1026_v10  ;;  %12538 = vmatprep.subr.bf16.mxu1 %v1025_v20  ;;  %v15207_v49 = vpop.permute.xlu1 %13097  ;;  %v15209_v47 = vpop.permute.xlu0 %13102  ;;  %v1022_v13 = vpack.c.bf16 %v13012_v63, %v21703_v12  ;;  %v15239_v63 = vrot.slane %v5140_v55, %v14412_v6  ;;  %v15256_v45 = vcombine.high %v15012_v4, %v15019_v51  ;;  %v11996_v40 = vld [vmem:[%s14410_s17 + $0x64] ss:$8 sm:$0x7] }
  0xfd   : > { %1077 = vmatprep.subr.bf16.mxu0 %v1024_v54  ;;  %13387 = vrot.lane.b32.xlu1 %v15065_v58, %s14366_s20  ;;  %v15259_v15 = vcombine.low %v15156_v52, %v4553_v9  ;;  %v4715_v34 = vcombine.low %v4693_v56, %v4700_v16  ;;  %v4716_v61 = vcombine.high %v4693_v56, %v4700_v16  ;;  %v11998_v54 = vld [vmem:[%s14410_s17 + $0xc4] ss:$8 sm:$0x7]  ;;  %v12003_v9 = vld [vmem:[%s14410_s17 + $0x35] ss:$8 sm:$0x7] }
  0xfe   : > { %13392 = vrot.lane.b32.xlu0 %v15071_v0, %s14366_s20  ;;  %1097 = vmatprep.mubr.bf16.mxu0 %v21693_v18  ;;  %21706 = vst [vmem:[#allocation3_spill] sm:$0xff] %v15256_v45  ;;  %v4717_v50 = vcombine.low %v4707_v32, %v4714_v44  ;;  %v4718_v26 = vcombine.high %v4707_v32, %v4714_v44  ;;  %v12000_v55 = vld [vmem:[%s14410_s17 + $0x124] ss:$8 sm:$0x7] }
  0xff   : > { %12539 = vmatpush3.bf16.msra.mxu1 %v1025_v20  ;;  %21707 = vst [vmem:[#allocation6_spill] sm:$0xff] %v15259_v15  ;;  %v5170_v52 = vcombine.low %v15229_v60, %v15236_v33  ;;  %v5172_v10 = vcombine.low %v15239_v63, %v15242_v57  ;;  %v11994_v20 = vld [vmem:[%s14410_s17 + $0x4] ss:$8 sm:$0x7]  ;;  %v4725_v12 = vrot.slane %v4715_v34, %v14412_v6 }
 0x100   : > { %1078 = vmatpush1.bf16.msra.mxu0 %v1023_v24  ;;  %12540 = vmatprep.subr.bf16.mxu1 %v1022_v13  ;;  %v15231_v14 = vpop.permute.xlu1 %13107  ;;  %v15233_v43 = vpop.permute.xlu0 %13112  ;;  %v12001_v27 = vld [vmem:[%s14410_s17 + $0x154] ss:$8 sm:$0x7]  ;;  %v12004_v56 = vld [vmem:[%s14410_s17 + $0x65] ss:$8 sm:$0x7]  ;;  %v15294_v24 = vpack.i.bf16 %v15256_v45, %v15259_v15  ;;  %v4732_v22 = vrot.slane %v4716_v61, %v14412_v6  ;;  %v4739_v8 = vrot.slane %v4717_v50, %v14412_v6 }
 0x101   : > { %1079 = vmatprep.subr.bf16.mxu0 %v1021_v29  ;;  %13397 = vrot.lane.b32.xlu1 %v15065_v58, %s14367_s21  ;;  %v12005_v16 = vld [vmem:[%s14410_s17 + $0x95] ss:$8 sm:$0x7]  ;;  %v4746_v29 = vrot.slane %v4718_v26, %v14412_v6  ;;  %v5180_v34 = vrot.slane %v5170_v52, %v14412_v6  ;;  %v5914_v61 = vcombine.low %v11994_v20, %v11995_v5 }
 0x102   : > { %13402 = vrot.lane.b32.xlu0 %v15071_v0, %s14367_s21  ;;  %v12007_v32 = vld [vmem:[%s14410_s17 + $0xf5] ss:$8 sm:$0x7]  ;;  %v5915_v50 = vcombine.low %v11996_v40, %v11997_v53  ;;  %v5916_v26 = vcombine.low %v11998_v54, %v11999_v11  ;;  %v5917_v48 = vcombine.low %v12000_v55, %v12001_v27  ;;  %v6107_v17 = vcombine.low %v12002_v38, %v12003_v9 }
 0x103   : > { %12541 = vmatpush3.bf16.msra.mxu1 %v1022_v13  ;;  %v12006_v13 = vld [vmem:[%s14410_s17 + $0xc5] ss:$8 sm:$0x7]  ;;  %v6108_v1 = vcombine.low %v12004_v56, %v12005_v16  ;;  %v15319_v42 = vcombine.low %v4725_v12, %v4739_v8  ;;  %v15321_v7 = vcombine.low %v4732_v22, %v4746_v29  ;;  %v15327_v41 = vcombine.high %v4725_v12, %v4739_v8 }
 0x104   : > { %1080 = vmatpush1.bf16.msra.mxu0 %v1020_v30  ;;  %v15266_v4 = vpop.permute.xlu1 %13117  ;;  %v15268_v51 = vpop.permute.xlu0 %13122  ;;  %v12008_v44 = vld [vmem:[%s14410_s17 + $0x125] ss:$8 sm:$0x7]  ;;  %v6109_v15 = vcombine.low %v12006_v13, %v12007_v32  ;;  %v5171_v5 = vcombine.high %v15229_v60, %v15236_v33  ;;  %v5173_v40 = vcombine.high %v15239_v63, %v15242_v57  ;;  %v5924_v53 = vrot.slane %v5914_v61, %v14412_v6 }
 0x105   : > { %13407 = vrot.lane.b32.xlu1 %v15065_v58, %s14368_s22  ;;  %v6110_v45 = vcombine.low %v12008_v44, %v12009_v46  ;;  %21708 = vst [vmem:[#allocation5_spill] sm:$0xff] %v15319_v42  ;;  %21709 = vst [vmem:[#allocation29_spill] sm:$0xff] %v15321_v7  ;;  %v5931_v54 = vrot.slane %v5915_v50, %v14412_v6  ;;  %v5938_v11 = vrot.slane %v5916_v26, %v14412_v6  ;;  %v15375_v56 = vld [vmem:[%s21389_s2] sm:$0xff]  ;;  %v15388_v13 = vld [vmem:[%s21389_s2 + $0x8] sm:$0xff] }
 0x106   : > { %12543 = vmatmul.mubr.msk.bf16.vlgmr.msra.gmra.mxu1 %vm592_vm0, %v15252_v2  ;;  %13412 = vrot.lane.b32.xlu0 %v15071_v0, %s14368_s22  ;;  %21711 = vst [vmem:[#allocation31_spill] sm:$0xff] %v15327_v41  ;;  %v5945_v55 = vrot.slane %v5917_v48, %v14412_v6  ;;  %v15344_v27 = vrot.slane %v6107_v17, %v14412_v6  ;;  %21714 = vst [vmem:[#allocation34_spill] sm:$0xff] %v15375_v56  ;;  %v15407_v50 = vld [vmem:[%s21389_s2 + $0x10] sm:$0xff]  ;;  %v13013_v26 = vunpack.i.h.bf16 %v14815_v39 }
 0x107   : > { %11704 = vmatmul.mubr.msk.bf16.vlgmr.msra.gmra.mxu0 %vm592_vm0, %v15128_v31  ;;  %12556 = vmatprep.mubr.msk.bf16.mxu1 %vm592_vm0, %v15264_v35  ;;  %v5194_v31 = vrot.slane %v5172_v10, %v14412_v6  ;;  %v15347_v60 = vrot.slane %v6108_v1, %v14412_v6  ;;  %v15350_v33 = vrot.slane %v6109_v15, %v14412_v6 }
 0x108   : > { %v15308_v30 = vpop.permute.xlu1 %13127  ;;  %v15310_v25 = vpop.permute.xlu0 %13132  ;;  %1107 = vmatprep.mubr.bf16.mxu0 %v21693_v18  ;;  %v15353_v63 = vrot.slane %v6110_v45, %v14412_v6  ;;  %v15359_v48 = vpack.i.bf16 %v15321_v7, %v15319_v42  ;;  %v5187_v1 = vrot.slane %v5171_v5, %v14412_v6  ;;  %v5201_v15 = vrot.slane %v5173_v40, %v14412_v6  ;;  %v15420_v40 = vld [vmem:[%s21389_s2 + $0x18] sm:$0xff] }
 0x109   : > { %13417 = vrot.lane.b32.xlu1 %v15065_v58, %s14369_s23  ;;  %v15329_v20 = vcombine.low %v5180_v34, %v5194_v31  ;;  %v5946_v45 = vcombine.low %v5924_v53, %v5931_v54  ;;  %v5947_v38 = vcombine.high %v5924_v53, %v5931_v54  ;;  %v5949_v9 = vcombine.high %v5938_v11, %v5945_v55 }
 0x10a   : > { %13422 = vrot.lane.b32.xlu0 %v15071_v0, %s14369_s23  ;;  %v6139_v12 = vcombine.low %v15344_v27, %v15347_v60  ;;  %21715 = vst [vmem:[#allocation35_spill] sm:$0xff] %v15388_v13  ;;  %v15394_v22 = vcombine.high %v5180_v34, %v5194_v31  ;;  %v15396_v8 = vcombine.low %v5187_v1, %v5201_v15  ;;  %21718 = vst [vmem:[#allocation38_spill] sm:$0xff] %v15407_v50 }
 0x10b   : > { %21712 = vst [vmem:[#allocation32_spill] sm:$0xff] %v15329_v20  ;;  %v15379_v16 = vpack.i.bf16 %v15329_v20, %v15327_v41  ;;  %v5956_v29 = vrot.slane %v5946_v45, %v14412_v6  ;;  %v5963_v44 = vrot.slane %v5947_v38, %v14412_v6  ;;  %v5977_v61 = vrot.slane %v5949_v9, %v14412_v6 }
 0x10c   : > { %v15323_v52 = vpop.permute.xlu1 %13137  ;;  %v15325_v10 = vpop.permute.xlu0 %13142  ;;  %21716 = vst [vmem:[#allocation36_spill] sm:$0xff] %v15394_v22  ;;  %21717 = vst [vmem:[#allocation37_spill] sm:$0xff] %v15396_v8  ;;  %v15410_v34 = vrot.slane %v6139_v12, %v14412_v6  ;;  %v13023_v5 = vunpack.i.h.bf16 %v14840_v3  ;;  %v13033_v53 = vunpack.i.h.bf16 %v14869_v36  ;;  %v13043_v54 = vunpack.i.h.bf16 %v14904_v59 }
 0x10d   : > { %21710 = vst [vmem:[#allocation30_spill] sm:$0xff] %v15325_v10  ;;  %13427 = vrot.lane.b32.xlu1 %v15065_v58, %s14370_s24  ;;  %21719 = vst [vmem:[#allocation39_spill] sm:$0xff] %v15420_v40  ;;  %v15430_v1 = vpack.i.bf16 %v15394_v22, %v15396_v8  ;;  %v15435_v3 = vcombine.low %v5963_v44, %v5977_v61  ;;  %v13089_v45 = vunpack.i.l.bf16 %v15182_v28  ;;  %v13090_v9 = vunpack.i.h.bf16 %v15182_v28 }
 0x10e   : > { %13432 = vrot.lane.b32.xlu0 %v15071_v0, %s14370_s24  ;;  %v13099_v20 = vunpack.i.l.bf16 %v15207_v49 }
 0x10f   : > { %11705 = vmatmul.mubr.msk.bf16.gmra.mxu0 %vm592_vm0, %v15252_v2  ;;  %v5948_v2 = vcombine.low %v5938_v11, %v5945_v55  ;;  %21720 = vst [vmem:[#allocation40_spill] sm:$0xff] %v15430_v1  ;;  %21722 = vst [vmem:[#allocation42_spill] sm:$0xff] %v15435_v3  ;;  %v15474_v59 = vsel %vm271_vm9, %v13089_v45, %v13090_v9 }
 0x110   : > { %v15361_v57 = vpop.permute.xlu1 %13147  ;;  %v15363_v17 = vpop.permute.xlu0 %13152  ;;  %2069 = vmatprep.mubr.bf16.mxu0 %v21693_v18  ;;  %21729 = vst [vmem:[#allocation49_spill] sm:$0xff] %v15474_v59  ;;  %v15508_v22 = vsel %vm295_vm7, %v13033_v53, %v13099_v20 }
 0x111   : > { %21713 = vst [vmem:[#allocation33_spill] sm:$0xff] %v15363_v17  ;;  %13437 = vrot.lane.b32.xlu1 %v15065_v58, %s14371_s25  ;;  %v6141_v58 = vcombine.low %v15350_v33, %v15353_v63  ;;  %v5970_v46 = vrot.slane %v5948_v2, %v14412_v6  ;;  %v15469_v2 = vsel %vm271_vm9, %v13013_v26, %v13089_v45  ;;  %v13104_v45 = vunpack.i.l.bf16 %v15209_v47 }
 0x112   : > { %13442 = vrot.lane.b32.xlu0 %v15071_v0, %s14371_s25  ;;  %21727 = vst [vmem:[#allocation47_spill] sm:$0xff] %v15469_v2 }
 0x113   : > { %v15413_v31 = vrot.slane %v6141_v58, %v14412_v6  ;;  %v15433_v39 = vcombine.low %v5956_v29, %v5970_v46  ;;  %v15438_v15 = vcombine.high %v5956_v29, %v5970_v46  ;;  %v13094_v46 = vunpack.i.l.bf16 %v15184_v23 }
 0x114   : > { %v15390_v0 = vpop.permute.xlu1 %13157  ;;  %v15392_v32 = vpop.permute.xlu0 %13162 }
 0x115   : > { %4036 = vperm.xlu1 %13085, %v15375_v56   ;;  %21721 = vst [vmem:[#allocation41_spill] sm:$0xff] %v15433_v39  ;;  %21723 = vst [vmem:[#allocation43_spill] sm:$0xff] %v15438_v15  ;;  %v15442_v36 = vcombine.low %v15410_v34, %v15413_v31  ;;  %v15460_v61 = vpack.i.bf16 %v15435_v3, %v15433_v39  ;;  %v15477_v44 = vsel %vm283_vm8, %v13023_v5, %v13094_v46 }
 0x116   : > { %4041 = vperm.xlu0 %13084, %v15388_v13   ;;  %v21730_v39 = vunpack.i.h.bf16 %v15184_v23  ;;  %v13160_v53 = vunpack.i.h.bf16 %v15390_v0 }
 0x117   : > { %21724 = vst [vmem:[#allocation44_spill] sm:$0xff] %v15442_v36  ;;  %21725 = vst [vmem:[#allocation45_spill] sm:$0xff] %v15460_v61  ;;  %v15466_v28 = vpack.i.bf16 %v15442_v36, %v15438_v15  ;;  %v21731_v15 = vld [vmem:[#allocation7_spill] sm:$0xff]  ;;  %v13100_v36 = vunpack.i.h.bf16 %v15207_v49 }
 0x118   : > { %v15424_v11 = vpop.permute.xlu1 %13167  ;;  %v15426_v55 = vpop.permute.xlu0 %13172  ;;  %v15484_v3 = vsel %vm283_vm8, %v13094_v46, %v21730_v39  ;;  %v15487_v26 = vpack.c.bf16 %v13090_v9, %v21731_v15  ;;  %v15511_v15 = vsel %vm307_vm6, %v13043_v54, %v13104_v45 }
 0x119   : > { %4046 = vperm.xlu1 %13085, %v15407_v50   ;;  %21726 = vst [vmem:[#allocation46_spill] sm:$0xff] %v15466_v28  ;;  %v13170_v50 = vunpack.i.h.bf16 %v15424_v11  ;;  %v13174_v13 = vunpack.i.l.bf16 %v15426_v55 }
 0x11a   : > { %4051 = vperm.xlu0 %13084, %v15420_v40   ;;  %21732 = vst [vmem:[#allocation7_spill] sm:$0xff] %v15487_v26  ;;  %v13169_v26 = vunpack.i.l.bf16 %v15424_v11 }
 0x11c   : > { %v15449_v12 = vpop.permute.xlu1 %13177  ;;  %v15451_v58 = vpop.permute.xlu0 %13182 }
 0x11d   : > { %13447 = vrot.lane.b32.xlu1 %v15294_v24, %s14365_s19  ;;  %v13180_v9 = vunpack.i.h.bf16 %v15449_v12  ;;  %v13184_v49 = vunpack.i.l.bf16 %v15451_v58  ;;  %v13179_v2 = vunpack.i.l.bf16 %v15449_v12 }
 0x11e   : > { %13452 = vrot.lane.b32.xlu0 %v15294_v24, %s14364_s18 }
 0x120   : > { %v13188_v29 = vpop.permute.xlu1 %13187  ;;  %v15471_v38 = vpop.permute.xlu0 %13192 }
 0x121   : > { %21728 = vst [vmem:[#allocation48_spill] sm:$0xff] %v15471_v38  ;;  %13457 = vrot.lane.b32.xlu1 %v15294_v24, %s14366_s20  ;;  %v13190_v42 = vunpack.i.h.bf16 %v13188_v29  ;;  %v13194_v39 = vunpack.i.l.bf16 %v15471_v38  ;;  %v13189_v28 = vunpack.i.l.bf16 %v13188_v29  ;;  %v13164_v38 = vunpack.i.l.bf16 %v15392_v32 }
 0x122   : > { %13462 = vrot.lane.b32.xlu0 %v15294_v24, %s14367_s21 }
 0x123   : > { %v1978_v5 = vsel %vm343_vm1, %v13190_v42, %v13194_v39 }
 0x124   : > { %v13198_v7 = vpop.permute.xlu1 %13197  ;;  %v15502_v41 = vpop.permute.xlu0 %13202 }
 0x125   : > { %v13200_v61 = vunpack.i.h.bf16 %v13198_v7  ;;  %v13199_v40 = vunpack.i.l.bf16 %v13198_v7  ;;  %v13204_v8 = vunpack.i.l.bf16 %v15502_v41  ;;  %13467 = vrot.lane.b32.xlu1 %v15294_v24, %s14368_s22 }
 0x126   : > { %13472 = vrot.lane.b32.xlu0 %v15294_v24, %s14369_s23 }
 0x127   : > { %v2007_v29 = vpack.c.bf16 %v13204_v8, %v13204_v8  ;;  %v1989_v7 = vsel %vm355_vm4, %v13200_v61, %v13204_v8  ;;  %v1988_v56 = vsel %vm355_vm4, %v13199_v40, %v13200_v61  ;;  %v1977_v8 = vsel %vm343_vm1, %v13189_v28, %v13190_v42 }
 0x128   : > { %v15522_v54 = vpop.permute.xlu1 %13207  ;;  %v15524_v1 = vpop.permute.xlu0 %13212  ;;  %v2006_v46 = vpack.c.bf16 %v1989_v7, %v1989_v7  ;;  %v2005_v59 = vpack.c.bf16 %v1988_v56, %v1988_v56  ;;  %v1967_v40 = vsel %vm331_vm3, %v13180_v9, %v13184_v49  ;;  %v2004_v61 = vpack.c.bf16 %v13194_v39, %v13184_v49 }
 0x129   : > { %21735 = vst [vmem:[#allocation50_spill] sm:$0xff] %v15522_v54  ;;  %21736 = vst [vmem:[#allocation51_spill] sm:$0xff] %v15524_v1  ;;  %13477 = vrot.lane.b32.xlu1 %v15294_v24, %s14370_s24  ;;  %12843 = vmatprep.subr.msk.bf16.mxu1 %vm599_vm2, %v2007_v29  ;;  %v2035_v56 = vsel %vm599_vm2, %v2007_v29, 0  ;;  %v2003_v11 = vpack.c.bf16 %v1978_v5, %v1967_v40  ;;  %v13150_v42 = vunpack.i.h.bf16 %v15361_v57  ;;  %v13154_v28 = vunpack.i.l.bf16 %v15363_v17  ;;  %v12034_v54 = vld [vmem:[%s14410_s17 + $0x126] ss:$8 sm:$0x7] }
 0x12a   : > { %13482 = vrot.lane.b32.xlu0 %v15294_v24, %s14371_s25  ;;  %11761 = vmatprep.subr.msk.bf16.mxu0 %vm599_vm2, %v2006_v46  ;;  %v2029_v12 = vsel %vm599_vm2, %v2005_v59, 0  ;;  %v1956_v7 = vsel %vm319_vm5, %v13170_v50, %v13174_v13  ;;  %v21737_v1 = vunpack.i.h.bf16 %v15209_v47  ;;  %v13159_v46 = vunpack.i.l.bf16 %v15390_v0 }
 0x12b   : > { %12547 = vmatpush3.bf16.msra.mxu1 %v2035_v56  ;;  %2044 = vmatpush1.bf16.msra.mxu0 %v2029_v12  ;;  %v1966_v29 = vsel %vm331_vm3, %v13179_v2, %v13180_v9  ;;  %v21739_v39 = vunpack.i.h.bf16 %v15184_v23  ;;  %v15557_v40 = vsel %vm295_vm7, %v13099_v20, %v13100_v36  ;;  %v1945_v2 = vsel %vm307_vm6, %v13160_v53, %v13164_v38 }
 0x12c   : > { %v15544_v24 = vsel %vm307_vm6, %v13104_v45, %v21737_v1  ;;  %12548 = vmatprep.subr.bf16.mxu1 %v2004_v61  ;;  %v15548_v59 = vpop.permute.xlu1 %13217  ;;  %v15550_v5 = vpop.permute.xlu0 %13222  ;;  %2045 = vmatprep.subr.bf16.mxu0 %v2003_v11  ;;  %v13140_v1 = vunpack.i.h.bf16 %v15323_v52  ;;  %v13144_v45 = vunpack.i.l.bf16 %v15325_v10  ;;  %v2002_v0 = vpack.c.bf16 %v1977_v8, %v1966_v29  ;;  %v12029_v29 = vld [vmem:[%s14410_s17 + $0x36] ss:$8 sm:$0x7] }
 0x12d   : > { %21738 = vst [vmem:[#allocation52_spill] sm:$0xff] %v15548_v59  ;;  %v15554_v49 = vpack.c.bf16 %v13100_v36, %v21739_v39  ;;  %13487 = vrot.lane.b32.xlu1 %v15359_v48, %s14365_s19  ;;  %v13149_v9 = vunpack.i.l.bf16 %v15361_v57  ;;  %v1955_v56 = vsel %vm319_vm5, %v13169_v26, %v13170_v50  ;;  %v2001_v23 = vpack.c.bf16 %v13174_v13, %v13164_v38  ;;  %v12033_v50 = vld [vmem:[%s14410_s17 + $0xf6] ss:$8 sm:$0x7] }
 0x12e   : > { %13492 = vrot.lane.b32.xlu0 %v15379_v16, %s14365_s19  ;;  %v2000_v20 = vpack.c.bf16 %v1956_v7, %v1945_v2  ;;  %v13130_v36 = vunpack.i.h.bf16 %v15308_v30  ;;  %v13134_v12 = vunpack.i.l.bf16 %v15310_v25  ;;  %v1934_v8 = vsel %vm295_vm7, %v13150_v42, %v13154_v28  ;;  %v12028_v7 = vld [vmem:[%s14410_s17 + $0x6] ss:$8 sm:$0x7] }
 0x12f   : > { %12549 = vmatpush3.bf16.msra.mxu1 %v2004_v61  ;;  %2046 = vmatpush1.bf16.msra.mxu0 %v2002_v0  ;;  %v13139_v13 = vunpack.i.l.bf16 %v15323_v52  ;;  %v1944_v38 = vsel %vm307_vm6, %v13159_v46, %v13160_v53  ;;  %v13129_v0 = vunpack.i.l.bf16 %v15308_v30  ;;  %v1923_v53 = vsel %vm283_vm8, %v13140_v1, %v13144_v45  ;;  %v12030_v46 = vld [vmem:[%s14410_s17 + $0x66] ss:$8 sm:$0x7] }
 0x130   : > { %12550 = vmatprep.subr.bf16.mxu1 %v2001_v23  ;;  %v15576_v26 = vpop.permute.xlu1 %13227  ;;  %v15578_v11 = vpop.permute.xlu0 %13232  ;;  %2047 = vmatprep.subr.bf16.mxu0 %v2000_v20  ;;  %v1999_v52 = vpack.c.bf16 %v1955_v56, %v1944_v38  ;;  %v12031_v2 = vld [vmem:[%s14410_s17 + $0x96] ss:$8 sm:$0x7]  ;;  %v13114_v20 = vunpack.i.l.bf16 %v15233_v43  ;;  %v1933_v57 = vsel %vm295_vm7, %v13149_v9, %v13150_v42  ;;  %v1998_v61 = vpack.c.bf16 %v13154_v28, %v13144_v45 }
 0x131   : > { %13497 = vrot.lane.b32.xlu1 %v15359_v48, %s14364_s18  ;;  %v1997_v39 = vpack.c.bf16 %v1934_v8, %v1923_v53  ;;  %v12032_v30 = vld [vmem:[%s14410_s17 + $0xc6] ss:$8 sm:$0x7]  ;;  %v13125_v17 = vunpack.i.h.bf16 %v15268_v51  ;;  %v13124_v56 = vunpack.i.l.bf16 %v15268_v51  ;;  %v1912_v38 = vsel %vm271_vm9, %v13130_v36, %v13134_v12 }
 0x132   : > { %13502 = vrot.lane.b32.xlu0 %v15379_v16, %s14364_s18  ;;  %v12035_v42 = vld [vmem:[%s14410_s17 + $0x156] ss:$8 sm:$0x7]  ;;  %v13110_v9 = vunpack.i.h.bf16 %v15231_v14  ;;  %v1922_v28 = vsel %vm283_vm8, %v13139_v13, %v13140_v1  ;;  %v6562_v51 = vcombine.low %v12028_v7, %v12029_v29  ;;  %v21741_v53 = vunpack.i.h.bf16 %v14922_v19  ;;  %v21742_v7 = vld [vmem:[#allocation11_spill] sm:$0xff] }
 0x133   : > { %12551 = vmatpush3.bf16.msra.mxu1 %v2001_v23  ;;  %2048 = vmatpush1.bf16.msra.mxu0 %v1999_v52  ;;  %v6563_v23 = vcombine.low %v12030_v46, %v12031_v2  ;;  %v21740_v52 = vunpack.i.l.bf16 %v15231_v14  ;;  %v1911_v59 = vsel %vm271_vm9, %v13129_v0, %v13130_v36  ;;  %v1996_v1 = vpack.c.bf16 %v1933_v57, %v1922_v28  ;;  %v21743_v19 = vld [vmem:[#allocation10_spill] sm:$0xff] }
 0x134   : > { %12552 = vmatprep.subr.bf16.mxu1 %v1998_v61  ;;  %v15606_v45 = vpop.permute.xlu1 %13237  ;;  %v15608_v8 = vpop.permute.xlu0 %13242  ;;  %2049 = vmatprep.subr.bf16.mxu0 %v1997_v39  ;;  %v6142_v13 = vcombine.high %v15350_v33, %v15353_v63  ;;  %v1995_v29 = vpack.c.bf16 %v13134_v12, %v21742_v7  ;;  %v1994_v39 = vpack.c.bf16 %v1912_v38, %v21743_v19  ;;  %v13119_v0 = vunpack.i.l.bf16 %v15266_v4  ;;  %v15639_v57 = vld [vmem:[%s14410_s17 + $0x5] ss:$8 sm:$0x7] }
 0x135   : > { %v15615_v10 = vsel %vm319_vm5, %v21741_v53, %v21740_v52  ;;  %13507 = vrot.lane.b32.xlu1 %v15359_v48, %s14366_s20  ;;  %v6564_v46 = vcombine.low %v12032_v30, %v12033_v50  ;;  %v6565_v2 = vcombine.low %v12034_v54, %v12035_v42  ;;  %v21744_v52 = vunpack.i.h.bf16 %v14964_v62  ;;  %v15642_v54 = vld [vmem:[%s14410_s17 + $0x35] ss:$8 sm:$0x7] }
 0x136   : > { %13512 = vrot.lane.b32.xlu0 %v15379_v16, %s14366_s20  ;;  %v1796_v33 = vsel %vm355_vm4, %v13124_v56, %v13125_v17  ;;  %v21745_v63 = vunpack.i.h.bf16 %v15233_v43  ;;  %v13120_v62 = vunpack.i.h.bf16 %v15266_v4  ;;  %v15652_v30 = vld [vmem:[%s21388_s1 + $0x18] sm:$0xff]   ;;  %v15658_v42 = vrot.slane %v6562_v51, %v14412_v6  ;;  %v12081_v28 = vld [vmem:[%s14410_s17 + $0x65] ss:$8 sm:$0x7] }
 0x137   : > { %v15629_v36 = vsel %vm331_vm3, %v21744_v52, %v13114_v20  ;;  %12553 = vmatpush3.bf16.msra.mxu1 %v1998_v61  ;;  %2050 = vmatpush1.bf16.msra.mxu0 %v1996_v1  ;;  %v6579_v4 = vrot.slane %v6563_v23, %v14412_v6  ;;  %v12082_v53 = vld [vmem:[%s14410_s17 + $0x95] ss:$8 sm:$0x7]  ;;  %v21750_v19 = vunpack.i.h.bf16 %v15209_v47  ;;  %v21752_v51 = vcombine.high %v15344_v27, %v15347_v60 }
 0x138   : > { %v15636_v12 = vsel %vm331_vm3, %v13114_v20, %v21745_v63  ;;  %12554 = vmatprep.subr.bf16.mxu1 %v1995_v29  ;;  %v15645_v50 = vpop.permute.xlu1 %2612  ;;  %v15647_v61 = vpop.permute.xlu0 %2617  ;;  %2051 = vmatprep.subr.bf16.mxu0 %v1994_v39  ;;  %v21748_v20 = vunpack.i.h.bf16 %v15031_v37  ;;  %v21749_v1 = vld [vmem:[#allocation9_spill] sm:$0xff]  ;;  %v21751_v37 = vunpack.i.l.bf16 %v15231_v14  ;;  %v12083_v52 = vld [vmem:[%s14410_s17 + $0xc5] ss:$8 sm:$0x7]  ;;  %v6586_v47 = vrot.slane %v6564_v46, %v14412_v6 }
 0x139   : > { %21746 = vst [vmem:[#allocation11_spill] sm:$0xff] %v15645_v50  ;;  %21747 = vst [vmem:[#allocation10_spill] sm:$0xff] %v15647_v61  ;;  %13517 = vrot.lane.b32.xlu1 %v15359_v48, %s14367_s21  ;;  %v1993_v7 = vpack.c.bf16 %v1911_v59, %v21749_v1  ;;  %v15668_v39 = vpack.c.bf16 %v13110_v9, %v21750_v19  ;;  %v6156_v23 = vrot.slane %v21752_v51, %v14412_v6  ;;  %v12084_v63 = vld [vmem:[%s14410_s17 + $0xf5] ss:$8 sm:$0x7] }
 0x13a   : > { %v1795_v38 = vsel %vm355_vm4, %v21748_v20, %v13124_v56  ;;  %v15673_v56 = vsel %vm319_vm5, %v21751_v37, %v13110_v9  ;;  %v1814_v20 = vpack.c.bf16 %v13125_v17, %v13125_v17  ;;  %13522 = vrot.lane.b32.xlu0 %v15379_v16, %s14367_s21  ;;  %v1813_v59 = vpack.c.bf16 %v1796_v33, %v1796_v33  ;;  %v12085_v14 = vld [vmem:[%s14410_s17 + $0x125] ss:$8 sm:$0x7] }
 0x13b   : > { %v6593_v1 = vrot.slane %v6565_v2, %v14412_v6  ;;  %v12086_v19 = vld [vmem:[%s14410_s17 + $0x155] ss:$8 sm:$0x7]  ;;  %v21753_v9 = vunpack.i.h.bf16 %v14994_v21  ;;  %12555 = vmatpush3.bf16.msra.mxu1 %v1995_v29  ;;  %2052 = vmatpush1.bf16.msra.mxu0 %v1993_v7  ;;  %v1812_v27 = vpack.c.bf16 %v1795_v38, %v1795_v38  ;;  %v6170_v60 = vrot.slane %v6142_v13, %v14412_v6 }
 0x13c   : > { %12844 = vmatprep.subr.msk.bf16.mxu1 %vm599_vm2, %v1814_v20  ;;  %v15692_v17 = vpop.permute.xlu1 %2622  ;;  %v15694_v33 = vpop.permute.xlu0 %2627  ;;  %11768 = vmatprep.subr.msk.bf16.mxu0 %vm599_vm2, %v1813_v59  ;;  %v1785_v46 = vsel %vm343_vm1, %v13119_v0, %v13120_v62  ;;  %v6594_v2 = vcombine.low %v15658_v42, %v6579_v4  ;;  %v7338_v21 = vcombine.low %v15639_v57, %v15642_v54  ;;  %v21756_v13 = vunpack.i.h.bf16 %v15233_v43  ;;  %v21780_v50 = vld [vmem:[#allocation30_spill] sm:$0xff] }
 0x13d   : > { %v1784_v37 = vsel %vm343_vm1, %v21753_v9, %v13119_v0  ;;  %21754 = vst [vmem:[#allocation9_spill] sm:$0xff] %v15692_v17  ;;  %21755 = vst [vmem:[#allocation53_spill] sm:$0xff] %v15694_v33  ;;  %13527 = vrot.lane.b32.xlu1 %v15359_v48, %s14368_s22  ;;  %v7339_v38 = vcombine.low %v12081_v28, %v12082_v53  ;;  %v7340_v7 = vcombine.low %v12083_v52, %v12084_v63  ;;  %v15718_v28 = vld [vmem:[%s21388_s1] sm:$0xff]  }
 0x13e   : > { %v1811_v29 = vpack.c.bf16 %v13120_v62, %v21756_v13  ;;  %v7341_v51 = vcombine.low %v12085_v14, %v12086_v19  ;;  %13532 = vrot.lane.b32.xlu0 %v15379_v16, %s14368_s22  ;;  %12557 = vmatmul.mubr.msk.bf16.vlgmr.msra.gmra.mxu1 %vm592_vm0, %v15652_v30  ;;  %v2162_v0 = vsel %vm599_vm2, %v1814_v20, 0  ;;  %v6595_v59 = vcombine.high %v15658_v42, %v6579_v4  ;;  %v12087_v14 = vld [vmem:[%s14410_s17 + $0x6] ss:$8 sm:$0x7] }
 0x13f   : > { %v6596_v57 = vcombine.low %v6586_v47, %v6593_v1  ;;  %v6597_v54 = vcombine.high %v6586_v47, %v6593_v1  ;;  %12561 = vmatpush3.bf16.msra.mxu1 %v2162_v0  ;;  %11762 = vmatmul.mubr.msk.bf16.vlgmr.msra.gmra.mxu0 %vm592_vm0, %v15264_v35  ;;  %v2156_v43 = vsel %vm599_vm2, %v1812_v27, 0  ;;  %v1810_v62 = vpack.c.bf16 %v1785_v46, %v15636_v12  ;;  %v12088_v19 = vld [vmem:[%s14410_s17 + $0x36] ss:$8 sm:$0x7] }
 0x140   : > { %v15722_v53 = vcombine.high %v15410_v34, %v15413_v31  ;;  %v15724_v42 = vcombine.low %v6156_v23, %v6170_v60  ;;  %2171 = vmatpush1.bf16.msra.mxu0 %v2156_v43  ;;  %12562 = vmatprep.subr.bf16.mxu1 %v1811_v29  ;;  %v15726_v4 = vpop.permute.xlu1 %13247  ;;  %v15728_v35 = vpop.permute.xlu0 %13252  ;;  %v1809_v52 = vpack.c.bf16 %v1784_v37, %v15629_v36  ;;  %v12090_v60 = vld [vmem:[%s14410_s17 + $0x96] ss:$8 sm:$0x7]  ;;  %v13244_v0 = vunpack.i.l.bf16 %v15608_v8 }
 0x141   : > { %v6604_v12 = vrot.slane %v6594_v2, %v14412_v6  ;;  %v15733_v63 = vrot.slane %v7338_v21, %v14412_v6  ;;  %2172 = vmatprep.subr.bf16.mxu0 %v1810_v62  ;;  %13537 = vrot.lane.b32.xlu1 %v15359_v48, %s14369_s23  ;;  %v15738_v34 = vrot.slane %v7339_v38, %v14412_v6  ;;  %v12091_v13 = vld [vmem:[%s14410_s17 + $0xc6] ss:$8 sm:$0x7] }
 0x142   : > { %21757 = vst [vmem:[#allocation54_spill] sm:$0xff] %v15722_v53  ;;  %21758 = vst [vmem:[#allocation55_spill] sm:$0xff] %v15724_v42  ;;  %v15741_v31 = vrot.slane %v7340_v7, %v14412_v6  ;;  %v15744_v23 = vrot.slane %v7341_v51, %v14412_v6  ;;  %13542 = vrot.lane.b32.xlu0 %v15379_v16, %s14369_s23  ;;  %2079 = vmatprep.mubr.bf16.mxu0 %v21693_v18  ;;  %v13245_v51 = vunpack.i.h.bf16 %v15608_v8  ;;  %v15902_v43 = vld [vmem:[%s21388_s1 + $0x20] sm:$0xff]  }
 0x143   : > { %v6611_v36 = vrot.slane %v6595_v59, %v14412_v6  ;;  %v6618_v20 = vrot.slane %v6596_v57, %v14412_v6  ;;  %v6625_v47 = vrot.slane %v6597_v54, %v14412_v6  ;;  %12563 = vmatpush3.bf16.msra.mxu1 %v1811_v29  ;;  %v1807_v1 = vpack.c.bf16 %v15673_v56, %v15544_v24  ;;  %v12089_v56 = vld [vmem:[%s14410_s17 + $0x66] ss:$8 sm:$0x7] }
 0x144   : > { %12570 = vmatprep.mubr.msk.bf16.mxu1 %vm592_vm0, %v15718_v28  ;;  %2173 = vmatpush1.bf16.msra.mxu0 %v1809_v52  ;;  %v15759_v9 = vpop.permute.xlu1 %13257  ;;  %v15761_v37 = vpop.permute.xlu0 %13262  ;;  %v1806_v27 = vpack.c.bf16 %v15615_v10, %v15511_v15  ;;  %v15767_v24 = vpack.i.bf16 %v15722_v53, %v15724_v42  ;;  %v7370_v46 = vcombine.low %v15733_v63, %v15738_v34  ;;  %v12092_v29 = vld [vmem:[%s14410_s17 + $0xf6] ss:$8 sm:$0x7] }
 0x145   : > { %12564 = vmatprep.subr.bf16.mxu1 %v15668_v39  ;;  %2174 = vmatprep.subr.bf16.mxu0 %v1807_v1  ;;  %v7372_v2 = vcombine.low %v15741_v31, %v15744_v23  ;;  %v15779_v10 = vcombine.low %v6604_v12, %v6618_v20  ;;  %v15781_v15 = vcombine.low %v6611_v36, %v6625_v47  ;;  %v12093_v54 = vld [vmem:[%s14410_s17 + $0x126] ss:$8 sm:$0x7]  ;;  %v13205_v47 = vunpack.i.h.bf16 %v15502_v41 }
 0x146   : > { %13547 = vrot.lane.b32.xlu1 %v15359_v48, %s14370_s24  ;;  %13552 = vrot.lane.b32.xlu0 %v15379_v16, %s14370_s24  ;;  %v7531_v38 = vcombine.low %v12087_v14, %v12088_v19  ;;  %v7532_v7 = vcombine.low %v12089_v56, %v12090_v60  ;;  %v21761_v62 = vpack.c.bf16 %v15557_v40, %v15484_v3  ;;  %v13239_v19 = vunpack.i.l.bf16 %v15606_v45 }
 0x147   : > { %21759 = vst [vmem:[#allocation56_spill] sm:$0xff] %v15779_v10  ;;  %21760 = vst [vmem:[#allocation57_spill] sm:$0xff] %v15781_v15  ;;  %12565 = vmatpush3.bf16.msra.mxu1 %v15668_v39  ;;  %11763 = vmatmul.mubr.msk.bf16.gmra.mxu0 %vm592_vm0, %v15652_v30  ;;  %v12094_v39 = vld [vmem:[%s14410_s17 + $0x156] ss:$8 sm:$0x7]  ;;  %v15806_v8 = vrot.slane %v7370_v46, %v14412_v6  ;;  %v15809_v52 = vrot.slane %v7372_v2, %v14412_v6 }
 0x148   : > { %2175 = vmatpush1.bf16.msra.mxu0 %v1806_v27  ;;  %12566 = vmatprep.subr.bf16.mxu1 %v15554_v49  ;;  %v15792_v59 = vpop.permute.xlu1 %13267  ;;  %v15794_v57 = vpop.permute.xlu0 %13272  ;;  %v15818_v3 = vpack.i.bf16 %v15781_v15, %v15779_v10  ;;  %v7533_v40 = vcombine.low %v12091_v13, %v12092_v29  ;;  %v7534_v1 = vcombine.low %v12093_v54, %v12094_v39  ;;  %v21766_v46 = vld [vmem:[#allocation48_spill] sm:$0xff]  ;;  %v21767_v13 = vld [vmem:[#allocation49_spill] sm:$0xff]  ;;  %v21779_v10 = vunpack.i.h.bf16 %v15451_v58 }
 0x149   : > { %2176 = vmatprep.subr.bf16.mxu0 %v21761_v62  ;;  %2196 = vmatprep.mubr.bf16.mxu0 %v21693_v18  ;;  %v15824_v14 = vrot.slane %v7531_v38, %v14412_v6  ;;  %v15827_v41 = vrot.slane %v7532_v7, %v14412_v6  ;;  %v21764_v27 = vpack.c.bf16 %v15508_v22, %v15477_v44  ;;  %v13195_v2 = vunpack.i.h.bf16 %v21766_v46  ;;  %v21768_v29 = vld [vmem:[#allocation8_spill] sm:$0xff]  ;;  %v21772_v46 = vld [vmem:[#allocation47_spill] sm:$0xff] }
 0x14a   : > { %13557 = vrot.lane.b32.xlu1 %v15359_v48, %s14371_s25  ;;  %13562 = vrot.lane.b32.xlu0 %v15379_v16, %s14371_s25  ;;  %21762 = vst [vmem:[#allocation58_spill] sm:$0xff] %v15818_v3  ;;  %v15820_v48 = vcombine.high %v6604_v12, %v6618_v20  ;;  %v13240_v16 = vunpack.i.h.bf16 %v15606_v45  ;;  %v21765_v12 = vld [vmem:[#allocation7_spill] sm:$0xff]  ;;  %v2444_v56 = vsel %vm355_vm4, %v13244_v0, %v13245_v51  ;;  %v21770_v45 = vld [vmem:[#allocation40_spill] sm:$0xff]  ;;  %v13235_v44 = vunpack.i.h.bf16 %v15578_v11 }
 0x14b   : > { %12567 = vmatpush3.bf16.msra.mxu1 %v15554_v49  ;;  %v2443_v60 = vsel %vm355_vm4, %v13205_v47, %v13244_v0  ;;  %v21769_v38 = vpack.c.bf16 %v21767_v13, %v21768_v29  ;;  %v15849_v22 = vcombine.low %v15806_v8, %v15809_v52  ;;  %v13234_v7 = vunpack.i.l.bf16 %v15578_v11  ;;  %v15858_v0 = vld [vmem:[%s21388_s1 + $0x8] sm:$0xff]   ;;  %v21773_v13 = vld [vmem:[#allocation4_spill] sm:$0xff] }
 0x14c   : > { %21763 = vst [vmem:[#allocation59_spill] sm:$0xff] %v15820_v48  ;;  %2177 = vmatpush1.bf16.msra.mxu0 %v21764_v27  ;;  %12568 = vmatprep.subr.bf16.mxu1 %v21765_v12  ;;  %v15835_v20 = vpop.permute.xlu1 %13277  ;;  %v15837_v49 = vpop.permute.xlu0 %13282  ;;  %v2462_v54 = vpack.c.bf16 %v13245_v51, %v13245_v51  ;;  %v2461_v39 = vpack.c.bf16 %v2444_v56, %v2444_v56  ;;  %v13230_v11 = vunpack.i.h.bf16 %v15576_v26  ;;  %v13229_v51 = vunpack.i.l.bf16 %v15576_v26 }
 0x14d   : > { %2178 = vmatprep.subr.bf16.mxu0 %v21769_v38  ;;  %21771 = vst [vmem:[#allocation7_spill] sm:$0xff] %v15849_v22  ;;  %v2460_v62 = vpack.c.bf16 %v2443_v60, %v2443_v60  ;;  %v15862_v47 = vrot.slane %v7533_v40, %v14412_v6  ;;  %v15865_v27 = vrot.slane %v7534_v1, %v14412_v6  ;;  %v13225_v56 = vunpack.i.h.bf16 %v15550_v5 }
 0x14e   : > { %13567 = vrot.lane.b32.xlu1 %v21770_v45, %s14365_s19  ;;  %13572 = vrot.lane.b32.xlu0 %v21770_v45, %s14364_s18  ;;  %v21774_v29 = vpack.c.bf16 %v21772_v46, %v21773_v13  ;;  %v2433_v40 = vsel %vm343_vm1, %v13239_v19, %v13240_v16  ;;  %v7564_v1 = vcombine.high %v15824_v14, %v15827_v41  ;;  %v13224_v60 = vunpack.i.l.bf16 %v15550_v5 }
 0x14f   : > { %12569 = vmatpush3.bf16.msra.mxu1 %v21765_v12  ;;  %v15886_v26 = vpack.i.bf16 %v15849_v22, %v15820_v48  ;;  %v2490_v46 = vsel %vm599_vm2, %v2462_v54, 0  ;;  %v2459_v13 = vpack.c.bf16 %v13240_v16, %v13235_v44  ;;  %v2484_v21 = vsel %vm599_vm2, %v2460_v62, 0  ;;  %v21776_v16 = vld [vmem:[#allocation52_spill] sm:$0xff] }
 0x150   : > { %2179 = vmatpush1.bf16.msra.mxu0 %v21774_v29  ;;  %12845 = vmatprep.subr.msk.bf16.mxu1 %vm599_vm2, %v2462_v54  ;;  %v15873_v38 = vpop.permute.xlu1 %13287  ;;  %v15875_v12 = vpop.permute.xlu0 %13292  ;;  %v2432_v29 = vsel %vm343_vm1, %v13195_v2, %v13239_v19  ;;  %v7566_v54 = vcombine.high %v15862_v47, %v15865_v27  ;;  %v13220_v30 = vunpack.i.h.bf16 %v21776_v16  ;;  %v2411_v2 = vsel %vm319_vm5, %v13229_v51, %v13230_v11 }
 0x151   : > { %11787 = vmatprep.subr.msk.bf16.mxu0 %vm599_vm2, %v2461_v39  ;;  %21775 = vst [vmem:[#allocation48_spill] sm:$0xff] %v15886_v26  ;;  %v2422_v39 = vsel %vm331_vm3, %v13234_v7, %v13235_v44  ;;  %v13219_v44 = vunpack.i.l.bf16 %v21776_v16  ;;  %v7580_v62 = vrot.slane %v7564_v1, %v14412_v6  ;;  %v2421_v61 = vsel %vm331_vm3, %v21779_v10, %v13234_v7 }
 0x152   : > { %13577 = vrot.lane.b32.xlu1 %v21770_v45, %s14366_s20  ;;  %13582 = vrot.lane.b32.xlu0 %v21770_v45, %s14367_s21  ;;  %v2458_v5 = vpack.c.bf16 %v2433_v40, %v2422_v39  ;;  %v21777_v40 = vld [vmem:[#allocation50_spill] sm:$0xff]  ;;  %v21778_v39 = vld [vmem:[#allocation51_spill] sm:$0xff]  ;;  %v2457_v16 = vpack.c.bf16 %v2432_v29, %v2421_v61  ;;  %v2456_v33 = vpack.c.bf16 %v13230_v11, %v13225_v56  ;;  %v13145_v15 = vunpack.i.h.bf16 %v21780_v50  ;;  %v21783_v29 = vld [vmem:[#allocation33_spill] sm:$0xff] }
 0x153   : > { %12571 = vmatmul.mubr.msk.bf16.vlgmr.msra.gmra.mxu1 %vm592_vm0, %v15858_v0  ;;  %11769 = vmatmul.mubr.msk.bf16.vlgmr.msra.gmra.mxu0 %vm592_vm0, %v15718_v28  ;;  %v13215_v36 = vunpack.i.h.bf16 %v21778_v39  ;;  %v2400_v1 = vsel %vm307_vm6, %v13224_v60, %v13225_v56  ;;  %v21781_v58 = vunpack.i.h.bf16 %v15426_v55  ;;  %v13210_v61 = vunpack.i.h.bf16 %v21777_v40 }
 0x154   : > { %12575 = vmatpush3.bf16.msra.mxu1 %v2490_v46  ;;  %2499 = vmatpush1.bf16.msra.mxu0 %v2484_v21  ;;  %v15908_v19 = vpop.permute.xlu1 %13297  ;;  %v15910_v28 = vpop.permute.xlu0 %13302  ;;  %v13209_v46 = vunpack.i.l.bf16 %v21777_v40  ;;  %v13214_v21 = vunpack.i.l.bf16 %v21778_v39  ;;  %v2455_v7 = vpack.c.bf16 %v2411_v2, %v2400_v1  ;;  %v21782_v11 = vunpack.i.h.bf16 %v15392_v32 }
 0x155   : > { %12576 = vmatprep.subr.bf16.mxu1 %v2459_v13  ;;  %2500 = vmatprep.subr.bf16.mxu0 %v2458_v5  ;;  %v2410_v10 = vsel %vm319_vm5, %v21781_v58, %v13229_v51  ;;  %v7594_v5 = vrot.slane %v7566_v54, %v14412_v6  ;;  %v2389_v51 = vsel %vm295_vm7, %v13219_v44, %v13220_v30  ;;  %v13155_v2 = vunpack.i.h.bf16 %v21783_v29  ;;  %v21789_v58 = vld [vmem:[#allocation14_spill] sm:$0xff] }
 0x156   : > { %13587 = vrot.lane.b32.xlu1 %v21770_v45, %s14368_s22  ;;  %13592 = vrot.lane.b32.xlu0 %v21770_v45, %s14369_s23  ;;  %v2399_v56 = vsel %vm307_vm6, %v21782_v11, %v13224_v60  ;;  %v7565_v32 = vcombine.low %v15862_v47, %v15865_v27  ;;  %v7371_v60 = vcombine.high %v15733_v63, %v15738_v34  ;;  %v21784_v40 = vunpack.i.h.bf16 %v15310_v25 }
 0x157   : > { %2206 = vmatprep.mubr.bf16.mxu0 %v21693_v18  ;;  %12584 = vmatprep.mubr.msk.bf16.mxu1 %vm592_vm0, %v15902_v43  ;;  %v7373_v54 = vcombine.high %v15741_v31, %v15744_v23  ;;  %v2377_v1 = vsel %vm283_vm8, %v13145_v15, %v13214_v21  ;;  %v2388_v47 = vsel %vm295_vm7, %v13155_v2, %v13219_v44  ;;  %v21786_v15 = vld [vmem:[#allocation34_spill] sm:$0xff]  ;;  %v21788_v44 = vld [vmem:[#allocation13_spill] sm:$0xff]  ;;  %v13254_v11 = vunpack.i.l.bf16 %v15728_v35 }
 0x158   : > { %12577 = vmatpush3.bf16.msra.mxu1 %v2459_v13  ;;  %2501 = vmatpush1.bf16.msra.mxu0 %v2457_v16  ;;  %v15937_v50 = vpop.permute.xlu1 %13307  ;;  %v15939_v55 = vpop.permute.xlu0 %13312  ;;  %v7563_v13 = vcombine.low %v15824_v14, %v15827_v41  ;;  %v2366_v39 = vsel %vm271_vm9, %v21784_v40, %v13209_v46  ;;  %v2454_v14 = vpack.c.bf16 %v2410_v10, %v2399_v56  ;;  %v21796_v40 = vld [vmem:[#allocation39_spill] sm:$0xff] }
 0x159   : > { %12578 = vmatprep.subr.bf16.mxu1 %v2456_v33  ;;  %2502 = vmatprep.subr.bf16.mxu0 %v2455_v7  ;;  %v2453_v41 = vpack.c.bf16 %v13220_v30, %v13215_v36  ;;  %v2378_v16 = vsel %vm283_vm8, %v13214_v21, %v13215_v36  ;;  %v2367_v31 = vsel %vm271_vm9, %v13209_v46, %v13210_v61  ;;  %v13249_v46 = vunpack.i.l.bf16 %v15726_v4  ;;  %v21790_v7 = vld [vmem:[#allocation12_spill] sm:$0xff] }
 0x15a   : > { %13597 = vrot.lane.b32.xlu1 %v21770_v45, %s14370_s24  ;;  %13602 = vrot.lane.b32.xlu0 %v21770_v45, %s14371_s25  ;;  %v2452_v63 = vpack.c.bf16 %v2389_v51, %v2378_v16  ;;  %v15968_v23 = vcombine.low %v7580_v62, %v7594_v5  ;;  %v7573_v30 = vrot.slane %v7563_v13, %v14412_v6  ;;  %v13250_v62 = vunpack.i.h.bf16 %v15726_v4  ;;  %v21792_v13 = vld [vmem:[#allocation38_spill] sm:$0xff] }
 0x15b   : > { %11770 = vmatmul.mubr.msk.bf16.gmra.mxu0 %vm592_vm0, %v15858_v0  ;;  %v7387_v36 = vrot.slane %v7371_v60, %v14412_v6  ;;  %v7401_v45 = vrot.slane %v7373_v54, %v14412_v6  ;;  %v21787_v0 = vld [vmem:[#allocation35_spill] sm:$0xff]  ;;  %v2451_v27 = vpack.c.bf16 %v2388_v47, %v2377_v1  ;;  %v2450_v21 = vpack.c.bf16 %v13210_v61, %v21788_v44  ;;  %v16024_v47 = vld [vmem:[%s21388_s1 + $0x10] sm:$0xff]  }
 0x15c   : > { %12579 = vmatpush3.bf16.msra.mxu1 %v2456_v33  ;;  %2503 = vmatpush1.bf16.msra.mxu0 %v2454_v14  ;;  %v15963_v25 = vpop.permute.xlu1 %13317  ;;  %v15965_v34 = vpop.permute.xlu0 %13322  ;;  %21785 = vst [vmem:[#allocation49_spill] sm:$0xff] %v15968_v23  ;;  %v7587_v33 = vrot.slane %v7565_v32, %v14412_v6  ;;  %v2449_v10 = vpack.c.bf16 %v2367_v31, %v21789_v58  ;;  %v13270_v32 = vunpack.i.h.bf16 %v15792_v59  ;;  %v13269_v60 = vunpack.i.l.bf16 %v15792_v59  ;;  %v21800_v31 = vld [vmem:[#allocation45_spill] sm:$0xff] }
 0x15d   : > { %12580 = vmatprep.subr.bf16.mxu1 %v2453_v41  ;;  %2504 = vmatprep.subr.bf16.mxu0 %v2452_v63  ;;  %v2448_v5 = vpack.c.bf16 %v2366_v39, %v21790_v7  ;;  %v15989_v61 = vpack.i.bf16 %v15968_v23, %v15820_v48  ;;  %v15996_v29 = vcombine.high %v15806_v8, %v15809_v52  ;;  %v13274_v54 = vunpack.i.l.bf16 %v15794_v57  ;;  %v16007_v39 = vld [vmem:[%s21388_s1 + $0x28] sm:$0xff]  }
 0x15e   : > { %5460 = vperm.xlu1 %13085, %v21786_v15   ;;  %5465 = vperm.xlu0 %13084, %v21787_v0   ;;  %v15992_v4 = vcombine.low %v7573_v30, %v7587_v33  ;;  %v15998_v2 = vcombine.low %v7387_v36, %v7401_v45  ;;  %v16010_v14 = vsel %vm271_vm9, %v13249_v46, %v13250_v62  ;;  %v13260_v52 = vunpack.i.h.bf16 %v15759_v9  ;;  %v21802_v36 = vld [vmem:[#allocation46_spill] sm:$0xff]  ;;  %v21803_v0 = vld [vmem:[#allocation17_spill] sm:$0xff] }
 0x15f   : > { %2524 = vmatprep.mubr.bf16.mxu0 %v21693_v18  ;;  %21791 = vst [vmem:[#allocation8_spill] sm:$0xff] %v15989_v61  ;;  %21794 = vst [vmem:[#allocation47_spill] sm:$0xff] %v15996_v29  ;;  %v16012_v8 = vcombine.high %v7573_v30, %v7587_v33  ;;  %v13264_v59 = vunpack.i.l.bf16 %v15761_v37  ;;  %v16027_v63 = vsel %vm271_vm9, %v13250_v62, %v13254_v11  ;;  %v16102_v15 = vld [vmem:[%s14410_s17 + $0x97] ss:$8 sm:$0x7]  ;;  %v13305_v48 = vunpack.i.h.bf16 %v15910_v28 }
 0x160   : > { %12581 = vmatpush3.bf16.msra.mxu1 %v2453_v41  ;;  %2505 = vmatpush1.bf16.msra.mxu0 %v2451_v27  ;;  %v15983_v56 = vpop.permute.xlu1 %13327  ;;  %v15985_v51 = vpop.permute.xlu0 %13332  ;;  %21793 = vst [vmem:[#allocation40_spill] sm:$0xff] %v15992_v4  ;;  %21795 = vst [vmem:[#allocation4_spill] sm:$0xff] %v15998_v2  ;;  %v13259_v41 = vunpack.i.l.bf16 %v15759_v9  ;;  %v16035_v30 = vpack.i.bf16 %v15996_v29, %v15998_v2  ;;  %v16039_v33 = vsel %vm295_vm7, %v13269_v60, %v13270_v32  ;;  %v16083_v60 = vld [vmem:[%s14410_s17 + $0x37] ss:$8 sm:$0x7] }
 0x161   : > { %12582 = vmatprep.subr.bf16.mxu1 %v2450_v21  ;;  %2506 = vmatprep.subr.bf16.mxu0 %v2449_v10  ;;  %21797 = vst [vmem:[#allocation52_spill] sm:$0xff] %v16010_v14  ;;  %21798 = vst [vmem:[#allocation50_spill] sm:$0xff] %v16012_v8  ;;  %v16046_v45 = vsel %vm295_vm7, %v13270_v32, %v13274_v54  ;;  %v16049_v27 = vpack.c.bf16 %v13254_v11, %v21803_v0  ;;  %v16080_v32 = vld [vmem:[%s14410_s17 + $0x7] ss:$8 sm:$0x7]  ;;  %v13295_v9 = vunpack.i.h.bf16 %v15875_v12 }
 0x162   : > { %5470 = vperm.xlu1 %13085, %v21792_v13   ;;  %5475 = vperm.xlu0 %13084, %v21796_v40   ;;  %21799 = vst [vmem:[#allocation51_spill] sm:$0xff] %v16027_v63  ;;  %21801 = vst [vmem:[#allocation30_spill] sm:$0xff] %v16035_v30  ;;  %v16059_v58 = vpack.i.bf16 %v16012_v8, %v15968_v23  ;;  %v16063_v10 = vpack.i.bf16 %v15992_v4, %v16012_v8  ;;  %v16108_v0 = vld [vmem:[%s14410_s17 + $0xc7] ss:$8 sm:$0x7]  ;;  %v13294_v44 = vunpack.i.l.bf16 %v15875_v12 }
 0x163   : > { %v16066_v7 = vsel %vm283_vm8, %v13259_v41, %v13260_v52  ;;  %v16077_v13 = vsel %vm283_vm8, %v13260_v52, %v13264_v59  ;;  %v16087_v40 = vpack.c.bf16 %v13274_v54, %v13264_v59  ;;  %v7986_v46 = vcombine.low %v16080_v32, %v16083_v60 }
 0x164   : > { %12583 = vmatpush3.bf16.msra.mxu1 %v2450_v21  ;;  %2507 = vmatpush1.bf16.msra.mxu0 %v2448_v5  ;;  %v16017_v16 = vpop.permute.xlu1 %13337  ;;  %v16019_v1 = vpop.permute.xlu0 %13342  ;;  %21806 = vst [vmem:[#allocation33_spill] sm:$0xff] %v16059_v58  ;;  %21807 = vst [vmem:[#allocation34_spill] sm:$0xff] %v16063_v10  ;;  %v16099_v21 = vld [vmem:[%s14410_s17 + $0x67] ss:$8 sm:$0x7]  ;;  %v13325_v52 = vunpack.i.h.bf16 %v15965_v34  ;;  %v13315_v10 = vunpack.i.h.bf16 %v15939_v55 }
 0x165   : > { %v16111_v5 = vld [vmem:[%s14410_s17 + $0xf7] ss:$8 sm:$0x7] }
 0x166   : > { %13607 = vrot.lane.b32.xlu1 %v21800_v31, %s14365_s19  ;;  %13612 = vrot.lane.b32.xlu0 %v21802_v36, %s14365_s19  ;;  %v7988_v60 = vcombine.low %v16108_v0, %v16111_v5  ;;  %v12120_v0 = vld [vmem:[%s14410_s17 + $0x157] ss:$8 sm:$0x7] }
 0x167   : > { %12585 = vmatmul.mubr.msk.bf16.vlgmr.msra.gmra.mxu1 %vm592_vm0, %v16007_v39  ;;  %11788 = vmatmul.mubr.msk.bf16.vlgmr.msra.gmra.mxu0 %vm592_vm0, %v15902_v43 }
 0x168   : > { %v16069_v43 = vpop.permute.xlu1 %13347  ;;  %v16071_v11 = vpop.permute.xlu0 %13352  ;;  %2534 = vmatprep.mubr.bf16.mxu0 %v21693_v18  ;;  %12598 = vmatprep.mubr.msk.bf16.mxu1 %vm592_vm0, %v16024_v47 }
 0x169   : > { %v13355_v23 = vunpack.i.h.bf16 %v16071_v11  ;;  %v13354_v8 = vunpack.i.l.bf16 %v16071_v11  ;;  %v13350_v32 = vunpack.i.h.bf16 %v16069_v43  ;;  %v7987_v11 = vcombine.low %v16099_v21, %v16102_v15 }
 0x16a   : > { %13617 = vrot.lane.b32.xlu1 %v21800_v31, %s14364_s18  ;;  %13622 = vrot.lane.b32.xlu0 %v21802_v36, %s14364_s18 }
 0x16b   : > { %v3390_v63 = vsel %vm331_vm3, %v13305_v48, %v13354_v8 }
 0x16c   : > { %v13358_v54 = vpop.permute.xlu1 %13357  ;;  %v13363_v17 = vpop.permute.xlu0 %13362 }
 0x16d   : > { %v13360_v59 = vunpack.i.h.bf16 %v13358_v54  ;;  %v13359_v42 = vunpack.i.l.bf16 %v13358_v54  ;;  %v13365_v41 = vunpack.i.h.bf16 %v13363_v17  ;;  %v13364_v53 = vunpack.i.l.bf16 %v13363_v17 }
 0x16e   : > { %13627 = vrot.lane.b32.xlu1 %v21800_v31, %s14366_s20  ;;  %13632 = vrot.lane.b32.xlu0 %v21802_v36, %s14366_s20  ;;  %v13349_v17 = vunpack.i.l.bf16 %v16069_v43  ;;  %v12119_v43 = vld [vmem:[%s14410_s17 + $0x127] ss:$8 sm:$0x7] }
 0x16f   : > { %v3431_v54 = vpack.c.bf16 %v13365_v41, %v13365_v41  ;;  %11789 = vmatmul.mubr.msk.bf16.gmra.mxu0 %vm592_vm0, %v16007_v39  ;;  %v3413_v58 = vsel %vm355_vm4, %v13364_v53, %v13365_v41  ;;  %v3412_v30 = vsel %vm355_vm4, %v13325_v52, %v13364_v53  ;;  %v3402_v5 = vsel %vm343_vm1, %v13359_v42, %v13360_v59 }
 0x170   : > { %v16135_v61 = vpop.permute.xlu1 %13367  ;;  %v16137_v62 = vpop.permute.xlu0 %13372  ;;  %v3430_v15 = vpack.c.bf16 %v3413_v58, %v3413_v58  ;;  %v3429_v21 = vpack.c.bf16 %v3412_v30, %v3412_v30  ;;  %3493 = vmatprep.mubr.bf16.mxu0 %v21693_v18  ;;  %v13345_v39 = vunpack.i.h.bf16 %v16019_v1  ;;  %v13344_v41 = vunpack.i.l.bf16 %v16019_v1 }
 0x171   : > { %v3401_v53 = vsel %vm343_vm1, %v13315_v10, %v13359_v42  ;;  %12846 = vmatprep.subr.msk.bf16.mxu1 %vm599_vm2, %v3431_v54  ;;  %v3391_v58 = vsel %vm331_vm3, %v13354_v8, %v13355_v23  ;;  %v3459_v30 = vsel %vm599_vm2, %v3431_v54, 0  ;;  %v3428_v14 = vpack.c.bf16 %v13360_v59, %v13355_v23 }
 0x172   : > { %13637 = vrot.lane.b32.xlu1 %v21800_v31, %s14367_s21  ;;  %13642 = vrot.lane.b32.xlu0 %v21802_v36, %s14367_s21  ;;  %v3453_v52 = vsel %vm599_vm2, %v3429_v21, 0  ;;  %v3427_v1 = vpack.c.bf16 %v3402_v5, %v3391_v58  ;;  %v13340_v42 = vunpack.i.h.bf16 %v16017_v16  ;;  %v13339_v10 = vunpack.i.l.bf16 %v16017_v16 }
 0x173   : > { %11846 = vmatprep.subr.msk.bf16.mxu0 %vm599_vm2, %v3430_v15  ;;  %12589 = vmatpush3.bf16.msra.mxu1 %v3459_v30  ;;  %v3380_v26 = vsel %vm319_vm5, %v13349_v17, %v13350_v32  ;;  %v7989_v3 = vcombine.low %v12119_v43, %v12120_v0  ;;  %v16165_v23 = vrot.slane %v7986_v46, %v14412_v6  ;;  %v13335_v59 = vunpack.i.h.bf16 %v15985_v51 }
 0x174   : > { %3468 = vmatpush1.bf16.msra.mxu0 %v3453_v52  ;;  %12590 = vmatprep.subr.bf16.mxu1 %v3428_v14  ;;  %v16160_v15 = vpop.permute.xlu1 %13377  ;;  %v16162_v54 = vpop.permute.xlu0 %13382  ;;  %v16168_v16 = vrot.slane %v7987_v11, %v14412_v6  ;;  %v13334_v21 = vunpack.i.l.bf16 %v15985_v51  ;;  %v3426_v48 = vpack.c.bf16 %v3401_v53, %v3390_v63  ;;  %v3369_v12 = vsel %vm307_vm6, %v13344_v41, %v13345_v39 }
 0x175   : > { %3469 = vmatprep.subr.bf16.mxu0 %v3427_v1  ;;  %v3379_v8 = vsel %vm319_vm5, %v13295_v9, %v13349_v17  ;;  %v3425_v46 = vpack.c.bf16 %v13350_v32, %v13345_v39  ;;  %v3424_v5 = vpack.c.bf16 %v3380_v26, %v3369_v12  ;;  %v16179_v11 = vrot.slane %v7988_v60, %v14412_v6 }
 0x176   : > { %13647 = vrot.lane.b32.xlu1 %v21800_v31, %s14368_s22  ;;  %13652 = vrot.lane.b32.xlu0 %v21802_v36, %s14368_s22  ;;  %v13330_v43 = vunpack.i.h.bf16 %v15983_v56  ;;  %v13329_v51 = vunpack.i.l.bf16 %v15983_v56  ;;  %v3358_v63 = vsel %vm295_vm7, %v13339_v10, %v13340_v42  ;;  %v8017_v0 = vrot.slane %v7989_v3, %v14412_v6 }
 0x177   : > { %12591 = vmatpush3.bf16.msra.mxu1 %v3428_v14  ;;  %v13275_v9 = vunpack.i.h.bf16 %v15794_v57  ;;  %v21808_v17 = vunpack.i.h.bf16 %v15835_v20  ;;  %v21809_v32 = vunpack.i.l.bf16 %v15835_v20  ;;  %v21810_v60 = vunpack.i.h.bf16 %v15837_v49 }
 0x178   : > { %3470 = vmatpush1.bf16.msra.mxu0 %v3426_v48  ;;  %12592 = vmatprep.subr.bf16.mxu1 %v3425_v46  ;;  %v16196_v56 = vpop.permute.xlu1 %13387  ;;  %v16198_v14 = vpop.permute.xlu0 %13392  ;;  %v21811_v3 = vunpack.i.l.bf16 %v15837_v49  ;;  %v21813_v58 = vunpack.i.h.bf16 %v15873_v38  ;;  %v21814_v30 = vunpack.i.l.bf16 %v15873_v38  ;;  %v3347_v1 = vsel %vm283_vm8, %v13334_v21, %v13335_v59 }
 0x179   : > { %v16191_v26 = vsel %vm307_vm6, %v21809_v32, %v21808_v17  ;;  %v3368_v39 = vsel %vm307_vm6, %v21810_v60, %v13344_v41  ;;  %3471 = vmatprep.subr.bf16.mxu0 %v3424_v5  ;;  %v21812_v57 = vmov %v21808_v17  ;;  %v3357_v12 = vsel %vm295_vm7, %v13275_v9, %v13339_v10 }
 0x17a   : > { %v16205_v53 = vsel %vm307_vm6, %v21812_v57, %v21811_v3  ;;  %v16212_v52 = vsel %vm319_vm5, %v21814_v30, %v21813_v58  ;;  %13657 = vrot.lane.b32.xlu1 %v21800_v31, %s14369_s23  ;;  %v3423_v41 = vpack.c.bf16 %v3379_v8, %v3368_v39  ;;  %v21815_v48 = vmov %v21813_v58  ;;  %v21819_v30 = vld [vmem:[#allocation19_spill] sm:$0xff] }
 0x17b   : > { %v16220_v20 = vsel %vm319_vm5, %v21815_v48, %v13294_v44  ;;  %13662 = vrot.lane.b32.xlu0 %v21802_v36, %s14369_s23  ;;  %v3422_v5 = vpack.c.bf16 %v13340_v42, %v13335_v59  ;;  %v3421_v17 = vpack.c.bf16 %v3358_v63, %v3347_v1  ;;  %v8019_v32 = vcombine.high %v16165_v23, %v16168_v16  ;;  %v21820_v1 = vld [vmem:[#allocation20_spill] sm:$0xff] }
 0x17c   : > { %v13320_v60 = vunpack.i.h.bf16 %v15963_v25  ;;  %v13324_v8 = vunpack.i.l.bf16 %v15965_v34  ;;  %12593 = vmatpush3.bf16.msra.mxu1 %v3425_v46  ;;  %3472 = vmatpush1.bf16.msra.mxu0 %v3423_v41  ;;  %v3336_v38 = vsel %vm271_vm9, %v13329_v51, %v13330_v43  ;;  %v8021_v39 = vcombine.high %v16179_v11, %v8017_v0  ;;  %v16235_v59 = vpop.permute.xlu1 %13397  ;;  %v16237_v63 = vpop.permute.xlu0 %13402 }
 0x17d   : > { %v13319_v10 = vunpack.i.l.bf16 %v15963_v25  ;;  %v21816_v9 = vunpack.i.h.bf16 %v15761_v37  ;;  %12594 = vmatprep.subr.bf16.mxu1 %v3422_v5  ;;  %3473 = vmatprep.subr.bf16.mxu0 %v3421_v17  ;;  %v21817_v34 = vmov %v21811_v3  ;;  %v3231_v3 = vpack.c.bf16 %v16220_v20, %v16205_v53  ;;  %v12176_v53 = vld [vmem:[%s14410_s17 + $0xc7] ss:$8 sm:$0x7] }
 0x17e   : > { %v16241_v46 = vpack.c.bf16 %v13294_v44, %v21817_v34  ;;  %v13310_v57 = vunpack.i.h.bf16 %v15937_v50  ;;  %13667 = vrot.lane.b32.xlu1 %v21800_v31, %s14370_s24  ;;  %v8018_v25 = vcombine.low %v16165_v23, %v16168_v16  ;;  %v13309_v58 = vunpack.i.l.bf16 %v15937_v50  ;;  %v12177_v20 = vld [vmem:[%s14410_s17 + $0xf7] ss:$8 sm:$0x7] }
 0x17f   : > { %v3346_v42 = vsel %vm283_vm8, %v21816_v9, %v13334_v21  ;;  %v8020_v21 = vcombine.low %v16179_v11, %v8017_v0  ;;  %v21818_v49 = vunpack.i.h.bf16 %v15728_v35  ;;  %13672 = vrot.lane.b32.xlu0 %v21802_v36, %s14370_s24  ;;  %v3419_v41 = vpack.c.bf16 %v13330_v43, %v21819_v30 }
 0x180   : > { %v3420_v37 = vpack.c.bf16 %v3357_v12, %v3346_v42  ;;  %v3418_v48 = vpack.c.bf16 %v3336_v38, %v21820_v1  ;;  %v13314_v12 = vunpack.i.l.bf16 %v15939_v55  ;;  %12595 = vmatpush3.bf16.msra.mxu1 %v3422_v5  ;;  %v3220_v23 = vsel %vm355_vm4, %v13320_v60, %v13324_v8  ;;  %v16266_v43 = vpop.permute.xlu1 %13407  ;;  %v16268_v0 = vpop.permute.xlu0 %13412  ;;  %v21821_v5 = vld [vmem:[#allocation18_spill] sm:$0xff] }
 0x181   : > { %v3335_v44 = vsel %vm271_vm9, %v21818_v49, %v13329_v51  ;;  %v8035_v16 = vrot.slane %v8019_v32, %v14412_v6  ;;  %v8049_v50 = vrot.slane %v8021_v39, %v14412_v6  ;;  %v13300_v35 = vunpack.i.h.bf16 %v15908_v19  ;;  %12596 = vmatprep.subr.bf16.mxu1 %v3419_v41 }
 0x182   : > { %3474 = vmatpush1.bf16.msra.mxu0 %v3420_v37  ;;  %v13299_v11 = vunpack.i.l.bf16 %v15908_v19  ;;  %v13304_v51 = vunpack.i.l.bf16 %v15910_v28  ;;  %v3219_v55 = vsel %vm355_vm4, %v13319_v10, %v13320_v60  ;;  %13677 = vrot.lane.b32.xlu1 %v21800_v31, %s14371_s25  ;;  %v3417_v17 = vpack.c.bf16 %v3335_v44, %v21821_v5  ;;  %v16284_v31 = vld [vmem:[%s21388_s1 + $0x18] sm:$0xff]  }
 0x183   : > { %3475 = vmatprep.subr.bf16.mxu0 %v3418_v48  ;;  %v3230_v32 = vpack.c.bf16 %v16212_v52, %v16191_v26  ;;  %v8028_v19 = vrot.slane %v8018_v25, %v14412_v6  ;;  %v8042_v28 = vrot.slane %v8020_v21, %v14412_v6  ;;  %v3208_v38 = vsel %vm343_vm1, %v13309_v58, %v13310_v57 }
 0x184   : > { %v3238_v39 = vpack.c.bf16 %v13324_v8, %v13324_v8  ;;  %13682 = vrot.lane.b32.xlu0 %v21802_v36, %s14371_s25  ;;  %v3237_v9 = vpack.c.bf16 %v3220_v23, %v3220_v23  ;;  %12597 = vmatpush3.bf16.msra.mxu1 %v3419_v41  ;;  %v3236_v60 = vpack.c.bf16 %v3219_v55, %v3219_v55  ;;  %v16291_v8 = vpop.permute.xlu1 %13417  ;;  %v16293_v36 = vpop.permute.xlu0 %13422  ;;  %v13370_v25 = vunpack.i.h.bf16 %v16135_v61 }
 0x185   : > { %v3209_v10 = vsel %vm343_vm1, %v13310_v57, %v13314_v12  ;;  %v16287_v42 = vcombine.low %v8035_v16, %v8049_v50  ;;  %v3197_v34 = vsel %vm331_vm3, %v13299_v11, %v13300_v35  ;;  %v3198_v37 = vsel %vm331_vm3, %v13300_v35, %v13304_v51 }
 0x186   : > { %3476 = vmatpush1.bf16.msra.mxu0 %v3417_v17  ;;  %12847 = vmatprep.subr.msk.bf16.mxu1 %vm599_vm2, %v3238_v39  ;;  %v13374_v21 = vunpack.i.l.bf16 %v16137_v62  ;;  %v3235_v57 = vpack.c.bf16 %v13314_v12, %v13304_v51  ;;  %v16301_v58 = vcombine.low %v8028_v19, %v8042_v28  ;;  %v13369_v49 = vunpack.i.l.bf16 %v16135_v61  ;;  %v16315_v61 = vld [vmem:[%s21388_s1] sm:$0xff]  }
 0x187   : > { %21822 = vst [vmem:[#allocation35_spill] sm:$0xff] %v16287_v42  ;;  %11853 = vmatprep.subr.msk.bf16.mxu0 %vm599_vm2, %v3237_v9  ;;  %13687 = vrot.lane.b32.xlu1 %v15767_v24, %s14365_s19  ;;  %v3586_v44 = vsel %vm599_vm2, %v3238_v39, 0  ;;  %v3234_v30 = vpack.c.bf16 %v3209_v10, %v3198_v37  ;;  %v3233_v41 = vpack.c.bf16 %v3208_v38, %v3197_v34  ;;  %v3580_v1 = vsel %vm599_vm2, %v3236_v60, 0  ;;  %v21826_v39 = vld [vmem:[#allocation23_spill] sm:$0xff]  ;;  %v21827_v60 = vld [vmem:[#allocation22_spill] sm:$0xff] }
 0x188   : > { %21823 = vst [vmem:[#allocation13_spill] sm:$0xff] %v16301_v58  ;;  %13692 = vrot.lane.b32.xlu0 %v15767_v24, %s14364_s18  ;;  %12599 = vmatmul.mubr.msk.bf16.vlgmr.msra.gmra.mxu1 %vm592_vm0, %v16284_v31  ;;  %v16319_v48 = vpack.i.bf16 %v16287_v42, %v15992_v4  ;;  %v16321_v12 = vpop.permute.xlu1 %13427  ;;  %v16323_v23 = vpop.permute.xlu0 %13432  ;;  %v16330_v16 = vsel %vm271_vm9, %v13370_v25, %v13374_v21  ;;  %v13380_v11 = vunpack.i.h.bf16 %v16160_v15  ;;  %v13379_v51 = vunpack.i.l.bf16 %v16160_v15  ;;  %v12172_v34 = vld [vmem:[%s14410_s17 + $0x7] ss:$8 sm:$0x7] }
 0x189   : > { %12603 = vmatpush3.bf16.msra.mxu1 %v3586_v44  ;;  %11847 = vmatmul.mubr.msk.bf16.vlgmr.msra.gmra.mxu0 %vm592_vm0, %v16024_v47  ;;  %v16335_v35 = vsel %vm271_vm9, %v13369_v49, %v13370_v25  ;;  %v13384_v55 = vunpack.i.l.bf16 %v16162_v54  ;;  %v16347_v5 = vpack.i.bf16 %v16287_v42, %v15849_v22  ;;  %v16349_v17 = vcombine.high %v8028_v19, %v8042_v28  ;;  %v12173_v37 = vld [vmem:[%s14410_s17 + $0x37] ss:$8 sm:$0x7]  ;;  %v12169_v42 = vld [vmem:[%s14410_s17 + $0xf6] ss:$8 sm:$0x7] }
 0x18a   : > { %3595 = vmatpush1.bf16.msra.mxu0 %v3580_v1  ;;  %12604 = vmatprep.subr.bf16.mxu1 %v3235_v57  ;;  %v16355_v9 = vpack.c.bf16 %v13374_v21, %v21826_v39  ;;  %v13390_v25 = vunpack.i.h.bf16 %v16196_v56  ;;  %v13389_v19 = vunpack.i.l.bf16 %v16196_v56  ;;  %v21828_v28 = vld [vmem:[#allocation21_spill] sm:$0xff]  ;;  %v16373_v44 = vsel %vm283_vm8, %v13379_v51, %v13380_v11  ;;  %v12178_v1 = vld [vmem:[%s14410_s17 + $0x127] ss:$8 sm:$0x7] }
 0x18b   : > { %3596 = vmatprep.subr.bf16.mxu0 %v3234_v30  ;;  %13697 = vrot.lane.b32.xlu1 %v15767_v24, %s14366_s20  ;;  %21824 = vst [vmem:[#allocation14_spill] sm:$0xff] %v16347_v5  ;;  %21825 = vst [vmem:[#allocation12_spill] sm:$0xff] %v16349_v17  ;;  %v12175_v49 = vld [vmem:[%s14410_s17 + $0x97] ss:$8 sm:$0x7]  ;;  %v16380_v56 = vsel %vm283_vm8, %v13380_v11, %v13384_v55  ;;  %v8955_v26 = vcombine.low %v12172_v34, %v12173_v37  ;;  %v13410_v21 = vunpack.i.h.bf16 %v16266_v43  ;;  %v21908_v22 = vmov 0 }
 0x18c   : > { %13702 = vrot.lane.b32.xlu0 %v15767_v24, %s14367_s21  ;;  %3503 = vmatprep.mubr.bf16.mxu0 %v21693_v18  ;;  %v13438_v15 = vpop.permute.xlu1 %13437  ;;  %v16352_v38 = vpop.permute.xlu0 %13442  ;;  %v12179_v51 = vld [vmem:[%s14410_s17 + $0x157] ss:$8 sm:$0x7]  ;;  %v13409_v30 = vunpack.i.l.bf16 %v16266_v43  ;;  %v13424_v34 = vunpack.i.l.bf16 %v16293_v36  ;;  %v13430_v37 = vunpack.i.h.bf16 %v16321_v12  ;;  %v12171_v5 = vld [vmem:[%s14410_s17 + $0x156] ss:$8 sm:$0x7] }
 0x18d   : > { %12605 = vmatpush3.bf16.msra.mxu1 %v3235_v57  ;;  %12612 = vmatprep.mubr.msk.bf16.mxu1 %vm592_vm0, %v16315_v61  ;;  %v12174_v57 = vld [vmem:[%s14410_s17 + $0x67] ss:$8 sm:$0x7]  ;;  %v13440_v11 = vunpack.i.h.bf16 %v13438_v15  ;;  %v13439_v39 = vunpack.i.l.bf16 %v13438_v15  ;;  %v13444_v50 = vunpack.i.l.bf16 %v16352_v38  ;;  %v21832_v15 = vpack.c.bf16 %v16046_v45, %v16077_v13  ;;  %v16461_v13 = vld [vmem:[%s14410_s17 + $0x6] ss:$8 sm:$0x7] }
 0x18e   : > { %3597 = vmatpush1.bf16.msra.mxu0 %v3233_v41  ;;  %12606 = vmatprep.subr.bf16.mxu1 %v16241_v46  ;;  %v16392_v41 = vpack.i.bf16 %v16301_v58, %v16349_v17  ;;  %v8956_v52 = vcombine.low %v12174_v57, %v12175_v49  ;;  %v8958_v10 = vcombine.low %v12178_v1, %v12179_v51  ;;  %v13434_v57 = vunpack.i.l.bf16 %v16323_v23  ;;  %v21836_v1 = vld [vmem:[#allocation51_spill] sm:$0xff]  ;;  %v21837_v51 = vld [vmem:[#allocation16_spill] sm:$0xff] }
 0x18f   : > { %3598 = vmatprep.subr.bf16.mxu0 %v3231_v3  ;;  %13707 = vrot.lane.b32.xlu1 %v15767_v24, %s14368_s22  ;;  %v13394_v3 = vunpack.i.l.bf16 %v16198_v14  ;;  %v3868_v43 = vsel %vm355_vm4, %v13440_v11, %v13444_v50 }
 0x190   : > { %13712 = vrot.lane.b32.xlu0 %v15767_v24, %s14369_s23  ;;  %21829 = vst [vmem:[#allocation38_spill] sm:$0xff] %v16392_v41  ;;  %v8986_v45 = vrot.slane %v8958_v10, %v14412_v6  ;;  %v12166_v10 = vld [vmem:[%s14410_s17 + $0x66] ss:$8 sm:$0x7] }
 0x191   : > { %12607 = vmatpush3.bf16.msra.mxu1 %v16241_v46  ;;  %11848 = vmatmul.mubr.msk.bf16.gmra.mxu0 %vm592_vm0, %v16284_v31  ;;  %v16401_v46 = vpop.permute.xlu1 %4036  ;;  %v16404_v31 = vsel %vm295_vm7, %v13389_v19, %v13390_v25  ;;  %v16407_v47 = vpop.permute.xlu0 %4041  ;;  %v8957_v19 = vcombine.low %v12176_v53, %v12177_v20  ;;  %v3867_v53 = vsel %vm355_vm4, %v13439_v39, %v13440_v11  ;;  %v12168_v41 = vld [vmem:[%s14410_s17 + $0xc6] ss:$8 sm:$0x7] }
 0x192   : > { %3599 = vmatpush1.bf16.msra.mxu0 %v3230_v32  ;;  %12608 = vmatprep.subr.bf16.mxu1 %v16087_v40  ;;  %21830 = vst [vmem:[#allocation39_spill] sm:$0xff] %v16401_v46  ;;  %21831 = vst [vmem:[#allocation45_spill] sm:$0xff] %v16407_v47  ;;  %v21489_v32 = vunpack.i.l.bf16 %v16237_v63  ;;  %v16449_v11 = vpack.c.bf16 %v13394_v3, %v13384_v55  ;;  %v8972_v39 = vrot.slane %v8956_v52, %v14412_v6  ;;  %v12165_v55 = vld [vmem:[%s14410_s17 + $0x36] ss:$8 sm:$0x7]  ;;  %v21843_v46 = vld [vmem:[#allocation15_spill] sm:$0xff] }
 0x193   : > { %3600 = vmatprep.subr.bf16.mxu0 %v21832_v15  ;;  %13717 = vrot.lane.b32.xlu1 %v15767_v24, %s14370_s24  ;;  %v21838_v15 = vpack.c.bf16 %v21836_v1, %v21837_v51  ;;  %v21840_v1 = vld [vmem:[#allocation48_spill] sm:$0xff]  ;;  %v16456_v51 = vsel %vm295_vm7, %v13390_v25, %v13394_v3  ;;  %v3884_v52 = vpack.c.bf16 %v3867_v53, %v3867_v53  ;;  %v21841_v25 = vunpack.i.h.bf16 %v16235_v59 }
 0x194   : > { %13722 = vrot.lane.b32.xlu0 %v15767_v24, %s14371_s25  ;;  %3620 = vmatprep.mubr.bf16.mxu0 %v21693_v18  ;;  %v21833_v24 = vpack.c.bf16 %v16039_v33, %v16066_v7  ;;  %v21839_v33 = vld [vmem:[#allocation58_spill] sm:$0xff]  ;;  %v16445_v7 = vld [vmem:[%s21388_s1 + $0x8] sm:$0xff]   ;;  %v13419_v47 = vunpack.i.l.bf16 %v16291_v8  ;;  %v8762_v29 = vcombine.low %v16461_v13, %v12165_v55  ;;  %v21848_v55 = vunpack.i.l.bf16 %v16237_v63 }
 0x195   : > { %12609 = vmatpush3.bf16.msra.mxu1 %v16087_v40  ;;  %v16430_v49 = vpop.permute.xlu1 %4046  ;;  %v13429_v40 = vunpack.i.l.bf16 %v16321_v12  ;;  %v16435_v20 = vpop.permute.xlu0 %4051  ;;  %v8965_v12 = vrot.slane %v8955_v26, %v14412_v6  ;;  %v16465_v26 = vsel %vm319_vm5, %v13409_v30, %v13410_v21  ;;  %v16473_v3 = vsel %vm307_vm6, %v21841_v25, %v21489_v32 }
 0x196   : > { %3601 = vmatpush1.bf16.msra.mxu0 %v21833_v24  ;;  %12610 = vmatprep.subr.bf16.mxu1 %v16049_v27  ;;  %21834 = vst [vmem:[#allocation46_spill] sm:$0xff] %v16430_v49  ;;  %21835 = vst [vmem:[#allocation17_spill] sm:$0xff] %v16435_v20  ;;  %v3886_v24 = vpack.c.bf16 %v13444_v50, %v13444_v50  ;;  %v3885_v50 = vpack.c.bf16 %v3868_v43, %v3868_v43  ;;  %v21842_v20 = vld [vmem:[#allocation52_spill] sm:$0xff]  ;;  %v21845_v43 = vunpack.i.h.bf16 %v16291_v8 }
 0x197   : > { %3602 = vmatprep.subr.bf16.mxu0 %v21838_v15  ;;  %13727 = vrot.lane.b32.xlu1 %v21839_v33, %s14365_s19  ;;  %v8979_v15 = vrot.slane %v8957_v19, %v14412_v6  ;;  %v12167_v19 = vld [vmem:[%s14410_s17 + $0x96] ss:$8 sm:$0x7]  ;;  %v21844_v30 = vpack.c.bf16 %v21842_v20, %v21843_v46  ;;  %v3857_v25 = vsel %vm343_vm1, %v13430_v37, %v13434_v57  ;;  %v21846_v32 = vunpack.i.l.bf16 %v16268_v0 }
 0x198   : > { %13732 = vrot.lane.b32.xlu0 %v21840_v1, %s14365_s19  ;;  %v3846_v53 = vsel %vm331_vm3, %v21845_v43, %v13424_v34  ;;  %v3856_v46 = vsel %vm343_vm1, %v13429_v40, %v13430_v37  ;;  %v8987_v17 = vcombine.low %v8965_v12, %v8972_v39  ;;  %v12170_v43 = vld [vmem:[%s14410_s17 + $0x126] ss:$8 sm:$0x7]  ;;  %v8763_v58 = vcombine.low %v12166_v10, %v12167_v19 }
 0x199   : > { %12611 = vmatpush3.bf16.msra.mxu1 %v16049_v27  ;;  %v16482_v27 = vpop.permute.xlu1 %13447  ;;  %v3835_v49 = vsel %vm319_vm5, %v13410_v21, %v21846_v32  ;;  %v16494_v20 = vpop.permute.xlu0 %13452  ;;  %v3914_v21 = vsel %vm599_vm2, %v3886_v24, 0  ;;  %v8988_v32 = vcombine.high %v8965_v12, %v8972_v39  ;;  %v8989_v37 = vcombine.low %v8979_v15, %v8986_v45 }
 0x19a   : > { %3603 = vmatpush1.bf16.msra.mxu0 %v21844_v30  ;;  %12848 = vmatprep.subr.msk.bf16.mxu1 %vm599_vm2, %v3886_v24  ;;  %v3883_v30 = vpack.c.bf16 %v13434_v57, %v13424_v34  ;;  %v8990_v40 = vcombine.high %v8979_v15, %v8986_v45  ;;  %v3908_v34 = vsel %vm599_vm2, %v3884_v52, 0  ;;  %v3882_v57 = vpack.c.bf16 %v3857_v25, %v3846_v53 }
 0x19b   : > { %11872 = vmatprep.subr.msk.bf16.mxu0 %vm599_vm2, %v3885_v50  ;;  %13737 = vrot.lane.b32.xlu1 %v21839_v33, %s14364_s18  ;;  %v16512_v50 = vld [vmem:[%s21388_s1 + $0x20] sm:$0xff]   ;;  %v21847_v24 = vunpack.i.h.bf16 %v16291_v8  ;;  %v8765_v39 = vcombine.low %v12170_v43, %v12171_v5  ;;  %v13399_v15 = vunpack.i.l.bf16 %v16235_v59  ;;  %v21849_v8 = vunpack.i.l.bf16 %v16268_v0 }
 0x19c   : > { %13742 = vrot.lane.b32.xlu0 %v21840_v1, %s14364_s18  ;;  %12613 = vmatmul.mubr.msk.bf16.vlgmr.msra.gmra.mxu1 %vm592_vm0, %v16445_v7  ;;  %v8997_v10 = vrot.slane %v8987_v17, %v14412_v6  ;;  %v9011_v5 = vrot.slane %v8989_v37, %v14412_v6  ;;  %v13375_v19 = vunpack.i.h.bf16 %v16137_v62  ;;  %v3879_v53 = vpack.c.bf16 %v3835_v49, %v16473_v3 }
 0x19d   : > { %12617 = vmatpush3.bf16.msra.mxu1 %v3914_v21  ;;  %11854 = vmatmul.mubr.msk.bf16.vlgmr.msra.gmra.mxu0 %vm592_vm0, %v16315_v61  ;;  %v3845_v12 = vsel %vm331_vm3, %v13419_v47, %v21847_v24  ;;  %v16518_v45 = vpop.permute.xlu1 %13457  ;;  %v8764_v61 = vcombine.low %v12168_v41, %v12169_v42  ;;  %v16521_v52 = vpop.permute.xlu0 %13462  ;;  %v3880_v47 = vpack.c.bf16 %v21849_v8, %v21848_v55  ;;  %v13395_v21 = vunpack.i.h.bf16 %v16198_v14 }
 0x19e   : > { %3923 = vmatpush1.bf16.msra.mxu0 %v3908_v34  ;;  %12618 = vmatprep.subr.bf16.mxu1 %v3883_v30  ;;  %v3881_v13 = vpack.c.bf16 %v3856_v46, %v3845_v12  ;;  %v9004_v42 = vrot.slane %v8988_v32, %v14412_v6  ;;  %v9018_v41 = vrot.slane %v8990_v40, %v14412_v6  ;;  %v13385_v46 = vunpack.i.h.bf16 %v16162_v54 }
 0x19f   : > { %3924 = vmatprep.subr.bf16.mxu0 %v3882_v57  ;;  %13747 = vrot.lane.b32.xlu1 %v21839_v33, %s14366_s20  ;;  %v16538_v25 = vpop.f32.mrf.mxu0  ;;  %v8772_v17 = vrot.slane %v8762_v29, %v14412_v6  ;;  %v8786_v49 = vrot.slane %v8764_v61, %v14412_v6  ;;  %v8793_v3 = vrot.slane %v8765_v39, %v14412_v6  ;;  %v21850_v32 = vunpack.i.h.bf16 %v16235_v59 }
 0x1a0   : > { %13752 = vrot.lane.b32.xlu0 %v21840_v1, %s14366_s20  ;;  %3630 = vmatprep.mubr.bf16.mxu0 %v21693_v18  ;;  %v8779_v1 = vrot.slane %v8763_v58, %v14412_v6  ;;  %v16566_v34 = vcombine.low %v8997_v10, %v9011_v5  ;;  %v16568_v59 = vcombine.low %v9004_v42, %v9018_v41  ;;  %v13405_v57 = vunpack.i.h.bf16 %v16237_v63  ;;  %v16594_v42 = vpop.f32.mrf.mxu1 }
 0x1a1   : > { %12619 = vmatpush3.bf16.msra.mxu1 %v3883_v30  ;;  %12626 = vmatprep.mubr.msk.bf16.mxu1 %vm592_vm0, %v16512_v50  ;;  %v16545_v43 = vpop.permute.xlu1 %13467  ;;  %v3876_v30 = vpack.c.bf16 %v16456_v51, %v16380_v56  ;;  %v3823_v29 = vsel %vm307_vm6, %v13399_v15, %v21850_v32  ;;  %v16555_v58 = vpop.permute.xlu0 %13472  ;;  %v3875_v56 = vpack.c.bf16 %v16404_v31, %v16373_v44  ;;  %v21851_v51 = vld [vmem:[#allocation8_spill] sm:$0xff]  ;;  %v13415_v44 = vunpack.i.h.bf16 %v16268_v0 }
 0x1a2   : > { %3925 = vmatpush1.bf16.msra.mxu0 %v3881_v13  ;;  %12620 = vmatprep.subr.bf16.mxu1 %v3880_v47  ;;  %v16559_v37 = vpop.f32.mrf.mxu0  ;;  %v3878_v40 = vpack.c.bf16 %v16465_v26, %v3823_v29  ;;  %21852 = vst [vmem:[#allocation19_spill] sm:$0xff] %v16566_v34  ;;  %21853 = vst [vmem:[#allocation20_spill] sm:$0xff] %v16568_v59  ;;  %v8794_v12 = vcombine.low %v8772_v17, %v8779_v1  ;;  %v13450_v55 = vunpack.i.h.bf16 %v16482_v27 }
 0x1a3   : > { %3926 = vmatprep.subr.bf16.mxu0 %v3879_v53  ;;  %13757 = vrot.lane.b32.xlu1 %v21839_v33, %s14367_s21  ;;  %v16575_v61 = vcombine.high %v8997_v10, %v9011_v5  ;;  %v8796_v26 = vcombine.low %v8786_v49, %v8793_v3  ;;  %v8795_v39 = vcombine.high %v8772_v17, %v8779_v1  ;;  %v13455_v41 = vunpack.i.h.bf16 %v16494_v20 }
 0x1a4   : > { %13762 = vrot.lane.b32.xlu0 %v21851_v51, %s14367_s21  ;;  %v16573_v24 = vpop.f32.mrf.mxu0  ;;  %v8797_v15 = vcombine.high %v8786_v49, %v8793_v3  ;;  %v13454_v53 = vunpack.i.l.bf16 %v16494_v20  ;;  %v16608_v1 = vrot.slane %v8794_v12, %v14412_v6  ;;  %v13460_v29 = vunpack.i.h.bf16 %v16518_v45 }
 0x1a5   : > { %12621 = vmatpush3.bf16.msra.mxu1 %v3880_v47  ;;  %11855 = vmatmul.mubr.msk.bf16.gmra.mxu0 %vm592_vm0, %v16445_v7  ;;  %21854 = vst [vmem:[#allocation18_spill] sm:$0xff] %v16575_v61  ;;  %v16579_v31 = vpop.permute.xlu1 %13477  ;;  %v13449_v7 = vunpack.i.l.bf16 %v16482_v27  ;;  %v16584_v8 = vpop.permute.xlu0 %13482  ;;  %v16600_v5 = vpack.i.bf16 %v16575_v61, %v16568_v59  ;;  %v16615_v3 = vrot.slane %v8796_v26, %v14412_v6  ;;  %v16663_v27 = vld [vmem:[%s21388_s1 + $0x10] sm:$0xff]  }
 0x1a6   : > { %3927 = vmatpush1.bf16.msra.mxu0 %v3878_v40  ;;  %12622 = vmatprep.subr.bf16.mxu1 %v16449_v11  ;;  %v16588_v47 = vpop.f32.mrf.mxu0  ;;  %v8811_v32 = vrot.slane %v8795_v39, %v14412_v6  ;;  %v8825_v20 = vrot.slane %v8797_v15, %v14412_v6  ;;  %v21858_v12 = vpack.c.bf16 %v16330_v16, %v21827_v60  ;;  %v21860_v16 = vld [vmem:[#allocation3_spill] sm:$0xff]  ;;  %v13465_v15 = vunpack.i.h.bf16 %v16521_v52 }
 0x1a7   : > { %3928 = vmatprep.subr.bf16.mxu0 %v3876_v30  ;;  %13767 = vrot.lane.b32.xlu1 %v21839_v33, %s14368_s22  ;;  %21855 = vst [vmem:[#allocation23_spill] sm:$0xff] %v16600_v5  ;;  %v16636_v62 = vsel %vm271_vm9, %v13449_v7, %v13450_v55  ;;  %v16648_v60 = vpack.c.bf16 %v13450_v55, %v21860_v16  ;;  %21863 = vst [vmem:[#allocation48_spill] sm:$0xff] %v16663_v27  ;;  %v13480_v0 = vunpack.i.h.bf16 %v16579_v31 }
 0x1a8   : > { %13772 = vrot.lane.b32.xlu0 %v21851_v51, %s14368_s22  ;;  %3948 = vmatprep.mubr.bf16.mxu0 %v21693_v18  ;;  %v16605_v17 = vpop.f32.mrf.mxu0  ;;  %21859 = vst [vmem:[#allocation51_spill] sm:$0xff] %v16636_v62  ;;  %v16653_v39 = vsel %vm283_vm8, %v13385_v46, %v13454_v53  ;;  %v16666_v55 = vsel %vm283_vm8, %v13454_v53, %v13455_v41  ;;  %v21889_v16 = vunpack.i.h.bf16 %v16323_v23  ;;  %v6881_v23 = vld [vmem:[%s21389_s2 + $0x18] sm:$0xff] }
 0x1a9   : > { %12623 = vmatpush3.bf16.msra.mxu1 %v16449_v11  ;;  %v16612_v49 = vpop.permute.xlu1 %13487  ;;  %v16622_v11 = vsel %vm271_vm9, %v13375_v19, %v13449_v7  ;;  %v16626_v40 = vpop.permute.xlu0 %13492  ;;  %21861 = vst [vmem:[#allocation16_spill] sm:$0xff] %v16648_v60  ;;  %21862 = vst [vmem:[#allocation58_spill] sm:$0xff] %v16653_v39  ;;  %v13464_v7 = vunpack.i.l.bf16 %v16521_v52  ;;  %v21865_v54 = vpack.c.bf16 %v16335_v35, %v21828_v28  ;;  %v13470_v35 = vunpack.i.h.bf16 %v16545_v43 }
 0x1aa   : > { %3929 = vmatpush1.bf16.msra.mxu0 %v3875_v56  ;;  %12624 = vmatprep.subr.bf16.mxu1 %v16355_v9  ;;  %21856 = vst [vmem:[#allocation22_spill] sm:$0xff] %v16622_v11  ;;  %v13459_v56 = vunpack.i.l.bf16 %v16518_v45  ;;  %21857 = vst [vmem:[#allocation21_spill] sm:$0xff] %v16626_v40  ;;  %v16633_v26 = vpop.f32.mrf.mxu0  ;;  %v16643_v45 = vld [vmem:[%s21388_s1 + $0x28] sm:$0xff]   ;;  %v16645_v19 = vpop.f32.mrf.mxu1  ;;  %v16679_v30 = vcombine.low %v16608_v1, %v16615_v3  ;;  %v16681_v13 = vcombine.low %v8811_v32, %v8825_v20 }
 0x1ab   : > { %3930 = vmatprep.subr.bf16.mxu0 %v21858_v12  ;;  %13777 = vrot.lane.b32.xlu1 %v21839_v33, %s14369_s23  ;;  %21864 = vst [vmem:[#allocation52_spill] sm:$0xff] %v16666_v55  ;;  %v13469_v28 = vunpack.i.l.bf16 %v16545_v43  ;;  %v13474_v32 = vunpack.i.l.bf16 %v16555_v58  ;;  %v13484_v20 = vunpack.i.l.bf16 %v16584_v8  ;;  %v16705_v43 = vpack.c.bf16 %v13460_v29, %v13455_v41 }
 0x1ac   : > { %13782 = vrot.lane.b32.xlu0 %v21851_v51, %s14369_s23  ;;  %v16658_v12 = vpop.f32.mrf.mxu0  ;;  %21868 = vst [vmem:[#allocation15_spill] sm:$0xff] %v16679_v30  ;;  %21869 = vst [vmem:[#allocation8_spill] sm:$0xff] %v16681_v13  ;;  %v16686_v53 = vsel %vm295_vm7, %v13395_v21, %v13459_v56  ;;  %v16695_v10 = vsel %vm295_vm7, %v13459_v56, %v13460_v29  ;;  %v16703_v14 = vpop.f32.mrf.mxu1  ;;  %v16710_v21 = vsel %vm307_vm6, %v13405_v57, %v13464_v7 }
 0x1ad   : > { %12625 = vmatpush3.bf16.msra.mxu1 %v16355_v9  ;;  %v16671_v46 = vpop.permute.xlu1 %13497  ;;  %21870 = vst [vmem:[#allocation3_spill] sm:$0xff] %v16686_v53  ;;  %21872 = vst [vmem:[#allocation61_spill] sm:$0xff] %v16695_v10  ;;  %v13475_v56 = vunpack.i.h.bf16 %v16555_v58  ;;  %v13485_v52 = vunpack.i.h.bf16 %v16584_v8  ;;  %v16721_v41 = vsel %vm307_vm6, %v13464_v7, %v13465_v15  ;;  %v16734_v57 = vpack.i.bf16 %v16681_v13, %v16566_v34 }
 0x1ae   : > { %3931 = vmatpush1.bf16.msra.mxu0 %v21865_v54  ;;  %v16690_v54 = vpop.permute.xlu0 %13502  ;;  %21873 = vst [vmem:[#allocation62_spill] sm:$0xff] %v16705_v43  ;;  %21874 = vst [vmem:[#allocation63_spill] sm:$0xff] %v16710_v21  ;;  %v16739_v8 = vsel %vm319_vm5, %v13415_v44, %v13469_v28  ;;  %v16745_v63 = vpack.c.bf16 %v13470_v35, %v13465_v15  ;;  %v16748_v58 = vsel %vm319_vm5, %v13469_v28, %v13470_v35  ;;  %v16764_v15 = vpop.f32.mrf.mxu1 }
 0x1af   : > { %21871 = vst [vmem:[#allocation60_spill] sm:$0xff] %v16690_v54  ;;  %13787 = vrot.lane.b32.xlu1 %v21839_v33, %s14370_s24  ;;  %21875 = vst [vmem:[#allocation64_spill] sm:$0xff] %v16721_v41  ;;  %v13479_v44 = vunpack.i.l.bf16 %v16579_v31  ;;  %v16769_v28 = vpack.c.bf16 %v13485_v52, %v13485_v52  ;;  %v13489_v31 = vunpack.i.l.bf16 %v16612_v49  ;;  %v13494_v34 = vunpack.i.l.bf16 %v16626_v40 }
 0x1b0   : > { %13792 = vrot.lane.b32.xlu0 %v21851_v51, %s14370_s24  ;;  %12627 = vmatmul.mubr.msk.bf16.vlgmr.msra.gmra.mxu1 %vm592_vm0, %v16643_v45  ;;  %v16716_v51 = vpop.f32.mrf.mxu0  ;;  %21876 = vst [vmem:[#allocation65_spill] sm:$0xff] %v16734_v57  ;;  %21877 = vst [vmem:[#allocation66_spill] sm:$0xff] %v16739_v8  ;;  %v21883_v57 = vld [vmem:[#allocation59_spill] sm:$0xff]  ;;  %v16803_v59 = vpack.c.bf16 %v13480_v0, %v13475_v56  ;;  %v13504_v55 = vunpack.i.l.bf16 %v16690_v54 }
 0x1b1   : > { %11873 = vmatmul.mubr.msk.bf16.vlgmr.msra.gmra.mxu0 %vm592_vm0, %v16512_v50  ;;  %12640 = vmatprep.mubr.msk.bf16.mxu1 %vm592_vm0, %v16663_v27  ;;  %v16723_v29 = vpop.permute.xlu1 %13507  ;;  %21879 = vst [vmem:[#allocation68_spill] sm:$0xff] %v16745_v63  ;;  %21880 = vst [vmem:[#allocation69_spill] sm:$0xff] %v16748_v58  ;;  %v21881_v50 = vunpack.i.h.bf16 %v16293_v36  ;;  %v21884_v61 = vpack.i.bf16 %v15992_v4, %v21883_v57  ;;  %v21885_v36 = vunpack.i.h.bf16 %v16352_v38 }
 0x1b2   : > { %3958 = vmatprep.mubr.bf16.mxu0 %v21693_v18  ;;  %v16741_v7 = vpop.permute.xlu0 %13512  ;;  %21886 = vst [vmem:[#allocation71_spill] sm:$0xff] %v16769_v28  ;;  %v16779_v57 = vsel %vm331_vm3, %v13474_v32, %v13475_v56  ;;  %v16798_v62 = vsel %vm343_vm1, %v21889_v16, %v13479_v44  ;;  %21891 = vst [vmem:[#allocation75_spill] sm:$0xff] %v16803_v59  ;;  %v13510_v56 = vunpack.i.h.bf16 %v16723_v29  ;;  %v13509_v60 = vunpack.i.l.bf16 %v16723_v29 }
 0x1b3   : > { %21878 = vst [vmem:[#allocation67_spill] sm:$0xff] %v16741_v7  ;;  %13797 = vrot.lane.b32.xlu1 %v21839_v33, %s14371_s25  ;;  %v16753_v5 = vsel %vm331_vm3, %v21881_v50, %v13474_v32  ;;  %v6878_v33 = vld [vmem:[%s21389_s2] sm:$0xff]  ;;  %v4643_v35 = vsel %vm355_vm4, %v21885_v36, %v13484_v20  ;;  %v13490_v50 = vunpack.i.h.bf16 %v16612_v49  ;;  %v16776_v4 = vpop.f32.mrf.mxu0  ;;  %21887 = vst [vmem:[#allocation72_spill] sm:$0xff] %v16779_v57  ;;  %v13514_v10 = vunpack.i.l.bf16 %v16741_v7 }
 0x1b4   : > { %21882 = vst [vmem:[#allocation70_spill] sm:$0xff] %v16753_v5  ;;  %13802 = vrot.lane.b32.xlu0 %v21884_v61, %s14371_s25  ;;  %v6879_v61 = vld [vmem:[%s21389_s2 + $0x8] sm:$0xff]  ;;  %v16785_v36 = vsel %vm355_vm4, %v13484_v20, %v13485_v52  ;;  %v4660_v32 = vpack.c.bf16 %v4643_v35, %v4643_v35  ;;  %21890 = vst [vmem:[#allocation74_spill] sm:$0xff] %v16798_v62  ;;  %v6880_v52 = vld [vmem:[%s21389_s2 + $0x10] sm:$0xff]  ;;  %v12530_v20 = vpop.f32.mrf.mxu1  ;;  %v16806_v49 = vsel %vm343_vm1, %v13479_v44, %v13480_v0 }
 0x1b5   : > { %v16782_v38 = vpop.permute.xlu1 %13517  ;;  %21888 = vst [vmem:[#allocation73_spill] sm:$0xff] %v16785_v36  ;;  %v16793_v11 = vpop.f32.mrf.mxu0  ;;  %21892 = vst [vmem:[#allocation76_spill] sm:$0xff] %v16806_v49  ;;  %v16821_v0 = vsel %vm599_vm2, %v16769_v28, 0  ;;  %v13500_v44 = vunpack.i.h.bf16 %v16671_v46  ;;  %v16833_v35 = vcombine.high %v16608_v1, %v16615_v3  ;;  %v16888_v13 = vadd.f32 %v12530_v20, %v16594_v42  ;;  %v16980_v36 = vld [vmem:[%s14410_s17 + $0xa8] ss:$8 sm:$0x7] }
 0x1b6   : > { %v16791_v9 = vpop.permute.xlu0 %13522  ;;  %21894 = vst [vmem:[#allocation78_spill] sm:$0xff] %v16821_v0  ;;  %v823_v1 = vpop.f32.mrf.mxu1  ;;  %v13519_v8 = vunpack.i.l.bf16 %v16782_v38 }
 0x1b7   : > { %6884 = vperm.xlu1 %13085, %v6878_v33   ;;  %v16809_v33 = vsel %vm271_vm9, %v13489_v31, %v13490_v50  ;;  %v774_v16 = vpop.f32.mrf.mxu0  ;;  %v13499_v31 = vunpack.i.l.bf16 %v16671_v46  ;;  %21895 = vst [vmem:[#allocation79_spill] sm:$0xff] %v16833_v35  ;;  %v16840_v46 = vsel %vm599_vm2, %v4660_v32, 0  ;;  %v21898_v32 = vld [vmem:[#allocation29_spill] sm:$0xff]  ;;  %v16865_v29 = vpack.i.bf16 %v16679_v30, %v16833_v35 }
 0x1b8   : > { %6889 = vperm.xlu0 %13084, %v6879_v61   ;;  %21893 = vst [vmem:[#allocation77_spill] sm:$0xff] %v16809_v33  ;;  %21896 = vst [vmem:[#allocation80_spill] sm:$0xff] %v16840_v46  ;;  %v13524_v63 = vunpack.i.l.bf16 %v16791_v9  ;;  %v12531_v3 = vpop.f32.mrf.mxu1  ;;  %v16890_v30 = vpack.c.bf16 %v13514_v10, %v13504_v55 }
 0x1b9   : > { %11874 = vmatmul.mubr.msk.bf16.gmra.mxu0 %vm592_vm0, %v16643_v45  ;;  %v16825_v61 = vpop.permute.xlu1 %13527  ;;  %v16828_v45 = vsel %vm271_vm9, %v13490_v50, %v13494_v34  ;;  %v776_v53 = vpop.f32.mrf.mxu0  ;;  %v16857_v41 = vsel %vm283_vm8, %v13499_v31, %v13500_v44  ;;  %v21901_v31 = vld [vmem:[#allocation30_spill] sm:$0xff]  ;;  %v16915_v20 = vadd.f32 %v12531_v3, %v16703_v14 }
 0x1ba   : > { %4917 = vmatprep.mubr.bf16.mxu0 %v21693_v18  ;;  %v16837_v39 = vpop.permute.xlu0 %13532  ;;  %v13530_v5 = vunpack.i.h.bf16 %v16825_v61  ;;  %v13529_v62 = vunpack.i.l.bf16 %v16825_v61  ;;  %v16936_v42 = vadd.f32 %v776_v53, %v16588_v47  ;;  %v16956_v53 = vld [vmem:[%s14410_s17 + $0x48] ss:$8 sm:$0x7] }
 0x1bb   : > { %6894 = vperm.xlu1 %13085, %v6880_v52   ;;  %v780_v43 = vpop.f32.mrf.mxu0  ;;  %v21897_v52 = vld [vmem:[#allocation31_spill] sm:$0xff]  ;;  %v13534_v57 = vunpack.i.l.bf16 %v16837_v39 }
 0x1bc   : > { %6899 = vperm.xlu0 %13084, %v6881_v23   ;;  %v16850_v21 = vpack.c.bf16 %v13494_v34, %v21897_v52  ;;  %21900 = vst [vmem:[#allocation31_spill] sm:$0xff] %v16865_v29  ;;  %v16868_v34 = vsel %vm295_vm7, %v13509_v60, %v13510_v56  ;;  %v13520_v52 = vunpack.i.h.bf16 %v16782_v38  ;;  %v16880_v29 = vsel %vm283_vm8, %v13500_v44, %v13504_v55 }
 0x1bd   : > { %v16859_v23 = vpop.permute.xlu1 %13537  ;;  %v782_v58 = vpop.f32.mrf.mxu0  ;;  %v16883_v60 = vsel %vm295_vm7, %v13510_v56, %v13514_v10  ;;  %v771_v38 = vadd.f32 %v16776_v4, %v16538_v25  ;;  %v773_v4 = vadd.f32 %v16793_v11, %v16559_v37  ;;  %v824_v25 = vadd.f32 %v823_v1, %v16645_v19 }
 0x1be   : > { %v16872_v50 = vpop.permute.xlu0 %13542  ;;  %v16900_v49 = vsel %vm307_vm6, %v13519_v8, %v13520_v52  ;;  %v16912_v55 = vadd.f32 %v774_v16, %v16573_v24  ;;  %v21902_v8 = vld [vmem:[#allocation33_spill] sm:$0xff]  ;;  %v826_v37 = vpop.f32.mrf.mxu1  ;;  %v16920_v11 = vsel %vm307_vm6, %v13520_v52, %v13524_v63  ;;  %v13540_v19 = vunpack.i.h.bf16 %v16859_v23 }
 0x1bf   : > { %13807 = vrot.lane.b32.xlu1 %v21901_v31, %s14365_s19  ;;  %v784_v35 = vpop.f32.mrf.mxu0  ;;  %v13539_v61 = vunpack.i.l.bf16 %v16859_v23  ;;  %v16925_v1 = vadd.f32 %v826_v37, %v16764_v15  ;;  %v16928_v24 = vsel %vm319_vm5, %v13529_v62, %v13530_v5  ;;  %v16933_v52 = vsel %vm319_vm5, %v13530_v5, %v13534_v57  ;;  %v21904_v37 = vld [vmem:[#allocation34_spill] sm:$0xff] }
 0x1c0   : > { %13812 = vrot.lane.b32.xlu0 %v21901_v31, %s14364_s18  ;;  %v13544_v15 = vunpack.i.l.bf16 %v16872_v50  ;;  %v16940_v23 = vadd.f32 %v780_v43, %v16605_v17  ;;  %v16946_v59 = vpack.c.bf16 %v13534_v57, %v13524_v63  ;;  %v16953_v17 = vld [vmem:[%s14410_s17 + $0x18] ss:$8 sm:$0x7]  ;;  %v16962_v63 = vadd.f32 %v782_v58, %v16633_v26 }
 0x1c1   : > { %v16895_v44 = vpop.permute.xlu1 %13547  ;;  %v786_v56 = vpop.f32.mrf.mxu0  ;;  %v16959_v43 = vsel %vm331_vm3, %v13539_v61, %v13540_v19  ;;  %v16972_v40 = vadd.f32 %v784_v35, %v16658_v12  ;;  %v16977_v58 = vld [vmem:[%s14410_s17 + $0x78] ss:$8 sm:$0x7] }
 0x1c2   : > { %v16905_v10 = vpop.permute.xlu0 %13552  ;;  %v13550_v14 = vunpack.i.h.bf16 %v16895_v44  ;;  %v13549_v16 = vunpack.i.l.bf16 %v16895_v44  ;;  %v16990_v12 = vsel %vm331_vm3, %v13540_v19, %v13544_v15  ;;  %v16993_v35 = vld [vmem:[%s14410_s17 + $0xd8] ss:$8 sm:$0x7] }
 0x1c3   : > { %13817 = vrot.lane.b32.xlu1 %v21901_v31, %s14366_s20  ;;  %v13554_v44 = vunpack.i.l.bf16 %v16905_v10 }
 0x1c4   : > { %13822 = vrot.lane.b32.xlu0 %v21902_v8, %s14371_s25  ;;  %v16969_v54 = vsel %vm343_vm1, %v13549_v16, %v13550_v14  ;;  %v9410_v16 = vcombine.low %v16953_v17, %v16956_v53 }
 0x1c5   : > { %v13558_v3 = vpop.permute.xlu1 %13557  ;;  %v4826_v19 = vsel %vm343_vm1, %v13550_v14, %v13554_v44 }
 0x1c6   : > { %v16942_v62 = vpop.permute.xlu0 %13562  ;;  %v13560_v46 = vunpack.i.h.bf16 %v13558_v3  ;;  %v13559_v5 = vunpack.i.l.bf16 %v13558_v3  ;;  %v12544_v47 = vpop.f32.mrf.mxu1  ;;  %v16983_v3 = vadd.f32 %v786_v56, %v16716_v51 }
 0x1c7   : > { %21903 = vst [vmem:[#allocation29_spill] sm:$0xff] %v16942_v62  ;;  %13827 = vrot.lane.b32.xlu1 %v21904_v37, %s14369_s23  ;;  %v13564_v27 = vunpack.i.l.bf16 %v16942_v62  ;;  %v1099_v57 = vpop.f32.mrf.mxu0 }
 0x1c8   : > { %13832 = vrot.lane.b32.xlu0 %v21904_v37, %s14370_s24  ;;  %v1167_v62 = vadd.f32 %v1099_v57, %v771_v38  ;;  %v1152_v31 = vpop.f32.mrf.mxu1  ;;  %v16996_v38 = vld [vmem:[%s14410_s17 + $0x108] ss:$8 sm:$0x7]  ;;  %v21906_v57 = vld [vmem:[#allocation26_spill] sm:$0xff] }
 0x1c9   : > { %v4855_v61 = vpack.c.bf16 %v13564_v27, %v13564_v27  ;;  %v16974_v26 = vpop.permute.xlu1 %13567  ;;  %v1169_v0 = vadd.f32 %v1152_v31, %v824_v25  ;;  %v1101_v28 = vpop.f32.mrf.mxu0  ;;  %v4836_v25 = vsel %vm355_vm4, %v13559_v5, %v13560_v46 }
 0x1ca   : > { %v16985_v18 = vpop.permute.xlu0 %13572  ;;  %v1168_v56 = vadd.f32 %v1101_v28, %v773_v4  ;;  %v17001_v31 = vpop.f32.mrf.mxu1  ;;  %v4852_v28 = vpack.c.bf16 %v13554_v44, %v13544_v15  ;;  %v1203_v5 = vadd.f32 %v21906_v57, %v1167_v62  ;;  %v4853_v7 = vpack.c.bf16 %v4836_v25, %v4836_v25 }
 0x1cb   : > { %21905 = vst [vmem:[#allocation33_spill] sm:$0xff] %v16985_v18  ;;  %13837 = vrot.lane.b32.xlu1 %v21904_v37, %s14367_s21  ;;  %12849 = vmatprep.subr.msk.bf16.mxu1 %vm599_vm2, %v4855_v61  ;;  %v1205_v33 = vadd.f32 %v21906_v57, %v1169_v0  ;;  %v21907_v18 = vlaneseq  ;;  %v1103_v17 = vpop.f32.mrf.mxu0  ;;  %v4851_v62 = vpack.c.bf16 %v4826_v19, %v16990_v12  ;;  %v21913_v12 = vld [vmem:[#allocation25_spill] sm:$0xff] }
 0x1cc   : > { %13842 = vrot.lane.b32.xlu0 %v21904_v37, %s14368_s22  ;;  %v1204_v14 = vadd.f32 %v21906_v57, %v1168_v56  ;;  %v1155_v0 = vpop.f32.mrf.mxu1  ;;  %v17032_v56 = vld [vmem:[%s14410_s17 + $0x138] ss:$8 sm:$0x7]  ;;  %v1170_v37 = vadd.f32 %v1103_v17, %v16912_v55 }
 0x1cd   : > { %vm17010_vm10 = vcmp.lt.s32.totalorder %v21907_v18, 288  ;;  %v4837_v18 = vsel %vm355_vm4, %v13560_v46, %v13564_v27  ;;  %v17021_v53 = vpop.permute.xlu1 %13577  ;;  %v1229_v44 = vcombine.high %v1205_v33, %v1205_v33  ;;  %v1172_v51 = vadd.f32 %v1155_v0, %v16925_v1  ;;  %v1105_v4 = vpop.f32.mrf.mxu0  ;;  %v17035_v27 = vld [vmem:[%s14410_s17 + $0x168] ss:$8 sm:$0x7] }
 0x1ce   : > { %v21909_v22 = vsel %vm17010_vm10, 4294967295, %v21908_v22  ;;  %21911 = vst [vmem:[#allocation26_spill] sm:$0xff] %v17021_v53  ;;  %v17026_v2 = vpop.permute.xlu0 %13582  ;;  %v1175_v46 = vadd.f32 %v12544_v47, %v16888_v13  ;;  %v1227_v57 = vcombine.low %v1203_v5, %v1204_v14  ;;  %v1228_v15 = vcombine.high %v1203_v5, %v1204_v14 }
 0x1cf   : > { %21910 = vst [vmem:[#allocation34_spill] sm:$0xff] %v21909_v22  ;;  %21912 = vst [vmem:[#allocation81_spill] sm:$0xff] %v17026_v2  ;;  %13847 = vrot.lane.b32.xlu1 %v21902_v8, %s14364_s18  ;;  %v1257_v1 = vrot.slane %v1229_v44, %v14412_v6  ;;  %v1208_v25 = vadd.f32 %v21913_v12, %v1172_v51  ;;  %v4854_v19 = vpack.c.bf16 %v4837_v18, %v4837_v18  ;;  %v1109_v47 = vpop.f32.mrf.mxu0 }
 0x1d0   : > { %13852 = vrot.lane.b32.xlu0 %v21902_v8, %s14366_s20  ;;  %v4883_v0 = vsel %vm599_vm2, %v4855_v61, 0  ;;  %v1250_v2 = vrot.slane %v1205_v33, %v14412_v6  ;;  %v1236_v53 = vrot.slane %v1227_v57, %v14412_v6  ;;  %v1243_v13 = vrot.slane %v1228_v15, %v14412_v6 }
 0x1d1   : > { %12631 = vmatpush3.bf16.msra.mxu1 %v4883_v0  ;;  %v17048_v55 = vpop.permute.xlu1 %13587  ;;  %v9413_v17 = vcombine.low %v17032_v56, %v17035_v27  ;;  %v1296_v5 = vcombine.high %v1208_v25, %v1208_v25  ;;  %11931 = vmatprep.subr.msk.bf16.mxu0 %vm599_vm2, %v4854_v19  ;;  %v1171_v51 = vadd.f32 %v1105_v4, %v16936_v42  ;;  %v4877_v61 = vsel %vm599_vm2, %v4853_v7, 0  ;;  %v21914_v4 = vld [vmem:[#allocation27_spill] sm:$0xff] }
 0x1d2   : > { %12632 = vmatprep.subr.bf16.mxu1 %v4852_v28  ;;  %v17055_v33 = vpop.permute.xlu0 %13592  ;;  %v17058_v14 = vrot.slane %v9410_v16, %v14412_v6  ;;  %v1258_v18 = vcombine.low %v1236_v53, %v1250_v2  ;;  %v1259_v15 = vcombine.high %v1236_v53, %v1250_v2  ;;  %v1260_v44 = vcombine.low %v1243_v13, %v1257_v1 }
 0x1d3   : > { %v1261_v57 = vcombine.high %v1243_v13, %v1257_v1  ;;  %4892 = vmatpush1.bf16.msra.mxu0 %v4877_v61  ;;  %v13525_v42 = vunpack.i.h.bf16 %v16791_v9  ;;  %v17067_v7 = vadd.f32 %v21914_v4, %v1175_v46  ;;  %v1206_v19 = vadd.f32 %v21913_v12, %v1170_v37  ;;  %13857 = vrot.lane.b32.xlu1 %v16319_v48, %s14364_s18  ;;  %v1111_v46 = vpop.f32.mrf.mxu0 }
 0x1d4   : > { %v1207_v16 = vadd.f32 %v21913_v12, %v1171_v51  ;;  %4893 = vmatprep.subr.bf16.mxu0 %v4851_v62  ;;  %v1268_v2 = vrot.slane %v1258_v18, %v14412_v6  ;;  %v1275_v53 = vrot.slane %v1260_v44, %v14412_v6  ;;  %v1282_v1 = vrot.slane %v1259_v15, %v14412_v6 }
 0x1d5   : > { %v1289_v0 = vrot.slane %v1261_v57, %v14412_v6  ;;  %12633 = vmatpush3.bf16.msra.mxu1 %v4852_v28  ;;  %v17077_v37 = vpop.permute.xlu1 %13597  ;;  %v13535_v62 = vunpack.i.h.bf16 %v16837_v39  ;;  %v1324_v12 = vrot.slane %v1296_v5, %v14412_v6  ;;  %13862 = vrot.lane.b32.xlu0 %v16319_v48, %s14366_s20  ;;  %v21915_v5 = vpack.c.bf16 %v16969_v54, %v16959_v43 }
 0x1d6   : > { %v1294_v13 = vcombine.low %v1206_v19, %v1207_v16  ;;  %v1295_v51 = vcombine.high %v1206_v19, %v1207_v16  ;;  %12634 = vmatprep.subr.bf16.mxu1 %v16946_v59  ;;  %v17084_v61 = vpop.permute.xlu0 %13602  ;;  %v1290_v28 = vcombine.high %v1268_v2, %v1268_v2  ;;  %v1291_v18 = vcombine.high %v1275_v53, %v1275_v53 }
 0x1d7   : > { %v1292_v15 = vcombine.high %v1282_v1, %v1282_v1  ;;  %v1293_v44 = vcombine.high %v1289_v0, %v1289_v0  ;;  %1531 = vst.msk [vmem:[%s17063_s26] ss:$8 sm:$0x7] %vm17010_vm10, %v1268_v2  ;;  %11708 = vst.msk [vmem:[%s17063_s26 + $0x18] ss:$8 sm:$0x7] %vm17010_vm10, %v1282_v1  ;;  %4894 = vmatpush1.bf16.msra.mxu0 %v21915_v5  ;;  %v13545_v57 = vunpack.i.h.bf16 %v16872_v50  ;;  %13867 = vrot.lane.b32.xlu1 %v21902_v8, %s14365_s19  ;;  %v1113_v8 = vpop.f32.mrf.mxu0 }
 0x1d8   : > { %11711 = vst.msk [vmem:[%s17063_s26 + $0x60] ss:$8 sm:$0x7] %vm17010_vm10, %v1275_v53  ;;  %11712 = vst.msk [vmem:[%s17063_s26 + $0x78] ss:$8 sm:$0x7] %vm17010_vm10, %v1289_v0  ;;  %v1317_v19 = vrot.slane %v1208_v25, %v14412_v6  ;;  %v1303_v16 = vrot.slane %v1294_v13, %v14412_v6  ;;  %v1310_v2 = vrot.slane %v1295_v51, %v14412_v6  ;;  %v13595_v9 = vunpack.i.h.bf16 %v17055_v33 }
 0x1d9   : > { %v21916_v1 = vpack.c.bf16 %v16933_v52, %v16920_v11  ;;  %11709 = vst.msk [vmem:[%s17063_s26 + $0x30] ss:$8 sm:$0x7] %vm17010_vm10, %v1290_v28  ;;  %11710 = vst.msk [vmem:[%s17063_s26 + $0x48] ss:$8 sm:$0x7] %vm17010_vm10, %v1292_v15  ;;  %v1178_v54 = vadd.f32 %v17001_v31, %v16915_v20  ;;  %v1173_v11 = vadd.f32 %v1109_v47, %v16940_v23  ;;  %12635 = vmatpush3.bf16.msra.mxu1 %v16946_v59  ;;  %v17127_v43 = vpop.permute.xlu1 %5460 }
 0x1da   : > { %11713 = vst.msk [vmem:[%s17063_s26 + $0x90] ss:$8 sm:$0x7] %vm17010_vm10, %v1291_v18  ;;  %11714 = vst.msk [vmem:[%s17063_s26 + $0xa8] ss:$8 sm:$0x7] %vm17010_vm10, %v1293_v44  ;;  %v1174_v52 = vadd.f32 %v1111_v46, %v16962_v63  ;;  %v21918_v25 = vcombine.low %v16977_v58, %v16980_v36  ;;  %v1325_v0 = vcombine.low %v1303_v16, %v1317_v19  ;;  %12636 = vmatprep.subr.bf16.mxu1 %v16890_v30  ;;  %v17136_v20 = vpop.permute.xlu0 %5465  ;;  %v1115_v44 = vpop.f32.mrf.mxu0 }
 0x1db   : > { %4895 = vmatprep.subr.bf16.mxu0 %v21916_v1  ;;  %21917 = vst [vmem:[#allocation25_spill] sm:$0xff] %v17127_v43  ;;  %v1326_v13 = vcombine.high %v1303_v16, %v1317_v19  ;;  %v1327_v51 = vcombine.low %v1310_v2, %v1324_v12  ;;  %v1328_v28 = vcombine.high %v1310_v2, %v1324_v12  ;;  %21919 = vst [vmem:[#allocation27_spill] sm:$0xff] %v17136_v20  ;;  %v21996_v20 = vld [vmem:[#allocation38_spill] sm:$0xff] }
 0x1dc   : > { %v17133_v53 = vrot.slane %v21918_v25, %v14412_v6  ;;  %v1363_v23 = vcombine.high %v17067_v7, %v17067_v7  ;;  %v1384_v59 = vrot.slane %v17067_v7, %v14412_v6  ;;  %v1209_v63 = vadd.f32 %v21914_v4, %v1173_v11  ;;  %13872 = vrot.lane.b32.xlu0 %v16319_v48, %s14365_s19 }
 0x1dd   : > { %v1210_v36 = vadd.f32 %v21914_v4, %v1174_v52  ;;  %v21920_v58 = vpack.c.bf16 %v16928_v24, %v16900_v49  ;;  %v1335_v31 = vrot.slane %v1325_v0, %v14412_v6  ;;  %v1342_v47 = vrot.slane %v1327_v51, %v14412_v6  ;;  %v21922_v49 = vld [vmem:[#allocation28_spill] sm:$0xff]  ;;  %12637 = vmatpush3.bf16.msra.mxu1 %v16890_v30  ;;  %v17161_v5 = vpop.permute.xlu1 %5470 }
 0x1de   : > { %v1349_v46 = vrot.slane %v1326_v13, %v14412_v6  ;;  %v1356_v12 = vrot.slane %v1328_v28, %v14412_v6  ;;  %v21921_v7 = vpack.c.bf16 %v16883_v60, %v16880_v29  ;;  %v17156_v24 = vadd.f32 %v21922_v49, %v1178_v54  ;;  %21923 = vst [vmem:[#allocation28_spill] sm:$0xff] %v17161_v5  ;;  %v17176_v48 = vpop.permute.xlu0 %5475 }
 0x1df   : > { %4896 = vmatpush1.bf16.msra.mxu0 %v21920_v58  ;;  %v1361_v18 = vcombine.low %v1209_v63, %v1210_v36  ;;  %v1362_v15 = vcombine.high %v1209_v63, %v1210_v36  ;;  %v1357_v19 = vcombine.high %v1335_v31, %v1335_v31  ;;  %v1358_v29 = vcombine.high %v1342_v47, %v1342_v47  ;;  %v21932_v63 = vld [vmem:[#allocation47_spill] sm:$0xff] }
 0x1e0   : > { %4897 = vmatprep.subr.bf16.mxu0 %v21921_v7  ;;  %v1359_v60 = vcombine.high %v1349_v46, %v1349_v46  ;;  %v1360_v16 = vcombine.high %v1356_v12, %v1356_v12  ;;  %11715 = vst.msk [vmem:[%s17063_s26 + $0xc0] ss:$8 sm:$0x7] %vm17010_vm10, %v1335_v31  ;;  %11716 = vst.msk [vmem:[%s17063_s26 + $0xd8] ss:$8 sm:$0x7] %vm17010_vm10, %v1349_v46  ;;  %12638 = vmatprep.subr.bf16.mxu1 %v16850_v21  ;;  %v21554_v52 = vunpack.i.l.bf16 %v16974_v26 }
 0x1e1   : > { %11719 = vst.msk [vmem:[%s17063_s26 + $0x120] ss:$8 sm:$0x7] %vm17010_vm10, %v1342_v47  ;;  %11720 = vst.msk [vmem:[%s17063_s26 + $0x138] ss:$8 sm:$0x7] %vm17010_vm10, %v1356_v12  ;;  %v1391_v30 = vrot.slane %v1363_v23, %v14412_v6  ;;  %v1370_v2 = vrot.slane %v1361_v18, %v14412_v6  ;;  %v1377_v1 = vrot.slane %v1362_v15, %v14412_v6  ;;  %v17222_v58 = vpop.permute.xlu1 %13607  ;;  %12639 = vmatpush3.bf16.msra.mxu1 %v16850_v21 }
 0x1e2   : > { %21924 = vst [vmem:[#allocation82_spill] sm:$0xff] %v17176_v48  ;;  %v1176_v54 = vadd.f32 %v1113_v8, %v16972_v40  ;;  %v21925_v11 = vpack.c.bf16 %v16868_v34, %v16857_v41  ;;  %11717 = vst.msk [vmem:[%s17063_s26 + $0xf0] ss:$8 sm:$0x7] %vm17010_vm10, %v1357_v19  ;;  %v1177_v40 = vadd.f32 %v1115_v44, %v16983_v3  ;;  %v21927_v34 = vld [vmem:[#allocation4_spill] sm:$0xff]  ;;  %v21928_v8 = vld [vmem:[#allocation7_spill] sm:$0xff] }
 0x1e3   : > { %11718 = vst.msk [vmem:[%s17063_s26 + $0x108] ss:$8 sm:$0x7] %vm17010_vm10, %v1359_v60  ;;  %11721 = vst.msk [vmem:[%s17063_s26 + $0x150] ss:$8 sm:$0x7] %vm17010_vm10, %v1358_v29  ;;  %v21926_v41 = vpack.c.bf16 %v16828_v45, %v21898_v32  ;;  %v21929_v25 = vpack.i.bf16 %v21927_v34, %v21928_v8  ;;  %v21930_v0 = vcombine.low %v16993_v35, %v16996_v38 }
 0x1e4   : > { %4898 = vmatpush1.bf16.msra.mxu0 %v21925_v11  ;;  %11722 = vst.msk [vmem:[%s17063_s26 + $0x168] ss:$8 sm:$0x7] %vm17010_vm10, %v1360_v16  ;;  %v17216_v3 = vrot.slane %v9413_v17, %v14412_v6  ;;  %v1392_v51 = vcombine.low %v1370_v2, %v1384_v59  ;;  %v1393_v45 = vcombine.high %v1370_v2, %v1384_v59  ;;  %v21931_v23 = vld [vmem:[#allocation13_spill] sm:$0xff]  ;;  %21934 = vst [vmem:[#allocation83_spill] sm:$0xff] %v17222_v58  ;;  %v17235_v59 = vpop.permute.xlu0 %13612  ;;  %v21939_v44 = vld [vmem:[#allocation26_spill] sm:$0xff] }
 0x1e5   : > { %4899 = vmatprep.subr.bf16.mxu0 %v21926_v41  ;;  %13877 = vrot.lane.b32.xlu1 %v21929_v25, %s14371_s25  ;;  %v17210_v13 = vrot.slane %v21930_v0, %v14412_v6  ;;  %v1394_v32 = vcombine.low %v1377_v1, %v1391_v30  ;;  %v1395_v28 = vcombine.high %v1377_v1, %v1391_v30  ;;  %v21935_v35 = vld [vmem:[#allocation33_spill] sm:$0xff]  ;;  %v21556_v19 = vunpack.i.l.bf16 %v21939_v44  ;;  %v21940_v16 = vld [vmem:[#allocation71_spill] sm:$0xff]  ;;  %v17267_v41 = vpop.permute.xlu1 %13617 }
 0x1e6   : > { %v21933_v36 = vpack.i.bf16 %v21931_v23, %v21932_v63  ;;  %v21555_v38 = vunpack.i.l.bf16 %v21935_v35  ;;  %v1430_v31 = vcombine.high %v17156_v24, %v17156_v24  ;;  %v1212_v56 = vadd.f32 %v21922_v49, %v1176_v54  ;;  %v17233_v17 = vld [vmem:[%s21388_s1 + $0x18] sm:$0xff]   ;;  %12850 = vmatprep.subr.msk.bf16.mxu1 %vm599_vm2, %v21940_v16 }
 0x1e7   : > { %v1213_v27 = vadd.f32 %v21922_v49, %v1177_v40  ;;  %v1402_v47 = vrot.slane %v1392_v51, %v14412_v6  ;;  %v1409_v46 = vrot.slane %v1394_v32, %v14412_v6  ;;  %v1416_v12 = vrot.slane %v1393_v45, %v14412_v6  ;;  %v21936_v21 = vld [vmem:[#allocation77_spill] sm:$0xff]  ;;  %12641 = vmatmul.mubr.msk.bf16.vlgmr.msra.gmra.mxu1 %vm592_vm0, %v17233_v17 }
 0x1e8   : > { %13882 = vrot.lane.b32.xlu0 %v21933_v36, %s14371_s25  ;;  %v1423_v7 = vrot.slane %v1395_v28, %v14412_v6  ;;  %v21937_v49 = vld [vmem:[#allocation5_spill] sm:$0xff]  ;;  %v1451_v15 = vrot.slane %v17156_v24, %v14412_v6  ;;  %v21943_v24 = vld [vmem:[#allocation30_spill] sm:$0xff]  ;;  %v1458_v51 = vrot.slane %v1430_v31, %v14412_v6  ;;  %v17277_v28 = vpop.permute.xlu0 %13622 }
 0x1e9   : > { %v21938_v18 = vpack.c.bf16 %v21936_v21, %v21937_v49  ;;  %v1428_v29 = vcombine.low %v1212_v56, %v1213_v27  ;;  %v1429_v60 = vcombine.high %v1212_v56, %v1213_v27  ;;  %v21941_v30 = vld [vmem:[#allocation73_spill] sm:$0xff]  ;;  %v1424_v1 = vcombine.high %v1402_v47, %v1402_v47  ;;  %11723 = vst.msk [vmem:[%s17063_s26 + $0x180] ss:$8 sm:$0x7] %vm17010_vm10, %v1402_v47  ;;  %v21949_v21 = vld [vmem:[#allocation78_spill] sm:$0xff]  ;;  %v21950_v49 = vld [vmem:[#allocation48_spill] sm:$0xff] }
 0x1ea   : > { %v21942_v2 = vpack.c.bf16 %v21941_v30, %v21941_v30  ;;  %v1425_v54 = vcombine.high %v1409_v46, %v1409_v46  ;;  %v1426_v11 = vcombine.high %v1416_v12, %v1416_v12  ;;  %v1427_v40 = vcombine.high %v1423_v7, %v1423_v7  ;;  %11724 = vst.msk [vmem:[%s17063_s26 + $0x198] ss:$8 sm:$0x7] %vm17010_vm10, %v1416_v12  ;;  %v21944_v25 = vld [vmem:[#allocation29_spill] sm:$0xff]  ;;  %v21951_v30 = vld [vmem:[#allocation80_spill] sm:$0xff] }
 0x1eb   : > { %4900 = vmatpush1.bf16.msra.mxu0 %v21938_v18  ;;  %11727 = vst.msk [vmem:[%s17063_s26 + $0x1e0] ss:$8 sm:$0x7] %vm17010_vm10, %v1409_v46  ;;  %11728 = vst.msk [vmem:[%s17063_s26 + $0x1f8] ss:$8 sm:$0x7] %vm17010_vm10, %v1423_v7  ;;  %13887 = vrot.lane.b32.xlu1 %v21943_v24, %s14369_s23  ;;  %v13565_v0 = vunpack.i.h.bf16 %v21944_v25  ;;  %v1437_v45 = vrot.slane %v1428_v29, %v14412_v6  ;;  %v1444_v32 = vrot.slane %v1429_v60, %v14412_v6 }
 0x1ec   : > { %11938 = vmatprep.subr.msk.bf16.mxu0 %vm599_vm2, %v21942_v2  ;;  %13892 = vrot.lane.b32.xlu0 %v21943_v24, %s14370_s24  ;;  %v21945_v56 = vld [vmem:[#allocation21_spill] sm:$0xff]  ;;  %v21947_v46 = vld [vmem:[#allocation60_spill] sm:$0xff]  ;;  %11725 = vst.msk [vmem:[%s17063_s26 + $0x1b0] ss:$8 sm:$0x7] %vm17010_vm10, %v1424_v1  ;;  %v21952_v1 = vld [vmem:[#allocation67_spill] sm:$0xff]  ;;  %v21559_v2 = vunpack.i.h.bf16 %v17222_v58 }
 0x1ed   : > { %v21946_v27 = vunpack.i.h.bf16 %v21945_v56  ;;  %v21948_v12 = vunpack.i.h.bf16 %v21947_v46  ;;  %11726 = vst.msk [vmem:[%s17063_s26 + $0x1c8] ss:$8 sm:$0x7] %vm17010_vm10, %v1426_v11  ;;  %11729 = vst.msk [vmem:[%s17063_s26 + $0x210] ss:$8 sm:$0x7] %vm17010_vm10, %v1425_v54  ;;  %12645 = vmatpush3.bf16.msra.mxu1 %v21949_v21  ;;  %v1459_v18 = vcombine.low %v1437_v45, %v1451_v15  ;;  %v1460_v29 = vcombine.high %v1437_v45, %v1451_v15 }
 0x1ee   : > { %11730 = vst.msk [vmem:[%s17063_s26 + $0x228] ss:$8 sm:$0x7] %vm17010_vm10, %v1427_v40  ;;  %11932 = vmatmul.mubr.msk.bf16.vlgmr.msra.gmra.mxu0 %vm592_vm0, %v21950_v49  ;;  %v1461_v60 = vcombine.low %v1444_v32, %v1458_v51  ;;  %v1462_v16 = vcombine.high %v1444_v32, %v1458_v51  ;;  %v21953_v54 = vunpack.i.h.bf16 %v21952_v1  ;;  %v21954_v40 = vld [vmem:[#allocation81_spill] sm:$0xff]  ;;  %v21955_v46 = vld [vmem:[#allocation75_spill] sm:$0xff]  ;;  %v21956_v15 = vld [vmem:[#allocation76_spill] sm:$0xff]  ;;  %v17325_v32 = vpop.permute.xlu1 %13627 }
 0x1ef   : > { %v17285_v31 = vsel %vm271_vm9, %v21946_v27, %v21554_v52  ;;  %v17293_v7 = vsel %vm283_vm8, %v21948_v12, %v21555_v38  ;;  %5019 = vmatpush1.bf16.msra.mxu0 %v21951_v30  ;;  %v21557_v27 = vunpack.i.l.bf16 %v21954_v40  ;;  %12646 = vmatprep.subr.bf16.mxu1 %v21955_v46  ;;  %v21957_v45 = vld [vmem:[#allocation72_spill] sm:$0xff]  ;;  %v1469_v12 = vrot.slane %v1459_v18, %v14412_v6  ;;  %v21959_v1 = vld [vmem:[#allocation14_spill] sm:$0xff] }
 0x1f0   : > { %v17317_v11 = vsel %vm295_vm7, %v21953_v54, %v21556_v19  ;;  %v21958_v51 = vpack.c.bf16 %v21956_v15, %v21957_v45  ;;  %v1476_v21 = vrot.slane %v1461_v60, %v14412_v6  ;;  %v1483_v49 = vrot.slane %v1460_v29, %v14412_v6  ;;  %13897 = vrot.lane.b32.xlu1 %v21959_v1, %s14369_s23  ;;  %v17333_v54 = vpop.permute.xlu0 %13632  ;;  %v21963_v47 = vld [vmem:[#allocation68_spill] sm:$0xff] }
 0x1f1   : > { %v1490_v30 = vrot.slane %v1462_v16, %v14412_v6  ;;  %v21558_v15 = vunpack.i.l.bf16 %v17048_v55  ;;  %v13594_v45 = vunpack.i.l.bf16 %v17055_v33  ;;  %v13605_v18 = vunpack.i.h.bf16 %v17084_v61  ;;  %13902 = vrot.lane.b32.xlu0 %v21959_v1, %s14370_s24  ;;  %12647 = vmatpush3.bf16.msra.mxu1 %v21955_v46  ;;  %11731 = vst.msk [vmem:[%s17063_s26 + $0x240] ss:$8 sm:$0x7] %vm17010_vm10, %v1469_v12  ;;  %v21961_v46 = vld [vmem:[#allocation70_spill] sm:$0xff]  ;;  %v21965_v56 = vld [vmem:[#allocation64_spill] sm:$0xff] }
 0x1f2   : > { %5020 = vmatprep.subr.bf16.mxu0 %v21958_v51  ;;  %v13604_v60 = vunpack.i.l.bf16 %v17084_v61  ;;  %v1491_v29 = vcombine.high %v1469_v12, %v1469_v12  ;;  %v1492_v16 = vcombine.high %v1476_v21, %v1476_v21  ;;  %v1493_v51 = vcombine.high %v1483_v49, %v1483_v49  ;;  %11732 = vst.msk [vmem:[%s17063_s26 + $0x258] ss:$8 sm:$0x7] %vm17010_vm10, %v1483_v49  ;;  %v21960_v61 = vld [vmem:[#allocation74_spill] sm:$0xff]  ;;  %v21964_v49 = vld [vmem:[#allocation69_spill] sm:$0xff]  ;;  %v17365_v4 = vpop.permute.xlu1 %13637 }
 0x1f3   : > { %v1494_v52 = vcombine.high %v1490_v30, %v1490_v30  ;;  %11735 = vst.msk [vmem:[%s17063_s26 + $0x2a0] ss:$8 sm:$0x7] %vm17010_vm10, %v1476_v21  ;;  %11736 = vst.msk [vmem:[%s17063_s26 + $0x2b8] ss:$8 sm:$0x7] %vm17010_vm10, %v1490_v30  ;;  %v21962_v36 = vpack.c.bf16 %v21960_v61, %v21961_v46  ;;  %v13599_v19 = vunpack.i.l.bf16 %v17077_v37  ;;  %v13609_v12 = vunpack.i.l.bf16 %v17222_v58  ;;  %12648 = vmatprep.subr.bf16.mxu1 %v21963_v47 }
 0x1f4   : > { %v21966_v21 = vpack.c.bf16 %v21964_v49, %v21965_v56  ;;  %11733 = vst.msk [vmem:[%s17063_s26 + $0x270] ss:$8 sm:$0x7] %vm17010_vm10, %v1491_v29  ;;  %11734 = vst.msk [vmem:[%s17063_s26 + $0x288] ss:$8 sm:$0x7] %vm17010_vm10, %v1493_v51  ;;  %v13619_v30 = vunpack.i.l.bf16 %v17267_v41  ;;  %13907 = vrot.lane.b32.xlu1 %v21943_v24, %s14367_s21  ;;  %v21561_v56 = vunpack.i.h.bf16 %v17325_v32  ;;  %v13629_v29 = vunpack.i.l.bf16 %v17325_v32  ;;  %v17386_v51 = vpop.permute.xlu0 %13642 }
 0x1f5   : > { %5021 = vmatpush1.bf16.msra.mxu0 %v21962_v36  ;;  %11737 = vst.msk [vmem:[%s17063_s26 + $0x2d0] ss:$8 sm:$0x7] %vm17010_vm10, %v1492_v16  ;;  %11738 = vst.msk [vmem:[%s17063_s26 + $0x2e8] ss:$8 sm:$0x7] %vm17010_vm10, %v1494_v52  ;;  %v21560_v36 = vunpack.i.h.bf16 %v17267_v41  ;;  %v17398_v52 = vsel %vm307_vm6, %v13525_v42, %v21557_v27  ;;  %v17405_v46 = vsel %vm319_vm5, %v13535_v62, %v21558_v15  ;;  %v13600_v49 = vunpack.i.h.bf16 %v17077_v37 }
 0x1f6   : > { %5022 = vmatprep.subr.bf16.mxu0 %v21966_v21  ;;  %v21967_v61 = vmov 0   ;;  %v17391_v16 = vld [vmem:[%s21388_s1] sm:$0xff]   ;;  %13912 = vrot.lane.b32.xlu0 %v21943_v24, %s14368_s22  ;;  %v5292_v21 = vsel %vm355_vm4, %v13604_v60, %v13605_v18  ;;  %v17418_v39 = vsel %vm331_vm3, %v13545_v57, %v13594_v45  ;;  %v5310_v42 = vpack.c.bf16 %v13605_v18, %v13605_v18  ;;  %v21969_v27 = vld [vmem:[#allocation63_spill] sm:$0xff]  ;;  %v21974_v57 = vld [vmem:[#allocation61_spill] sm:$0xff] }
 0x1f7   : > { %4927 = vmatprep.mubr.bf16.mxu0 %v21967_v61  ;;  %12649 = vmatpush3.bf16.msra.mxu1 %v21963_v47  ;;  %v21968_v62 = vld [vmem:[#allocation66_spill] sm:$0xff]  ;;  %v5291_v24 = vsel %vm355_vm4, %v13565_v0, %v13604_v60  ;;  %v21972_v47 = vunpack.i.h.bf16 %v16905_v10  ;;  %v17435_v50 = vsel %vm271_vm9, %v13609_v12, %v21559_v2  ;;  %v21975_v18 = vld [vmem:[#allocation52_spill] sm:$0xff]  ;;  %v21562_v25 = vunpack.i.h.bf16 %v17365_v4  ;;  %v17444_v10 = vpop.permute.xlu1 %13647 }
 0x1f8   : > { %v21970_v37 = vpack.c.bf16 %v21968_v62, %v21969_v27  ;;  %v21971_v15 = vld [vmem:[#allocation62_spill] sm:$0xff]  ;;  %21973 = vst [vmem:[#allocation33_spill] sm:$0xff] %v17435_v50  ;;  %v21976_v27 = vpack.c.bf16 %v21974_v57, %v21975_v18  ;;  %11933 = vmatmul.mubr.msk.bf16.gmra.mxu0 %vm592_vm0, %v17233_v17  ;;  %v13639_v0 = vunpack.i.l.bf16 %v17365_v4  ;;  %v17450_v12 = vsel %vm283_vm8, %v13619_v30, %v21560_v36  ;;  %v17459_v17 = vpop.permute.xlu0 %13652 }
 0x1f9   : > { %12650 = vmatprep.subr.bf16.mxu1 %v21971_v15  ;;  %v17430_v38 = vsel %vm343_vm1, %v21972_v47, %v13599_v19  ;;  %21977 = vst [vmem:[#allocation77_spill] sm:$0xff] %v17450_v12  ;;  %v17455_v62 = vsel %vm295_vm7, %v13629_v29, %v21561_v56  ;;  %13917 = vrot.lane.b32.xlu1 %v21959_v1, %s14367_s21  ;;  %v21979_v57 = vunpack.i.h.bf16 %v17048_v55  ;;  %v21980_v18 = vunpack.i.l.bf16 %v17048_v55  ;;  %v21982_v2 = vld [vmem:[#allocation58_spill] sm:$0xff]  ;;  %v21984_v56 = vld [vmem:[#allocation16_spill] sm:$0xff] }
 0x1fa   : > { %5023 = vmatpush1.bf16.msra.mxu0 %v21970_v37  ;;  %21978 = vst [vmem:[#allocation5_spill] sm:$0xff] %v17455_v62  ;;  %v5309_v37 = vpack.c.bf16 %v5292_v21, %v5292_v21  ;;  %12654 = vmatprep.mubr.msk.bf16.mxu1 %vm592_vm0, %v17391_v16  ;;  %v5308_v30 = vpack.c.bf16 %v5291_v24, %v5291_v24  ;;  %v21990_v60 = vunpack.i.l.bf16 %v21954_v40  ;;  %v22018_v34 = vunpack.i.h.bf16 %v17365_v4  ;;  %v12263_v62 = vld [vmem:[%s14410_s17 + $0x138] ss:$8 sm:$0x7] }
 0x1fb   : > { %5024 = vmatprep.subr.bf16.mxu0 %v21976_v27  ;;  %13922 = vrot.lane.b32.xlu0 %v21959_v1, %s14368_s22  ;;  %v17468_v29 = vsel %vm343_vm1, %v13599_v19, %v13600_v49  ;;  %v17475_v21 = vsel %vm319_vm5, %v21980_v18, %v21979_v57  ;;  %v21981_v27 = vld [vmem:[#allocation3_spill] sm:$0xff]  ;;  %v13650_v1 = vunpack.i.h.bf16 %v17444_v10  ;;  %v5338_v19 = vsel %vm599_vm2, %v5310_v42, 0 }
 0x1fc   : > { %12651 = vmatpush3.bf16.msra.mxu1 %v21971_v15  ;;  %v21983_v36 = vpack.c.bf16 %v21981_v27, %v21982_v2  ;;  %v13649_v15 = vunpack.i.l.bf16 %v17444_v10  ;;  %v17484_v24 = vpack.c.bf16 %v13600_v49, %v13595_v9  ;;  %v17489_v47 = vsel %vm307_vm6, %v13639_v0, %v21562_v25  ;;  %v21986_v18 = vld [vmem:[#allocation51_spill] sm:$0xff]  ;;  %v21987_v2 = vld [vmem:[#allocation6_spill] sm:$0xff]  ;;  %5044 = vmatprep.mubr.bf16.mxu0 %v21967_v61  ;;  %v17496_v27 = vpop.permute.xlu1 %13657  ;;  %v21991_v25 = vld [vmem:[#allocation12_spill] sm:$0xff]  ;;  %v17517_v33 = vpop.permute.xlu0 %13662 }
 0x1fd   : > { %12652 = vmatprep.subr.bf16.mxu1 %v21984_v56  ;;  %21985 = vst [vmem:[#allocation26_spill] sm:$0xff] %v17489_v47  ;;  %v5270_v49 = vsel %vm331_vm3, %v13594_v45, %v13595_v9  ;;  %v21989_v10 = vunpack.i.h.bf16 %v21954_v40  ;;  %v21992_v57 = vld [vmem:[#allocation35_spill] sm:$0xff]  ;;  %v5332_v48 = vsel %vm599_vm2, %v5308_v30, 0  ;;  %v21998_v40 = vunpack.i.h.bf16 %v21939_v44  ;;  %v22001_v9 = vld [vmem:[#allocation22_spill] sm:$0xff] }
 0x1fe   : > { %5025 = vmatpush1.bf16.msra.mxu0 %v21983_v36  ;;  %v21988_v36 = vpack.c.bf16 %v21986_v18, %v21987_v2  ;;  %v21993_v18 = vpack.i.bf16 %v21991_v25, %v21992_v57  ;;  %v17515_v2 = vld [vmem:[%s21388_s1 + $0x8] sm:$0xff]   ;;  %v5306_v45 = vpack.c.bf16 %v17468_v29, %v5270_v49  ;;  %v21997_v49 = vunpack.i.h.bf16 %v21935_v35  ;;  %v22010_v57 = vld [vmem:[#allocation37_spill] sm:$0xff] }
 0x1ff   : > { %v17506_v0 = vsel %vm307_vm6, %v21990_v60, %v21989_v10  ;;  %v21994_v60 = vmov %v21989_v10  ;;  %13932 = vrot.lane.b32.xlu0 %v21996_v20, %s14369_s23  ;;  %v17554_v30 = vsel %vm319_vm5, %v13649_v15, %v13650_v1  ;;  %v13654_v29 = vunpack.i.l.bf16 %v17459_v17  ;;  %v22008_v15 = vld [vmem:[#allocation36_spill] sm:$0xff] }
 0x200   : > { %5026 = vmatprep.subr.bf16.mxu0 %v21988_v36  ;;  %13927 = vrot.lane.b32.xlu1 %v21993_v18, %s14371_s25  ;;  %v21995_v36 = vunpack.i.h.bf16 %v17048_v55  ;;  %v17540_v55 = vpack.c.bf16 %v21998_v40, %v21997_v49  ;;  %22004 = vst [vmem:[#allocation71_spill] sm:$0xff] %v17554_v30  ;;  %v22022_v22 = vpack.c.bf16 %v17430_v38, %v17418_v39 }
 0x201   : > { %12653 = vmatpush3.bf16.msra.mxu1 %v21984_v56  ;;  %v22002_v56 = vld [vmem:[#allocation24_spill] sm:$0xff] }
 0x202   : > { %v17526_v10 = vpack.c.bf16 %v21995_v36, %v21994_v60  ;;  %v21999_v60 = vmov %v21998_v40  ;;  %v22000_v36 = vunpack.i.l.bf16 %v21939_v44  ;;  %v22003_v43 = vpack.c.bf16 %v22001_v9, %v22002_v56  ;;  %12851 = vmatprep.subr.msk.bf16.mxu1 %vm599_vm2, %v5310_v42  ;;  %v13668_v42 = vpop.permute.xlu1 %13667 }
 0x203   : > { %v22005_v40 = vunpack.i.l.bf16 %v21935_v35  ;;  %v9442_v9 = vcombine.low %v17058_v14, %v17133_v53  ;;  %v9443_v35 = vcombine.high %v17058_v14, %v17133_v53  ;;  %v9444_v56 = vcombine.low %v17210_v13, %v17216_v3  ;;  %13942 = vrot.lane.b32.xlu0 %v21996_v20, %s14367_s21 }
 0x204   : > { %v17547_v18 = vsel %vm295_vm7, %v22000_v36, %v21999_v60  ;;  %5027 = vmatpush1.bf16.msra.mxu0 %v22003_v43  ;;  %v22006_v60 = vunpack.i.h.bf16 %v16974_v26  ;;  %v22007_v36 = vunpack.i.l.bf16 %v16974_v26  ;;  %13937 = vrot.lane.b32.xlu1 %v21996_v20, %s14370_s24  ;;  %v13660_v14 = vunpack.i.h.bf16 %v17496_v27  ;;  %v17611_v26 = vld [vmem:[%s21388_s1 + $0x20] sm:$0xff]  }
 0x205   : > { %v17562_v44 = vsel %vm283_vm8, %v22005_v40, %v21997_v49  ;;  %11957 = vmatprep.subr.msk.bf16.mxu0 %vm599_vm2, %v5309_v37  ;;  %12655 = vmatmul.mubr.msk.bf16.vlgmr.msra.gmra.mxu1 %vm592_vm0, %v17515_v2  ;;  %v13670_v37 = vunpack.i.h.bf16 %v13668_v42  ;;  %v13669_v49 = vunpack.i.l.bf16 %v13668_v42  ;;  %v17584_v40 = vpop.permute.xlu0 %13672  ;;  %v13659_v53 = vunpack.i.l.bf16 %v17496_v27 }
 0x206   : > { %v17569_v43 = vsel %vm271_vm9, %v22007_v36, %v22006_v60  ;;  %v9445_v36 = vcombine.high %v17210_v13, %v17216_v3  ;;  %12659 = vmatpush3.bf16.msra.mxu1 %v5338_v19  ;;  %v22009_v5 = vmov %v22006_v60  ;;  %v13664_v13 = vunpack.i.l.bf16 %v17517_v33  ;;  %v22011_v19 = vld [vmem:[#allocation32_spill] sm:$0xff]  ;;  %12668 = vmatprep.mubr.msk.bf16.mxu1 %vm592_vm0, %v17611_v26 }
 0x207   : > { %v17597_v42 = vpack.c.bf16 %v22009_v5, %v22008_v15  ;;  %11939 = vmatmul.mubr.msk.bf16.vlgmr.msra.gmra.mxu0 %vm592_vm0, %v17391_v16  ;;  %12660 = vmatprep.subr.bf16.mxu1 %v17484_v24  ;;  %v13674_v3 = vunpack.i.l.bf16 %v17584_v40  ;;  %v17614_v5 = vsel %vm319_vm5, %v13650_v1, %v13654_v29  ;;  %v17617_v15 = vpop.permute.xlu1 %13677  ;;  %v9452_v23 = vrot.slane %v9442_v9, %v14412_v6 }
 0x208   : > { %22012 = vst [vmem:[#allocation73_spill] sm:$0xff] %v17614_v5  ;;  %5347 = vmatpush1.bf16.msra.mxu0 %v5332_v48  ;;  %5054 = vmatprep.mubr.bf16.mxu0 %v21967_v61  ;;  %v9459_v27 = vrot.slane %v9443_v35, %v14412_v6  ;;  %v9466_v60 = vrot.slane %v9444_v56, %v14412_v6  ;;  %v13680_v48 = vunpack.i.h.bf16 %v17617_v15  ;;  %v13679_v16 = vunpack.i.l.bf16 %v17617_v15  ;;  %v17634_v35 = vld [vmem:[%s14410_s17 + $0x18] ss:$8 sm:$0x7] }
 0x209   : > { %5348 = vmatprep.subr.bf16.mxu0 %v5306_v45  ;;  %13947 = vrot.lane.b32.xlu1 %v21996_v20, %s14368_s22  ;;  %v17626_v1 = vsel %vm343_vm1, %v13669_v49, %v13670_v37  ;;  %v17630_v25 = vpop.permute.xlu0 %13682  ;;  %v9473_v9 = vrot.slane %v9445_v36, %v14412_v6  ;;  %v17637_v56 = vld [vmem:[%s14410_s17 + $0x48] ss:$8 sm:$0x7]  ;;  %v17641_v8 = vsel %vm331_vm3, %v13659_v53, %v13660_v14  ;;  %v22015_v49 = vunpack.i.l.bf16 %v17386_v51 }
 0x20a   : > { %22013 = vst [vmem:[#allocation30_spill] sm:$0xff] %v17626_v1  ;;  %22014 = vst [vmem:[#allocation29_spill] sm:$0xff] %v17641_v8  ;;  %13952 = vrot.lane.b32.xlu0 %v21996_v20, %s14364_s18  ;;  %12661 = vmatpush3.bf16.msra.mxu1 %v17484_v24  ;;  %v12259_v45 = vld [vmem:[%s14410_s17 + $0x78] ss:$8 sm:$0x7]  ;;  %v17663_v24 = vpop.f32.mrf.mxu0  ;;  %v17669_v4 = vsel %vm343_vm1, %v13670_v37, %v13674_v3  ;;  %v17679_v58 = vpack.c.bf16 %v13674_v3, %v13664_v13 }
 0x20b   : > { %v17648_v15 = vpack.c.bf16 %v13654_v29, %v22015_v49  ;;  %v22017_v36 = vmov %v22015_v49  ;;  %v12260_v53 = vld [vmem:[%s14410_s17 + $0xa8] ss:$8 sm:$0x7]  ;;  %12662 = vmatprep.subr.bf16.mxu1 %v17526_v10  ;;  %v17666_v29 = vsel %vm331_vm3, %v13660_v14, %v13664_v13  ;;  %22021 = vst [vmem:[#allocation48_spill] sm:$0xff] %v17669_v4  ;;  %v13688_v50 = vpop.permute.xlu1 %13687  ;;  %v10379_v12 = vcombine.low %v17634_v35, %v17637_v56 }
 0x20c   : > { %v17655_v63 = vsel %vm307_vm6, %v22018_v34, %v22017_v36  ;;  %22020 = vst [vmem:[#allocation78_spill] sm:$0xff] %v17666_v29  ;;  %v12261_v49 = vld [vmem:[%s14410_s17 + $0xd8] ss:$8 sm:$0x7]  ;;  %5349 = vmatpush1.bf16.msra.mxu0 %v22022_v22  ;;  %22023 = vst [vmem:[#allocation80_spill] sm:$0xff] %v17679_v58  ;;  %v17695_v38 = vpop.f32.mrf.mxu0  ;;  %v17698_v39 = vsel %vm355_vm4, %v13679_v16, %v13680_v48  ;;  %v17700_v13 = vcombine.low %v9452_v23, %v9466_v60 }
 0x20d   : > { %22016 = vst [vmem:[#allocation21_spill] sm:$0xff] %v17648_v15  ;;  %22019 = vst [vmem:[#allocation60_spill] sm:$0xff] %v17655_v63  ;;  %v12262_v36 = vld [vmem:[%s14410_s17 + $0x108] ss:$8 sm:$0x7]  ;;  %v13684_v15 = vunpack.i.l.bf16 %v17630_v25  ;;  %v22024_v63 = vpack.c.bf16 %v17475_v21, %v17506_v0  ;;  %13957 = vrot.lane.b32.xlu1 %v21996_v20, %s14366_s20  ;;  %v17693_v22 = vpop.permute.xlu0 %13692  ;;  %v17702_v3 = vcombine.low %v9459_v27, %v9473_v9  ;;  %v13690_v27 = vunpack.i.h.bf16 %v13688_v50 }
 0x20e   : > { %v12264_v37 = vld [vmem:[%s14410_s17 + $0x168] ss:$8 sm:$0x7]  ;;  %22025 = vst [vmem:[#allocation67_spill] sm:$0xff] %v17700_v13  ;;  %13962 = vrot.lane.b32.xlu0 %v21996_v20, %s14365_s19  ;;  %12663 = vmatpush3.bf16.msra.mxu1 %v17526_v10  ;;  %v10380_v0 = vcombine.low %v12259_v45, %v12260_v53  ;;  %v10381_v56 = vcombine.low %v12261_v49, %v12262_v36  ;;  %v13689_v16 = vunpack.i.l.bf16 %v13688_v50  ;;  %v17715_v9 = vpop.f32.mrf.mxu0  ;;  %v13694_v45 = vunpack.i.l.bf16 %v17693_v22 }
 0x20f   : > { %5350 = vmatprep.subr.bf16.mxu0 %v22024_v63  ;;  %22026 = vst [vmem:[#allocation81_spill] sm:$0xff] %v17702_v3  ;;  %v17708_v63 = vpop.f32.mrf.mxu1  ;;  %12664 = vmatprep.subr.bf16.mxu1 %v17540_v55  ;;  %v17717_v14 = vcombine.high %v9452_v23, %v9466_v60  ;;  %v10382_v20 = vcombine.low %v12263_v62, %v12264_v37  ;;  %v13698_v53 = vpop.permute.xlu1 %13697  ;;  %v13695_v60 = vunpack.i.h.bf16 %v17693_v22  ;;  %v17807_v34 = vld [vmem:[%s21388_s1 + $0x28] sm:$0xff]   ;;  %v22053_v4 = vunpack.i.h.bf16 %v17386_v51 }
 0x210   : > { %11940 = vmatmul.mubr.msk.bf16.gmra.mxu0 %vm592_vm0, %v17515_v2  ;;  %v22028_v10 = vpack.c.bf16 %v17405_v46, %v17398_v52  ;;  %v17722_v35 = vpack.c.bf16 %v13684_v15, %v13684_v15  ;;  %v17727_v2 = vsel %vm355_vm4, %v13680_v48, %v13684_v15  ;;  %v22030_v23 = vpack.c.bf16 %v17547_v18, %v17562_v44  ;;  %v22031_v52 = vld [vmem:[#allocation20_spill] sm:$0xff]  ;;  %v22032_v46 = vld [vmem:[#allocation19_spill] sm:$0xff]  ;;  %v17741_v48 = vpop.f32.mrf.mxu0  ;;  %v22035_v44 = vld [vmem:[#allocation18_spill] sm:$0xff] }
 0x211   : > { %22027 = vst [vmem:[#allocation75_spill] sm:$0xff] %v17717_v14  ;;  %5372 = vmatprep.mubr.bf16.mxu0 %v21967_v61  ;;  %22029 = vst [vmem:[#allocation76_spill] sm:$0xff] %v17727_v2  ;;  %v22033_v62 = vpack.i.bf16 %v22031_v52, %v22032_v46  ;;  %v13700_v49 = vunpack.i.h.bf16 %v13698_v53  ;;  %v13699_v36 = vunpack.i.l.bf16 %v13698_v53  ;;  %v17739_v37 = vpop.permute.xlu0 %13702  ;;  %v22034_v18 = vld [vmem:[#allocation15_spill] sm:$0xff]  ;;  %v17754_v22 = vrot.slane %v10379_v12, %v14412_v6  ;;  %v22042_v52 = vld [vmem:[#allocation54_spill] sm:$0xff] }
 0x212   : > { %5351 = vmatpush1.bf16.msra.mxu0 %v22028_v10  ;;  %12665 = vmatpush3.bf16.msra.mxu1 %v17540_v55  ;;  %v17757_v53 = vrot.slane %v10380_v0, %v14412_v6  ;;  %v17760_v21 = vrot.slane %v10381_v56, %v14412_v6  ;;  %v22037_v15 = vunpack.i.h.bf16 %v17235_v59  ;;  %v17771_v55 = vsel %vm271_vm9, %v13689_v16, %v13690_v27 }
 0x213   : > { %5352 = vmatprep.subr.bf16.mxu0 %v22030_v23  ;;  %13967 = vrot.lane.b32.xlu1 %v22033_v62, %s14371_s25  ;;  %v22036_v23 = vpack.i.bf16 %v22034_v18, %v22035_v44  ;;  %v17751_v62 = vpop.f32.mrf.mxu1  ;;  %22039 = vst [vmem:[#allocation14_spill] sm:$0xff] %v17771_v55  ;;  %v17776_v0 = vrot.slane %v10382_v20, %v14412_v6  ;;  %v22041_v10 = vunpack.i.h.bf16 %v17277_v28  ;;  %v17788_v18 = vpop.permute.xlu1 %13707  ;;  %v22054_v13 = vunpack.i.h.bf16 %v17739_v37 }
 0x214   : > { %12666 = vmatprep.subr.bf16.mxu1 %v17597_v42  ;;  %v17766_v50 = vsel %vm271_vm9, %v22037_v15, %v13689_v16  ;;  %v22040_v56 = vpack.c.bf16 %v17317_v11, %v17293_v7  ;;  %v13704_v16 = vunpack.i.l.bf16 %v17739_v37  ;;  %v17791_v12 = vpack.c.bf16 %v13690_v27, %v22042_v52  ;;  %v22045_v11 = vld [vmem:[#allocation23_spill] sm:$0xff] }
 0x215   : > { %13972 = vrot.lane.b32.xlu0 %v22036_v23, %s14371_s25  ;;  %22038 = vst [vmem:[#allocation72_spill] sm:$0xff] %v17766_v50  ;;  %v17768_v23 = vpop.f32.mrf.mxu0  ;;  %v17784_v15 = vsel %vm283_vm8, %v22041_v10, %v13694_v45  ;;  %v22044_v7 = vpack.c.bf16 %v17569_v43, %v22010_v57  ;;  %v22046_v10 = vunpack.i.h.bf16 %v17333_v54  ;;  %v17809_v27 = vpop.permute.xlu0 %13712  ;;  %v17814_v57 = vsel %vm283_vm8, %v13694_v45, %v13695_v60  ;;  %v17830_v45 = vld [vmem:[%s21388_s1 + $0x10] sm:$0xff]  }
 0x216   : > { %5353 = vmatpush1.bf16.msra.mxu0 %v22040_v56  ;;  %22043 = vst [vmem:[#allocation74_spill] sm:$0xff] %v17791_v12  ;;  %v17817_v43 = vsel %vm295_vm7, %v13699_v36, %v13700_v49  ;;  %12667 = vmatpush3.bf16.msra.mxu1 %v17597_v42  ;;  %22049 = vst [vmem:[#allocation68_spill] sm:$0xff] %v17830_v45  ;;  %v13710_v44 = vunpack.i.h.bf16 %v17788_v18  ;;  %v13709_v42 = vunpack.i.l.bf16 %v17788_v18  ;;  %v13715_v51 = vunpack.i.h.bf16 %v17809_v27 }
 0x217   : > { %5354 = vmatprep.subr.bf16.mxu0 %v22044_v7  ;;  %13977 = vrot.lane.b32.xlu1 %v22045_v11, %s14369_s23  ;;  %v17802_v56 = vsel %vm295_vm7, %v22046_v10, %v13699_v36  ;;  %v17811_v52 = vpop.f32.mrf.mxu0  ;;  %v13685_v7 = vunpack.i.h.bf16 %v17630_v25  ;;  %v17823_v10 = vpop.f32.mrf.mxu1  ;;  %v10411_v36 = vcombine.low %v17754_v22, %v17757_v53  ;;  %v10413_v25 = vcombine.low %v17760_v21, %v17776_v0 }
 0x218   : > { %22047 = vst [vmem:[#allocation70_spill] sm:$0xff] %v17811_v52  ;;  %v17840_v8 = vpack.c.bf16 %v13700_v49, %v13695_v60  ;;  %v22052_v29 = vpack.c.bf16 %v17285_v31, %v22011_v19  ;;  %v17850_v58 = vsel %vm307_vm6, %v22053_v4, %v13704_v16  ;;  %v13718_v2 = vpop.permute.xlu1 %13717  ;;  %v17855_v18 = vsel %vm307_vm6, %v13704_v16, %v22054_v13  ;;  %v22055_v31 = vld [vmem:[#allocation65_spill] sm:$0xff] }
 0x219   : > { %13982 = vrot.lane.b32.xlu0 %v22045_v11, %s14370_s24  ;;  %v17838_v5 = vpop.f32.mrf.mxu0  ;;  %12669 = vmatmul.mubr.msk.bf16.vlgmr.msra.gmra.mxu1 %vm592_vm0, %v17807_v34  ;;  %v13714_v19 = vunpack.i.l.bf16 %v17809_v27  ;;  %v13719_v4 = vunpack.i.l.bf16 %v13718_v2  ;;  %v13723_v13 = vpop.permute.xlu0 %13722  ;;  %v17874_v49 = vrot.slane %v10411_v36, %v14412_v6  ;;  %v17877_v46 = vrot.slane %v10413_v25, %v14412_v6 }
 0x21a   : > { %22050 = vst [vmem:[#allocation69_spill] sm:$0xff] %v17838_v5  ;;  %5355 = vmatpush1.bf16.msra.mxu0 %v22052_v29  ;;  %v13720_v29 = vunpack.i.h.bf16 %v13718_v2  ;;  %v13725_v16 = vunpack.i.h.bf16 %v13723_v13  ;;  %v13724_v1 = vunpack.i.l.bf16 %v13723_v13  ;;  %v17869_v60 = vpop.f32.mrf.mxu1  ;;  %12682 = vmatprep.mubr.msk.bf16.mxu1 %vm592_vm0, %v17830_v45  ;;  %v22058_v2 = vunpack.i.h.bf16 %v17459_v17 }
 0x21b   : > { %13987 = vrot.lane.b32.xlu1 %v22055_v31, %s14369_s23  ;;  %22056 = vst [vmem:[#allocation64_spill] sm:$0xff] %v17874_v49  ;;  %22057 = vst [vmem:[#allocation66_spill] sm:$0xff] %v17877_v46  ;;  %v17886_v13 = vpop.f32.mrf.mxu0  ;;  %v17889_v50 = vsel %vm319_vm5, %v13709_v42, %v13710_v44  ;;  %v22060_v45 = vunpack.i.l.bf16 %v17277_v28  ;;  %v22061_v25 = vunpack.i.l.bf16 %v17333_v54  ;;  %v17918_v20 = vcombine.low %v17874_v49, %v17877_v46  ;;  %v22130_v46 = vld [vmem:[#allocation60_spill] sm:$0xff] }
 0x21c   : > { %v17884_v27 = vsel %vm319_vm5, %v22058_v2, %v13709_v42  ;;  %22059 = vst [vmem:[#allocation63_spill] sm:$0xff] %v17886_v13  ;;  %v17900_v17 = vpop.permute.xlu1 %13727  ;;  %v6261_v2 = vsel %vm355_vm4, %v13724_v1, %v13725_v16  ;;  %v6260_v13 = vsel %vm355_vm4, %v13685_v7, %v13724_v1  ;;  %v6250_v42 = vsel %vm343_vm1, %v13719_v4, %v13720_v29  ;;  %v12572_v7 = vpop.f32.mrf.mxu1 }
 0x21d   : > { %13992 = vrot.lane.b32.xlu0 %v22055_v31, %s14370_s24  ;;  %11958 = vmatmul.mubr.msk.bf16.vlgmr.msra.gmra.mxu0 %vm592_vm0, %v17611_v26  ;;  %v17897_v5 = vpack.c.bf16 %v22061_v25, %v22060_v45  ;;  %v6279_v26 = vpack.c.bf16 %v13725_v16, %v13725_v16  ;;  %v17907_v36 = vpop.permute.xlu0 %13732  ;;  %v6278_v47 = vpack.c.bf16 %v6261_v2, %v6261_v2  ;;  %v13729_v16 = vunpack.i.l.bf16 %v17900_v17 }
 0x21e   : > { %5382 = vmatprep.mubr.bf16.mxu0 %v21967_v61  ;;  %v6277_v30 = vpack.c.bf16 %v6260_v13, %v6260_v13  ;;  %v6276_v45 = vpack.c.bf16 %v13720_v29, %v13715_v51  ;;  %v6239_v25 = vsel %vm331_vm3, %v13714_v19, %v13715_v51  ;;  %22063 = vst [vmem:[#allocation61_spill] sm:$0xff] %v17918_v20  ;;  %v22064_v29 = vunpack.i.h.bf16 %v17584_v40 }
 0x21f   : > { %22062 = vst [vmem:[#allocation62_spill] sm:$0xff] %v17897_v5  ;;  %13997 = vrot.lane.b32.xlu1 %v22045_v11, %s14367_s21  ;;  %12852 = vmatprep.subr.msk.bf16.mxu1 %vm599_vm2, %v6279_v26  ;;  %v6307_v1 = vsel %vm599_vm2, %v6279_v26, 0  ;;  %v6275_v2 = vpack.c.bf16 %v6250_v42, %v6239_v25  ;;  %v2198_v5 = vpop.f32.mrf.mxu0  ;;  %v22065_v55 = vunpack.i.h.bf16 %v17739_v37  ;;  %v22066_v26 = vunpack.i.h.bf16 %v17517_v33 }
 0x220   : > { %v6249_v51 = vsel %vm343_vm1, %v22064_v29, %v13719_v4  ;;  %12016 = vmatprep.subr.msk.bf16.mxu0 %vm599_vm2, %v6278_v47  ;;  %12673 = vmatpush3.bf16.msra.mxu1 %v6307_v1  ;;  %v6301_v13 = vsel %vm599_vm2, %v6277_v30, 0  ;;  %v17930_v49 = vpop.permute.xlu1 %13737  ;;  %v6272_v40 = vpack.c.bf16 %v17889_v50, %v17855_v18  ;;  %v2251_v47 = vpop.f32.mrf.mxu1  ;;  %v22067_v4 = vunpack.i.l.bf16 %v17333_v54 }
 0x221   : > { %14002 = vrot.lane.b32.xlu0 %v22045_v11, %s14368_s22  ;;  %v6273_v52 = vpack.c.bf16 %v13710_v44, %v22065_v55  ;;  %v6238_v12 = vsel %vm331_vm3, %v22066_v26, %v13714_v19  ;;  %6316 = vmatpush1.bf16.msra.mxu0 %v6301_v13  ;;  %v22068_v30 = vunpack.i.h.bf16 %v17325_v32  ;;  %v13614_v37 = vunpack.i.l.bf16 %v17235_v59  ;;  %v17944_v33 = vpop.permute.xlu0 %13742  ;;  %v2200_v44 = vpop.f32.mrf.mxu0  ;;  %v22074_v13 = vld [vmem:[#allocation77_spill] sm:$0xff] }
 0x222   : > { %12674 = vmatprep.subr.bf16.mxu1 %v6276_v45  ;;  %6317 = vmatprep.subr.bf16.mxu0 %v6275_v2  ;;  %v6271_v50 = vpack.c.bf16 %v17884_v27, %v17850_v58  ;;  %v22069_v55 = vunpack.i.l.bf16 %v17277_v28  ;;  %v22070_v54 = vunpack.i.h.bf16 %v17267_v41  ;;  %v17957_v59 = vpack.i.bf16 %v17717_v14, %v17702_v3  ;;  %v22075_v2 = vld [vmem:[#allocation5_spill] sm:$0xff] }
 0x223   : > { %v17939_v42 = vsel %vm295_vm7, %v22068_v30, %v22067_v4  ;;  %14007 = vrot.lane.b32.xlu1 %v22055_v31, %s14367_s21  ;;  %v22071_v18 = vunpack.i.h.bf16 %v17900_v17  ;;  %v6274_v58 = vpack.c.bf16 %v6249_v51, %v6238_v12  ;;  %v17967_v28 = vadd.f32 %v12572_v7, %v17708_v63  ;;  %v22100_v12 = vld [vmem:[#allocation72_spill] sm:$0xff] }
 0x224   : > { %v17953_v32 = vsel %vm283_vm8, %v22070_v54, %v22069_v55  ;;  %v13740_v27 = vunpack.i.h.bf16 %v17930_v49  ;;  %v13739_v25 = vunpack.i.l.bf16 %v17930_v49  ;;  %v17976_v1 = vadd.f32 %v2198_v5, %v17663_v24  ;;  %12675 = vmatpush3.bf16.msra.mxu1 %v6276_v45  ;;  %v17980_v63 = vpop.permute.xlu1 %13747 }
 0x225   : > { %14012 = vrot.lane.b32.xlu0 %v22055_v31, %s14368_s22  ;;  %v17964_v19 = vsel %vm271_vm9, %v13729_v16, %v22071_v18  ;;  %11959 = vmatmul.mubr.msk.bf16.gmra.mxu0 %vm592_vm0, %v17807_v34  ;;  %v2202_v16 = vpop.f32.mrf.mxu0  ;;  %v17983_v7 = vadd.f32 %v2251_v47, %v17751_v62  ;;  %v12573_v34 = vpop.f32.mrf.mxu1  ;;  %v17987_v29 = vsel %vm599_vm2, %v17722_v35, 0  ;;  %v10412_v5 = vcombine.high %v17754_v22, %v17757_v53  ;;  %v22076_v47 = vld [vmem:[#allocation83_spill] sm:$0xff] }
 0x226   : > { %22072 = vst [vmem:[#allocation52_spill] sm:$0xff] %v17964_v19  ;;  %6318 = vmatpush1.bf16.msra.mxu0 %v6274_v58  ;;  %12676 = vmatprep.subr.bf16.mxu1 %v6273_v52  ;;  %v17993_v24 = vpop.permute.xlu0 %13752  ;;  %v22073_v51 = vpack.c.bf16 %v17698_v39, %v17698_v39  ;;  %v22077_v4 = vunpack.i.h.bf16 %v22076_v47  ;;  %v10414_v53 = vcombine.high %v17760_v21, %v17776_v0  ;;  %v13750_v39 = vunpack.i.h.bf16 %v17980_v63  ;;  %v22079_v18 = vld [vmem:[#allocation43_spill] sm:$0xff] }
 0x227   : > { %14017 = vrot.lane.b32.xlu1 %v22045_v11, %s14364_s18  ;;  %6319 = vmatprep.subr.bf16.mxu0 %v6272_v40  ;;  %v2204_v45 = vpop.f32.mrf.mxu0  ;;  %v13744_v40 = vunpack.i.l.bf16 %v17944_v33  ;;  %v13749_v30 = vunpack.i.l.bf16 %v17980_v63  ;;  %v10428_v55 = vrot.slane %v10412_v5, %v14412_v6  ;;  %v18020_v54 = vsel %vm283_vm8, %v13739_v25, %v13740_v27 }
 0x228   : > { %v17999_v62 = vsel %vm599_vm2, %v22073_v51, 0  ;;  %v18006_v22 = vsel %vm271_vm9, %v22077_v4, %v13614_v37  ;;  %6341 = vmatprep.mubr.bf16.mxu0 %v21967_v61  ;;  %22078 = vst [vmem:[#allocation3_spill] sm:$0xff] %v18020_v54  ;;  %v18023_v21 = vadd.f32 %v2200_v44, %v17695_v38  ;;  %12677 = vmatpush3.bf16.msra.mxu1 %v6273_v52  ;;  %v13754_v63 = vunpack.i.l.bf16 %v17993_v24  ;;  %v13758_v25 = vpop.permute.xlu1 %13757  ;;  %v2254_v38 = vpop.f32.mrf.mxu1  ;;  %v22080_v52 = vld [vmem:[#allocation42_spill] sm:$0xff]  ;;  %v22086_v44 = vld [vmem:[#allocation33_spill] sm:$0xff]  ;;  %v22117_v54 = vld [vmem:[#allocation48_spill] sm:$0xff] }
 0x229   : > { %14022 = vrot.lane.b32.xlu0 %v22045_v11, %s14366_s20  ;;  %v2208_v0 = vpop.f32.mrf.mxu0  ;;  %v18026_v58 = vpack.c.bf16 %v13614_v37, %v22079_v18  ;;  %v10442_v51 = vrot.slane %v10414_v53, %v14412_v6  ;;  %v18031_v47 = vadd.f32 %v2202_v16, %v17715_v9  ;;  %12678 = vmatprep.subr.bf16.mxu1 %v17840_v8  ;;  %v13760_v37 = vunpack.i.h.bf16 %v13758_v25 }
 0x22a   : > { %6320 = vmatpush1.bf16.msra.mxu0 %v6271_v50  ;;  %v18035_v5 = vadd.f32 %v12573_v34, %v17823_v10  ;;  %v13759_v4 = vunpack.i.l.bf16 %v13758_v25  ;;  %v18041_v53 = vpop.permute.xlu0 %13762  ;;  %v18044_v9 = vadd.f32 %v2204_v45, %v17741_v48  ;;  %v22082_v50 = vpack.c.bf16 %v17817_v43, %v17814_v57  ;;  %v22085_v25 = vld [vmem:[#allocation41_spill] sm:$0xff]  ;;  %v12586_v49 = vpop.f32.mrf.mxu1 }
 0x22b   : > { %14027 = vrot.lane.b32.xlu1 %v22055_v31, %s14364_s18  ;;  %22081 = vst [vmem:[#allocation58_spill] sm:$0xff] %v18041_v53  ;;  %v2210_v10 = vpop.f32.mrf.mxu0  ;;  %v18050_v16 = vadd.f32 %v2254_v38, %v17869_v60  ;;  %v18055_v34 = vsel %vm295_vm7, %v13749_v30, %v13750_v39  ;;  %v18057_v18 = vcombine.low %v10428_v55, %v10442_v51  ;;  %v13764_v45 = vunpack.i.l.bf16 %v18041_v53  ;;  %v22088_v30 = vld [vmem:[#allocation74_spill] sm:$0xff] }
 0x22c   : > { %6321 = vmatprep.subr.bf16.mxu0 %v22082_v50  ;;  %22083 = vst [vmem:[#allocation16_spill] sm:$0xff] %v18055_v34  ;;  %v18063_v57 = vadd.f32 %v2208_v0, %v17768_v23  ;;  %12679 = vmatpush3.bf16.msra.mxu1 %v17840_v8  ;;  %v13734_v60 = vunpack.i.l.bf16 %v17907_v36  ;;  %v22087_v38 = vpack.c.bf16 %v17802_v56, %v17784_v15  ;;  %v13768_v55 = vpop.permute.xlu1 %13767  ;;  %v22089_v51 = vld [vmem:[#allocation70_spill] sm:$0xff]  ;;  %v22093_v56 = vld [vmem:[#allocation55_spill] sm:$0xff] }
 0x22d   : > { %14032 = vrot.lane.b32.xlu0 %v22055_v31, %s14366_s20  ;;  %22084 = vst [vmem:[#allocation51_spill] sm:$0xff] %v18057_v18  ;;  %v2212_v43 = vpop.f32.mrf.mxu0  ;;  %12680 = vmatprep.subr.bf16.mxu1 %v22088_v30  ;;  %v18072_v50 = vadd.f32 %v2210_v10, %v22089_v51  ;;  %v18074_v48 = vpack.c.bf16 %v13754_v63, %v13744_v40  ;;  %v13770_v23 = vunpack.i.h.bf16 %v13768_v55  ;;  %v13769_v0 = vunpack.i.l.bf16 %v13768_v55  ;;  %v22092_v15 = vld [vmem:[#allocation14_spill] sm:$0xff]  ;;  %v22097_v51 = vld [vmem:[#allocation69_spill] sm:$0xff] }
 0x22e   : > { %6322 = vmatpush1.bf16.msra.mxu0 %v22087_v38  ;;  %v18079_v8 = vsel %vm307_vm6, %v13759_v4, %v13760_v37  ;;  %v18081_v26 = vpop.permute.xlu0 %13772  ;;  %v22094_v38 = vpack.c.bf16 %v22092_v15, %v22093_v56  ;;  %v18087_v41 = vsel %vm295_vm7, %v13750_v39, %v13754_v63  ;;  %v22096_v4 = vld [vmem:[#allocation67_spill] sm:$0xff]  ;;  %v18102_v15 = vadd.f32 %v2212_v43, %v22097_v51  ;;  %v22118_v34 = vld [vmem:[#allocation78_spill] sm:$0xff] }
 0x22f   : > { %14037 = vrot.lane.b32.xlu1 %v22045_v11, %s14365_s19  ;;  %22090 = vst [vmem:[#allocation6_spill] sm:$0xff] %v18079_v8  ;;  %22091 = vst [vmem:[#allocation38_spill] sm:$0xff] %v18081_v26  ;;  %v13774_v10 = vunpack.i.l.bf16 %v18081_v26  ;;  %v18095_v11 = vld [vmem:[%s21388_s1 + $0x18] sm:$0xff]   ;;  %v18099_v55 = vpack.i.bf16 %v18057_v18, %v22096_v4  ;;  %v2214_v39 = vpop.f32.mrf.mxu0  ;;  %v18106_v63 = vsel %vm307_vm6, %v13760_v37, %v13764_v45  ;;  %v22101_v18 = vld [vmem:[#allocation44_spill] sm:$0xff] }
 0x230   : > { %6323 = vmatprep.subr.bf16.mxu0 %v22094_v38  ;;  %22095 = vst [vmem:[#allocation22_spill] sm:$0xff] %v18087_v41  ;;  %12681 = vmatpush3.bf16.msra.mxu1 %v22088_v30  ;;  %v18115_v38 = vsel %vm319_vm5, %v13769_v0, %v13770_v23  ;;  %v22102_v43 = vpack.c.bf16 %v22100_v12, %v22101_v18  ;;  %v13778_v30 = vpop.permute.xlu1 %13777  ;;  %v22103_v37 = vld [vmem:[#allocation63_spill] sm:$0xff]  ;;  %v22105_v0 = vld [vmem:[#allocation8_spill] sm:$0xff] }
 0x231   : > { %14042 = vrot.lane.b32.xlu0 %v22055_v31, %s14365_s19  ;;  %v18111_v31 = vsel %vm283_vm8, %v13740_v27, %v13744_v40  ;;  %22099 = vst [vmem:[#allocation36_spill] sm:$0xff] %v18115_v38  ;;  %12853 = vmatprep.subr.msk.bf16.mxu1 %vm599_vm2, %v17722_v35  ;;  %v18123_v51 = vadd.f32 %v2214_v39, %v22103_v37  ;;  %v22104_v40 = vld [vmem:[#allocation79_spill] sm:$0xff]  ;;  %v22107_v12 = vld [vmem:[#allocation76_spill] sm:$0xff]  ;;  %v13779_v37 = vunpack.i.l.bf16 %v13778_v30 }
 0x232   : > { %22098 = vst [vmem:[#allocation24_spill] sm:$0xff] %v18111_v31  ;;  %6324 = vmatpush1.bf16.msra.mxu0 %v22102_v43  ;;  %v22106_v56 = vpack.i.bf16 %v22104_v40, %v22105_v0  ;;  %v18132_v19 = vpop.permute.xlu0 %13782  ;;  %v22108_v18 = vpack.c.bf16 %v22107_v12, %v22107_v12  ;;  %v18139_v35 = vsel %vm319_vm5, %v13770_v23, %v13774_v10  ;;  %v22109_v39 = vld [vmem:[#allocation31_spill] sm:$0xff]  ;;  %v13780_v43 = vunpack.i.h.bf16 %v13778_v30  ;;  %v2526_v23 = vpop.f32.mrf.mxu0  ;;  %v22110_v0 = vld [vmem:[#allocation68_spill] sm:$0xff] }
 0x233   : > { %12683 = vmatmul.mubr.msk.bf16.vlgmr.msra.gmra.mxu1 %vm592_vm0, %v18095_v11  ;;  %v22111_v40 = vunpack.i.h.bf16 %v17900_v17  ;;  %v2594_v27 = vadd.f32 %v2526_v23, %v17976_v1  ;;  %v2579_v12 = vpop.f32.mrf.mxu1  ;;  %v22119_v31 = vpack.c.bf16 %v22117_v54, %v22118_v34  ;;  %v22121_v17 = vld [vmem:[#allocation11_spill] sm:$0xff] }
 0x234   : > { %14047 = vrot.lane.b32.xlu1 %v22106_v56, %s14371_s25  ;;  %12023 = vmatprep.subr.msk.bf16.mxu0 %vm599_vm2, %v22108_v18  ;;  %v18145_v56 = vpack.c.bf16 %v13774_v10, %v13764_v45  ;;  %v2602_v18 = vadd.f32 %v12586_v49, %v17967_v28  ;;  %v22113_v28 = vld [vmem:[#allocation80_spill] sm:$0xff]  ;;  %v2596_v23 = vadd.f32 %v2579_v12, %v17983_v7  ;;  %v2528_v10 = vpop.f32.mrf.mxu0  ;;  %v22123_v7 = vld [vmem:[#allocation30_spill] sm:$0xff] }
 0x235   : > { %14052 = vrot.lane.b32.xlu0 %v22109_v39, %s14369_s23  ;;  %12687 = vmatpush3.bf16.msra.mxu1 %v17987_v29  ;;  %v18159_v45 = vsel %vm271_vm9, %v22111_v40, %v13734_v60  ;;  %v18165_v29 = vpop.permute.xlu1 %13787  ;;  %v22116_v40 = vld [vmem:[#allocation9_spill] sm:$0xff] }
 0x236   : > { %12017 = vmatmul.mubr.msk.bf16.vlgmr.msra.gmra.mxu0 %vm592_vm0, %v22110_v0  ;;  %22112 = vst [vmem:[#allocation37_spill] sm:$0xff] %v18159_v45  ;;  %12688 = vmatprep.subr.bf16.mxu1 %v22113_v28  ;;  %v22114_v0 = vld [vmem:[#allocation59_spill] sm:$0xff]  ;;  %v2638_v1 = vadd.f32 %v22116_v40, %v2602_v18  ;;  %v12587_v18 = vpop.f32.mrf.mxu1  ;;  %v2632_v54 = vadd.f32 %v22121_v17, %v2596_v23  ;;  %v2530_v34 = vpop.f32.mrf.mxu0  ;;  %v22126_v23 = vld [vmem:[#allocation21_spill] sm:$0xff] }
 0x237   : > { %6443 = vmatpush1.bf16.msra.mxu0 %v17999_v62  ;;  %v18170_v30 = vpack.c.bf16 %v13734_v60, %v22114_v0  ;;  %v18177_v62 = vpop.permute.xlu0 %13792  ;;  %v18186_v60 = vsel %vm331_vm3, %v13779_v37, %v13780_v43  ;;  %v2595_v0 = vadd.f32 %v2528_v10, %v18023_v21  ;;  %6351 = vmatprep.mubr.bf16.mxu0 %v21967_v61 }
 0x238   : > { %14057 = vrot.lane.b32.xlu1 %v22109_v39, %s14370_s24  ;;  %6444 = vmatprep.subr.bf16.mxu0 %v22119_v31  ;;  %v22122_v31 = vunpack.i.l.bf16 %v18132_v19  ;;  %v2790_v10 = vcombine.high %v2638_v1, %v2638_v1  ;;  %v2605_v41 = vadd.f32 %v12587_v18, %v18035_v5  ;;  %v2582_v12 = vpop.f32.mrf.mxu1  ;;  %v2597_v21 = vadd.f32 %v2530_v34, %v18031_v47 }
 0x239   : > { %22115 = vst [vmem:[#allocation32_spill] sm:$0xff] %v18170_v30  ;;  %14062 = vrot.lane.b32.xlu0 %v22109_v39, %s14367_s21  ;;  %v2630_v30 = vadd.f32 %v22121_v17, %v2594_v27  ;;  %12689 = vmatpush3.bf16.msra.mxu1 %v22113_v28  ;;  %v2631_v49 = vadd.f32 %v22121_v17, %v2595_v0  ;;  %v22124_v27 = vld [vmem:[#allocation29_spill] sm:$0xff]  ;;  %v18207_v28 = vpop.permute.xlu1 %13797  ;;  %v2532_v0 = vpop.f32.mrf.mxu0 }
 0x23a   : > { %v18198_v37 = vsel %vm331_vm3, %v13780_v43, %v22122_v31  ;;  %v22125_v45 = vpack.c.bf16 %v22123_v7, %v22124_v27  ;;  %12690 = vmatprep.subr.bf16.mxu1 %v22126_v23  ;;  %v2656_v43 = vcombine.high %v2632_v54, %v2632_v54  ;;  %v2599_v17 = vadd.f32 %v2582_v12, %v18050_v16  ;;  %v22127_v27 = vld [vmem:[#allocation53_spill] sm:$0xff]  ;;  %v22128_v12 = vld [vmem:[#allocation10_spill] sm:$0xff] }
 0x23b   : > { %v18214_v5 = vpop.permute.xlu0 %13802  ;;  %v2654_v18 = vcombine.low %v2630_v30, %v2631_v49  ;;  %v2655_v7 = vcombine.high %v2630_v30, %v2631_v49  ;;  %v18220_v8 = vadd.f32 %v22127_v27, %v2605_v41  ;;  %v18223_v38 = vrot.slane %v2638_v1, %v14412_v6  ;;  %v22129_v31 = vld [vmem:[#allocation73_spill] sm:$0xff]  ;;  %v2536_v53 = vpop.f32.mrf.mxu0  ;;  %v22133_v16 = vld [vmem:[#allocation26_spill] sm:$0xff] }
 0x23c   : > { %6445 = vmatpush1.bf16.msra.mxu0 %v22125_v45  ;;  %14067 = vrot.lane.b32.xlu1 %v22109_v39, %s14368_s22  ;;  %v2684_v47 = vrot.slane %v2656_v43, %v14412_v6  ;;  %v2635_v34 = vadd.f32 %v22128_v12, %v2599_v17  ;;  %v22131_v26 = vpack.c.bf16 %v22129_v31, %v22130_v46  ;;  %v22132_v43 = vld [vmem:[#allocation71_spill] sm:$0xff] }
 0x23d   : > { %14072 = vrot.lane.b32.xlu0 %v22109_v39, %s14364_s18  ;;  %12691 = vmatpush3.bf16.msra.mxu1 %v22126_v23  ;;  %v18233_v30 = vrot.slane %v2790_v10, %v14412_v6  ;;  %v2677_v41 = vrot.slane %v2632_v54, %v14412_v6  ;;  %v2663_v49 = vrot.slane %v2654_v18, %v14412_v6  ;;  %v18241_v17 = vpop.permute.xlu1 %6884  ;;  %v22136_v23 = vld [vmem:[#allocation62_spill] sm:$0xff]  ;;  %v2538_v18 = vpop.f32.mrf.mxu0 }
 0x23e   : > { %6446 = vmatprep.subr.bf16.mxu0 %v22131_v26  ;;  %v2670_v1 = vrot.slane %v2655_v7, %v14412_v6  ;;  %v22134_v45 = vpack.c.bf16 %v22132_v43, %v22133_v16  ;;  %22135 = vst [vmem:[#allocation54_spill] sm:$0xff] %v18241_v17  ;;  %v2857_v26 = vcombine.high %v18220_v8, %v18220_v8 }
 0x23f   : > { %v2633_v54 = vadd.f32 %v22128_v12, %v2597_v21  ;;  %v2723_v10 = vcombine.high %v2635_v34, %v2635_v34  ;;  %12692 = vmatprep.subr.bf16.mxu1 %v22136_v23  ;;  %v18250_v31 = vpop.permute.xlu0 %6889  ;;  %v2685_v7 = vcombine.low %v2663_v49, %v2677_v41  ;;  %v18256_v46 = vrot.slane %v18220_v8, %v14412_v6 }
 0x240   : > { %6447 = vmatpush1.bf16.msra.mxu0 %v22134_v45  ;;  %14077 = vrot.lane.b32.xlu1 %v22109_v39, %s14366_s20  ;;  %22137 = vst [vmem:[#allocation23_spill] sm:$0xff] %v18250_v31  ;;  %v2686_v45 = vcombine.high %v2663_v49, %v2677_v41  ;;  %v2687_v16 = vcombine.low %v2670_v1, %v2684_v47  ;;  %v18262_v21 = vunpack.i.l.bf16 %v18214_v5 }
 0x241   : > { %v2688_v43 = vcombine.high %v2670_v1, %v2684_v47  ;;  %14082 = vrot.lane.b32.xlu0 %v22109_v39, %s14365_s19  ;;  %v18259_v17 = vrot.slane %v2723_v10, %v14412_v6  ;;  %v2598_v31 = vadd.f32 %v2532_v0, %v18044_v9  ;;  %v22138_v41 = vpack.c.bf16 %v17939_v42, %v17953_v32  ;;  %v2540_v47 = vpop.f32.mrf.mxu0  ;;  %v18274_v9 = vpop.permute.xlu1 %6894 }
 0x242   : > { %v2695_v49 = vrot.slane %v2685_v7, %v14412_v6  ;;  %v2702_v39 = vrot.slane %v2687_v16, %v14412_v6  ;;  %v2709_v8 = vrot.slane %v2686_v45, %v14412_v6  ;;  %12018 = vmatmul.mubr.msk.bf16.gmra.mxu0 %vm592_vm0, %v18095_v11  ;;  %22139 = vst [vmem:[#allocation65_spill] sm:$0xff] %v18274_v9 }
 0x243   : > { %6448 = vmatprep.subr.bf16.mxu0 %v22138_v41  ;;  %v2716_v1 = vrot.slane %v2688_v43, %v14412_v6  ;;  %v2634_v42 = vadd.f32 %v22128_v12, %v2598_v31  ;;  %v22140_v32 = vpack.i.bf16 %v17702_v3, %v22096_v4  ;;  %v2600_v0 = vadd.f32 %v2536_v53, %v18063_v57  ;;  %v18284_v45 = vpop.permute.xlu0 %6899  ;;  %v2542_v11 = vpop.f32.mrf.mxu0 }
 0x244   : > { %v2601_v10 = vadd.f32 %v2538_v18, %v18072_v50  ;;  %v2603_v7 = vadd.f32 %v2540_v47, %v18102_v15  ;;  %22141 = vst [vmem:[#allocation77_spill] sm:$0xff] %v18284_v45  ;;  %v2717_v16 = vcombine.high %v2695_v49, %v2695_v49  ;;  %v2718_v43 = vcombine.high %v2702_v39, %v2702_v39  ;;  %v22189_v45 = vld [vmem:[#allocation3_spill] sm:$0xff] }
 0x245   : > { %14087 = vrot.lane.b32.xlu1 %v22140_v32, %s14371_s25  ;;  %v2719_v12 = vcombine.high %v2709_v8, %v2709_v8  ;;  %v2720_v31 = vcombine.high %v2716_v1, %v2716_v1  ;;  %11792 = vst.msk [vmem:[%s17063_s26 + $0x1] ss:$8 sm:$0x7] %vm17010_vm10, %v2695_v49  ;;  %11793 = vst.msk [vmem:[%s17063_s26 + $0x19] ss:$8 sm:$0x7] %vm17010_vm10, %v2709_v8  ;;  %v22143_v53 = vpack.i.bf16 %v17918_v20, %v17717_v14 }
 0x246   : > { %11796 = vst.msk [vmem:[%s17063_s26 + $0x61] ss:$8 sm:$0x7] %vm17010_vm10, %v2702_v39  ;;  %11797 = vst.msk [vmem:[%s17063_s26 + $0x79] ss:$8 sm:$0x7] %vm17010_vm10, %v2716_v1  ;;  %v2721_v57 = vcombine.low %v2633_v54, %v2634_v42  ;;  %v2722_v50 = vcombine.high %v2633_v54, %v2634_v42  ;;  %v2636_v15 = vadd.f32 %v22116_v40, %v2600_v0  ;;  %12693 = vmatpush3.bf16.msra.mxu1 %v22136_v23  ;;  %v18327_v39 = vpop.permute.xlu1 %13807 }
 0x247   : > { %14092 = vrot.lane.b32.xlu0 %v22143_v53, %s14371_s25  ;;  %v2637_v18 = vadd.f32 %v22116_v40, %v2601_v10  ;;  %11794 = vst.msk [vmem:[%s17063_s26 + $0x31] ss:$8 sm:$0x7] %vm17010_vm10, %v2717_v16  ;;  %11795 = vst.msk [vmem:[%s17063_s26 + $0x49] ss:$8 sm:$0x7] %vm17010_vm10, %v2719_v12  ;;  %v18318_v54 = vrot.slane %v2857_v26, %v14412_v6  ;;  %v2744_v47 = vrot.slane %v2635_v34, %v14412_v6  ;;  %v18333_v34 = vpop.permute.xlu0 %13812 }
 0x248   : > { %11798 = vst.msk [vmem:[%s17063_s26 + $0x91] ss:$8 sm:$0x7] %vm17010_vm10, %v2718_v43  ;;  %11799 = vst.msk [vmem:[%s17063_s26 + $0xa9] ss:$8 sm:$0x7] %vm17010_vm10, %v2720_v31  ;;  %v13800_v40 = vunpack.i.h.bf16 %v18207_v28  ;;  %v22144_v23 = vpack.c.bf16 %v22075_v2, %v22074_v13  ;;  %12694 = vmatprep.subr.bf16.mxu1 %v18026_v58  ;;  %v2604_v49 = vadd.f32 %v2542_v11, %v18123_v51  ;;  %v13799_v13 = vunpack.i.l.bf16 %v18207_v28 }
 0x249   : > { %22145 = vst [vmem:[#allocation5_spill] sm:$0xff] %v18327_v39  ;;  %v2730_v8 = vrot.slane %v2721_v57, %v14412_v6  ;;  %v2737_v1 = vrot.slane %v2722_v50, %v14412_v6  ;;  %v2788_v26 = vcombine.low %v2636_v15, %v2637_v18  ;;  %v2789_v42 = vcombine.high %v2636_v15, %v2637_v18 }
 0x24a   : > { %6449 = vmatpush1.bf16.msra.mxu0 %v22144_v23  ;;  %14097 = vrot.lane.b32.xlu1 %v17957_v59, %s14369_s23  ;;  %22146 = vst [vmem:[#allocation83_spill] sm:$0xff] %v18333_v34  ;;  %v6734_v2 = vpack.c.bf16 %v18262_v21, %v18262_v21  ;;  %v2639_v51 = vadd.f32 %v22127_v27, %v2603_v7 }
 0x24b   : > { %14102 = vrot.lane.b32.xlu0 %v17957_v59, %s14370_s24  ;;  %v2640_v32 = vadd.f32 %v22127_v27, %v2604_v49  ;;  %v22147_v0 = vpack.c.bf16 %v18006_v22, %v22080_v52  ;;  %v2752_v10 = vcombine.low %v2730_v8, %v2744_v47  ;;  %v2753_v11 = vcombine.high %v2730_v8, %v2744_v47  ;;  %v18353_v22 = vpop.permute.xlu1 %13817 }
 0x24c   : > { %v2754_v16 = vcombine.low %v2737_v1, %v18259_v17  ;;  %v2755_v43 = vcombine.high %v2737_v1, %v18259_v17  ;;  %12695 = vmatpush3.bf16.msra.mxu1 %v18026_v58  ;;  %v2797_v12 = vrot.slane %v2788_v26, %v14412_v6  ;;  %v2804_v31 = vrot.slane %v2789_v42, %v14412_v6 }
 0x24d   : > { %6450 = vmatprep.subr.bf16.mxu0 %v22147_v0  ;;  %v2855_v53 = vcombine.low %v2639_v51, %v2640_v32  ;;  %v2856_v7 = vcombine.high %v2639_v51, %v2640_v32  ;;  %v22148_v27 = vpack.c.bf16 %v22086_v44, %v22085_v25  ;;  %22149 = vst [vmem:[#allocation43_spill] sm:$0xff] %v18353_v22  ;;  %v14332_v44 = vld [vmem:[%s21388_s1] sm:$0xff]   ;;  %v18364_v25 = vpop.permute.xlu0 %13822  ;;  %v18393_v51 = vld [vmem:[%s21388_s1 + $0x8] sm:$0xff]  }
 0x24e   : > { %v2762_v52 = vrot.slane %v2752_v10, %v14412_v6  ;;  %v2769_v57 = vrot.slane %v2754_v16, %v14412_v6  ;;  %v2776_v58 = vrot.slane %v2753_v11, %v14412_v6  ;;  %v2783_v17 = vrot.slane %v2755_v43, %v14412_v6  ;;  %14107 = vrot.lane.b32.xlu1 %v18099_v55, %s14369_s23 }
 0x24f   : > { %6451 = vmatpush1.bf16.msra.mxu0 %v22148_v27  ;;  %v2819_v50 = vcombine.low %v2797_v12, %v18223_v38  ;;  %v2820_v15 = vcombine.high %v2797_v12, %v18223_v38  ;;  %v2821_v18 = vcombine.low %v2804_v31, %v18233_v30  ;;  %v2822_v47 = vcombine.high %v2804_v31, %v18233_v30  ;;  %v18395_v32 = vpop.permute.xlu1 %13827 }
 0x250   : > { %14112 = vrot.lane.b32.xlu0 %v18099_v55, %s14370_s24  ;;  %v2784_v23 = vcombine.high %v2762_v52, %v2762_v52  ;;  %v2785_v49 = vcombine.high %v2769_v57, %v2769_v57  ;;  %v2786_v8 = vcombine.high %v2776_v58, %v2776_v58  ;;  %v2787_v1 = vcombine.high %v2783_v17, %v2783_v17 }
 0x251   : > { %11800 = vst.msk [vmem:[%s17063_s26 + $0xc1] ss:$8 sm:$0x7] %vm17010_vm10, %v2762_v52  ;;  %11801 = vst.msk [vmem:[%s17063_s26 + $0xd9] ss:$8 sm:$0x7] %vm17010_vm10, %v2776_v58  ;;  %12854 = vmatprep.subr.msk.bf16.mxu1 %vm599_vm2, %v6734_v2  ;;  %v2829_v38 = vrot.slane %v2819_v50, %v14412_v6  ;;  %v2836_v30 = vrot.slane %v2821_v18, %v14412_v6  ;;  %v2843_v26 = vrot.slane %v2820_v15, %v14412_v6  ;;  %v18419_v43 = vpop.permute.xlu0 %13832 }
 0x252   : > { %11804 = vst.msk [vmem:[%s17063_s26 + $0x121] ss:$8 sm:$0x7] %vm17010_vm10, %v2769_v57  ;;  %11805 = vst.msk [vmem:[%s17063_s26 + $0x139] ss:$8 sm:$0x7] %vm17010_vm10, %v2783_v17  ;;  %v2850_v42 = vrot.slane %v2822_v47, %v14412_v6  ;;  %6468 = vmatprep.mubr.bf16.mxu0 %v21967_v61  ;;  %v2864_v0 = vrot.slane %v2855_v53, %v14412_v6  ;;  %v2871_v10 = vrot.slane %v2856_v7, %v14412_v6 }
 0x253   : > { %11802 = vst.msk [vmem:[%s17063_s26 + $0xf1] ss:$8 sm:$0x7] %vm17010_vm10, %v2784_v23  ;;  %11803 = vst.msk [vmem:[%s17063_s26 + $0x109] ss:$8 sm:$0x7] %vm17010_vm10, %v2786_v8  ;;  %v6716_v11 = vsel %vm355_vm4, %v13800_v40, %v18262_v21  ;;  %14117 = vrot.lane.b32.xlu1 %v17957_v59, %s14367_s21  ;;  %12696 = vmatprep.mubr.msk.bf16.mxu1 %vm592_vm0, %v14332_v44  ;;  %v2851_v12 = vcombine.high %v2829_v38, %v2829_v38  ;;  %v22150_v58 = vunpack.i.l.bf16 %v18132_v19  ;;  %v18464_v50 = vpop.permute.xlu1 %13837 }
 0x254   : > { %11806 = vst.msk [vmem:[%s17063_s26 + $0x151] ss:$8 sm:$0x7] %vm17010_vm10, %v2785_v49  ;;  %11807 = vst.msk [vmem:[%s17063_s26 + $0x169] ss:$8 sm:$0x7] %vm17010_vm10, %v2787_v1  ;;  %v2852_v31 = vcombine.high %v2836_v30, %v2836_v30  ;;  %v2853_v53 = vcombine.high %v2843_v26, %v2843_v26  ;;  %v2854_v7 = vcombine.high %v2850_v42, %v2850_v42  ;;  %14122 = vrot.lane.b32.xlu0 %v17957_v59, %s14368_s22 }
 0x255   : > { %v6762_v16 = vsel %vm599_vm2, %v6734_v2, 0  ;;  %11808 = vst.msk [vmem:[%s17063_s26 + $0x181] ss:$8 sm:$0x7] %vm17010_vm10, %v2829_v38  ;;  %v2886_v21 = vcombine.low %v2864_v0, %v18256_v46  ;;  %v2887_v2 = vcombine.high %v2864_v0, %v18256_v46  ;;  %v2888_v27 = vcombine.low %v2871_v10, %v18318_v54  ;;  %12024 = vmatmul.mubr.msk.bf16.vlgmr.msra.gmra.mxu0 %vm592_vm0, %v14332_v44  ;;  %v18470_v28 = vpop.permute.xlu0 %13842 }
 0x256   : > { %11809 = vst.msk [vmem:[%s17063_s26 + $0x199] ss:$8 sm:$0x7] %vm17010_vm10, %v2843_v26  ;;  %11812 = vst.msk [vmem:[%s17063_s26 + $0x1e1] ss:$8 sm:$0x7] %vm17010_vm10, %v2836_v30  ;;  %v2889_v52 = vcombine.high %v2871_v10, %v18318_v54  ;;  %v21610_v46 = vunpack.i.l.bf16 %v18327_v39  ;;  %v6733_v57 = vpack.c.bf16 %v6716_v11, %v6716_v11  ;;  %12697 = vmatmul.mubr.msk.bf16.vlgmr.msra.gmra.mxu1 %vm592_vm0, %v18393_v51  ;;  %v22151_v17 = vunpack.i.l.bf16 %v18177_v62  ;;  %v18499_v11 = vpop.f32.mrf.mxu0 }
 0x257   : > { %11813 = vst.msk [vmem:[%s17063_s26 + $0x1f9] ss:$8 sm:$0x7] %vm17010_vm10, %v2850_v42  ;;  %11810 = vst.msk [vmem:[%s17063_s26 + $0x1b1] ss:$8 sm:$0x7] %vm17010_vm10, %v2851_v12  ;;  %v6715_v54 = vsel %vm355_vm4, %v13799_v13, %v13800_v40  ;;  %v2896_v15 = vrot.slane %v2886_v21, %v14412_v6  ;;  %v2903_v18 = vrot.slane %v2888_v27, %v14412_v6  ;;  %12701 = vmatpush3.bf16.msra.mxu1 %v6762_v16 }
 0x258   : > { %11811 = vst.msk [vmem:[%s17063_s26 + $0x1c9] ss:$8 sm:$0x7] %vm17010_vm10, %v2853_v53  ;;  %11814 = vst.msk [vmem:[%s17063_s26 + $0x211] ss:$8 sm:$0x7] %vm17010_vm10, %v2852_v31  ;;  %v6731_v44 = vpack.c.bf16 %v22151_v17, %v22150_v58  ;;  %v2910_v47 = vrot.slane %v2887_v2, %v14412_v6  ;;  %v2917_v23 = vrot.slane %v2889_v52, %v14412_v6  ;;  %v22152_v40 = vunpack.i.h.bf16 %v18165_v29 }
 0x259   : > { %11815 = vst.msk [vmem:[%s17063_s26 + $0x229] ss:$8 sm:$0x7] %vm17010_vm10, %v2854_v7  ;;  %v22153_v13 = vunpack.i.l.bf16 %v18165_v29  ;;  %v13805_v8 = vunpack.i.h.bf16 %v18214_v5  ;;  %v21612_v1 = vunpack.i.l.bf16 %v18333_v34  ;;  %12042 = vmatprep.subr.msk.bf16.mxu0 %vm599_vm2, %v6733_v57  ;;  %v6732_v38 = vpack.c.bf16 %v6715_v54, %v6715_v54  ;;  %v18483_v30 = vld [vmem:[%s21388_s1 + $0x20] sm:$0xff]   ;;  %14127 = vrot.lane.b32.xlu1 %v18099_v55, %s14367_s21  ;;  %v18508_v7 = vpop.permute.xlu1 %13847  ;;  %v18636_v5 = vpop.f32.mrf.mxu1 }
 0x25a   : > { %12702 = vmatprep.subr.bf16.mxu1 %v6731_v44  ;;  %v2918_v26 = vcombine.high %v2896_v15, %v2896_v15  ;;  %v2919_v42 = vcombine.high %v2903_v18, %v2903_v18  ;;  %v2920_v0 = vcombine.high %v2910_v47, %v2910_v47  ;;  %v2921_v10 = vcombine.high %v2917_v23, %v2917_v23 }
 0x25b   : > { %v6704_v49 = vsel %vm343_vm1, %v22153_v13, %v22152_v40  ;;  %11816 = vst.msk [vmem:[%s17063_s26 + $0x241] ss:$8 sm:$0x7] %vm17010_vm10, %v2896_v15  ;;  %11817 = vst.msk [vmem:[%s17063_s26 + $0x259] ss:$8 sm:$0x7] %vm17010_vm10, %v2910_v47  ;;  %v21611_v31 = vunpack.i.l.bf16 %v18353_v22  ;;  %v13825_v53 = vunpack.i.h.bf16 %v18364_v25  ;;  %14132 = vrot.lane.b32.xlu0 %v18099_v55, %s14368_s22  ;;  %6478 = vmatprep.mubr.bf16.mxu0 %v21967_v61  ;;  %v22154_v21 = vunpack.i.h.bf16 %v17907_v36  ;;  %v18538_v15 = vpop.f32.mrf.mxu0 }
 0x25c   : > { %11820 = vst.msk [vmem:[%s17063_s26 + $0x2a1] ss:$8 sm:$0x7] %vm17010_vm10, %v2903_v18  ;;  %11821 = vst.msk [vmem:[%s17063_s26 + $0x2b9] ss:$8 sm:$0x7] %vm17010_vm10, %v2917_v23  ;;  %v22156_v52 = vmov %v22151_v17  ;;  %v22157_v57 = vmov %v22152_v40  ;;  %12703 = vmatpush3.bf16.msra.mxu1 %v6731_v44  ;;  %v13830_v58 = vunpack.i.h.bf16 %v18395_v32  ;;  %v18536_v17 = vpop.permute.xlu0 %13852  ;;  %v22158_v36 = vunpack.i.h.bf16 %v17944_v33  ;;  %12710 = vmatprep.mubr.msk.bf16.mxu1 %vm592_vm0, %v18483_v30 }
 0x25d   : > { %v6756_v12 = vsel %vm599_vm2, %v6732_v38, 0  ;;  %11818 = vst.msk [vmem:[%s17063_s26 + $0x271] ss:$8 sm:$0x7] %vm17010_vm10, %v2918_v26  ;;  %v18527_v2 = vsel %vm271_vm9, %v22154_v21, %v21610_v46  ;;  %v6705_v54 = vsel %vm343_vm1, %v22157_v57, %v22156_v52  ;;  %12704 = vmatprep.subr.bf16.mxu1 %v18145_v56  ;;  %v13835_v29 = vunpack.i.h.bf16 %v18419_v43  ;;  %14137 = vrot.lane.b32.xlu1 %v17957_v59, %s14364_s18  ;;  %v18561_v13 = vpop.f32.mrf.mxu0  ;;  %v22167_v57 = vld [vmem:[#allocation58_spill] sm:$0xff]  ;;  %v22175_v46 = vld [vmem:[#allocation52_spill] sm:$0xff] }
 0x25e   : > { %11819 = vst.msk [vmem:[%s17063_s26 + $0x289] ss:$8 sm:$0x7] %vm17010_vm10, %v2920_v0  ;;  %11822 = vst.msk [vmem:[%s17063_s26 + $0x2d1] ss:$8 sm:$0x7] %vm17010_vm10, %v2919_v42  ;;  %6771 = vmatpush1.bf16.msra.mxu0 %v6756_v12  ;;  %v18545_v18 = vsel %vm283_vm8, %v22158_v36, %v21612_v1  ;;  %v6730_v47 = vpack.c.bf16 %v6705_v54, %v18198_v37  ;;  %v13840_v44 = vunpack.i.h.bf16 %v18464_v50  ;;  %v13824_v40 = vunpack.i.l.bf16 %v18364_v25 }
 0x25f   : > { %11823 = vst.msk [vmem:[%s17063_s26 + $0x2e9] ss:$8 sm:$0x7] %vm17010_vm10, %v2921_v10  ;;  %22155 = vst [vmem:[#allocation42_spill] sm:$0xff] %v18527_v2  ;;  %v6729_v33 = vpack.c.bf16 %v6704_v49, %v18186_v60  ;;  %12025 = vmatmul.mubr.msk.bf16.gmra.mxu0 %vm592_vm0, %v18393_v51  ;;  %v13845_v37 = vunpack.i.h.bf16 %v18470_v28  ;;  %v22160_v38 = vunpack.i.h.bf16 %v17993_v24  ;;  %v18570_v25 = vpack.c.bf16 %v13825_v53, %v13825_v53  ;;  %v18576_v51 = vpop.permute.xlu1 %13857  ;;  %v18593_v21 = vpop.f32.mrf.mxu0 }
 0x260   : > { %22159 = vst [vmem:[#allocation41_spill] sm:$0xff] %v18545_v18  ;;  %6772 = vmatprep.subr.bf16.mxu0 %v6730_v47  ;;  %v13829_v60 = vunpack.i.l.bf16 %v18395_v32  ;;  %v13834_v49 = vunpack.i.l.bf16 %v18419_v43  ;;  %14142 = vrot.lane.b32.xlu0 %v17957_v59, %s14366_s20  ;;  %22162 = vst [vmem:[#allocation74_spill] sm:$0xff] %v18576_v51  ;;  %v22163_v42 = vunpack.i.h.bf16 %v18132_v19  ;;  %v22164_v0 = vunpack.i.h.bf16 %v18177_v62  ;;  %v18591_v12 = vpop.permute.xlu0 %13862  ;;  %v12288_v2 = vld [vmem:[%s14410_s17 + $0x109] ss:$8 sm:$0x7] }
 0x261   : > { %v18568_v26 = vsel %vm295_vm7, %v22160_v38, %v21611_v31  ;;  %12705 = vmatpush3.bf16.msra.mxu1 %v18145_v56  ;;  %22165 = vst [vmem:[#allocation70_spill] sm:$0xff] %v18591_v12  ;;  %v22166_v52 = vpack.c.bf16 %v18139_v35, %v18106_v63  ;;  %v22168_v54 = vunpack.i.h.bf16 %v22167_v57  ;;  %v13859_v36 = vunpack.i.l.bf16 %v18576_v51  ;;  %14147 = vrot.lane.b32.xlu1 %v18099_v55, %s14364_s18  ;;  %v22171_v35 = vld [vmem:[#allocation66_spill] sm:$0xff]  ;;  %v22181_v56 = vld [vmem:[#allocation24_spill] sm:$0xff] }
 0x262   : > { %22161 = vst [vmem:[#allocation33_spill] sm:$0xff] %v18568_v26  ;;  %6773 = vmatpush1.bf16.msra.mxu0 %v6729_v33  ;;  %v18581_v24 = vsel %vm331_vm3, %v13830_v58, %v22163_v42  ;;  %v18586_v10 = vsel %vm343_vm1, %v13835_v29, %v22164_v0  ;;  %12706 = vmatprep.subr.bf16.mxu1 %v18074_v48  ;;  %v13864_v47 = vunpack.i.l.bf16 %v18591_v12  ;;  %v22169_v29 = vld [vmem:[#allocation38_spill] sm:$0xff]  ;;  %v13849_v63 = vunpack.i.l.bf16 %v18508_v7  ;;  %v22172_v42 = vld [vmem:[#allocation64_spill] sm:$0xff] }
 0x263   : > { %6774 = vmatprep.subr.bf16.mxu0 %v22166_v52  ;;  %v18602_v58 = vsel %vm307_vm6, %v13840_v44, %v22168_v54  ;;  %v22170_v33 = vunpack.i.h.bf16 %v22169_v29  ;;  %v18617_v44 = vcombine.high %v22172_v42, %v22171_v35  ;;  %6796 = vmatprep.mubr.bf16.mxu0 %v21967_v61  ;;  %v7684_v0 = vsel %vm355_vm4, %v13805_v8, %v13824_v40  ;;  %v18623_v52 = vpop.f32.mrf.mxu0  ;;  %v18634_v42 = vpop.permute.xlu1 %13867  ;;  %v22176_v8 = vld [vmem:[#allocation36_spill] sm:$0xff]  ;;  %v22177_v31 = vld [vmem:[#allocation6_spill] sm:$0xff] }
 0x264   : > { %14152 = vrot.lane.b32.xlu0 %v18099_v55, %s14366_s20  ;;  %v13854_v54 = vunpack.i.l.bf16 %v18536_v17  ;;  %v18632_v35 = vsel %vm355_vm4, %v13824_v40, %v13825_v53  ;;  %v22178_v1 = vpack.c.bf16 %v22176_v8, %v22177_v31  ;;  %v18646_v53 = vpop.permute.xlu0 %13872  ;;  %v22183_v31 = vld [vmem:[#allocation32_spill] sm:$0xff]  ;;  %v13869_v8 = vunpack.i.l.bf16 %v18634_v42 }
 0x265   : > { %v18610_v38 = vsel %vm319_vm5, %v13845_v37, %v22170_v33  ;;  %22173 = vst [vmem:[#allocation14_spill] sm:$0xff] %v18617_v44  ;;  %v22174_v33 = vld [vmem:[#allocation56_spill] sm:$0xff]  ;;  %12707 = vmatpush3.bf16.msra.mxu1 %v18074_v48  ;;  %22179 = vst [vmem:[#allocation55_spill] sm:$0xff] %v18646_v53  ;;  %v18648_v40 = vpop.f32.mrf.mxu0  ;;  %v22180_v37 = vld [vmem:[#allocation22_spill] sm:$0xff]  ;;  %v18655_v48 = vsel %vm283_vm8, %v13859_v36, %v13849_v63  ;;  %14157 = vrot.lane.b32.xlu1 %v17957_v59, %s14365_s19  ;;  %v22195_v4 = vunpack.i.h.bf16 %v22169_v29 }
 0x266   : > { %v6720_v16 = vpack.c.bf16 %v22175_v46, %v22174_v33  ;;  %6775 = vmatpush1.bf16.msra.mxu0 %v22178_v1  ;;  %v7731_v46 = vsel %vm599_vm2, %v18570_v25, 0  ;;  %v7701_v33 = vpack.c.bf16 %v7684_v0, %v7684_v0  ;;  %v22182_v43 = vpack.c.bf16 %v22180_v37, %v22181_v56  ;;  %12708 = vmatprep.subr.bf16.mxu1 %v22183_v31  ;;  %v22184_v56 = vld [vmem:[#allocation51_spill] sm:$0xff] }
 0x267   : > { %v18658_v1 = vsel %vm295_vm7, %v13864_v47, %v13854_v54  ;;  %v13874_v0 = vunpack.i.l.bf16 %v18646_v53  ;;  %v7702_v27 = vpack.c.bf16 %v18632_v35, %v18632_v35  ;;  %v22185_v37 = vunpack.i.h.bf16 %v18132_v19  ;;  %v18678_v32 = vpop.f32.mrf.mxu0  ;;  %v18689_v19 = vld [vmem:[%s21388_s1 + $0x28] sm:$0xff]  }
 0x268   : > { %6776 = vmatprep.subr.bf16.mxu0 %v22182_v43  ;;  %v14166_v43 = vpack.i.bf16 %v18617_v44, %v22184_v56  ;;  %v22186_v47 = vunpack.i.h.bf16 %v18177_v62  ;;  %22187 = vst [vmem:[#allocation69_spill] sm:$0xff] %v18678_v32  ;;  %14162 = vrot.lane.b32.xlu0 %v18099_v55, %s14365_s19  ;;  %v18684_v59 = vpack.i.bf16 %v17918_v20, %v18617_v44  ;;  %v13870_v62 = vunpack.i.h.bf16 %v18634_v42  ;;  %v22188_v55 = vld [vmem:[#allocation16_spill] sm:$0xff]  ;;  %v18703_v20 = vpop.permute.xlu0 %13882 }
 0x269   : > { %v18671_v36 = vsel %vm331_vm3, %v22185_v37, %v13829_v60  ;;  %v18691_v35 = vpack.c.bf16 %v13834_v49, %v13829_v60  ;;  %v18694_v37 = vpop.permute.xlu1 %13877  ;;  %v22190_v9 = vpack.c.bf16 %v22188_v55, %v22189_v45  ;;  %12709 = vmatpush3.bf16.msra.mxu1 %v22183_v31  ;;  %v7725_v56 = vsel %vm599_vm2, %v7701_v33, 0  ;;  %22191 = vst [vmem:[#allocation72_spill] sm:$0xff] %v18703_v20  ;;  %v22196_v45 = vld [vmem:[#allocation37_spill] sm:$0xff] }
 0x26a   : > { %v18676_v23 = vsel %vm343_vm1, %v22186_v47, %v13834_v49  ;;  %v18696_v47 = vpop.f32.mrf.mxu1  ;;  %v22192_v60 = vunpack.i.l.bf16 %v18464_v50  ;;  %v22193_v49 = vunpack.i.h.bf16 %v22167_v57  ;;  %v22194_v44 = vunpack.i.l.bf16 %v18470_v28  ;;  %v22197_v31 = vld [vmem:[#allocation57_spill] sm:$0xff]  ;;  %12855 = vmatprep.subr.msk.bf16.mxu1 %vm599_vm2, %v18570_v25  ;;  %14167 = vrot.lane.b32.xlu1 %v14166_v43, %s14371_s25  ;;  %v12251_v43 = vld [vmem:[%s14410_s17 + $0x67] ss:$8 sm:$0x7] }
 0x26b   : > { %6777 = vmatpush1.bf16.msra.mxu0 %v22190_v9  ;;  %v22198_v33 = vpack.c.bf16 %v22196_v45, %v22197_v31  ;;  %v18726_v55 = vsel %vm271_vm9, %v13874_v0, %v13869_v8  ;;  %v7699_v29 = vpack.c.bf16 %v18676_v23, %v18671_v36  ;;  %v22200_v25 = vunpack.i.l.bf16 %v18470_v28  ;;  %v12252_v57 = vld [vmem:[%s14410_s17 + $0x97] ss:$8 sm:$0x7]  ;;  %v12284_v12 = vld [vmem:[%s14410_s17 + $0x49] ss:$8 sm:$0x7] }
 0x26c   : > { %v18710_v42 = vsel %vm307_vm6, %v22193_v49, %v22192_v60  ;;  %v18717_v9 = vsel %vm319_vm5, %v22195_v4, %v22194_v44  ;;  %v12249_v44 = vld [vmem:[%s14410_s17 + $0x7] ss:$8 sm:$0x7]  ;;  %v22199_v49 = vunpack.i.l.bf16 %v18464_v50  ;;  %v18742_v0 = vunpack.i.l.bf16 %v18703_v20  ;;  %14172 = vrot.lane.b32.xlu0 %v18684_v59, %s14369_s23  ;;  %12711 = vmatmul.mubr.msk.bf16.vlgmr.msra.gmra.mxu1 %vm592_vm0, %v18689_v19  ;;  %v18769_v23 = vpop.f32.mrf.mxu1  ;;  %v18784_v53 = vpop.permute.xlu0 %13892  ;;  %v12283_v50 = vld [vmem:[%s14410_s17 + $0x19] ss:$8 sm:$0x7] }
 0x26d   : > { %6778 = vmatprep.subr.bf16.mxu0 %v22198_v33  ;;  %v12250_v60 = vld [vmem:[%s14410_s17 + $0x37] ss:$8 sm:$0x7]  ;;  %v22201_v36 = vunpack.i.h.bf16 %v18508_v7  ;;  %v18751_v33 = vpop.f32.mrf.mxu0  ;;  %v18760_v28 = vpop.permute.xlu1 %13887  ;;  %12715 = vmatpush3.bf16.msra.mxu1 %v7731_v46  ;;  %v10834_v26 = vcombine.low %v12283_v50, %v12284_v12  ;;  %v12290_v18 = vld [vmem:[%s14410_s17 + $0x169] ss:$8 sm:$0x7] }
 0x26e   : > { %v18739_v45 = vpack.c.bf16 %v22200_v25, %v22199_v49  ;;  %22202 = vst [vmem:[#allocation44_spill] sm:$0xff] %v18751_v33  ;;  %v22203_v49 = vunpack.i.h.bf16 %v18536_v17  ;;  %v12253_v25 = vld [vmem:[%s14410_s17 + $0xc7] ss:$8 sm:$0x7]  ;;  %v18774_v3 = vpack.c.bf16 %v18742_v0, %v18742_v0  ;;  %12716 = vmatprep.subr.bf16.mxu1 %v18691_v35  ;;  %14177 = vrot.lane.b32.xlu1 %v18684_v59, %s14370_s24  ;;  %v22207_v4 = vld [vmem:[#allocation49_spill] sm:$0xff] }
 0x26f   : > { %v18749_v31 = vsel %vm283_vm8, %v13849_v63, %v22201_v36  ;;  %v12254_v36 = vld [vmem:[%s14410_s17 + $0xf7] ss:$8 sm:$0x7]  ;;  %6779 = vmatpush1.bf16.msra.mxu0 %v6720_v16  ;;  %v10186_v17 = vcombine.low %v12249_v44, %v12250_v60 }
 0x270   : > { %v18765_v63 = vsel %vm295_vm7, %v13854_v54, %v22203_v49  ;;  %v22204_v54 = vunpack.i.h.bf16 %v18508_v7  ;;  %v12255_v16 = vld [vmem:[%s14410_s17 + $0x127] ss:$8 sm:$0x7]  ;;  %12101 = vmatprep.subr.msk.bf16.mxu0 %vm599_vm2, %v7702_v27  ;;  %v18796_v7 = vsel %vm271_vm9, %v13869_v8, %v13870_v62  ;;  %v18800_v27 = vpop.f32.mrf.mxu0  ;;  %14182 = vrot.lane.b32.xlu0 %v18684_v59, %s14367_s21  ;;  %v18819_v41 = vpop.permute.xlu0 %13902  ;;  %v12289_v8 = vld [vmem:[%s14410_s17 + $0x139] ss:$8 sm:$0x7] }
 0x271   : > { %v12256_v46 = vld [vmem:[%s14410_s17 + $0x157] ss:$8 sm:$0x7]  ;;  %v18812_v60 = vpop.permute.xlu1 %13897  ;;  %12717 = vmatpush3.bf16.msra.mxu1 %v18691_v35  ;;  %v13904_v12 = vunpack.i.l.bf16 %v18819_v41 }
 0x272   : > { %v18782_v14 = vpack.c.bf16 %v22203_v49, %v22204_v54  ;;  %v10187_v54 = vcombine.low %v12251_v43, %v12252_v57  ;;  %v10188_v49 = vcombine.low %v12253_v25, %v12254_v36  ;;  %12043 = vmatmul.mubr.msk.bf16.vlgmr.msra.gmra.mxu0 %vm592_vm0, %v18483_v30  ;;  %v22205_v44 = vld [vmem:[#allocation50_spill] sm:$0xff]  ;;  %v10189_v43 = vcombine.low %v12255_v16, %v12256_v46  ;;  %v18815_v36 = vpop.f32.mrf.mxu1  ;;  %v12286_v16 = vld [vmem:[%s14410_s17 + $0xa9] ss:$8 sm:$0x7]  ;;  %v18827_v51 = vpop.f32.mrf.mxu0 }
 0x273   : > { %v18810_v57 = vpack.c.bf16 %v13870_v62, %v22205_v44  ;;  %v12285_v25 = vld [vmem:[%s14410_s17 + $0x79] ss:$8 sm:$0x7]  ;;  %22206 = vst [vmem:[#allocation63_spill] sm:$0xff] %v18815_v36  ;;  %7740 = vmatpush1.bf16.msra.mxu0 %v7725_v56  ;;  %v10196_v62 = vrot.slane %v10186_v17, %v14412_v6  ;;  %12718 = vmatprep.subr.bf16.mxu1 %v18739_v45  ;;  %v13899_v17 = vunpack.i.l.bf16 %v18812_v60 }
 0x274   : > { %v10203_v44 = vrot.slane %v10187_v54, %v14412_v6  ;;  %v12287_v46 = vld [vmem:[%s14410_s17 + $0xd9] ss:$8 sm:$0x7]  ;;  %7741 = vmatprep.subr.bf16.mxu0 %v7699_v29  ;;  %v10210_v35 = vrot.slane %v10188_v49, %v14412_v6  ;;  %v10217_v30 = vrot.slane %v10189_v43, %v14412_v6  ;;  %14187 = vrot.lane.b32.xlu1 %v18684_v59, %s14368_s22  ;;  %v18840_v39 = vpop.f32.mrf.mxu0  ;;  %v18844_v49 = vsel %vm599_vm2, %v18774_v3, 0  ;;  %v18851_v33 = vpop.f32.mrf.mxu1 }
 0x275   : > { %6806 = vmatprep.mubr.bf16.mxu0 %v21967_v61  ;;  %14192 = vrot.lane.b32.xlu0 %v18684_v59, %s14364_s18  ;;  %v10835_v56 = vcombine.low %v12285_v25, %v12286_v16  ;;  %v18849_v20 = vpop.permute.xlu1 %13907  ;;  %v10836_v22 = vcombine.low %v12287_v46, %v12288_v2  ;;  %v18860_v34 = vpop.permute.xlu0 %13912  ;;  %v10837_v16 = vcombine.low %v12289_v8, %v12290_v18  ;;  %v22210_v2 = vunpack.i.l.bf16 %v18760_v28  ;;  %v18890_v18 = vld [vmem:[%s21388_s1 + $0x10] sm:$0xff]  }
 0x276   : > { %v10218_v54 = vcombine.low %v10196_v62, %v10203_v44  ;;  %v10219_v29 = vcombine.high %v10196_v62, %v10203_v44  ;;  %v10220_v50 = vcombine.low %v10210_v35, %v10217_v30  ;;  %v10221_v43 = vcombine.high %v10210_v35, %v10217_v30  ;;  %12719 = vmatpush3.bf16.msra.mxu1 %v18739_v45  ;;  %v18862_v25 = vpop.f32.mrf.mxu0 }
 0x277   : > { %v22208_v62 = vpack.c.bf16 %v18586_v10, %v18581_v24  ;;  %v21636_v44 = vunpack.i.h.bf16 %v18812_v60  ;;  %v22209_v30 = vpack.c.bf16 %v18717_v9, %v18710_v42  ;;  %12720 = vmatprep.subr.bf16.mxu1 %v18782_v14  ;;  %v21638_v24 = vunpack.i.h.bf16 %v18819_v41  ;;  %12724 = vmatprep.mubr.msk.bf16.mxu1 %vm592_vm0, %v18890_v18 }
 0x278   : > { %v10228_v36 = vrot.slane %v10218_v54, %v14412_v6  ;;  %v10235_v32 = vrot.slane %v10219_v29, %v14412_v6  ;;  %v10242_v10 = vrot.slane %v10220_v50, %v14412_v6  ;;  %v10249_v45 = vrot.slane %v10221_v43, %v14412_v6  ;;  %14197 = vrot.lane.b32.xlu1 %v18684_v59, %s14366_s20  ;;  %v18892_v8 = vpop.f32.mrf.mxu0  ;;  %v18910_v50 = vpop.f32.mrf.mxu1 }
 0x279   : > { %7742 = vmatpush1.bf16.msra.mxu0 %v22208_v62  ;;  %v18876_v46 = vsel %vm331_vm3, %v13899_v17, %v22210_v2  ;;  %v18879_v42 = vrot.slane %v10834_v26, %v14412_v6  ;;  %v18882_v9 = vrot.slane %v10835_v56, %v14412_v6  ;;  %v18885_v35 = vrot.slane %v10836_v22, %v14412_v6  ;;  %v18908_v29 = vpop.permute.xlu1 %13917  ;;  %v18926_v62 = vpop.permute.xlu0 %13922 }
 0x27a   : > { %7743 = vmatprep.subr.bf16.mxu0 %v22209_v30  ;;  %12044 = vmatmul.mubr.msk.bf16.gmra.mxu0 %vm592_vm0, %v18689_v19  ;;  %v22211_v26 = vunpack.i.l.bf16 %v18784_v53  ;;  %v18903_v22 = vcombine.low %v10228_v36, %v10242_v10  ;;  %v18905_v17 = vcombine.low %v10235_v32, %v10249_v45  ;;  %v13910_v54 = vunpack.i.h.bf16 %v18849_v20 }
 0x27b   : > { %14202 = vrot.lane.b32.xlu0 %v18684_v59, %s14365_s19  ;;  %v22214_v19 = vpack.c.bf16 %v18610_v38, %v18602_v58  ;;  %12721 = vmatpush3.bf16.msra.mxu1 %v18782_v14  ;;  %v18917_v59 = vrot.slane %v10837_v16, %v14412_v6  ;;  %v18923_v32 = vadd.f32 %v18800_v27, %v18499_v11  ;;  %v13909_v43 = vunpack.i.l.bf16 %v18849_v20 }
 0x27c   : > { %v18901_v56 = vsel %vm343_vm1, %v13904_v12, %v22211_v26  ;;  %22212 = vst [vmem:[#allocation76_spill] sm:$0xff] %v18903_v22  ;;  %22213 = vst [vmem:[#allocation31_spill] sm:$0xff] %v18905_v17  ;;  %v10866_v12 = vcombine.low %v18879_v42, %v18882_v9  ;;  %v22215_v58 = vpack.c.bf16 %v18765_v63, %v18749_v31  ;;  %12722 = vmatprep.subr.bf16.mxu1 %v18810_v57  ;;  %v22218_v63 = vld [vmem:[#allocation40_spill] sm:$0xff] }
 0x27d   : > { %7744 = vmatpush1.bf16.msra.mxu0 %v22214_v19  ;;  %v14206_v14 = vpack.i.bf16 %v18905_v17, %v18903_v22  ;;  %v18934_v38 = vcombine.high %v10228_v36, %v10242_v10  ;;  %v13915_v30 = vunpack.i.h.bf16 %v18860_v34  ;;  %v22217_v11 = vunpack.i.h.bf16 %v18694_v37  ;;  %v18954_v10 = vpop.f32.mrf.mxu0  ;;  %7765 = vmatprep.mubr.bf16.mxu0 %v21967_v61 }
 0x27e   : > { %7745 = vmatprep.subr.bf16.mxu0 %v22215_v58  ;;  %v10868_v45 = vcombine.low %v18885_v35, %v18917_v59  ;;  %v18944_v31 = vrot.slane %v10866_v12, %v14412_v6  ;;  %v7689_v16 = vpack.c.bf16 %v18726_v55, %v22218_v63  ;;  %v18950_v36 = vadd.f32 %v18827_v51, %v18538_v15  ;;  %v18965_v55 = vld [vmem:[%s21388_s1 + $0x18] sm:$0xff]   ;;  %v18973_v12 = vpop.permute.xlu1 %13927  ;;  %v18975_v58 = vpop.f32.mrf.mxu1 }
 0x27f   : > { %22216 = vst [vmem:[#allocation68_spill] sm:$0xff] %v18934_v38  ;;  %v7492_v27 = vsel %vm355_vm4, %v22217_v11, %v18742_v0  ;;  %14207 = vrot.lane.b32.xlu1 %v14206_v14, %s14371_s25  ;;  %v18959_v2 = vpack.i.bf16 %v18934_v38, %v18905_v17  ;;  %v22219_v15 = vmov %v22217_v11  ;;  %v22220_v51 = vunpack.i.l.bf16 %v18694_v37  ;;  %12723 = vmatpush3.bf16.msra.mxu1 %v18810_v57  ;;  %v18989_v63 = vpop.permute.xlu0 %13932 }
 0x280   : > { %v7509_v0 = vpack.c.bf16 %v7492_v27, %v7492_v27  ;;  %v13919_v19 = vunpack.i.l.bf16 %v18908_v29  ;;  %v22221_v14 = vpack.c.bf16 %v18658_v1, %v18655_v48  ;;  %v18981_v11 = vrot.slane %v10868_v45, %v14412_v6  ;;  %12856 = vmatprep.subr.msk.bf16.mxu1 %vm599_vm2, %v18774_v3 }
 0x281   : > { %v7491_v26 = vsel %vm355_vm4, %v22220_v51, %v22219_v15  ;;  %v13914_v27 = vunpack.i.l.bf16 %v18860_v34  ;;  %v18987_v37 = vadd.f32 %v18840_v39, %v18561_v13  ;;  %v22222_v15 = vpack.c.bf16 %v18796_v7, %v22207_v4 }
 0x282   : > { %7746 = vmatpush1.bf16.msra.mxu0 %v22221_v14  ;;  %v7508_v48 = vpack.c.bf16 %v7491_v26, %v7491_v26  ;;  %v22223_v1 = vunpack.i.h.bf16 %v18760_v28  ;;  %v22224_v57 = vunpack.i.h.bf16 %v18784_v53  ;;  %v13924_v51 = vunpack.i.l.bf16 %v18926_v62  ;;  %12725 = vmatmul.mubr.msk.bf16.vlgmr.msra.gmra.mxu1 %vm592_vm0, %v18965_v55 }
 0x283   : > { %7747 = vmatprep.subr.bf16.mxu0 %v22222_v15  ;;  %v22226_v13 = vunpack.i.l.bf16 %v18760_v28  ;;  %v19008_v4 = vcombine.low %v18944_v31, %v18981_v11  ;;  %v19013_v3 = vsel %vm307_vm6, %v13919_v19, %v13909_v43  ;;  %v22229_v26 = vunpack.i.l.bf16 %v18784_v53  ;;  %14217 = vrot.lane.b32.xlu1 %v18959_v2, %s14369_s23 }
 0x284   : > { %v7507_v45 = vpack.c.bf16 %v22224_v57, %v22223_v1  ;;  %v22225_v39 = vmov %v22223_v1  ;;  %v22228_v7 = vmov %v22224_v57  ;;  %v10867_v28 = vcombine.high %v18879_v42, %v18882_v9  ;;  %v3636_v1 = vpop.f32.mrf.mxu0  ;;  %v3678_v9 = vpop.f32.mrf.mxu1  ;;  %12729 = vmatpush3.bf16.msra.mxu1 %v18844_v49 }
 0x285   : > { %v7470_v14 = vsel %vm331_vm3, %v22226_v13, %v22225_v39  ;;  %22227 = vst [vmem:[#allocation80_spill] sm:$0xff] %v19008_v4  ;;  %v7481_v15 = vsel %vm343_vm1, %v22229_v26, %v22228_v7  ;;  %v19029_v19 = vsel %vm319_vm5, %v13924_v51, %v13914_v27  ;;  %v19033_v53 = vadd.f32 %v18862_v25, %v18593_v21  ;;  %v19038_v39 = vpop.permute.xlu1 %13937  ;;  %v19043_v13 = vld [vmem:[%s21388_s1] sm:$0xff]  }
 0x286   : > { %v10869_v57 = vcombine.high %v18885_v35, %v18917_v59  ;;  %v13930_v42 = vunpack.i.h.bf16 %v18973_v12  ;;  %v14211_v51 = vpack.i.bf16 %v19008_v4, %v18934_v38  ;;  %7748 = vmatpush1.bf16.msra.mxu0 %v7689_v16  ;;  %v7506_v21 = vpack.c.bf16 %v7481_v15, %v7470_v14  ;;  %v19050_v59 = vpop.permute.xlu0 %13942  ;;  %12730 = vmatprep.subr.bf16.mxu1 %v7507_v45 }
 0x287   : > { %v10883_v25 = vrot.slane %v10867_v28, %v14412_v6  ;;  %v21637_v35 = vunpack.i.l.bf16 %v18973_v12  ;;  %12108 = vmatprep.subr.msk.bf16.mxu0 %vm599_vm2, %v7509_v0  ;;  %v3684_v16 = vadd.f32 %v18851_v33, %v18636_v5  ;;  %v13935_v49 = vunpack.i.h.bf16 %v18989_v63  ;;  %v3638_v5 = vpop.f32.mrf.mxu0  ;;  %12738 = vmatprep.mubr.msk.bf16.mxu1 %vm592_vm0, %v19043_v13 }
 0x288   : > { %v10897_v26 = vrot.slane %v10869_v57, %v14412_v6  ;;  %14212 = vrot.lane.b32.xlu0 %v14211_v51, %s14371_s25  ;;  %v19062_v14 = vadd.f32 %v18892_v8, %v18623_v52  ;;  %v3676_v0 = vadd.f32 %v18910_v50, %v18696_v47  ;;  %v7505_v15 = vpack.c.bf16 %v18901_v56, %v18876_v46  ;;  %v12628_v46 = vpop.f32.mrf.mxu1 }
 0x289   : > { %v7504_v28 = vpack.c.bf16 %v13915_v30, %v13910_v54  ;;  %12102 = vmatmul.mubr.msk.bf16.vlgmr.msra.gmra.mxu0 %vm592_vm0, %v18890_v18  ;;  %v7852_v33 = vsel %vm599_vm2, %v7508_v48, 0  ;;  %v19077_v52 = vpack.c.bf16 %v13930_v42, %v13930_v42  ;;  %v19082_v47 = vsel %vm355_vm4, %v21637_v35, %v13930_v42  ;;  %v19084_v8 = vpop.permute.xlu1 %13947  ;;  %12731 = vmatpush3.bf16.msra.mxu1 %v7507_v45 }
 0x28a   : > { %v19075_v57 = vcombine.low %v10883_v25, %v10897_v26  ;;  %7867 = vmatpush1.bf16.msra.mxu0 %v7852_v33  ;;  %v19093_v56 = vsel %vm331_vm3, %v13935_v49, %v21636_v44  ;;  %v7448_v50 = vsel %vm307_vm6, %v13909_v43, %v13910_v54  ;;  %v13940_v48 = vunpack.i.h.bf16 %v19038_v39  ;;  %v19101_v42 = vpop.permute.xlu0 %13952  ;;  %v22234_v49 = vld [vmem:[#allocation43_spill] sm:$0xff]  ;;  %v22236_v44 = vld [vmem:[#allocation69_spill] sm:$0xff]  ;;  %7775 = vmatprep.mubr.bf16.mxu0 %v21967_v61 }
 0x28b   : > { %22231 = vst [vmem:[#allocation9_spill] sm:$0xff] %v19101_v42  ;;  %7868 = vmatprep.subr.bf16.mxu0 %v7506_v21  ;;  %12732 = vmatprep.subr.bf16.mxu1 %v7504_v28  ;;  %v19108_v25 = vadd.f32 %v18954_v10, %v18648_v40  ;;  %v7459_v20 = vsel %vm319_vm5, %v13914_v27, %v13915_v30  ;;  %v21640_v43 = vunpack.i.l.bf16 %v19038_v39  ;;  %v3950_v21 = vpop.f32.mrf.mxu0  ;;  %v22232_v40 = vld [vmem:[#allocation83_spill] sm:$0xff]  ;;  %v22235_v33 = vunpack.i.h.bf16 %v22234_v49  ;;  %v4003_v27 = vpop.f32.mrf.mxu1 }
 0x28c   : > { %22230 = vst [vmem:[#allocation59_spill] sm:$0xff] %v19075_v57  ;;  %v14226_v51 = vpack.i.bf16 %v19075_v57, %v18903_v22  ;;  %14222 = vrot.lane.b32.xlu0 %v18959_v2, %s14370_s24  ;;  %v7503_v54 = vpack.c.bf16 %v7459_v20, %v7448_v50  ;;  %v19121_v26 = vadd.f32 %v18975_v58, %v18769_v23  ;;  %v22233_v10 = vunpack.i.h.bf16 %v22232_v40  ;;  %v22237_v23 = vld [vmem:[#allocation63_spill] sm:$0xff] }
 0x28d   : > { %v19130_v30 = vsel %vm343_vm1, %v13940_v48, %v21638_v24  ;;  %v19132_v50 = vpop.permute.xlu1 %13957  ;;  %v21639_v20 = vunpack.i.l.bf16 %v18989_v63  ;;  %v19136_v35 = vadd.f32 %v3636_v1, %v22236_v44  ;;  %12733 = vmatpush3.bf16.msra.mxu1 %v7504_v28  ;;  %v3679_v58 = vadd.f32 %v3678_v9, %v22237_v23  ;;  %v22242_v23 = vld [vmem:[#allocation44_spill] sm:$0xff]  ;;  %v12629_v45 = vpop.f32.mrf.mxu1 }
 0x28e   : > { %14227 = vrot.lane.b32.xlu1 %v14226_v51, %s14369_s23  ;;  %v7501_v34 = vpack.c.bf16 %v22235_v33, %v22233_v10  ;;  %7869 = vmatpush1.bf16.msra.mxu0 %v7505_v15  ;;  %v19141_v33 = vpop.permute.xlu0 %13962  ;;  %v13945_v48 = vunpack.i.h.bf16 %v19050_v59  ;;  %v22238_v24 = vmov %v22233_v10  ;;  %v22239_v15 = vunpack.i.l.bf16 %v22232_v40  ;;  %v3952_v10 = vpop.f32.mrf.mxu0 }
 0x28f   : > { %7870 = vmatprep.subr.bf16.mxu0 %v7503_v54  ;;  %v22240_v44 = vunpack.i.h.bf16 %v22234_v49  ;;  %v22241_v1 = vunpack.i.l.bf16 %v22234_v49  ;;  %v13950_v28 = vunpack.i.h.bf16 %v19084_v8  ;;  %v19160_v54 = vpack.c.bf16 %v21640_v43, %v21639_v20  ;;  %v22243_v20 = vld [vmem:[#allocation72_spill] sm:$0xff] }
 0x290   : > { %12734 = vmatprep.subr.bf16.mxu1 %v7501_v34  ;;  %v7426_v18 = vsel %vm283_vm8, %v22239_v15, %v22238_v24  ;;  %14232 = vrot.lane.b32.xlu0 %v14226_v51, %s14370_s24  ;;  %v19163_v40 = vadd.f32 %v3638_v5, %v22242_v23  ;;  %v4026_v15 = vadd.f32 %v12628_v46, %v3684_v16  ;;  %v22245_v16 = vld [vmem:[#allocation46_spill] sm:$0xff]  ;;  %v22249_v17 = vunpack.i.h.bf16 %v18926_v62 }
 0x291   : > { %v7437_v9 = vsel %vm295_vm7, %v22241_v1, %v22240_v44  ;;  %v4018_v44 = vadd.f32 %v3950_v21, %v18923_v32  ;;  %v4020_v1 = vadd.f32 %v4003_v27, %v3676_v0  ;;  %v19170_v7 = vpop.permute.xlu1 %13967  ;;  %v22244_v5 = vpack.c.bf16 %v19029_v19, %v19013_v3  ;;  %12735 = vmatpush3.bf16.msra.mxu1 %v7501_v34  ;;  %v22253_v19 = vld [vmem:[#allocation39_spill] sm:$0xff] }
 0x292   : > { %v7500_v24 = vpack.c.bf16 %v7437_v9, %v7426_v18  ;;  %14237 = vrot.lane.b32.xlu1 %v18959_v2, %s14367_s21  ;;  %v4062_v46 = vadd.f32 %v22245_v16, %v4026_v15  ;;  %v22246_v18 = vld [vmem:[#allocation47_spill] sm:$0xff]  ;;  %v22247_v9 = vld [vmem:[#allocation5_spill] sm:$0xff]  ;;  %v19183_v32 = vsel %vm319_vm5, %v13950_v28, %v22249_v17  ;;  %v19185_v0 = vpop.permute.xlu0 %13972  ;;  %v22251_v21 = vunpack.i.h.bf16 %v18908_v29  ;;  %12103 = vmatmul.mubr.msk.bf16.gmra.mxu0 %vm592_vm0, %v18965_v55 }
 0x293   : > { %7871 = vmatpush1.bf16.msra.mxu0 %v22244_v5  ;;  %v22248_v23 = vunpack.i.h.bf16 %v22247_v9  ;;  %22250 = vst [vmem:[#allocation48_spill] sm:$0xff] %v19183_v32  ;;  %v4056_v34 = vadd.f32 %v22253_v19, %v4020_v1  ;;  %v22254_v15 = vld [vmem:[#allocation41_spill] sm:$0xff]  ;;  %v4054_v17 = vadd.f32 %v22253_v19, %v4018_v44  ;;  %v22256_v43 = vunpack.i.h.bf16 %v22247_v9  ;;  %7892 = vmatprep.mubr.bf16.mxu0 %v21967_v61 }
 0x294   : > { %v19190_v27 = vsel %vm307_vm6, %v13945_v48, %v22251_v21  ;;  %7872 = vmatprep.subr.bf16.mxu0 %v7500_v24  ;;  %v22255_v5 = vld [vmem:[#allocation33_spill] sm:$0xff]  ;;  %14242 = vrot.lane.b32.xlu0 %v18959_v2, %s14368_s22  ;;  %v13955_v24 = vunpack.i.h.bf16 %v19101_v42  ;;  %v4214_v55 = vcombine.high %v4062_v46, %v4062_v46  ;;  %v19207_v1 = vrot.slane %v4062_v46, %v14412_v6 }
 0x295   : > { %v7498_v49 = vpack.c.bf16 %v22248_v23, %v22246_v18  ;;  %22252 = vst [vmem:[#allocation78_spill] sm:$0xff] %v19190_v27  ;;  %v7499_v18 = vpack.c.bf16 %v22255_v5, %v22254_v15  ;;  %v3954_v23 = vpop.f32.mrf.mxu0  ;;  %v4080_v21 = vcombine.high %v4056_v34, %v4056_v34  ;;  %v4019_v15 = vadd.f32 %v3952_v10, %v18950_v36  ;;  %v4006_v5 = vpop.f32.mrf.mxu1  ;;  %v22259_v27 = vld [vmem:[#allocation4_spill] sm:$0xff] }
 0x296   : > { %14247 = vrot.lane.b32.xlu1 %v14226_v51, %s14367_s21  ;;  %v19210_v44 = vpop.permute.xlu1 %13977  ;;  %v22257_v28 = vunpack.i.l.bf16 %v22247_v9  ;;  %v13960_v3 = vunpack.i.h.bf16 %v19132_v50  ;;  %v19218_v51 = vpop.permute.xlu0 %13982  ;;  %v4029_v10 = vadd.f32 %v12629_v45, %v19121_v26  ;;  %v4021_v9 = vadd.f32 %v3954_v23, %v18987_v37  ;;  %v22262_v45 = vld [vmem:[#allocation17_spill] sm:$0xff] }
 0x297   : > { %12736 = vmatprep.subr.bf16.mxu1 %v7498_v49  ;;  %7873 = vmatpush1.bf16.msra.mxu0 %v7499_v18  ;;  %22258 = vst [vmem:[#allocation11_spill] sm:$0xff] %v19218_v51  ;;  %v4108_v46 = vrot.slane %v4080_v21, %v14412_v6  ;;  %v4055_v38 = vadd.f32 %v22253_v19, %v4019_v15  ;;  %v3956_v37 = vpop.f32.mrf.mxu0  ;;  %v22263_v23 = vunpack.i.l.bf16 %v19050_v59  ;;  %v22264_v15 = vunpack.i.l.bf16 %v19084_v8 }
 0x298   : > { %v7415_v48 = vsel %vm271_vm9, %v22257_v28, %v22256_v43  ;;  %12737 = vmatpush3.bf16.msra.mxu1 %v7498_v49  ;;  %10300 = vrot.lane.b32.xlu0 %v18903_v22, %s14368_s22  ;;  %v4023_v18 = vadd.f32 %v4006_v5, %v3679_v58  ;;  %v22260_v43 = vld [vmem:[#allocation7_spill] sm:$0xff]  ;;  %v22261_v28 = vld [vmem:[#allocation42_spill] sm:$0xff]  ;;  %v4065_v26 = vadd.f32 %v22262_v45, %v4029_v10 }
 0x299   : > { %v7497_v36 = vpack.c.bf16 %v7415_v48, %v22259_v27  ;;  %v7496_v32 = vpack.c.bf16 %v22261_v28, %v22260_v43  ;;  %12857 = vmatprep.subr.msk.bf16.mxu1 %vm599_vm2, %v19077_v52  ;;  %v4078_v27 = vcombine.low %v4054_v17, %v4055_v38  ;;  %v4079_v48 = vcombine.high %v4054_v17, %v4055_v38  ;;  %v22265_v43 = vld [vmem:[#allocation74_spill] sm:$0xff]  ;;  %v22268_v17 = vld [vmem:[#allocation45_spill] sm:$0xff] }
 0x29a   : > { %14252 = vrot.lane.b32.xlu1 %v18959_v2, %s14364_s18  ;;  %v19236_v58 = vpop.permute.xlu1 %13987  ;;  %v4101_v49 = vrot.slane %v4056_v34, %v14412_v6  ;;  %v19243_v5 = vpack.c.bf16 %v22264_v15, %v22263_v23  ;;  %v22266_v28 = vunpack.i.h.bf16 %v22265_v43  ;;  %v19253_v10 = vpop.permute.xlu0 %13992  ;;  %v19256_v21 = vrot.slane %v4214_v55, %v14412_v6  ;;  %v22269_v23 = vld [vmem:[#allocation70_spill] sm:$0xff] }
 0x29b   : > { %7874 = vmatprep.subr.bf16.mxu0 %v7497_v36  ;;  %v19251_v36 = vadd.f32 %v22268_v17, %v4023_v18  ;;  %v4087_v34 = vrot.slane %v4078_v27, %v14412_v6  ;;  %v4094_v19 = vrot.slane %v4079_v48, %v14412_v6  ;;  %v22270_v15 = vunpack.i.h.bf16 %v22269_v23  ;;  %v3960_v43 = vpop.f32.mrf.mxu0 }
 0x29c   : > { %v19248_v38 = vsel %vm283_vm8, %v13955_v24, %v22266_v28  ;;  %7875 = vmatpush1.bf16.msra.mxu0 %v7496_v32  ;;  %v22272_v24 = vpack.c.bf16 %v19082_v47, %v19082_v47  ;;  %v19272_v32 = vld [vmem:[%s21388_s1 + $0x8] sm:$0xff]   ;;  %14257 = vrot.lane.b32.xlu0 %v18959_v2, %s14366_s20  ;;  %v4281_v55 = vcombine.high %v4065_v26, %v4065_v26  ;;  %v22274_v27 = vunpack.i.l.bf16 %v19132_v50 }
 0x29d   : > { %22267 = vst [vmem:[#allocation30_spill] sm:$0xff] %v19248_v38  ;;  %v19263_v51 = vsel %vm295_vm7, %v13960_v3, %v22270_v15  ;;  %v19277_v18 = vadd.f32 %v22268_v17, %v4021_v9  ;;  %v22273_v3 = vunpack.i.l.bf16 %v19101_v42  ;;  %v13965_v47 = vunpack.i.h.bf16 %v19141_v33  ;;  %12739 = vmatmul.mubr.msk.bf16.vlgmr.msra.gmra.mxu1 %vm592_vm0, %v19272_v32 }
 0x29e   : > { %22271 = vst [vmem:[#allocation29_spill] sm:$0xff] %v19263_v51  ;;  %12127 = vmatprep.subr.msk.bf16.mxu0 %vm599_vm2, %v22272_v24  ;;  %v4109_v28 = vcombine.low %v4087_v34, %v4101_v49  ;;  %v4110_v15 = vcombine.high %v4087_v34, %v4101_v49  ;;  %v4111_v24 = vcombine.low %v4094_v19, %v4108_v46  ;;  %v19289_v9 = vpop.permute.xlu1 %13997 }
 0x29f   : > { %v19283_v48 = vpack.c.bf16 %v22274_v27, %v22273_v3  ;;  %v4112_v23 = vcombine.high %v4094_v19, %v4108_v46  ;;  %10267 = vrot.lane.b32.xlu1 %v18903_v22, %s14364_s18  ;;  %v19292_v42 = vrot.slane %v4065_v26, %v14412_v6  ;;  %v4147_v3 = vcombine.high %v19251_v36, %v19251_v36  ;;  %v19304_v46 = vpop.permute.xlu0 %14002  ;;  %v19309_v19 = vld [vmem:[%s21388_s1 + $0x20] sm:$0xff]  }
 0x2a0   : > { %v19298_v27 = vrot.slane %v19251_v36, %v14412_v6  ;;  %12109 = vmatmul.mubr.msk.bf16.vlgmr.msra.gmra.mxu0 %vm592_vm0, %v19043_v13  ;;  %22276 = vst [vmem:[#allocation53_spill] sm:$0xff] %v19304_v46  ;;  %v4119_v26 = vrot.slane %v4109_v28, %v14412_v6  ;;  %v4126_v36 = vrot.slane %v4111_v24, %v14412_v6  ;;  %v8186_v24 = vsel %vm599_vm2, %v19077_v52, 0 }
 0x2a1   : > { %22275 = vst [vmem:[#allocation21_spill] sm:$0xff] %v19292_v42  ;;  %v4133_v34 = vrot.slane %v4110_v15, %v14412_v6  ;;  %v4140_v49 = vrot.slane %v4112_v23, %v14412_v6  ;;  %v19318_v13 = vrot.slane %v4281_v55, %v14412_v6  ;;  %v4022_v38 = vadd.f32 %v3956_v37, %v19033_v53  ;;  %v3962_v53 = vpop.f32.mrf.mxu0  ;;  %v22279_v37 = vld [vmem:[#allocation55_spill] sm:$0xff] }
 0x2a2   : > { %10278 = vrot.lane.b32.xlu0 %v18903_v22, %s14366_s20  ;;  %v4024_v28 = vadd.f32 %v3960_v43, %v19062_v14  ;;  %7902 = vmatprep.mubr.bf16.mxu0 %v21967_v61  ;;  %v4141_v15 = vcombine.high %v4119_v26, %v4119_v26  ;;  %v4142_v23 = vcombine.high %v4126_v36, %v4126_v36  ;;  %v19339_v14 = vpop.permute.xlu1 %14007  ;;  %v13964_v52 = vunpack.i.l.bf16 %v19141_v33 }
 0x2a3   : > { %22277 = vst [vmem:[#allocation10_spill] sm:$0xff] %v19318_v13  ;;  %v4143_v51 = vcombine.high %v4133_v34, %v4133_v34  ;;  %v4144_v46 = vcombine.high %v4140_v49, %v4140_v49  ;;  %11877 = vst.msk [vmem:[%s17063_s26 + $0x2] ss:$8 sm:$0x7] %vm17010_vm10, %v4119_v26  ;;  %12743 = vmatpush3.bf16.msra.mxu1 %v8186_v24  ;;  %v22280_v43 = vunpack.i.h.bf16 %v22279_v37  ;;  %12752 = vmatprep.mubr.msk.bf16.mxu1 %vm592_vm0, %v19309_v19 }
 0x2a4   : > { %11878 = vst.msk [vmem:[%s17063_s26 + $0x1a] ss:$8 sm:$0x7] %vm17010_vm10, %v4133_v34  ;;  %11881 = vst.msk [vmem:[%s17063_s26 + $0x62] ss:$8 sm:$0x7] %vm17010_vm10, %v4126_v36  ;;  %v4058_v26 = vadd.f32 %v22268_v17, %v4022_v38  ;;  %v22281_v34 = vunpack.i.l.bf16 %v18973_v12  ;;  %v22282_v36 = vunpack.i.h.bf16 %v22243_v20  ;;  %12744 = vmatprep.subr.bf16.mxu1 %v19160_v54  ;;  %v4175_v12 = vrot.slane %v4147_v3, %v14412_v6 }
 0x2a5   : > { %11882 = vst.msk [vmem:[%s17063_s26 + $0x7a] ss:$8 sm:$0x7] %vm17010_vm10, %v4140_v49  ;;  %v19345_v55 = vsel %vm271_vm9, %v13965_v47, %v22280_v43  ;;  %v19354_v49 = vpop.permute.xlu0 %14012  ;;  %11879 = vst.msk [vmem:[%s17063_s26 + $0x32] ss:$8 sm:$0x7] %vm17010_vm10, %v4141_v15  ;;  %v13970_v38 = vunpack.i.h.bf16 %v19170_v7  ;;  %v13974_v17 = vunpack.i.l.bf16 %v19185_v0  ;;  %14262 = vrot.lane.b32.xlu1 %v18959_v2, %s14365_s19 }
 0x2a6   : > { %v8139_v13 = vsel %vm355_vm4, %v22282_v36, %v22281_v34  ;;  %11880 = vst.msk [vmem:[%s17063_s26 + $0x4a] ss:$8 sm:$0x7] %vm17010_vm10, %v4143_v51  ;;  %11883 = vst.msk [vmem:[%s17063_s26 + $0x92] ss:$8 sm:$0x7] %vm17010_vm10, %v4142_v23  ;;  %v4145_v51 = vcombine.low %v19277_v18, %v4058_v26  ;;  %v4146_v15 = vcombine.high %v19277_v18, %v4058_v26  ;;  %10256 = vrot.lane.b32.xlu0 %v18903_v22, %s14365_s19  ;;  %v19393_v18 = vpop.permute.xlu1 %14017 }
 0x2a7   : > { %11884 = vst.msk [vmem:[%s17063_s26 + $0xaa] ss:$8 sm:$0x7] %vm17010_vm10, %v4144_v46  ;;  %v8156_v20 = vpack.c.bf16 %v8139_v13, %v8139_v13  ;;  %v22283_v47 = vld [vmem:[#allocation12_spill] sm:$0xff]  ;;  %v4025_v23 = vadd.f32 %v3962_v53, %v19108_v25  ;;  %v22284_v3 = vld [vmem:[#allocation13_spill] sm:$0xff]  ;;  %v4060_v13 = vadd.f32 %v22245_v16, %v4024_v28  ;;  %v22285_v34 = vunpack.i.l.bf16 %v19038_v39  ;;  %12745 = vmatpush3.bf16.msra.mxu1 %v19160_v54 }
 0x2a8   : > { %v19376_v24 = vpack.c.bf16 %v13964_v52, %v22283_v47  ;;  %v8144_v46 = vpack.c.bf16 %v19345_v55, %v22284_v3  ;;  %v22286_v36 = vunpack.i.h.bf16 %v18819_v41  ;;  %v4154_v25 = vrot.slane %v4145_v51, %v14412_v6  ;;  %12746 = vmatprep.subr.bf16.mxu1 %v19243_v5  ;;  %12110 = vmatmul.mubr.msk.bf16.gmra.mxu0 %vm592_vm0, %v19272_v32 }
 0x2a9   : > { %v8180_v43 = vsel %vm599_vm2, %v8156_v20, 0  ;;  %v4161_v53 = vrot.slane %v4146_v15, %v14412_v6  ;;  %v4061_v26 = vadd.f32 %v22245_v16, %v4025_v23  ;;  %v22287_v28 = vunpack.i.l.bf16 %v18989_v63  ;;  %v19403_v41 = vpop.permute.xlu0 %14022  ;;  %v3964_v15 = vpop.f32.mrf.mxu0  ;;  %8220 = vmatprep.mubr.bf16.mxu0 %v21967_v61 }
 0x2aa   : > { %v8129_v47 = vsel %vm343_vm1, %v22286_v36, %v22285_v34  ;;  %8195 = vmatpush1.bf16.msra.mxu0 %v8180_v43  ;;  %v22288_v20 = vunpack.i.h.bf16 %v18812_v60  ;;  %v13969_v34 = vunpack.i.l.bf16 %v19170_v7  ;;  %v19409_v54 = vsel %vm355_vm4, %v13970_v38, %v13974_v17 }
 0x2ab   : > { %v4176_v60 = vcombine.low %v4154_v25, %v19298_v27  ;;  %v4177_v63 = vcombine.high %v4154_v25, %v19298_v27  ;;  %v4178_v16 = vcombine.low %v4161_v53, %v4175_v12  ;;  %v4179_v23 = vcombine.high %v4161_v53, %v4175_v12  ;;  %12747 = vmatpush3.bf16.msra.mxu1 %v19243_v5 }
 0x2ac   : > { %v8118_v39 = vsel %vm331_vm3, %v22288_v20, %v22287_v28  ;;  %v19418_v36 = vpack.c.bf16 %v13974_v17, %v13974_v17  ;;  %v4212_v28 = vcombine.low %v4060_v13, %v4061_v26  ;;  %v19422_v20 = vpop.permute.xlu1 %14027  ;;  %v9126_v2 = vpack.c.bf16 %v19409_v54, %v19409_v54  ;;  %12748 = vmatprep.subr.bf16.mxu1 %v19283_v48 }
 0x2ad   : > { %v8154_v51 = vpack.c.bf16 %v8129_v47, %v8118_v39  ;;  %v4213_v47 = vcombine.high %v4060_v13, %v4061_v26  ;;  %v4186_v32 = vrot.slane %v4176_v60, %v14412_v6  ;;  %v4193_v27 = vrot.slane %v4178_v16, %v14412_v6  ;;  %v19431_v25 = vpop.permute.xlu0 %14032 }
 0x2ae   : > { %v4200_v12 = vrot.slane %v4177_v63, %v14412_v6  ;;  %v4207_v17 = vrot.slane %v4179_v23, %v14412_v6  ;;  %v22289_v13 = vpack.c.bf16 %v19130_v30, %v19093_v56  ;;  %v4221_v53 = vrot.slane %v4212_v28, %v14412_v6 }
 0x2af   : > { %8196 = vmatprep.subr.bf16.mxu0 %v8154_v51  ;;  %v4228_v26 = vrot.slane %v4213_v47, %v14412_v6  ;;  %v4027_v39 = vadd.f32 %v3964_v15, %v19136_v35  ;;  %v3966_v51 = vpop.f32.mrf.mxu0  ;;  %v4208_v60 = vcombine.high %v4186_v32, %v4186_v32  ;;  %v4209_v56 = vcombine.high %v4193_v27, %v4193_v27 }
 0x2b0   : > { %8197 = vmatpush1.bf16.msra.mxu0 %v22289_v13  ;;  %v4210_v30 = vcombine.high %v4200_v12, %v4200_v12  ;;  %v4211_v63 = vcombine.high %v4207_v17, %v4207_v17  ;;  %11885 = vst.msk [vmem:[%s17063_s26 + $0xc2] ss:$8 sm:$0x7] %vm17010_vm10, %v4186_v32  ;;  %11886 = vst.msk [vmem:[%s17063_s26 + $0xda] ss:$8 sm:$0x7] %vm17010_vm10, %v4200_v12  ;;  %v4243_v35 = vcombine.low %v4221_v53, %v19207_v1  ;;  %v19456_v23 = vpop.permute.xlu1 %14037 }
 0x2b1   : > { %11889 = vst.msk [vmem:[%s17063_s26 + $0x122] ss:$8 sm:$0x7] %vm17010_vm10, %v4193_v27  ;;  %11890 = vst.msk [vmem:[%s17063_s26 + $0x13a] ss:$8 sm:$0x7] %vm17010_vm10, %v4207_v17  ;;  %v4244_v5 = vcombine.high %v4221_v53, %v19207_v1  ;;  %v4245_v15 = vcombine.low %v4228_v26, %v19256_v21  ;;  %v4246_v16 = vcombine.high %v4228_v26, %v19256_v21  ;;  %v13980_v1 = vunpack.i.h.bf16 %v19210_v44  ;;  %v19482_v13 = vpop.permute.xlu0 %14042 }
 0x2b2   : > { %11887 = vst.msk [vmem:[%s17063_s26 + $0xf2] ss:$8 sm:$0x7] %vm17010_vm10, %v4208_v60  ;;  %11888 = vst.msk [vmem:[%s17063_s26 + $0x10a] ss:$8 sm:$0x7] %vm17010_vm10, %v4210_v30  ;;  %v4028_v28 = vadd.f32 %v3966_v51, %v19163_v40  ;;  %v22290_v21 = vunpack.i.l.bf16 %v19050_v59  ;;  %v22291_v47 = vunpack.i.h.bf16 %v18908_v29  ;;  %v22292_v27 = vunpack.i.l.bf16 %v19084_v8  ;;  %12749 = vmatpush3.bf16.msra.mxu1 %v19283_v48 }
 0x2b3   : > { %11891 = vst.msk [vmem:[%s17063_s26 + $0x152] ss:$8 sm:$0x7] %vm17010_vm10, %v4209_v56  ;;  %11892 = vst.msk [vmem:[%s17063_s26 + $0x16a] ss:$8 sm:$0x7] %vm17010_vm10, %v4211_v63  ;;  %v22293_v12 = vunpack.i.h.bf16 %v18926_v62  ;;  %v4253_v53 = vrot.slane %v4243_v35, %v14412_v6  ;;  %v4260_v40 = vrot.slane %v4245_v15, %v14412_v6  ;;  %v4267_v29 = vrot.slane %v4244_v5, %v14412_v6 }
 0x2b4   : > { %v8096_v32 = vsel %vm307_vm6, %v22291_v47, %v22290_v21  ;;  %v4274_v59 = vrot.slane %v4246_v16, %v14412_v6  ;;  %v4063_v62 = vadd.f32 %v22262_v45, %v4027_v39  ;;  %v4064_v8 = vadd.f32 %v22262_v45, %v4028_v28  ;;  %12750 = vmatprep.subr.bf16.mxu1 %v19376_v24  ;;  %v19519_v35 = vld [vmem:[%s21388_s1 + $0x28] sm:$0xff]   ;;  %v22295_v16 = vld [vmem:[#allocation48_spill] sm:$0xff]  ;;  %v22296_v28 = vld [vmem:[#allocation78_spill] sm:$0xff] }
 0x2b5   : > { %v8107_v17 = vsel %vm319_vm5, %v22293_v12, %v22292_v27  ;;  %v19493_v51 = vcombine.high %v18944_v31, %v18981_v11  ;;  %v4275_v60 = vcombine.high %v4253_v53, %v4253_v53  ;;  %v4276_v56 = vcombine.high %v4260_v40, %v4260_v40  ;;  %11893 = vst.msk [vmem:[%s17063_s26 + $0x182] ss:$8 sm:$0x7] %vm17010_vm10, %v4253_v53  ;;  %v19508_v31 = vpop.permute.xlu1 %14047  ;;  %v19521_v5 = vpop.permute.xlu0 %14052  ;;  %v22298_v27 = vld [vmem:[#allocation9_spill] sm:$0xff] }
 0x2b6   : > { %v8151_v26 = vpack.c.bf16 %v8107_v17, %v8096_v32  ;;  %v4277_v30 = vcombine.high %v4267_v29, %v4267_v29  ;;  %v4278_v63 = vcombine.high %v4274_v59, %v4274_v59  ;;  %11894 = vst.msk [vmem:[%s17063_s26 + $0x19a] ss:$8 sm:$0x7] %vm17010_vm10, %v4267_v29  ;;  %11897 = vst.msk [vmem:[%s17063_s26 + $0x1e2] ss:$8 sm:$0x7] %vm17010_vm10, %v4260_v40  ;;  %v13979_v15 = vunpack.i.l.bf16 %v19210_v44 }
 0x2b7   : > { %22294 = vst [vmem:[#allocation73_spill] sm:$0xff] %v19493_v51  ;;  %11898 = vst.msk [vmem:[%s17063_s26 + $0x1fa] ss:$8 sm:$0x7] %vm17010_vm10, %v4274_v59  ;;  %v4279_v11 = vcombine.low %v4063_v62, %v4064_v8  ;;  %v4280_v45 = vcombine.high %v4063_v62, %v4064_v8  ;;  %v19512_v48 = vpack.i.bf16 %v19493_v51, %v19075_v57  ;;  %v13989_v47 = vunpack.i.l.bf16 %v19236_v58  ;;  %v22300_v17 = vld [vmem:[#allocation74_spill] sm:$0xff]  ;;  %v19550_v29 = vld [vmem:[%s21388_s1 + $0x10] sm:$0xff]  }
 0x2b8   : > { %8198 = vmatprep.subr.bf16.mxu0 %v8151_v26  ;;  %v14271_v39 = vpack.i.bf16 %v19008_v4, %v19493_v51  ;;  %11895 = vst.msk [vmem:[%s17063_s26 + $0x1b2] ss:$8 sm:$0x7] %vm17010_vm10, %v4275_v60  ;;  %11896 = vst.msk [vmem:[%s17063_s26 + $0x1ca] ss:$8 sm:$0x7] %vm17010_vm10, %v4277_v30  ;;  %v22297_v21 = vpack.c.bf16 %v22295_v16, %v22296_v28  ;;  %v13994_v32 = vunpack.i.l.bf16 %v19253_v10  ;;  %v22299_v12 = vunpack.i.l.bf16 %v22298_v27 }
 0x2b9   : > { %11899 = vst.msk [vmem:[%s17063_s26 + $0x212] ss:$8 sm:$0x7] %vm17010_vm10, %v4276_v56  ;;  %11900 = vst.msk [vmem:[%s17063_s26 + $0x22a] ss:$8 sm:$0x7] %vm17010_vm10, %v4278_v63  ;;  %v22301_v53 = vunpack.i.h.bf16 %v22300_v17  ;;  %12751 = vmatpush3.bf16.msra.mxu1 %v19376_v24  ;;  %v4288_v8 = vrot.slane %v4279_v11, %v14412_v6  ;;  %v4295_v26 = vrot.slane %v4280_v45, %v14412_v6  ;;  %14267 = vrot.lane.b32.xlu1 %v19512_v48, %s14371_s25  ;;  %v19567_v11 = vpop.permute.xlu1 %14057 }
 0x2ba   : > { %8199 = vmatpush1.bf16.msra.mxu0 %v22297_v21  ;;  %v22302_v59 = vld [vmem:[#allocation11_spill] sm:$0xff]  ;;  %14272 = vrot.lane.b32.xlu0 %v14271_v39, %s14369_s23  ;;  %v22303_v60 = vunpack.i.l.bf16 %v19132_v50  ;;  %v22304_v56 = vld [vmem:[#allocation70_spill] sm:$0xff]  ;;  %v14000_v28 = vunpack.i.h.bf16 %v19289_v9  ;;  %v22306_v45 = vld [vmem:[#allocation21_spill] sm:$0xff]  ;;  %v14025_v55 = vunpack.i.h.bf16 %v19403_v41  ;;  %v14029_v44 = vunpack.i.l.bf16 %v19422_v20 }
 0x2bb   : > { %v8074_v40 = vsel %vm283_vm8, %v22301_v53, %v22299_v12  ;;  %v13985_v62 = vunpack.i.h.bf16 %v22302_v59  ;;  %v22305_v24 = vunpack.i.h.bf16 %v22304_v56  ;;  %v21652_v63 = vunpack.i.l.bf16 %v22302_v59  ;;  %12858 = vmatprep.subr.msk.bf16.mxu1 %vm599_vm2, %v19418_v36  ;;  %v22307_v12 = vld [vmem:[#allocation10_spill] sm:$0xff]  ;;  %v19575_v53 = vpop.permute.xlu0 %14062 }
 0x2bc   : > { %v4310_v21 = vcombine.low %v4288_v8, %v22306_v45  ;;  %v4311_v27 = vcombine.high %v4288_v8, %v22306_v45  ;;  %v4312_v50 = vcombine.low %v4295_v26, %v22307_v12  ;;  %v4313_v17 = vcombine.high %v4295_v26, %v22307_v12  ;;  %12753 = vmatmul.mubr.msk.bf16.vlgmr.msra.gmra.mxu1 %vm592_vm0, %v19519_v35  ;;  %v22308_v8 = vld [vmem:[#allocation53_spill] sm:$0xff] }
 0x2bd   : > { %v8085_v30 = vsel %vm295_vm7, %v22305_v24, %v22303_v60  ;;  %v19585_v60 = vsel %vm343_vm1, %v13994_v32, %v21652_v63  ;;  %v14005_v56 = vunpack.i.h.bf16 %v22308_v8  ;;  %12766 = vmatprep.mubr.msk.bf16.mxu1 %vm592_vm0, %v19550_v29  ;;  %14277 = vrot.lane.b32.xlu1 %v14271_v39, %s14370_s24  ;;  %v9124_v32 = vpack.c.bf16 %v13985_v62, %v13980_v1  ;;  %v22309_v45 = vld [vmem:[#allocation29_spill] sm:$0xff] }
 0x2be   : > { %v8148_v16 = vpack.c.bf16 %v8085_v30, %v8074_v40  ;;  %v19580_v40 = vsel %vm331_vm3, %v13989_v47, %v13979_v15  ;;  %v4320_v26 = vrot.slane %v4310_v21, %v14412_v6  ;;  %v4327_v24 = vrot.slane %v4312_v50, %v14412_v6  ;;  %14282 = vrot.lane.b32.xlu0 %v14271_v39, %s14367_s21  ;;  %v22310_v21 = vld [vmem:[#allocation30_spill] sm:$0xff] }
 0x2bf   : > { %v4334_v47 = vrot.slane %v4311_v27, %v14412_v6  ;;  %v4341_v30 = vrot.slane %v4313_v17, %v14412_v6  ;;  %v22311_v12 = vpack.c.bf16 %v22309_v45, %v22310_v21  ;;  %v22312_v27 = vunpack.i.h.bf16 %v22279_v37  ;;  %v19609_v17 = vpop.permute.xlu1 %14067  ;;  %v19623_v33 = vpop.permute.xlu0 %14072  ;;  %v22313_v45 = vld [vmem:[#allocation35_spill] sm:$0xff] }
 0x2c0   : > { %8200 = vmatprep.subr.bf16.mxu0 %v8148_v16  ;;  %v4342_v43 = vcombine.high %v4320_v26, %v4320_v26  ;;  %v4343_v16 = vcombine.high %v4327_v24, %v4327_v24  ;;  %11901 = vst.msk [vmem:[%s17063_s26 + $0x242] ss:$8 sm:$0x7] %vm17010_vm10, %v4320_v26  ;;  %11905 = vst.msk [vmem:[%s17063_s26 + $0x2a2] ss:$8 sm:$0x7] %vm17010_vm10, %v4327_v24  ;;  %v9122_v37 = vpack.c.bf16 %v19585_v60, %v19580_v40 }
 0x2c1   : > { %8201 = vmatpush1.bf16.msra.mxu0 %v22311_v12  ;;  %v8063_v50 = vsel %vm271_vm9, %v22312_v27, %v13964_v52  ;;  %v4344_v63 = vcombine.high %v4334_v47, %v4334_v47  ;;  %v4345_v39 = vcombine.high %v4341_v30, %v4341_v30  ;;  %11902 = vst.msk [vmem:[%s17063_s26 + $0x25a] ss:$8 sm:$0x7] %vm17010_vm10, %v4334_v47  ;;  %11906 = vst.msk [vmem:[%s17063_s26 + $0x2ba] ss:$8 sm:$0x7] %vm17010_vm10, %v4341_v30 }
 0x2c2   : > { %v13995_v52 = vunpack.i.h.bf16 %v19253_v10  ;;  %v8145_v21 = vpack.c.bf16 %v8063_v50, %v22313_v45  ;;  %v14009_v26 = vunpack.i.l.bf16 %v19339_v14  ;;  %11903 = vst.msk [vmem:[%s17063_s26 + $0x272] ss:$8 sm:$0x7] %vm17010_vm10, %v4342_v43  ;;  %11907 = vst.msk [vmem:[%s17063_s26 + $0x2d2] ss:$8 sm:$0x7] %vm17010_vm10, %v4343_v16  ;;  %v13999_v24 = vunpack.i.l.bf16 %v19289_v9  ;;  %14287 = vrot.lane.b32.xlu1 %v19512_v48, %s14368_s22  ;;  %10948 = vrot.lane.b32.xlu0 %v19008_v4, %s14368_s22 }
 0x2c3   : > { %11904 = vst.msk [vmem:[%s17063_s26 + $0x28a] ss:$8 sm:$0x7] %vm17010_vm10, %v4344_v63  ;;  %11908 = vst.msk [vmem:[%s17063_s26 + $0x2ea] ss:$8 sm:$0x7] %vm17010_vm10, %v4345_v39  ;;  %v19647_v47 = vpack.c.bf16 %v14005_v56, %v14000_v28  ;;  %v14014_v43 = vunpack.i.l.bf16 %v19354_v49  ;;  %v14004_v63 = vunpack.i.l.bf16 %v22308_v8  ;;  %v9108_v16 = vsel %vm355_vm4, %v13969_v34, %v13970_v38  ;;  %v19662_v12 = vpop.permute.xlu1 %14077  ;;  %v19672_v45 = vpop.permute.xlu0 %14082 }
 0x2c4   : > { %8202 = vmatprep.subr.bf16.mxu0 %v8145_v21  ;;  %v9155_v30 = vsel %vm599_vm2, %v19418_v36, 0  ;;  %v21654_v27 = vunpack.i.h.bf16 %v19339_v14  ;;  %v19669_v50 = vsel %vm307_vm6, %v14009_v26, %v13999_v24  ;;  %v9125_v39 = vpack.c.bf16 %v9108_v16, %v9108_v16  ;;  %v19692_v34 = vpop.f32.mrf.mxu0 }
 0x2c5   : > { %8203 = vmatpush1.bf16.msra.mxu0 %v8144_v46  ;;  %12757 = vmatpush3.bf16.msra.mxu1 %v9155_v30  ;;  %v14020_v36 = vunpack.i.h.bf16 %v19393_v18  ;;  %v19675_v7 = vsel %vm319_vm5, %v14014_v43, %v14004_v63  ;;  %v9087_v38 = vsel %vm331_vm3, %v13979_v15, %v13980_v1  ;;  %v22314_v3 = vunpack.i.l.bf16 %v22302_v59 }
 0x2c6   : > { %12186 = vmatprep.subr.msk.bf16.mxu0 %vm599_vm2, %v9126_v2  ;;  %12758 = vmatprep.subr.bf16.mxu1 %v9124_v32  ;;  %v9149_v54 = vsel %vm599_vm2, %v9125_v39, 0  ;;  %v14019_v2 = vunpack.i.l.bf16 %v19393_v18  ;;  %v14024_v21 = vunpack.i.l.bf16 %v19403_v41  ;;  %v14034_v15 = vunpack.i.l.bf16 %v19431_v25  ;;  %v19737_v39 = vpop.f32.mrf.mxu1 }
 0x2c7   : > { %v9098_v46 = vsel %vm343_vm1, %v22314_v3, %v13985_v62  ;;  %14292 = vrot.lane.b32.xlu1 %v19512_v48, %s14364_s18  ;;  %14297 = vrot.lane.b32.xlu0 %v19512_v48, %s14366_s20  ;;  %v9065_v59 = vsel %vm307_vm6, %v13999_v24, %v14000_v28  ;;  %v9076_v18 = vsel %vm319_vm5, %v14004_v63, %v14005_v56  ;;  %v19711_v41 = vpop.permute.xlu1 %14087  ;;  %v19713_v62 = vpop.f32.mrf.mxu0  ;;  %v21653_v26 = vunpack.i.h.bf16 %v19354_v49 }
 0x2c8   : > { %12128 = vmatmul.mubr.msk.bf16.vlgmr.msra.gmra.mxu0 %vm592_vm0, %v19309_v19  ;;  %v9123_v1 = vpack.c.bf16 %v9098_v46, %v9087_v38  ;;  %v9119_v19 = vpack.c.bf16 %v19675_v7, %v19669_v50  ;;  %v14040_v9 = vunpack.i.h.bf16 %v19456_v23  ;;  %v19720_v28 = vpop.permute.xlu0 %14092  ;;  %v9118_v8 = vpack.c.bf16 %v14025_v55, %v14020_v36 }
 0x2c9   : > { %9164 = vmatpush1.bf16.msra.mxu0 %v9149_v54  ;;  %12759 = vmatpush3.bf16.msra.mxu1 %v9124_v32  ;;  %22315 = vst [vmem:[#allocation60_spill] sm:$0xff] %v19720_v28  ;;  %v19724_v56 = vsel %vm283_vm8, %v14029_v44, %v14019_v2  ;;  %v14039_v24 = vunpack.i.l.bf16 %v19456_v23  ;;  %v14044_v63 = vunpack.i.l.bf16 %v19482_v13  ;;  %v19728_v30 = vpop.f32.mrf.mxu0  ;;  %v19733_v32 = vsel %vm295_vm7, %v14034_v15, %v14024_v21 }
 0x2ca   : > { %9165 = vmatprep.subr.bf16.mxu0 %v9123_v1  ;;  %12760 = vmatprep.subr.bf16.mxu1 %v19647_v47  ;;  %v9120_v16 = vpack.c.bf16 %v9076_v18, %v9065_v59  ;;  %v14050_v50 = vunpack.i.h.bf16 %v19508_v31  ;;  %v9043_v7 = vsel %vm283_vm8, %v14019_v2, %v14020_v36  ;;  %v9054_v38 = vsel %vm295_vm7, %v14024_v21, %v14025_v55  ;;  %v22316_v1 = vld [vmem:[#allocation18_spill] sm:$0xff] }
 0x2cb   : > { %10915 = vrot.lane.b32.xlu1 %v19008_v4, %s14364_s18  ;;  %8230 = vmatprep.mubr.bf16.mxu0 %v21967_v61  ;;  %v19742_v23 = vsel %vm271_vm9, %v14044_v63, %v14039_v24  ;;  %v14049_v3 = vunpack.i.l.bf16 %v19508_v31  ;;  %v19747_v46 = vpop.permute.xlu1 %14097  ;;  %v19749_v54 = vpop.f32.mrf.mxu0  ;;  %v9115_v15 = vpack.c.bf16 %v14040_v9, %v22316_v1  ;;  %v14055_v55 = vunpack.i.h.bf16 %v19521_v5 }
 0x2cc   : > { %10926 = vrot.lane.b32.xlu0 %v19008_v4, %s14366_s20  ;;  %v19759_v2 = vpop.permute.xlu0 %14102  ;;  %v8934_v31 = vpack.c.bf16 %v14050_v50, %v14050_v50  ;;  %v9032_v40 = vsel %vm271_vm9, %v14039_v24, %v14040_v9  ;;  %v14060_v60 = vunpack.i.h.bf16 %v19567_v11  ;;  %v9117_v18 = vpack.c.bf16 %v9054_v38, %v9043_v7  ;;  %v19782_v9 = vld [vmem:[%s21389_s2] sm:$0xff] }
 0x2cd   : > { %9166 = vmatpush1.bf16.msra.mxu0 %v9122_v37  ;;  %12761 = vmatpush3.bf16.msra.mxu1 %v19647_v47  ;;  %v19762_v21 = vsel %vm355_vm4, %v14049_v3, %v14050_v50  ;;  %v9116_v37 = vpack.c.bf16 %v19733_v32, %v19724_v56  ;;  %v22317_v47 = vld [vmem:[#allocation19_spill] sm:$0xff]  ;;  %v14054_v63 = vunpack.i.l.bf16 %v19521_v5  ;;  %v14065_v5 = vunpack.i.h.bf16 %v19575_v53  ;;  %v19794_v50 = vpop.f32.mrf.mxu0 }
 0x2ce   : > { %9167 = vmatprep.subr.bf16.mxu0 %v9120_v16  ;;  %12762 = vmatprep.subr.bf16.mxu1 %v9118_v8  ;;  %v19773_v16 = vpop.f32.mrf.mxu1  ;;  %v19788_v56 = vsel %vm343_vm1, %v14060_v60, %v13995_v52  ;;  %v22318_v24 = vunpack.i.h.bf16 %v19185_v0  ;;  %v22320_v38 = vunpack.i.h.bf16 %v19236_v58  ;;  %v14070_v60 = vunpack.i.h.bf16 %v19609_v17 }
 0x2cf   : > { %14302 = vrot.lane.b32.xlu1 %v19512_v48, %s14365_s19  ;;  %v14059_v48 = vunpack.i.l.bf16 %v19567_v11  ;;  %v19801_v11 = vld [vmem:[%s21389_s2 + $0x8] sm:$0xff]  ;;  %v14069_v7 = vunpack.i.l.bf16 %v19609_v17  ;;  %v19817_v36 = vpop.f32.mrf.mxu0  ;;  %v19836_v17 = vld [vmem:[%s21389_s2 + $0x10] sm:$0xff]  ;;  %v14079_v10 = vunpack.i.l.bf16 %v19662_v12  ;;  %v14085_v57 = vunpack.i.h.bf16 %v19672_v45 }
 0x2d0   : > { %10904 = vrot.lane.b32.xlu0 %v19008_v4, %s14365_s19  ;;  %12129 = vmatmul.mubr.msk.bf16.gmra.mxu0 %vm592_vm0, %v19519_v35  ;;  %v8915_v32 = vsel %vm355_vm4, %v22318_v24, %v14049_v3  ;;  %v19796_v35 = vpop.permute.xlu1 %14107  ;;  %v19808_v0 = vsel %vm331_vm3, %v14055_v55, %v22320_v38  ;;  %v22321_v3 = vld [vmem:[#allocation20_spill] sm:$0xff]  ;;  %v19812_v24 = vpop.permute.xlu0 %14112  ;;  %v14074_v55 = vunpack.i.l.bf16 %v19623_v33  ;;  %v14094_v51 = vunpack.i.l.bf16 %v19720_v28 }
 0x2d1   : > { %22319 = vst [vmem:[#allocation71_spill] sm:$0xff] %v19796_v35  ;;  %9168 = vmatpush1.bf16.msra.mxu0 %v9119_v19  ;;  %12763 = vmatpush3.bf16.msra.mxu1 %v9118_v8  ;;  %v9114_v1 = vpack.c.bf16 %v9032_v40, %v22321_v3  ;;  %22322 = vst [vmem:[#allocation26_spill] sm:$0xff] %v19812_v24  ;;  %v14064_v19 = vunpack.i.l.bf16 %v19575_v53  ;;  %v9282_v8 = vsel %vm599_vm2, %v8934_v31, 0  ;;  %v14075_v53 = vunpack.i.h.bf16 %v19623_v33 }
 0x2d2   : > { %9169 = vmatprep.subr.bf16.mxu0 %v9117_v18  ;;  %12764 = vmatprep.subr.bf16.mxu1 %v9115_v15  ;;  %v8932_v59 = vpack.c.bf16 %v8915_v32, %v8915_v32  ;;  %v19826_v40 = vsel %vm319_vm5, %v14070_v60, %v21653_v26  ;;  %v14080_v18 = vunpack.i.h.bf16 %v19662_v12  ;;  %v19830_v32 = vpop.f32.mrf.mxu1  ;;  %v19838_v38 = vpack.c.bf16 %v14059_v48, %v14054_v63  ;;  %v19848_v60 = vld [vmem:[%s21388_s1 + $0x18] sm:$0xff]   ;;  %v19856_v26 = vpop.f32.mrf.mxu0 }
 0x2d3   : > { %8308 = vperm.xlu1 %13085, %v19782_v9   ;;  %9189 = vmatprep.mubr.bf16.mxu0 %v21967_v61  ;;  %v19843_v3 = vsel %vm307_vm6, %v14065_v5, %v21654_v27  ;;  %v19854_v43 = vsel %vm343_vm1, %v13995_v52, %v14059_v48  ;;  %v19863_v5 = vld [vmem:[%s21389_s2 + $0x18] sm:$0xff]  ;;  %v22323_v27 = vunpack.i.h.bf16 %v19236_v58  ;;  %v22324_v52 = vunpack.i.h.bf16 %v19431_v25 }
 0x2d4   : > { %8313 = vperm.xlu0 %13084, %v19801_v11   ;;  %v19858_v44 = vpop.permute.xlu1 %14117  ;;  %v22325_v12 = vunpack.i.h.bf16 %v19354_v49  ;;  %v14090_v58 = vunpack.i.h.bf16 %v19711_v41  ;;  %v19904_v49 = vld [vmem:[%s21388_s1] sm:$0xff]  }
 0x2d5   : > { %9170 = vmatpush1.bf16.msra.mxu0 %v9116_v37  ;;  %12765 = vmatpush3.bf16.msra.mxu1 %v9115_v15  ;;  %v8894_v33 = vsel %vm331_vm3, %v22323_v27, %v14054_v63  ;;  %v19872_v48 = vsel %vm295_vm7, %v14080_v18, %v22324_v52  ;;  %v19875_v37 = vpop.permute.xlu0 %14122  ;;  %v9276_v15 = vsel %vm599_vm2, %v8932_v59, 0  ;;  %v19881_v27 = vpack.c.bf16 %v14069_v7, %v14064_v19 }
 0x2d6   : > { %9171 = vmatprep.subr.bf16.mxu0 %v9114_v1  ;;  %12859 = vmatprep.subr.msk.bf16.mxu1 %vm599_vm2, %v8934_v31  ;;  %v19886_v63 = vsel %vm319_vm5, %v22325_v12, %v14069_v7  ;;  %v22326_v18 = vunpack.i.h.bf16 %v19422_v20  ;;  %v8930_v31 = vpack.c.bf16 %v19854_v43, %v8894_v33  ;;  %v22327_v59 = vunpack.i.h.bf16 %v19482_v13  ;;  %22328 = vst [vmem:[#allocation62_spill] sm:$0xff] %v19904_v49  ;;  %v19906_v7 = vpop.f32.mrf.mxu0 }
 0x2d7   : > { %8318 = vperm.xlu1 %13085, %v19836_v17   ;;  %v22329_v33 = vunpack.i.h.bf16 %v19339_v14  ;;  %v14089_v43 = vunpack.i.l.bf16 %v19711_v41  ;;  %v22335_v41 = vld [vmem:[#allocation79_spill] sm:$0xff] }
 0x2d8   : > { %v19892_v1 = vsel %vm283_vm8, %v14075_v53, %v22326_v18  ;;  %v19898_v52 = vsel %vm271_vm9, %v14085_v57, %v22327_v59  ;;  %8323 = vperm.xlu0 %13084, %v19863_v5   ;;  %12767 = vmatmul.mubr.msk.bf16.vlgmr.msra.gmra.mxu1 %vm592_vm0, %v19848_v60  ;;  %v19913_v53 = vpack.c.bf16 %v14079_v10, %v14074_v55  ;;  %v14084_v57 = vunpack.i.l.bf16 %v19672_v45  ;;  %v19921_v18 = vpop.f32.mrf.mxu1 }
 0x2d9   : > { %v19919_v12 = vsel %vm307_vm6, %v22329_v33, %v14064_v19  ;;  %v22330_v59 = vpack.c.bf16 %v19742_v23, %v22317_v47  ;;  %12771 = vmatpush3.bf16.msra.mxu1 %v9282_v8  ;;  %v22331_v45 = vunpack.i.h.bf16 %v19431_v25  ;;  %v19935_v19 = vpop.permute.xlu1 %14127  ;;  %v22333_v33 = vpack.c.bf16 %v19762_v21, %v19762_v21  ;;  %v22334_v23 = vld [vmem:[#allocation15_spill] sm:$0xff]  ;;  %12780 = vmatprep.mubr.msk.bf16.mxu1 %vm592_vm0, %v19904_v49 }
 0x2da   : > { %v8927_v4 = vpack.c.bf16 %v19886_v63, %v19919_v12  ;;  %22332 = vst [vmem:[#allocation58_spill] sm:$0xff] %v19935_v19  ;;  %12772 = vmatprep.subr.bf16.mxu1 %v19838_v38  ;;  %v19945_v8 = vpack.c.bf16 %v14084_v57, %v22335_v41  ;;  %v19953_v12 = vpop.permute.xlu0 %14132  ;;  %v19957_v21 = vsel %vm355_vm4, %v14090_v58, %v14094_v51  ;;  %v14105_v41 = vunpack.i.h.bf16 %v19759_v2  ;;  %v19973_v47 = vpop.f32.mrf.mxu1 }
 0x2db   : > { %9172 = vmatpush1.bf16.msra.mxu0 %v22330_v59  ;;  %v19933_v14 = vsel %vm295_vm7, %v22331_v45, %v14079_v10  ;;  %v22336_v10 = vunpack.i.h.bf16 %v19422_v20  ;;  %9732 = vperm.xlu1 %13085, %v19782_v9   ;;  %v14100_v45 = vunpack.i.h.bf16 %v19747_v46  ;;  %v5046_v20 = vpop.f32.mrf.mxu0  ;;  %v14109_v25 = vunpack.i.l.bf16 %v19796_v35 }
 0x2dc   : > { %12193 = vmatprep.subr.msk.bf16.mxu0 %vm599_vm2, %v22333_v33  ;;  %v14099_v33 = vunpack.i.l.bf16 %v19747_v46  ;;  %9737 = vperm.xlu0 %13084, %v19801_v11   ;;  %v22337_v46 = vunpack.i.h.bf16 %v19482_v13  ;;  %v9563_v22 = vsel %vm355_vm4, %v14089_v43, %v14090_v58  ;;  %v14125_v43 = vunpack.i.h.bf16 %v19875_v37  ;;  %v5099_v49 = vpop.f32.mrf.mxu1 }
 0x2dd   : > { %v19951_v63 = vsel %vm283_vm8, %v22336_v10, %v14074_v55  ;;  %v19968_v55 = vpack.c.bf16 %v14094_v51, %v14094_v51  ;;  %v14104_v10 = vunpack.i.l.bf16 %v19759_v2  ;;  %12773 = vmatpush3.bf16.msra.mxu1 %v19838_v38  ;;  %v14114_v51 = vunpack.i.l.bf16 %v19812_v24  ;;  %v5048_v42 = vpop.f32.mrf.mxu0  ;;  %v19984_v2 = vpop.permute.xlu1 %14137  ;;  %v22339_v38 = vld [vmem:[#allocation8_spill] sm:$0xff] }
 0x2de   : > { %12187 = vmatmul.mubr.msk.bf16.vlgmr.msra.gmra.mxu0 %vm592_vm0, %v19550_v29  ;;  %v19979_v59 = vsel %vm271_vm9, %v22337_v46, %v14084_v57  ;;  %12774 = vmatprep.subr.bf16.mxu1 %v19881_v27  ;;  %v19990_v13 = vsel %vm331_vm3, %v14109_v25, %v14099_v33  ;;  %v14120_v57 = vunpack.i.h.bf16 %v19858_v44  ;;  %v19993_v46 = vpop.permute.xlu0 %14142  ;;  %v14124_v29 = vunpack.i.l.bf16 %v19875_v37 }
 0x2df   : > { %9291 = vmatpush1.bf16.msra.mxu0 %v9276_v15  ;;  %v9580_v15 = vpack.c.bf16 %v9563_v22, %v9563_v22  ;;  %9742 = vperm.xlu1 %13085, %v19836_v17   ;;  %v19998_v58 = vsel %vm343_vm1, %v14114_v51, %v14104_v10  ;;  %v5050_v25 = vpop.f32.mrf.mxu0  ;;  %v20004_v22 = vpack.c.bf16 %v14105_v41, %v14100_v45  ;;  %v20011_v51 = vsel %vm599_vm2, %v19968_v55, 0 }
 0x2e0   : > { %9292 = vmatprep.subr.bf16.mxu0 %v8930_v31  ;;  %9199 = vmatprep.mubr.bf16.mxu0 %v21967_v61  ;;  %v14119_v31 = vunpack.i.l.bf16 %v19858_v44  ;;  %v22340_v44 = vpack.c.bf16 %v19788_v56, %v19808_v0  ;;  %v20020_v35 = vsel %vm331_vm3, %v14099_v33, %v14100_v45  ;;  %v20023_v28 = vsel %vm343_vm1, %v14104_v10, %v14105_v41 }
 0x2e1   : > { %9747 = vperm.xlu0 %13084, %v19863_v5   ;;  %22338 = vst [vmem:[#allocation38_spill] sm:$0xff] %v20004_v22  ;;  %12775 = vmatpush3.bf16.msra.mxu1 %v19881_v27  ;;  %v14129_v6 = vunpack.i.l.bf16 %v19935_v19  ;;  %v5052_v24 = vpop.f32.mrf.mxu0  ;;  %v20026_v22 = vpop.permute.xlu1 %14147  ;;  %v20030_v56 = vsel %vm599_vm2, %v9580_v15, 0  ;;  %v20032_v0 = vpack.c.bf16 %v14125_v43, %v14120_v57  ;;  %v20035_v27 = vadd.f32 %v5046_v20, %v19692_v34 }
 0x2e2   : > { %12776 = vmatprep.subr.bf16.mxu1 %v19913_v53  ;;  %v14134_v45 = vunpack.i.l.bf16 %v19953_v12  ;;  %v20038_v33 = vpop.permute.xlu0 %14152  ;;  %v20048_v10 = vsel %vm319_vm5, %v14124_v29, %v14125_v43  ;;  %v14140_v15 = vunpack.i.h.bf16 %v19984_v2  ;;  %v14145_v20 = vunpack.i.h.bf16 %v19993_v46 }
 0x2e3   : > { %9293 = vmatpush1.bf16.msra.mxu0 %v22340_v44  ;;  %11156 = vperm.xlu1 %13085, %v19782_v9   ;;  %v20042_v41 = vsel %vm307_vm6, %v14129_v6, %v14119_v31  ;;  %v5056_v44 = vpop.f32.mrf.mxu0  ;;  %v14139_v9 = vunpack.i.l.bf16 %v19984_v2  ;;  %v20070_v43 = vadd.f32 %v5050_v25, %v19728_v30  ;;  %v22342_v37 = vpack.c.bf16 %v19933_v14, %v19951_v63 }
 0x2e4   : > { %9294 = vmatprep.subr.bf16.mxu0 %v8927_v4  ;;  %v20045_v4 = vsel %vm307_vm6, %v14119_v31, %v14120_v57  ;;  %v20057_v6 = vsel %vm319_vm5, %v14134_v45, %v14124_v29  ;;  %v12657_v57 = vpop.f32.mrf.mxu1  ;;  %v22341_v31 = vpack.c.bf16 %v19826_v40, %v19843_v3  ;;  %v14144_v29 = vunpack.i.l.bf16 %v19993_v46 }
 0x2e5   : > { %11161 = vperm.xlu0 %13084, %v19801_v11   ;;  %12777 = vmatpush3.bf16.msra.mxu1 %v19913_v53  ;;  %v5058_v2 = vpop.f32.mrf.mxu0  ;;  %v14158_v45 = vpop.permute.xlu1 %14157  ;;  %v20089_v53 = vpack.c.bf16 %v14145_v20, %v14140_v15  ;;  %v5108_v14 = vadd.f32 %v19973_v47, %v19737_v39  ;;  %v14149_v63 = vunpack.i.l.bf16 %v20026_v22  ;;  %v14154_v46 = vunpack.i.l.bf16 %v20038_v33  ;;  %v22357_v11 = vld [vmem:[#allocation26_spill] sm:$0xff] }
 0x2e6   : > { %12188 = vmatmul.mubr.msk.bf16.gmra.mxu0 %vm592_vm0, %v19848_v60  ;;  %v20067_v60 = vadd.f32 %v5048_v42, %v19713_v62  ;;  %12778 = vmatprep.subr.bf16.mxu1 %v19945_v8  ;;  %v20083_v62 = vadd.f32 %v5052_v24, %v19749_v54  ;;  %v20085_v30 = vpop.permute.xlu0 %14162  ;;  %v20099_v54 = vld [vmem:[%s21388_s1 + $0x8] sm:$0xff]   ;;  %v20102_v24 = vadd.f32 %v5056_v44, %v19794_v50  ;;  %v22358_v34 = vunpack.i.h.bf16 %v22357_v11 }
 0x2e7   : > { %9295 = vmatpush1.bf16.msra.mxu0 %v22341_v31  ;;  %22343 = vst [vmem:[#allocation66_spill] sm:$0xff] %v20085_v30  ;;  %11166 = vperm.xlu1 %13085, %v19836_v17   ;;  %v5060_v25 = vpop.f32.mrf.mxu0  ;;  %v5100_v17 = vadd.f32 %v5099_v49, %v19773_v16  ;;  %v20109_v39 = vsel %vm295_vm7, %v14144_v29, %v14145_v20  ;;  %v5102_v49 = vpop.f32.mrf.mxu1  ;;  %v22352_v31 = vld [vmem:[#allocation71_spill] sm:$0xff] }
 0x2e8   : > { %9296 = vmatprep.subr.bf16.mxu0 %v22342_v37  ;;  %9316 = vmatprep.mubr.bf16.mxu0 %v21967_v61  ;;  %v20106_v37 = vsel %vm283_vm8, %v14139_v9, %v14140_v15  ;;  %v22344_v47 = vpack.c.bf16 %v19872_v48, %v19892_v1  ;;  %v20119_v50 = vsel %vm295_vm7, %v14154_v46, %v14144_v29  ;;  %v14160_v15 = vunpack.i.h.bf16 %v14158_v45 }
 0x2e9   : > { %11171 = vperm.xlu0 %13084, %v19863_v5   ;;  %12779 = vmatpush3.bf16.msra.mxu1 %v19945_v8  ;;  %v20116_v5 = vsel %vm283_vm8, %v14149_v63, %v14139_v9  ;;  %v20122_v16 = vadd.f32 %v5058_v2, %v19817_v36  ;;  %v20124_v44 = vpop.permute.xlu1 %14167  ;;  %v22345_v20 = vpack.c.bf16 %v19979_v59, %v22339_v38  ;;  %v14159_v8 = vunpack.i.l.bf16 %v14158_v45  ;;  %v5062_v29 = vpop.f32.mrf.mxu0 }
 0x2ea   : > { %12860 = vmatprep.subr.msk.bf16.mxu1 %vm599_vm2, %v19968_v55  ;;  %v5111_v48 = vadd.f32 %v12657_v57, %v19830_v32  ;;  %v20133_v1 = vadd.f32 %v5060_v25, %v19856_v26  ;;  %v20137_v9 = vpop.permute.xlu0 %14172  ;;  %v5103_v59 = vadd.f32 %v5102_v49, %v19921_v18  ;;  %v14164_v38 = vunpack.i.l.bf16 %v20085_v30  ;;  %v20147_v26 = vld [vmem:[%s21388_s1 + $0x20] sm:$0xff]   ;;  %v22346_v32 = vld [vmem:[#allocation75_spill] sm:$0xff]  ;;  %v22366_v30 = vld [vmem:[#allocation60_spill] sm:$0xff] }
 0x2eb   : > { %9297 = vmatpush1.bf16.msra.mxu0 %v22344_v47  ;;  %v14170_v55 = vunpack.i.h.bf16 %v20124_v44  ;;  %v20152_v57 = vpack.c.bf16 %v14160_v15, %v22346_v32  ;;  %v14169_v2 = vunpack.i.l.bf16 %v20124_v44  ;;  %v14175_v18 = vunpack.i.h.bf16 %v20137_v9  ;;  %v12670_v47 = vpop.f32.mrf.mxu1  ;;  %v22351_v32 = vld [vmem:[#allocation67_spill] sm:$0xff]  ;;  %v5374_v40 = vpop.f32.mrf.mxu0 }
 0x2ec   : > { %9298 = vmatprep.subr.bf16.mxu0 %v22345_v20  ;;  %12781 = vmatmul.mubr.msk.bf16.vlgmr.msra.gmra.mxu1 %vm592_vm0, %v20099_v54  ;;  %v20157_v45 = vsel %vm271_vm9, %v14159_v8, %v14160_v15  ;;  %v22347_v63 = vpack.c.bf16 %v19898_v52, %v22334_v23  ;;  %v20164_v46 = vsel %vm271_vm9, %v14164_v38, %v14159_v8  ;;  %v22349_v52 = vld [vmem:[#allocation38_spill] sm:$0xff]  ;;  %v22356_v8 = vld [vmem:[#allocation28_spill] sm:$0xff] }
 0x2ed   : > { %12785 = vmatpush3.bf16.msra.mxu1 %v20011_v51  ;;  %v20167_v25 = vadd.f32 %v5062_v29, %v19906_v7  ;;  %v20169_v49 = vpack.c.bf16 %v14170_v55, %v14170_v55  ;;  %v20172_v20 = vpop.permute.xlu1 %14177  ;;  %v22348_v15 = vpack.c.bf16 %v19957_v21, %v19957_v21  ;;  %v5450_v23 = vadd.f32 %v12670_v47, %v5108_v14  ;;  %v22350_v7 = vld [vmem:[#allocation81_spill] sm:$0xff]  ;;  %v5427_v21 = vpop.f32.mrf.mxu1  ;;  %v22355_v47 = vld [vmem:[#allocation62_spill] sm:$0xff] }
 0x2ee   : > { %12786 = vmatprep.subr.bf16.mxu1 %v22349_v52  ;;  %v20180_v51 = vsel %vm355_vm4, %v14169_v2, %v14170_v55  ;;  %v14180_v38 = vunpack.i.h.bf16 %v20172_v20  ;;  %v20185_v29 = vpop.permute.xlu0 %14182  ;;  %12794 = vmatprep.mubr.msk.bf16.mxu1 %vm592_vm0, %v20147_v26  ;;  %v5444_v42 = vadd.f32 %v5427_v21, %v5100_v17  ;;  %v22361_v17 = vunpack.i.l.bf16 %v20172_v20 }
 0x2ef   : > { %9299 = vmatpush1.bf16.msra.mxu0 %v22347_v63  ;;  %v14185_v55 = vunpack.i.h.bf16 %v20185_v29  ;;  %v5486_v3 = vadd.f32 %v22356_v8, %v5450_v23  ;;  %v5442_v63 = vadd.f32 %v5374_v40, %v20035_v27  ;;  %v12671_v44 = vpop.f32.mrf.mxu1  ;;  %v22360_v40 = vunpack.i.l.bf16 %v20137_v9 }
 0x2f0   : > { %12212 = vmatprep.subr.msk.bf16.mxu0 %vm599_vm2, %v22348_v15  ;;  %v22353_v15 = vunpack.i.h.bf16 %v22352_v31  ;;  %v22364_v27 = vunpack.i.h.bf16 %v19935_v19 }
 0x2f1   : > { %12787 = vmatpush3.bf16.msra.mxu1 %v22349_v52  ;;  %v5638_v23 = vcombine.high %v5486_v3, %v5486_v3  ;;  %v20233_v14 = vpop.permute.xlu1 %14187  ;;  %v5430_v52 = vpop.f32.mrf.mxu1 }
 0x2f2   : > { %v20192_v36 = vsel %vm331_vm3, %v14175_v18, %v22353_v15  ;;  %12194 = vmatmul.mubr.msk.bf16.vlgmr.msra.gmra.mxu0 %vm592_vm0, %v22355_v47  ;;  %v20205_v18 = vsel %vm343_vm1, %v14180_v38, %v22358_v34  ;;  %v5376_v47 = vpop.f32.mrf.mxu0  ;;  %v20218_v34 = vpack.c.bf16 %v22361_v17, %v22360_v40  ;;  %v22363_v38 = vld [vmem:[#allocation2_spill] sm:$0xff]  ;;  %v20231_v15 = vsel %vm307_vm6, %v14185_v55, %v22364_v27  ;;  %v22365_v40 = vld [vmem:[#allocation25_spill] sm:$0xff] }
 0x2f3   : > { %22354 = vst [vmem:[#allocation64_spill] sm:$0xff] %v20192_v36  ;;  %22359 = vst [vmem:[#allocation56_spill] sm:$0xff] %v20205_v18  ;;  %9619 = vmatpush1.bf16.msra.mxu0 %v20030_v56  ;;  %v22362_v56 = vpack.c.bf16 %v20023_v28, %v20020_v35  ;;  %9326 = vmatprep.mubr.bf16.mxu0 %v21967_v61  ;;  %v20226_v21 = vrot.slane %v5486_v3, %v22363_v38  ;;  %v22367_v36 = vunpack.i.h.bf16 %v22366_v30 }
 0x2f4   : > { %12788 = vmatprep.subr.bf16.mxu1 %v20032_v0  ;;  %v5480_v28 = vadd.f32 %v22365_v40, %v5444_v42  ;;  %v5443_v35 = vadd.f32 %v5376_v47, %v20067_v60  ;;  %v5453_v17 = vadd.f32 %v12671_v44, %v5111_v48  ;;  %v20242_v19 = vrot.slane %v5638_v23, %v22363_v38  ;;  %v20252_v44 = vpop.permute.xlu0 %14192 }
 0x2f5   : > { %9620 = vmatprep.subr.bf16.mxu0 %v22362_v56  ;;  %v5378_v56 = vpop.f32.mrf.mxu0  ;;  %v10532_v3 = vsel %vm355_vm4, %v22367_v36, %v14169_v2  ;;  %v5478_v55 = vadd.f32 %v22365_v40, %v5442_v63  ;;  %v5447_v18 = vadd.f32 %v5430_v52, %v5103_v59  ;;  %v22368_v42 = vpack.c.bf16 %v19998_v58, %v19990_v13  ;;  %v22370_v58 = vld [vmem:[#allocation82_spill] sm:$0xff]  ;;  %v20265_v52 = vpop.permute.xlu1 %14197 }
 0x2f6   : > { %v5445_v27 = vadd.f32 %v5378_v56, %v20070_v43  ;;  %12789 = vmatpush3.bf16.msra.mxu1 %v20032_v0  ;;  %v5504_v60 = vcombine.high %v5480_v28, %v5480_v28  ;;  %v5479_v48 = vadd.f32 %v22365_v40, %v5443_v35  ;;  %v14184_v30 = vunpack.i.l.bf16 %v20185_v29  ;;  %v22371_v0 = vld [vmem:[#allocation27_spill] sm:$0xff] }
 0x2f7   : > { %9621 = vmatpush1.bf16.msra.mxu0 %v22368_v42  ;;  %v5380_v36 = vpop.f32.mrf.mxu0  ;;  %v10549_v2 = vpack.c.bf16 %v10532_v3, %v10532_v3  ;;  %v22369_v63 = vpack.c.bf16 %v20048_v10, %v20045_v4  ;;  %12790 = vmatprep.subr.bf16.mxu1 %v20089_v53  ;;  %v5525_v13 = vrot.slane %v5480_v28, %v22363_v38  ;;  %v20263_v47 = vsel %vm599_vm2, %v20169_v49, 0 }
 0x2f8   : > { %v5489_v43 = vadd.f32 %v22370_v58, %v5453_v17  ;;  %v5483_v59 = vadd.f32 %v22371_v0, %v5447_v18  ;;  %v5532_v23 = vrot.slane %v5504_v60, %v22363_v38  ;;  %v5502_v40 = vcombine.low %v5478_v55, %v5479_v48 }
 0x2f9   : > { %9622 = vmatprep.subr.bf16.mxu0 %v22369_v63  ;;  %v5503_v35 = vcombine.high %v5478_v55, %v5479_v48  ;;  %v5446_v4 = vadd.f32 %v5380_v36, %v20083_v62  ;;  %v5481_v28 = vadd.f32 %v22371_v0, %v5445_v27  ;;  %v5384_v18 = vpop.f32.mrf.mxu0  ;;  %v14190_v56 = vunpack.i.h.bf16 %v20233_v14  ;;  %v20295_v48 = vpop.permute.xlu1 %14207 }
 0x2fa   : > { %12195 = vmatmul.mubr.msk.bf16.gmra.mxu0 %vm592_vm0, %v20099_v54  ;;  %v5705_v10 = vcombine.high %v5489_v43, %v5489_v43  ;;  %v5571_v17 = vcombine.high %v5483_v59, %v5483_v59  ;;  %v22372_v3 = vpack.c.bf16 %v20057_v6, %v20042_v41  ;;  %12791 = vmatpush3.bf16.msra.mxu1 %v20089_v53  ;;  %v20281_v54 = vsel %vm599_vm2, %v10549_v2, 0 }
 0x2fb   : > { %v5511_v55 = vrot.slane %v5502_v40, %v22363_v38  ;;  %v5518_v62 = vrot.slane %v5503_v35, %v22363_v38  ;;  %v5482_v42 = vadd.f32 %v22371_v0, %v5446_v4  ;;  %v22373_v27 = vpack.c.bf16 %v20109_v39, %v20106_v37  ;;  %12792 = vmatprep.subr.bf16.mxu1 %v20152_v57  ;;  %v20298_v37 = vpop.permute.xlu0 %14202  ;;  %v5386_v4 = vpop.f32.mrf.mxu0 }
 0x2fc   : > { %9623 = vmatpush1.bf16.msra.mxu0 %v22372_v3  ;;  %v20287_v60 = vrot.slane %v5489_v43, %v22363_v38  ;;  %v20290_v41 = vrot.slane %v5705_v10, %v22363_v38  ;;  %v5592_v6 = vrot.slane %v5483_v59, %v22363_v38  ;;  %v14189_v53 = vunpack.i.l.bf16 %v20233_v14  ;;  %9644 = vmatprep.mubr.bf16.mxu0 %v21967_v61  ;;  %v22393_v14 = vld [vmem:[#allocation66_spill] sm:$0xff] }
 0x2fd   : > { %9624 = vmatprep.subr.bf16.mxu0 %v22373_v27  ;;  %v5533_v36 = vcombine.low %v5511_v55, %v5525_v13  ;;  %v5534_v2 = vcombine.high %v5511_v55, %v5525_v13  ;;  %v5535_v63 = vcombine.low %v5518_v62, %v5532_v23  ;;  %v5536_v0 = vcombine.high %v5518_v62, %v5532_v23 }
 0x2fe   : > { %v5599_v39 = vrot.slane %v5571_v17, %v22363_v38  ;;  %v5569_v43 = vcombine.low %v5481_v28, %v5482_v42  ;;  %v5570_v40 = vcombine.high %v5481_v28, %v5482_v42  ;;  %v5448_v35 = vadd.f32 %v5384_v18, %v20102_v24  ;;  %v20312_v24 = vld [vmem:[%s21388_s1 + $0x28] sm:$0xff]   ;;  %12793 = vmatpush3.bf16.msra.mxu1 %v20152_v57 }
 0x2ff   : > { %v22374_v59 = vpack.c.bf16 %v20119_v50, %v20116_v5  ;;  %v5543_v13 = vrot.slane %v5533_v36, %v22363_v38  ;;  %v5550_v23 = vrot.slane %v5535_v63, %v22363_v38  ;;  %v5557_v10 = vrot.slane %v5534_v2, %v22363_v38  ;;  %12861 = vmatprep.subr.msk.bf16.mxu1 %vm599_vm2, %v20169_v49  ;;  %v5388_v63 = vpop.f32.mrf.mxu0 }
 0x300   : > { %v5564_v17 = vrot.slane %v5536_v0, %v22363_v38  ;;  %v22375_v5 = vpack.c.bf16 %v20157_v45, %v22350_v7  ;;  %v5578_v50 = vrot.slane %v5569_v43, %v22363_v38  ;;  %v5585_v28 = vrot.slane %v5570_v40, %v22363_v38  ;;  %v20340_v0 = vpop.permute.xlu1 %14217 }
 0x301   : > { %9625 = vmatpush1.bf16.msra.mxu0 %v22374_v59  ;;  %v22376_v18 = vunpack.i.h.bf16 %v19953_v12  ;;  %v14195_v55 = vunpack.i.h.bf16 %v20252_v44  ;;  %v5565_v62 = vcombine.high %v5543_v13, %v5543_v13  ;;  %v5566_v42 = vcombine.high %v5550_v23, %v5550_v23  ;;  %11962 = vst.msk [vmem:[%s17063_s26 + $0x3] ss:$8 sm:$0x7] %vm17010_vm10, %v5543_v13  ;;  %11963 = vst.msk [vmem:[%s17063_s26 + $0x1b] ss:$8 sm:$0x7] %vm17010_vm10, %v5557_v10  ;;  %v20364_v59 = vpop.permute.xlu0 %14212 }
 0x302   : > { %9626 = vmatprep.subr.bf16.mxu0 %v22375_v5  ;;  %v5567_v45 = vcombine.high %v5557_v10, %v5557_v10  ;;  %v5568_v7 = vcombine.high %v5564_v17, %v5564_v17  ;;  %11966 = vst.msk [vmem:[%s17063_s26 + $0x63] ss:$8 sm:$0x7] %vm17010_vm10, %v5550_v23  ;;  %11967 = vst.msk [vmem:[%s17063_s26 + $0x7b] ss:$8 sm:$0x7] %vm17010_vm10, %v5564_v17  ;;  %v5601_v27 = vcombine.high %v5578_v50, %v5592_v6 }
 0x303   : > { %v20323_v3 = vsel %vm319_vm5, %v14190_v56, %v22376_v18  ;;  %v5600_v56 = vcombine.low %v5578_v50, %v5592_v6  ;;  %v5602_v36 = vcombine.low %v5585_v28, %v5599_v39  ;;  %v5603_v2 = vcombine.high %v5585_v28, %v5599_v39  ;;  %11964 = vst.msk [vmem:[%s17063_s26 + $0x33] ss:$8 sm:$0x7] %vm17010_vm10, %v5565_v62 }
 0x304   : > { %11965 = vst.msk [vmem:[%s17063_s26 + $0x4b] ss:$8 sm:$0x7] %vm17010_vm10, %v5567_v45  ;;  %11968 = vst.msk [vmem:[%s17063_s26 + $0x93] ss:$8 sm:$0x7] %vm17010_vm10, %v5566_v42  ;;  %v22378_v49 = vpack.c.bf16 %v20164_v46, %v22351_v32  ;;  %12795 = vmatmul.mubr.msk.bf16.vlgmr.msra.gmra.mxu1 %vm592_vm0, %v20312_v24  ;;  %v5484_v6 = vadd.f32 %v22356_v8, %v5448_v35  ;;  %v10543_v39 = vpack.c.bf16 %v20323_v3, %v20231_v15 }
 0x305   : > { %11969 = vst.msk [vmem:[%s17063_s26 + $0xab] ss:$8 sm:$0x7] %vm17010_vm10, %v5568_v7  ;;  %v5449_v43 = vadd.f32 %v5386_v4, %v20122_v16  ;;  %v14200_v40 = vunpack.i.h.bf16 %v20265_v52  ;;  %v5610_v13 = vrot.slane %v5600_v56, %v22363_v38  ;;  %v5617_v46 = vrot.slane %v5602_v36, %v22363_v38  ;;  %v20377_v16 = vld [vmem:[%s21388_s1 + $0x10] sm:$0xff]   ;;  %12799 = vmatpush3.bf16.msra.mxu1 %v20263_v47  ;;  %v5390_v7 = vpop.f32.mrf.mxu0  ;;  %v20413_v56 = vpop.permute.xlu0 %14222 }
 0x306   : > { %9627 = vmatpush1.bf16.msra.mxu0 %v22378_v49  ;;  %v5624_v32 = vrot.slane %v5601_v27, %v22363_v38  ;;  %v5631_v35 = vrot.slane %v5603_v2, %v22363_v38  ;;  %v22379_v23 = vpack.c.bf16 %v20180_v51, %v20180_v51  ;;  %v10545_v4 = vpack.c.bf16 %v14189_v53, %v14184_v30  ;;  %v20439_v2 = vpop.permute.xlu1 %14227 }
 0x307   : > { %v5485_v10 = vadd.f32 %v22356_v8, %v5449_v43  ;;  %v5451_v17 = vadd.f32 %v5388_v63, %v20133_v1  ;;  %v22380_v51 = vunpack.i.l.bf16 %v20172_v20  ;;  %v22381_v5 = vunpack.i.h.bf16 %v22357_v11  ;;  %11970 = vst.msk [vmem:[%s17063_s26 + $0xc3] ss:$8 sm:$0x7] %vm17010_vm10, %v5610_v13  ;;  %11974 = vst.msk [vmem:[%s17063_s26 + $0x123] ss:$8 sm:$0x7] %vm17010_vm10, %v5617_v46  ;;  %12800 = vmatprep.subr.bf16.mxu1 %v20218_v34  ;;  %v20448_v43 = vpop.f32.mrf.mxu0 }
 0x308   : > { %12271 = vmatprep.subr.msk.bf16.mxu0 %vm599_vm2, %v22379_v23  ;;  %v5632_v28 = vcombine.high %v5610_v13, %v5610_v13  ;;  %v5633_v18 = vcombine.high %v5617_v46, %v5617_v46  ;;  %v5634_v62 = vcombine.high %v5624_v32, %v5624_v32  ;;  %v5635_v47 = vcombine.high %v5631_v35, %v5631_v35 }
 0x309   : > { %v10522_v50 = vsel %vm343_vm1, %v22381_v5, %v22380_v51  ;;  %11971 = vst.msk [vmem:[%s17063_s26 + $0xdb] ss:$8 sm:$0x7] %vm17010_vm10, %v5624_v32  ;;  %11975 = vst.msk [vmem:[%s17063_s26 + $0x13b] ss:$8 sm:$0x7] %vm17010_vm10, %v5631_v35  ;;  %12213 = vmatmul.mubr.msk.bf16.vlgmr.msra.gmra.mxu0 %vm592_vm0, %v20147_v26  ;;  %v5636_v11 = vcombine.low %v5484_v6, %v5485_v10  ;;  %v5637_v1 = vcombine.high %v5484_v6, %v5485_v10 }
 0x30a   : > { %10588 = vmatpush1.bf16.msra.mxu0 %v20281_v54  ;;  %v22382_v20 = vunpack.i.l.bf16 %v20137_v9  ;;  %v22383_v8 = vunpack.i.h.bf16 %v22352_v31  ;;  %v14199_v45 = vunpack.i.l.bf16 %v20265_v52  ;;  %11972 = vst.msk [vmem:[%s17063_s26 + $0xf3] ss:$8 sm:$0x7] %vm17010_vm10, %v5632_v28  ;;  %11973 = vst.msk [vmem:[%s17063_s26 + $0x10b] ss:$8 sm:$0x7] %vm17010_vm10, %v5634_v62  ;;  %v22384_v9 = vunpack.i.h.bf16 %v20026_v22  ;;  %9654 = vmatprep.mubr.bf16.mxu0 %v21967_v61  ;;  %v20467_v28 = vpop.f32.mrf.mxu0 }
 0x30b   : > { %11976 = vst.msk [vmem:[%s17063_s26 + $0x153] ss:$8 sm:$0x7] %vm17010_vm10, %v5633_v18  ;;  %11977 = vst.msk [vmem:[%s17063_s26 + $0x16b] ss:$8 sm:$0x7] %vm17010_vm10, %v5635_v47  ;;  %v14194_v26 = vunpack.i.l.bf16 %v20252_v44  ;;  %v22385_v27 = vunpack.i.h.bf16 %v20038_v33  ;;  %12808 = vmatprep.mubr.msk.bf16.mxu1 %vm592_vm0, %v20377_v16  ;;  %v5645_v63 = vrot.slane %v5636_v11, %v22363_v38  ;;  %v5487_v49 = vadd.f32 %v22370_v58, %v5451_v17 }
 0x30c   : > { %v10511_v42 = vsel %vm331_vm3, %v22383_v8, %v22382_v20  ;;  %v20430_v31 = vsel %vm283_vm8, %v14195_v55, %v22384_v9  ;;  %v5652_v55 = vrot.slane %v5637_v1, %v22363_v38  ;;  %12801 = vmatpush3.bf16.msra.mxu1 %v20218_v34  ;;  %v14205_v6 = vunpack.i.h.bf16 %v20298_v37  ;;  %v22386_v17 = vld [vmem:[#allocation56_spill] sm:$0xff]  ;;  %v22389_v18 = vld [vmem:[#allocation14_spill] sm:$0xff]  ;;  %v20485_v20 = vpop.permute.xlu1 %14237  ;;  %v20494_v9 = vpop.f32.mrf.mxu0 }
 0x30d   : > { %v10547_v54 = vpack.c.bf16 %v10522_v50, %v10511_v42  ;;  %v20436_v36 = vsel %vm295_vm7, %v14200_v40, %v22385_v27  ;;  %v10542_v13 = vpack.c.bf16 %v14199_v45, %v14194_v26  ;;  %v14204_v46 = vunpack.i.l.bf16 %v20298_v37  ;;  %12802 = vmatprep.subr.bf16.mxu1 %v10545_v4  ;;  %v22387_v51 = vld [vmem:[#allocation64_spill] sm:$0xff]  ;;  %v20465_v50 = vpop.permute.xlu0 %14232 }
 0x30e   : > { %v10540_v40 = vpack.c.bf16 %v20436_v36, %v20430_v31  ;;  %v5452_v32 = vadd.f32 %v5390_v7, %v20167_v25  ;;  %v5667_v34 = vcombine.low %v5645_v63, %v20226_v21  ;;  %v5668_v35 = vcombine.high %v5645_v63, %v20226_v21  ;;  %v22390_v21 = vld [vmem:[#allocation58_spill] sm:$0xff]  ;;  %v20551_v44 = vpop.f32.mrf.mxu0 }
 0x30f   : > { %10589 = vmatprep.subr.bf16.mxu0 %v10547_v54  ;;  %v5669_v23 = vcombine.low %v5652_v55, %v20242_v19  ;;  %v5670_v10 = vcombine.high %v5652_v55, %v20242_v19  ;;  %v22388_v5 = vpack.c.bf16 %v22386_v17, %v22387_v51  ;;  %v20472_v25 = vpack.c.bf16 %v14204_v46, %v22389_v18  ;;  %v20562_v18 = vld [vmem:[%s21388_s1 + $0x18] sm:$0xff]  }
 0x310   : > { %v5488_v62 = vadd.f32 %v22370_v58, %v5452_v32  ;;  %v22391_v47 = vunpack.i.h.bf16 %v22390_v21  ;;  %v22392_v11 = vunpack.i.h.bf16 %v19953_v12  ;;  %v5677_v8 = vrot.slane %v5667_v34, %v22363_v38  ;;  %12803 = vmatpush3.bf16.msra.mxu1 %v10545_v4  ;;  %v20588_v37 = vpop.f32.mrf.mxu0 }
 0x311   : > { %10590 = vmatpush1.bf16.msra.mxu0 %v22388_v5  ;;  %v5684_v42 = vrot.slane %v5669_v23, %v22363_v38  ;;  %v5691_v29 = vrot.slane %v5668_v35, %v22363_v38  ;;  %v5698_v58 = vrot.slane %v5670_v10, %v22363_v38  ;;  %12804 = vmatprep.subr.bf16.mxu1 %v10542_v13  ;;  %v14210_v34 = vunpack.i.h.bf16 %v20295_v48 }
 0x312   : > { %v10489_v19 = vsel %vm307_vm6, %v22391_v47, %v14184_v30  ;;  %v10500_v1 = vsel %vm319_vm5, %v22392_v11, %v14189_v53  ;;  %v14165_v30 = vunpack.i.h.bf16 %v22393_v14  ;;  %v5703_v12 = vcombine.low %v5487_v49, %v5488_v62  ;;  %12214 = vmatmul.mubr.msk.bf16.gmra.mxu0 %vm592_vm0, %v20312_v24  ;;  %11978 = vst.msk [vmem:[%s17063_s26 + $0x183] ss:$8 sm:$0x7] %vm17010_vm10, %v5677_v8  ;;  %v20509_v24 = vpop.permute.xlu0 %14242 }
 0x313   : > { %v5704_v7 = vcombine.high %v5487_v49, %v5488_v62  ;;  %v10544_v53 = vpack.c.bf16 %v10500_v1, %v10489_v19  ;;  %v5699_v54 = vcombine.high %v5677_v8, %v5677_v8  ;;  %v5700_v27 = vcombine.high %v5684_v42, %v5684_v42  ;;  %11979 = vst.msk [vmem:[%s17063_s26 + $0x19b] ss:$8 sm:$0x7] %vm17010_vm10, %v5691_v29 }
 0x314   : > { %v5701_v63 = vcombine.high %v5691_v29, %v5691_v29  ;;  %v5702_v55 = vcombine.high %v5698_v58, %v5698_v58  ;;  %11982 = vst.msk [vmem:[%s17063_s26 + $0x1e3] ss:$8 sm:$0x7] %vm17010_vm10, %v5684_v42  ;;  %11983 = vst.msk [vmem:[%s17063_s26 + $0x1fb] ss:$8 sm:$0x7] %vm17010_vm10, %v5698_v58  ;;  %10613 = vmatprep.mubr.bf16.mxu0 %v21967_v61  ;;  %v20512_v4 = vsel %vm271_vm9, %v14205_v6, %v14165_v30 }
 0x315   : > { %v5712_v49 = vrot.slane %v5703_v12, %v22363_v38  ;;  %v5719_v32 = vrot.slane %v5704_v7, %v22363_v38  ;;  %10591 = vmatprep.subr.bf16.mxu0 %v10544_v53  ;;  %11980 = vst.msk [vmem:[%s17063_s26 + $0x1b3] ss:$8 sm:$0x7] %vm17010_vm10, %v5699_v54  ;;  %11984 = vst.msk [vmem:[%s17063_s26 + $0x213] ss:$8 sm:$0x7] %vm17010_vm10, %v5700_v27  ;;  %v14209_v6 = vunpack.i.l.bf16 %v20295_v48  ;;  %v14214_v35 = vunpack.i.l.bf16 %v20364_v59 }
 0x316   : > { %11981 = vst.msk [vmem:[%s17063_s26 + $0x1cb] ss:$8 sm:$0x7] %vm17010_vm10, %v5701_v63  ;;  %11985 = vst.msk [vmem:[%s17063_s26 + $0x22b] ss:$8 sm:$0x7] %vm17010_vm10, %v5702_v55  ;;  %10592 = vmatpush1.bf16.msra.mxu0 %v10543_v39  ;;  %v22394_v23 = vunpack.i.h.bf16 %v20026_v22  ;;  %v22395_v17 = vunpack.i.h.bf16 %v20038_v33  ;;  %12805 = vmatpush3.bf16.msra.mxu1 %v10542_v13  ;;  %v20549_v22 = vpop.permute.xlu1 %14247  ;;  %v14220_v33 = vunpack.i.h.bf16 %v20340_v0  ;;  %v20564_v62 = vpop.permute.xlu0 %10300  ;;  %v14219_v47 = vunpack.i.l.bf16 %v20340_v0 }
 0x317   : > { %v5734_v15 = vcombine.low %v5712_v49, %v20287_v60  ;;  %v5735_v3 = vcombine.high %v5712_v49, %v20287_v60  ;;  %v5736_v48 = vcombine.low %v5719_v32, %v20290_v41  ;;  %v5737_v39 = vcombine.high %v5719_v32, %v20290_v41  ;;  %12806 = vmatprep.subr.bf16.mxu1 %v20472_v25  ;;  %v22396_v0 = vld [vmem:[#allocation61_spill] sm:$0xff]  ;;  %v20620_v55 = vpop.f32.mrf.mxu0 }
 0x318   : > { %v10467_v10 = vsel %vm283_vm8, %v22394_v23, %v14194_v26  ;;  %v10478_v51 = vsel %vm295_vm7, %v22395_v17, %v14199_v45  ;;  %v10358_v52 = vpack.c.bf16 %v14214_v35, %v14214_v35  ;;  %v14225_v45 = vunpack.i.h.bf16 %v20413_v56 }
 0x319   : > { %v10541_v26 = vpack.c.bf16 %v10478_v51, %v10467_v10  ;;  %v5744_v13 = vrot.slane %v5734_v15, %v22363_v38  ;;  %v5751_v60 = vrot.slane %v5736_v48, %v22363_v38  ;;  %v5758_v41 = vrot.slane %v5735_v3, %v22363_v38  ;;  %v20633_v51 = vpop.f32.mrf.mxu1 }
 0x31a   : > { %v5765_v5 = vrot.slane %v5737_v39, %v22363_v38  ;;  %v10340_v21 = vsel %vm355_vm4, %v14210_v34, %v14214_v35  ;;  %v14224_v19 = vunpack.i.l.bf16 %v20413_v56  ;;  %v10456_v11 = vsel %vm271_vm9, %v14165_v30, %v14204_v46  ;;  %12807 = vmatpush3.bf16.msra.mxu1 %v20472_v25  ;;  %v22397_v25 = vld [vmem:[#allocation51_spill] sm:$0xff]  ;;  %v20598_v30 = vld [vmem:[%s21388_s1] sm:$0xff]   ;;  %v14253_v7 = vpop.permute.xlu1 %14252 }
 0x31b   : > { %10593 = vmatprep.subr.bf16.mxu0 %v10541_v26  ;;  %v5766_v1 = vcombine.high %v5744_v13, %v5744_v13  ;;  %v5767_v8 = vcombine.high %v5751_v60, %v5751_v60  ;;  %v5768_v42 = vcombine.high %v5758_v41, %v5758_v41  ;;  %11986 = vst.msk [vmem:[%s17063_s26 + $0x243] ss:$8 sm:$0x7] %vm17010_vm10, %v5744_v13  ;;  %11987 = vst.msk [vmem:[%s17063_s26 + $0x25b] ss:$8 sm:$0x7] %vm17010_vm10, %v5758_v41 }
 0x31c   : > { %v5769_v29 = vcombine.high %v5765_v5, %v5765_v5  ;;  %11990 = vst.msk [vmem:[%s17063_s26 + $0x2a3] ss:$8 sm:$0x7] %vm17010_vm10, %v5751_v60  ;;  %11991 = vst.msk [vmem:[%s17063_s26 + $0x2bb] ss:$8 sm:$0x7] %vm17010_vm10, %v5765_v5  ;;  %10594 = vmatpush1.bf16.msra.mxu0 %v10540_v40  ;;  %v10537_v56 = vpack.c.bf16 %v20512_v4, %v22396_v0  ;;  %v10355_v46 = vpack.c.bf16 %v14225_v45, %v14220_v33 }
 0x31d   : > { %v10538_v58 = vpack.c.bf16 %v10456_v11, %v22397_v25  ;;  %v14229_v14 = vunpack.i.l.bf16 %v20439_v2  ;;  %12862 = vmatprep.subr.msk.bf16.mxu1 %vm599_vm2, %v10358_v52  ;;  %11988 = vst.msk [vmem:[%s17063_s26 + $0x273] ss:$8 sm:$0x7] %vm17010_vm10, %v5766_v1  ;;  %11989 = vst.msk [vmem:[%s17063_s26 + $0x28b] ss:$8 sm:$0x7] %vm17010_vm10, %v5768_v42  ;;  %v14234_v31 = vunpack.i.l.bf16 %v20465_v50  ;;  %12809 = vmatmul.mubr.msk.bf16.vlgmr.msra.gmra.mxu1 %vm592_vm0, %v20562_v18  ;;  %v14240_v12 = vunpack.i.h.bf16 %v20485_v20 }
 0x31e   : > { %11992 = vst.msk [vmem:[%s17063_s26 + $0x2d3] ss:$8 sm:$0x7] %vm17010_vm10, %v5767_v8  ;;  %11993 = vst.msk [vmem:[%s17063_s26 + $0x2eb] ss:$8 sm:$0x7] %vm17010_vm10, %v5769_v29  ;;  %v10339_v40 = vsel %vm355_vm4, %v14209_v6, %v14210_v34  ;;  %v10357_v53 = vpack.c.bf16 %v10340_v21, %v10340_v21  ;;  %v14239_v27 = vunpack.i.l.bf16 %v20485_v20  ;;  %v14245_v63 = vunpack.i.h.bf16 %v20509_v24  ;;  %v14258_v34 = vpop.permute.xlu0 %14257  ;;  %12822 = vmatprep.mubr.msk.bf16.mxu1 %vm592_vm0, %v20598_v30 }
 0x31f   : > { %v10706_v36 = vsel %vm599_vm2, %v10358_v52, 0  ;;  %10595 = vmatprep.subr.bf16.mxu0 %v10538_v58  ;;  %v10356_v54 = vpack.c.bf16 %v10339_v40, %v10339_v40  ;;  %v14244_v4 = vunpack.i.l.bf16 %v20509_v24  ;;  %v10318_v49 = vsel %vm331_vm3, %v14219_v47, %v14220_v33  ;;  %v20638_v52 = vpop.f32.mrf.mxu0 }
 0x320   : > { %12813 = vmatpush3.bf16.msra.mxu1 %v10706_v36  ;;  %10596 = vmatpush1.bf16.msra.mxu0 %v10537_v56  ;;  %v10329_v32 = vsel %vm343_vm1, %v14224_v19, %v14225_v45  ;;  %v10317_v6 = vsel %vm331_vm3, %v14229_v14, %v14219_v47  ;;  %v10328_v35 = vsel %vm343_vm1, %v14234_v31, %v14224_v19  ;;  %v14249_v24 = vunpack.i.l.bf16 %v20549_v22  ;;  %v10268_v45 = vpop.permute.xlu1 %10267  ;;  %v20646_v19 = vpop.f32.mrf.mxu1  ;;  %v22398_v31 = vld [vmem:[#allocation68_spill] sm:$0xff] }
 0x321   : > { %12814 = vmatprep.subr.bf16.mxu1 %v10355_v46  ;;  %12278 = vmatprep.subr.msk.bf16.mxu0 %vm599_vm2, %v10357_v53  ;;  %v10352_v20 = vpack.c.bf16 %v14245_v63, %v14240_v12  ;;  %v10700_v23 = vsel %vm599_vm2, %v10356_v54, 0  ;;  %v10354_v10 = vpack.c.bf16 %v10329_v32, %v10318_v49  ;;  %v10296_v17 = vsel %vm307_vm6, %v14239_v27, %v14240_v12  ;;  %v20648_v11 = vpop.f32.mrf.mxu0  ;;  %v22399_v53 = vld [vmem:[#allocation31_spill] sm:$0xff]  ;;  %v20678_v32 = vld [vmem:[%s21388_s1 + $0x20] sm:$0xff]  }
 0x322   : > { %v10307_v15 = vsel %vm319_vm5, %v14244_v4, %v14245_v63  ;;  %v14255_v3 = vunpack.i.h.bf16 %v14253_v7  ;;  %v14254_v48 = vunpack.i.l.bf16 %v14253_v7  ;;  %v14260_v39 = vunpack.i.h.bf16 %v14258_v34  ;;  %v10279_v5 = vpop.permute.xlu0 %10278  ;;  %v20652_v0 = vpop.f32.mrf.mxu1 }
 0x323   : > { %12272 = vmatmul.mubr.msk.bf16.vlgmr.msra.gmra.mxu0 %vm592_vm0, %v20377_v16  ;;  %v10353_v26 = vpack.c.bf16 %v10328_v35, %v10317_v6  ;;  %v14259_v33 = vunpack.i.l.bf16 %v14258_v34  ;;  %v10295_v13 = vsel %vm307_vm6, %v14249_v24, %v14239_v27  ;;  %v10306_v60 = vsel %vm319_vm5, %v20564_v62, %v14244_v4  ;;  %v20656_v25 = vpop.f32.mrf.mxu0  ;;  %v22400_v4 = vld [vmem:[#allocation76_spill] sm:$0xff] }
 0x324   : > { %12815 = vmatpush3.bf16.msra.mxu1 %v10355_v46  ;;  %10715 = vmatpush1.bf16.msra.mxu0 %v10700_v23  ;;  %v10351_v16 = vpack.c.bf16 %v10307_v15, %v10296_v17  ;;  %v10349_v41 = vpack.c.bf16 %v14260_v39, %v14255_v3  ;;  %v10274_v21 = vsel %vm283_vm8, %v14254_v48, %v14255_v3  ;;  %v14263_v29 = vpop.permute.xlu1 %14262  ;;  %v20665_v27 = vpop.f32.mrf.mxu1 }
 0x325   : > { %12816 = vmatprep.subr.bf16.mxu1 %v10352_v20  ;;  %10716 = vmatprep.subr.bf16.mxu0 %v10354_v10  ;;  %v10285_v47 = vsel %vm295_vm7, %v14259_v33, %v14260_v39  ;;  %v10350_v1 = vpack.c.bf16 %v10306_v60, %v10295_v13  ;;  %v10273_v62 = vsel %vm283_vm8, %v10268_v45, %v14254_v48  ;;  %v14265_v56 = vunpack.i.h.bf16 %v14263_v29  ;;  %v20662_v7 = vpop.f32.mrf.mxu0 }
 0x326   : > { %10623 = vmatprep.mubr.bf16.mxu0 %v21967_v61  ;;  %v10284_v8 = vsel %vm295_vm7, %v10279_v5, %v14259_v33  ;;  %v10348_v42 = vpack.c.bf16 %v10285_v47, %v10274_v21  ;;  %v14264_v46 = vunpack.i.l.bf16 %v14263_v29  ;;  %v10257_v14 = vpop.permute.xlu0 %10256  ;;  %v12698_v6 = vpop.f32.mrf.mxu1  ;;  %v14215_v10 = vunpack.i.h.bf16 %v20364_v59 }
 0x327   : > { %v10347_v58 = vpack.c.bf16 %v10284_v8, %v10273_v62  ;;  %v10346_v36 = vpack.c.bf16 %v14265_v56, %v22398_v31  ;;  %v20672_v63 = vpop.f32.mrf.mxu0  ;;  %v14230_v45 = vunpack.i.h.bf16 %v20439_v2 }
 0x328   : > { %12817 = vmatpush3.bf16.msra.mxu1 %v10352_v20  ;;  %10717 = vmatpush1.bf16.msra.mxu0 %v10353_v26  ;;  %v10262_v40 = vsel %vm271_vm9, %v10257_v14, %v14264_v46  ;;  %v10263_v12 = vsel %vm271_vm9, %v14264_v46, %v14265_v56  ;;  %v6523_v15 = vpop.f32.mrf.mxu1 }
 0x329   : > { %12818 = vmatprep.subr.bf16.mxu1 %v10349_v41  ;;  %10718 = vmatprep.subr.bf16.mxu0 %v10351_v16  ;;  %v10345_v54 = vpack.c.bf16 %v10263_v12, %v22399_v53  ;;  %v10344_v49 = vpack.c.bf16 %v10262_v40, %v22400_v4  ;;  %v20680_v34 = vpop.f32.mrf.mxu0 }
 0x32b   : > { %12273 = vmatmul.mubr.msk.bf16.gmra.mxu0 %vm592_vm0, %v20562_v18  ;;  %v20670_v18 = vld [vmem:[%s21388_s1 + $0x8] sm:$0xff]   ;;  %v20684_v35 = vpop.f32.mrf.mxu0  ;;  %v14268_v20 = vpop.permute.xlu1 %14267 }
 0x32c   : > { %12819 = vmatpush3.bf16.msra.mxu1 %v10349_v41  ;;  %10719 = vmatpush1.bf16.msra.mxu0 %v10350_v1  ;;  %v14273_v23 = vpop.permute.xlu0 %14272  ;;  %v14270_v24 = vunpack.i.h.bf16 %v14268_v20  ;;  %v14269_v17 = vunpack.i.l.bf16 %v14268_v20  ;;  %v14235_v41 = vunpack.i.h.bf16 %v20465_v50  ;;  %v12699_v1 = vpop.f32.mrf.mxu1 }
 0x32d   : > { %10740 = vmatprep.mubr.bf16.mxu0 %v21967_v61  ;;  %10720 = vmatprep.subr.bf16.mxu0 %v10348_v42  ;;  %v14275_v3 = vunpack.i.h.bf16 %v14273_v23  ;;  %v14274_v48 = vunpack.i.l.bf16 %v14273_v23  ;;  %v20695_v16 = vpop.f32.mrf.mxu0 }
 0x32e   : > { %12820 = vmatprep.subr.bf16.mxu1 %v10346_v36  ;;  %v11006_v39 = vpack.c.bf16 %v14270_v24, %v14270_v24  ;;  %v10988_v26 = vsel %vm355_vm4, %v14269_v17, %v14270_v24  ;;  %v10987_v33 = vsel %vm355_vm4, %v14215_v10, %v14269_v17  ;;  %v6526_v4 = vpop.f32.mrf.mxu1 }
 0x32f   : > { %v11005_v13 = vpack.c.bf16 %v10988_v26, %v10988_v26  ;;  %v14278_v60 = vpop.permute.xlu1 %14277  ;;  %v11004_v59 = vpack.c.bf16 %v10987_v33, %v10987_v33  ;;  %v10965_v62 = vsel %vm331_vm3, %v14275_v3, %v14230_v45  ;;  %v10966_v42 = vsel %vm331_vm3, %v14230_v45, %v14274_v48  ;;  %v6484_v40 = vpop.f32.mrf.mxu0 }
 0x330   : > { %10721 = vmatpush1.bf16.msra.mxu0 %v10347_v58  ;;  %12821 = vmatpush3.bf16.msra.mxu1 %v10346_v36  ;;  %v14280_v5 = vunpack.i.h.bf16 %v14278_v60  ;;  %v14279_v21 = vunpack.i.l.bf16 %v14278_v60  ;;  %v14283_v47 = vpop.permute.xlu0 %14282  ;;  %v14250_v58 = vunpack.i.h.bf16 %v20549_v22  ;;  %v12712_v17 = vpop.f32.mrf.mxu1  ;;  %v6524_v3 = vadd.f32 %v6523_v15, %v20646_v19 }
 0x331   : > { %10722 = vmatprep.subr.bf16.mxu0 %v10345_v54  ;;  %12863 = vmatprep.subr.msk.bf16.mxu1 %vm599_vm2, %v11006_v39  ;;  %v14285_v8 = vunpack.i.h.bf16 %v14283_v47  ;;  %v11028_v2 = vsel %vm599_vm2, %v11004_v59, 0  ;;  %v14284_v56 = vunpack.i.l.bf16 %v14283_v47  ;;  %v6471_v33 = vadd.f32 %v20656_v25, %v20448_v43 }
 0x332   : > { %v10976_v50 = vsel %vm343_vm1, %v14280_v5, %v14235_v41  ;;  %v11003_v29 = vpack.c.bf16 %v14279_v21, %v14274_v48  ;;  %v10977_v46 = vsel %vm343_vm1, %v14235_v41, %v14279_v21  ;;  %v6473_v45 = vadd.f32 %v20662_v7, %v20467_v28  ;;  %v6851_v41 = vpop.f32.mrf.mxu1 }
 0x333   : > { %12823 = vmatmul.mubr.msk.bf16.vlgmr.msra.gmra.mxu1 %vm592_vm0, %v20670_v18  ;;  %v11001_v14 = vpack.c.bf16 %v10976_v50, %v10965_v62  ;;  %v11002_v36 = vpack.c.bf16 %v10977_v46, %v10966_v42  ;;  %v10943_v20 = vsel %vm307_vm6, %v14285_v8, %v14250_v58  ;;  %v10944_v22 = vsel %vm307_vm6, %v14250_v58, %v14284_v56  ;;  %v22401_v8 = vld [vmem:[#allocation65_spill] sm:$0xff] }
 0x334   : > { %10723 = vmatpush1.bf16.msra.mxu0 %v10344_v49  ;;  %12836 = vmatprep.mubr.msk.bf16.mxu1 %vm592_vm0, %v20678_v32  ;;  %v14288_v31 = vpop.permute.xlu1 %14287  ;;  %v10949_v54 = vpop.permute.xlu0 %10948  ;;  %v6532_v49 = vadd.f32 %v12698_v6, %v20633_v51  ;;  %v6475_v19 = vadd.f32 %v20672_v63, %v20494_v9  ;;  %v6868_v5 = vadd.f32 %v6851_v41, %v6524_v3  ;;  %v22406_v41 = vld [vmem:[#allocation23_spill] sm:$0xff] }
 0x335   : > { %12297 = vmatprep.subr.msk.bf16.mxu0 %vm599_vm2, %v11005_v13  ;;  %v14290_v12 = vunpack.i.h.bf16 %v14288_v31  ;;  %v14289_v53 = vunpack.i.l.bf16 %v14288_v31  ;;  %v6486_v6 = vpop.f32.mrf.mxu0  ;;  %v6477_v43 = vadd.f32 %v20680_v34, %v20551_v44  ;;  %v6535_v28 = vadd.f32 %v12699_v1, %v20652_v0  ;;  %v12713_v47 = vpop.f32.mrf.mxu1  ;;  %v22402_v1 = vld [vmem:[#allocation54_spill] sm:$0xff] }
 0x336   : > { %v6874_v26 = vadd.f32 %v12712_v17, %v6532_v49  ;;  %v6527_v25 = vadd.f32 %v6526_v4, %v20665_v27  ;;  %v20729_v9 = vadd.f32 %v20684_v35, %v20588_v37  ;;  %v6904_v42 = vadd.f32 %v22402_v1, %v6868_v5  ;;  %v22403_v17 = vld [vmem:[#allocation73_spill] sm:$0xff] }
 0x337   : > { %12279 = vmatmul.mubr.msk.bf16.vlgmr.msra.gmra.mxu0 %vm592_vm0, %v20598_v30  ;;  %v11034_v30 = vsel %vm599_vm2, %v11006_v39, 0  ;;  %v11000_v23 = vpack.c.bf16 %v14290_v12, %v14284_v56  ;;  %v10954_v10 = vsel %vm319_vm5, %v10949_v54, %v14289_v53  ;;  %v10955_v24 = vsel %vm319_vm5, %v14289_v53, %v14290_v12  ;;  %v6798_v21 = vpop.f32.mrf.mxu0  ;;  %v6854_v46 = vpop.f32.mrf.mxu1 }
 0x338   : > { %10750 = vmatprep.mubr.bf16.mxu0 %v21967_v61  ;;  %12827 = vmatpush3.bf16.msra.mxu1 %v11034_v30  ;;  %v10998_v48 = vpack.c.bf16 %v10954_v10, %v10943_v20  ;;  %v10999_v51 = vpack.c.bf16 %v10955_v24, %v10944_v22  ;;  %v6866_v34 = vadd.f32 %v6798_v21, %v6471_v33 }
 0x339   : > { %11043 = vmatpush1.bf16.msra.mxu0 %v11028_v2  ;;  %12828 = vmatprep.subr.bf16.mxu1 %v11003_v29  ;;  %v14293_v39 = vpop.permute.xlu1 %14292  ;;  %v14298_v59 = vpop.permute.xlu0 %14297  ;;  %v20733_v2 = vadd.f32 %v22401_v8, %v6874_v26  ;;  %v20742_v37 = vadd.f32 %v6484_v40, %v20638_v52  ;;  %v6928_v31 = vcombine.high %v6904_v42, %v6904_v42  ;;  %v22404_v26 = vld [vmem:[#allocation80_spill] sm:$0xff] }
 0x33a   : > { %11044 = vmatprep.subr.bf16.mxu0 %v11002_v36  ;;  %v14295_v13 = vunpack.i.h.bf16 %v14293_v39  ;;  %v14294_v60 = vunpack.i.l.bf16 %v14293_v39  ;;  %v14299_v15 = vunpack.i.l.bf16 %v14298_v59  ;;  %v6800_v50 = vpop.f32.mrf.mxu0  ;;  %v6902_v52 = vadd.f32 %v22402_v1, %v6866_v34 }
 0x33b   : > { %v6867_v56 = vadd.f32 %v6800_v50, %v6473_v45  ;;  %v6877_v40 = vadd.f32 %v12713_v47, %v6535_v28  ;;  %v6871_v49 = vadd.f32 %v6854_v46, %v6527_v25  ;;  %v6956_v10 = vrot.slane %v6928_v31, %v22363_v38  ;;  %v20773_v25 = vld [vmem:[%s21388_s1 + $0x28] sm:$0xff]  }
 0x33c   : > { %12829 = vmatpush3.bf16.msra.mxu1 %v11003_v29  ;;  %v10922_v7 = vsel %vm283_vm8, %v14294_v60, %v14295_v13  ;;  %v20739_v29 = vadd.f32 %v20695_v16, %v20620_v55  ;;  %v6802_v36 = vpop.f32.mrf.mxu0  ;;  %v7062_v55 = vcombine.high %v20733_v2, %v20733_v2  ;;  %v6949_v39 = vrot.slane %v6904_v42, %v22363_v38 }
 0x33d   : > { %11045 = vmatpush1.bf16.msra.mxu0 %v11001_v14  ;;  %12830 = vmatprep.subr.bf16.mxu1 %v11000_v23  ;;  %v10916_v30 = vpop.permute.xlu1 %10915  ;;  %v20746_v14 = vadd.f32 %v6486_v6, %v20648_v11  ;;  %v6903_v16 = vadd.f32 %v22402_v1, %v6867_v56  ;;  %v6869_v4 = vadd.f32 %v6802_v36, %v6475_v19 }
 0x33e   : > { %11046 = vmatprep.subr.bf16.mxu0 %v10999_v51  ;;  %v10921_v44 = vsel %vm283_vm8, %v10916_v30, %v14294_v60  ;;  %v10927_v0 = vpop.permute.xlu0 %10926  ;;  %v6804_v11 = vpop.f32.mrf.mxu0  ;;  %v22405_v60 = vld [vmem:[#allocation77_spill] sm:$0xff]  ;;  %v6907_v5 = vadd.f32 %v22406_v41, %v6871_v49 }
 0x33f   : > { %12280 = vmatmul.mubr.msk.bf16.gmra.mxu0 %vm592_vm0, %v20670_v18  ;;  %v14300_v18 = vunpack.i.h.bf16 %v14298_v59  ;;  %v10932_v35 = vsel %vm295_vm7, %v10927_v0, %v14299_v15  ;;  %v6926_v22 = vcombine.low %v6902_v52, %v6903_v16  ;;  %v6927_v24 = vcombine.high %v6902_v52, %v6903_v16 }
 0x340   : > { %11068 = vmatprep.mubr.bf16.mxu0 %v21967_v61  ;;  %12831 = vmatpush3.bf16.msra.mxu1 %v11000_v23  ;;  %v10995_v58 = vpack.c.bf16 %v10932_v35, %v10921_v44  ;;  %v20754_v23 = vrot.slane %v20733_v2, %v22363_v38  ;;  %v6808_v6 = vpop.f32.mrf.mxu0  ;;  %v20765_v59 = vadd.f32 %v22405_v60, %v6877_v40 }
 0x341   : > { %11047 = vmatpush1.bf16.msra.mxu0 %v10998_v48  ;;  %v10997_v63 = vpack.c.bf16 %v14300_v18, %v14295_v13  ;;  %v10933_v62 = vsel %vm295_vm7, %v14299_v15, %v14300_v18  ;;  %v14303_v12 = vpop.permute.xlu1 %14302  ;;  %v6935_v45 = vrot.slane %v6926_v22, %v22363_v38  ;;  %v6942_v13 = vrot.slane %v6927_v24, %v22363_v38  ;;  %v22407_v18 = vld [vmem:[#allocation59_spill] sm:$0xff] }
 0x342   : > { %v10996_v27 = vpack.c.bf16 %v10933_v62, %v10922_v7  ;;  %v14305_v53 = vunpack.i.h.bf16 %v14303_v12  ;;  %v14304_v54 = vunpack.i.l.bf16 %v14303_v12  ;;  %v10905_v20 = vpop.permute.xlu0 %10904  ;;  %v6905_v19 = vadd.f32 %v22406_v41, %v6869_v4  ;;  %v6810_v7 = vpop.f32.mrf.mxu0 }
 0x343   : > { %12832 = vmatprep.subr.bf16.mxu1 %v10997_v63  ;;  %v6870_v28 = vadd.f32 %v6804_v11, %v6477_v43  ;;  %v6957_v21 = vcombine.low %v6935_v45, %v6949_v39  ;;  %v6958_v47 = vcombine.high %v6935_v45, %v6949_v39  ;;  %v6960_v30 = vcombine.high %v6942_v13, %v6956_v10 }
 0x344   : > { %11048 = vmatprep.subr.bf16.mxu0 %v10996_v27  ;;  %12833 = vmatpush3.bf16.msra.mxu1 %v10997_v63  ;;  %v10994_v3 = vpack.c.bf16 %v14305_v53, %v22403_v17  ;;  %v10910_v48 = vsel %vm271_vm9, %v10905_v20, %v14304_v54  ;;  %v10911_v51 = vsel %vm271_vm9, %v14304_v54, %v14305_v53  ;;  %v6812_v43 = vpop.f32.mrf.mxu0 }
 0x345   : > { %11049 = vmatpush1.bf16.msra.mxu0 %v10995_v58  ;;  %v10992_v33 = vpack.c.bf16 %v10910_v48, %v22404_v26  ;;  %v10993_v15 = vpack.c.bf16 %v10911_v51, %v22407_v18  ;;  %v6959_v63 = vcombine.low %v6942_v13, %v6956_v10  ;;  %v6995_v62 = vcombine.high %v6907_v5, %v6907_v5 }
 0x346   : > { %12834 = vmatprep.subr.bf16.mxu1 %v10994_v3  ;;  %v7016_v44 = vrot.slane %v6907_v5, %v22363_v38  ;;  %v6906_v0 = vadd.f32 %v22406_v41, %v6870_v28  ;;  %v6872_v27 = vadd.f32 %v6808_v6, %v20729_v9  ;;  %v6967_v34 = vrot.slane %v6957_v21, %v22363_v38  ;;  %v6814_v58 = vpop.f32.mrf.mxu0 }
 0x347   : > { %11050 = vmatprep.subr.bf16.mxu0 %v10993_v15  ;;  %v6974_v1 = vrot.slane %v6959_v63, %v22363_v38  ;;  %v6981_v42 = vrot.slane %v6958_v47, %v22363_v38  ;;  %v6988_v50 = vrot.slane %v6960_v30, %v22363_v38  ;;  %v7023_v35 = vrot.slane %v6995_v62, %v22363_v38 }
 0x348   : > { %12835 = vmatpush3.bf16.msra.mxu1 %v10994_v3  ;;  %v6993_v56 = vcombine.low %v6905_v19, %v6906_v0  ;;  %v6994_v46 = vcombine.high %v6905_v19, %v6906_v0  ;;  %v6873_v9 = vadd.f32 %v6810_v7, %v20739_v29  ;;  %v6989_v31 = vcombine.high %v6967_v34, %v6967_v34 }
 0x349   : > { %11051 = vmatpush1.bf16.msra.mxu0 %v10992_v33  ;;  %v6990_v36 = vcombine.high %v6974_v1, %v6974_v1  ;;  %v6991_v12 = vcombine.high %v6981_v42, %v6981_v42  ;;  %v6992_v52 = vcombine.high %v6988_v50, %v6988_v50  ;;  %12047 = vst.msk [vmem:[%s17063_s26 + $0x4] ss:$8 sm:$0x7] %vm17010_vm10, %v6967_v34  ;;  %12048 = vst.msk [vmem:[%s17063_s26 + $0x1c] ss:$8 sm:$0x7] %vm17010_vm10, %v6981_v42  ;;  %v20831_v3 = vpop.f32.mrf.mxu0 }
 0x34a   : > { %12051 = vst.msk [vmem:[%s17063_s26 + $0x64] ss:$8 sm:$0x7] %vm17010_vm10, %v6974_v1  ;;  %12052 = vst.msk [vmem:[%s17063_s26 + $0x7c] ss:$8 sm:$0x7] %vm17010_vm10, %v6988_v50  ;;  %v7002_v29 = vrot.slane %v6993_v56, %v22363_v38  ;;  %v7009_v16 = vrot.slane %v6994_v46, %v22363_v38  ;;  %v6909_v40 = vadd.f32 %v22401_v8, %v6873_v9 }
 0x34b   : > { %12837 = vmatmul.mubr.msk.bf16.vlgmr.msra.gmra.mxu1 %vm592_vm0, %v20773_v25  ;;  %v6875_v53 = vadd.f32 %v6812_v43, %v20742_v37  ;;  %v7090_v54 = vrot.slane %v7062_v55, %v22363_v38  ;;  %12049 = vst.msk [vmem:[%s17063_s26 + $0x34] ss:$8 sm:$0x7] %vm17010_vm10, %v6989_v31  ;;  %12050 = vst.msk [vmem:[%s17063_s26 + $0x4c] ss:$8 sm:$0x7] %vm17010_vm10, %v6991_v12  ;;  %v6908_v37 = vadd.f32 %v22401_v8, %v6872_v27 }
 0x34c   : > { %12298 = vmatmul.mubr.msk.bf16.vlgmr.msra.gmra.mxu0 %vm592_vm0, %v20678_v32  ;;  %12053 = vst.msk [vmem:[%s17063_s26 + $0x94] ss:$8 sm:$0x7] %vm17010_vm10, %v6990_v36  ;;  %12054 = vst.msk [vmem:[%s17063_s26 + $0xac] ss:$8 sm:$0x7] %vm17010_vm10, %v6992_v52  ;;  %v7129_v32 = vcombine.high %v20765_v59, %v20765_v59  ;;  %v6876_v2 = vadd.f32 %v6814_v58, %v20746_v14  ;;  %v7024_v55 = vcombine.low %v7002_v29, %v7016_v44 }
 0x34d   : > { %11078 = vmatprep.mubr.bf16.mxu0 %v21967_v61  ;;  %v7025_v4 = vcombine.high %v7002_v29, %v7016_v44  ;;  %v7026_v49 = vcombine.low %v7009_v16, %v7023_v35  ;;  %v7027_v11 = vcombine.high %v7009_v16, %v7023_v35  ;;  %v7060_v20 = vcombine.low %v6908_v37, %v6909_v40  ;;  %v12726_v29 = vpop.f32.mrf.mxu1 }
 0x34e   : > { %v7061_v10 = vcombine.high %v6908_v37, %v6909_v40  ;;  %v6911_v22 = vadd.f32 %v22405_v60, %v6875_v53  ;;  %v6912_v24 = vadd.f32 %v22405_v60, %v6876_v2  ;;  %v7034_v17 = vrot.slane %v7024_v55, %v22363_v38  ;;  %v20847_v60 = vpop.f32.mrf.mxu0 }
 0x34f   : > { %v7041_v8 = vrot.slane %v7026_v49, %v22363_v38  ;;  %v7048_v61 = vrot.slane %v7025_v4, %v22363_v38  ;;  %v7055_v14 = vrot.slane %v7027_v11, %v22363_v38  ;;  %v7069_v48 = vrot.slane %v7060_v20, %v22363_v38  ;;  %v7820_v40 = vpop.f32.mrf.mxu1 }
 0x350   : > { %v7076_v39 = vrot.slane %v7061_v10, %v22363_v38  ;;  %v7127_v51 = vcombine.low %v6911_v22, %v6912_v24  ;;  %v7128_v6 = vcombine.high %v6911_v22, %v6912_v24  ;;  %v7056_v26 = vcombine.high %v7034_v17, %v7034_v17  ;;  %12055 = vst.msk [vmem:[%s17063_s26 + $0xc4] ss:$8 sm:$0x7] %vm17010_vm10, %v7034_v17 }
 0x351   : > { %v7057_v33 = vcombine.high %v7041_v8, %v7041_v8  ;;  %v7058_v45 = vcombine.high %v7048_v61, %v7048_v61  ;;  %v7059_v13 = vcombine.high %v7055_v14, %v7055_v14  ;;  %12056 = vst.msk [vmem:[%s17063_s26 + $0xdc] ss:$8 sm:$0x7] %vm17010_vm10, %v7048_v61  ;;  %12059 = vst.msk [vmem:[%s17063_s26 + $0x124] ss:$8 sm:$0x7] %vm17010_vm10, %v7041_v8  ;;  %v8309_v61 = vpop.permute.xlu1 %8308 }
 0x352   : > { %12060 = vst.msk [vmem:[%s17063_s26 + $0x13c] ss:$8 sm:$0x7] %vm17010_vm10, %v7055_v14  ;;  %v7091_v41 = vcombine.low %v7069_v48, %v20754_v23  ;;  %v7092_v19 = vcombine.high %v7069_v48, %v20754_v23  ;;  %v7093_v18 = vcombine.low %v7076_v39, %v7090_v54  ;;  %v7094_v15 = vcombine.high %v7076_v39, %v7090_v54  ;;  %v12727_v54 = vpop.f32.mrf.mxu1 }
 0x353   : > { %v7150_v5 = vrot.slane %v20765_v59, %v22363_v38  ;;  %v7157_v28 = vrot.slane %v7129_v32, %v22363_v38  ;;  %12057 = vst.msk [vmem:[%s17063_s26 + $0xf4] ss:$8 sm:$0x7] %vm17010_vm10, %v7056_v26  ;;  %12058 = vst.msk [vmem:[%s17063_s26 + $0x10c] ss:$8 sm:$0x7] %vm17010_vm10, %v7058_v45  ;;  %v7136_v23 = vrot.slane %v7127_v51, %v22363_v38  ;;  %v20870_v59 = vpop.f32.mrf.mxu0 }
 0x354   : > { %12061 = vst.msk [vmem:[%s17063_s26 + $0x154] ss:$8 sm:$0x7] %vm17010_vm10, %v7057_v33  ;;  %12062 = vst.msk [vmem:[%s17063_s26 + $0x16c] ss:$8 sm:$0x7] %vm17010_vm10, %v7059_v13  ;;  %v7143_v7 = vrot.slane %v7128_v6, %v22363_v38  ;;  %12299 = vmatmul.mubr.msk.bf16.gmra.mxu0 %vm592_vm0, %v20773_v25  ;;  %v7101_v21 = vrot.slane %v7091_v41, %v22363_v38  ;;  %v7108_v47 = vrot.slane %v7093_v18, %v22363_v38  ;;  %v7823_v37 = vpop.f32.mrf.mxu1 }
 0x355   : > { %v7115_v63 = vrot.slane %v7092_v19, %v22363_v38  ;;  %v7122_v30 = vrot.slane %v7094_v15, %v22363_v38  ;;  %v7158_v62 = vcombine.low %v7136_v23, %v7150_v5  ;;  %v7159_v44 = vcombine.high %v7136_v23, %v7150_v5  ;;  %v20876_v25 = vpop.f32.mrf.mxu0  ;;  %v8319_v19 = vpop.permute.xlu1 %8318 }
 0x356   : > { %v7160_v0 = vcombine.low %v7143_v7, %v7157_v28  ;;  %v7161_v27 = vcombine.high %v7143_v7, %v7157_v28  ;;  %v7123_v43 = vcombine.high %v7101_v21, %v7101_v21  ;;  %v7124_v34 = vcombine.high %v7108_v47, %v7108_v47  ;;  %12063 = vst.msk [vmem:[%s17063_s26 + $0x184] ss:$8 sm:$0x7] %vm17010_vm10, %v7101_v21  ;;  %v8314_v23 = vpop.permute.xlu0 %8313 }
 0x357   : > { %v7125_v1 = vcombine.high %v7115_v63, %v7115_v63  ;;  %v7126_v42 = vcombine.high %v7122_v30, %v7122_v30  ;;  %12064 = vst.msk [vmem:[%s17063_s26 + $0x19c] ss:$8 sm:$0x7] %vm17010_vm10, %v7115_v63  ;;  %12067 = vst.msk [vmem:[%s17063_s26 + $0x1e4] ss:$8 sm:$0x7] %vm17010_vm10, %v7108_v47  ;;  %v7168_v50 = vrot.slane %v7158_v62, %v22363_v38  ;;  %v7777_v12 = vpop.f32.mrf.mxu0 }
 0x358   : > { %12068 = vst.msk [vmem:[%s17063_s26 + $0x1fc] ss:$8 sm:$0x7] %vm17010_vm10, %v7122_v30  ;;  %v7175_v35 = vrot.slane %v7160_v0, %v22363_v38  ;;  %v7182_v56 = vrot.slane %v7159_v44, %v22363_v38  ;;  %v7189_v46 = vrot.slane %v7161_v27, %v22363_v38  ;;  %12065 = vst.msk [vmem:[%s17063_s26 + $0x1b4] ss:$8 sm:$0x7] %vm17010_vm10, %v7123_v43 }
 0x359   : > { %12066 = vst.msk [vmem:[%s17063_s26 + $0x1cc] ss:$8 sm:$0x7] %vm17010_vm10, %v7125_v1  ;;  %12069 = vst.msk [vmem:[%s17063_s26 + $0x214] ss:$8 sm:$0x7] %vm17010_vm10, %v7124_v34  ;;  %v7190_v9 = vcombine.high %v7168_v50, %v7168_v50  ;;  %v7779_v52 = vpop.f32.mrf.mxu0 }
 0x35a   : > { %12070 = vst.msk [vmem:[%s17063_s26 + $0x22c] ss:$8 sm:$0x7] %vm17010_vm10, %v7126_v42  ;;  %v7191_v58 = vcombine.high %v7175_v35, %v7175_v35  ;;  %v7192_v31 = vcombine.high %v7182_v56, %v7182_v56  ;;  %v7193_v36 = vcombine.high %v7189_v46, %v7189_v46  ;;  %12071 = vst.msk [vmem:[%s17063_s26 + $0x244] ss:$8 sm:$0x7] %vm17010_vm10, %v7168_v50 }
 0x35b   : > { %12072 = vst.msk [vmem:[%s17063_s26 + $0x25c] ss:$8 sm:$0x7] %vm17010_vm10, %v7182_v56  ;;  %12075 = vst.msk [vmem:[%s17063_s26 + $0x2a4] ss:$8 sm:$0x7] %vm17010_vm10, %v7175_v35  ;;  %v7781_v16 = vpop.f32.mrf.mxu0 }
 0x35c   : > { %12076 = vst.msk [vmem:[%s17063_s26 + $0x2bc] ss:$8 sm:$0x7] %vm17010_vm10, %v7189_v46  ;;  %12073 = vst.msk [vmem:[%s17063_s26 + $0x274] ss:$8 sm:$0x7] %vm17010_vm10, %v7190_v9 }
 0x35d   : > { %12074 = vst.msk [vmem:[%s17063_s26 + $0x28c] ss:$8 sm:$0x7] %vm17010_vm10, %v7192_v31  ;;  %12077 = vst.msk [vmem:[%s17063_s26 + $0x2d4] ss:$8 sm:$0x7] %vm17010_vm10, %v7191_v58  ;;  %v7783_v53 = vpop.f32.mrf.mxu0  ;;  %v12740_v55 = vpop.f32.mrf.mxu1 }
 0x35e   : > { %12078 = vst.msk [vmem:[%s17063_s26 + $0x2ec] ss:$8 sm:$0x7] %vm17010_vm10, %v7193_v36  ;;  %v7956_v39 = vadd.f32 %v12740_v55, %v12726_v29 }
 0x35f   : > { %v7947_v49 = vpop.f32.mrf.mxu1 }
 0x360   : > { %v7894_v32 = vpop.f32.mrf.mxu0  ;;  %v7948_v14 = vadd.f32 %v7947_v49, %v7820_v40 }
 0x361   : > { %v12741_v20 = vpop.f32.mrf.mxu1  ;;  %v7895_v18 = vadd.f32 %v7894_v32, %v20831_v3 }
 0x362   : > { %v7896_v2 = vpop.f32.mrf.mxu0  ;;  %v7959_v27 = vadd.f32 %v12741_v20, %v12727_v54 }
 0x363   : > { %v7950_v22 = vpop.f32.mrf.mxu1  ;;  %v7897_v7 = vadd.f32 %v7896_v2, %v20847_v60 }
 0x364   : > { %v7898_v4 = vpop.f32.mrf.mxu0  ;;  %v7951_v33 = vadd.f32 %v7950_v22, %v7823_v37 }
 0x365   : > { %v7899_v44 = vadd.f32 %v7898_v4, %v20870_v59 }
 0x366   : > { %v7900_v11 = vpop.f32.mrf.mxu0 }
 0x367   : > { %v7901_v0 = vadd.f32 %v7900_v11, %v20876_v25 }
 0x368   : > { %v7904_v10 = vpop.f32.mrf.mxu0 }
 0x369   : > { %v7905_v1 = vadd.f32 %v7904_v10, %v7777_v12 }
 0x36a   : > { %v7906_v17 = vpop.f32.mrf.mxu0 }
 0x36b   : > { %v7907_v3 = vadd.f32 %v7906_v17, %v7779_v52 }
 0x36c   : > { %v7908_v51 = vpop.f32.mrf.mxu0 }
 0x36d   : > { %v7909_v35 = vadd.f32 %v7908_v51, %v7781_v16  ;;  %v8324_v16 = vpop.permute.xlu0 %8323 }
 0x36e   : > { %v7910_v13 = vpop.f32.mrf.mxu0 }
 0x36f   : > { %v7911_v59 = vadd.f32 %v7910_v13, %v7783_v53 }
 0x37c   : > { %v12754_v24 = vpop.f32.mrf.mxu1 }
 0x37d   : > { %v8298_v45 = vadd.f32 %v12754_v24, %v7956_v39 }
 0x37e   : > { %v8275_v8 = vpop.f32.mrf.mxu1 }
 0x37f   : > { %v8292_v6 = vadd.f32 %v8275_v8, %v7948_v14  ;;  %v8334_v5 = vadd.f32 %v8319_v19, %v8298_v45 }
 0x380   : > { %v12755_v48 = vpop.f32.mrf.mxu1 }
 0x381   : > { %v8328_v15 = vadd.f32 %v8309_v61, %v8292_v6  ;;  %v8486_v43 = vcombine.high %v8334_v5, %v8334_v5  ;;  %v8301_v56 = vadd.f32 %v12755_v48, %v7959_v27  ;;  %v20936_v25 = vrot.slane %v8334_v5, %v22363_v38 }
 0x382   : > { %v8278_v26 = vpop.f32.mrf.mxu1 }
 0x383   : > { %v8295_v41 = vadd.f32 %v8278_v26, %v7951_v33  ;;  %v8352_v30 = vcombine.high %v8328_v15, %v8328_v15  ;;  %v20939_v40 = vrot.slane %v8486_v43, %v22363_v38  ;;  %v8373_v12 = vrot.slane %v8328_v15, %v22363_v38 }
 0x384   : > { %v20944_v55 = vadd.f32 %v8324_v16, %v8301_v56 }
 0x385   : > { %v8331_v63 = vadd.f32 %v8314_v23, %v8295_v41  ;;  %v8380_v58 = vrot.slane %v8352_v30, %v22363_v38 }
 0x387   : > { %v8419_v60 = vcombine.high %v8331_v63, %v8331_v63  ;;  %v8440_v53 = vrot.slane %v8331_v63, %v22363_v38  ;;  %v8553_v63 = vcombine.high %v20944_v55, %v20944_v55 }
 0x388   : > { %v8222_v28 = vpop.f32.mrf.mxu0 }
 0x389   : > { %v8290_v21 = vadd.f32 %v8222_v28, %v7895_v18  ;;  %v8447_v49 = vrot.slane %v8419_v60, %v22363_v38 }
 0x38a   : > { %v8224_v47 = vpop.f32.mrf.mxu0 }
 0x38b   : > { %v8291_v62 = vadd.f32 %v8224_v47, %v7897_v7  ;;  %v8326_v42 = vadd.f32 %v8309_v61, %v8290_v21 }
 0x38c   : > { %v8226_v34 = vpop.f32.mrf.mxu0 }
 0x38d   : > { %v8327_v50 = vadd.f32 %v8309_v61, %v8291_v62  ;;  %v8293_v46 = vadd.f32 %v8226_v34, %v7899_v44 }
 0x38e   : > { %v8228_v9 = vpop.f32.mrf.mxu0 }
 0x38f   : > { %v8350_v31 = vcombine.low %v8326_v42, %v8327_v50  ;;  %v8351_v36 = vcombine.high %v8326_v42, %v8327_v50  ;;  %v8294_v29 = vadd.f32 %v8228_v9, %v7901_v0  ;;  %v8329_v4 = vadd.f32 %v8314_v23, %v8293_v46 }
 0x390   : > { %v8232_v52 = vpop.f32.mrf.mxu0 }
 0x391   : > { %v8359_v54 = vrot.slane %v8350_v31, %v22363_v38  ;;  %v8366_v32 = vrot.slane %v8351_v36, %v22363_v38  ;;  %v8330_v37 = vadd.f32 %v8314_v23, %v8294_v29  ;;  %v8296_v2 = vadd.f32 %v8232_v52, %v7905_v1 }
 0x392   : > { %v8234_v11 = vpop.f32.mrf.mxu0 }
 0x393   : > { %v8381_v20 = vcombine.low %v8359_v54, %v8373_v12  ;;  %v8382_v10 = vcombine.high %v8359_v54, %v8373_v12  ;;  %v8383_v22 = vcombine.low %v8366_v32, %v8380_v58  ;;  %v8384_v24 = vcombine.high %v8366_v32, %v8380_v58 }
 0x394   : > { %v8417_v17 = vcombine.low %v8329_v4, %v8330_v37  ;;  %v8418_v8 = vcombine.high %v8329_v4, %v8330_v37  ;;  %v8332_v61 = vadd.f32 %v8319_v19, %v8296_v2  ;;  %v8297_v14 = vadd.f32 %v8234_v11, %v7907_v3  ;;  %v8236_v48 = vpop.f32.mrf.mxu0 }
 0x395   : > { %v8391_v39 = vrot.slane %v8381_v20, %v22363_v38  ;;  %v8398_v51 = vrot.slane %v8383_v22, %v22363_v38  ;;  %v8405_v6 = vrot.slane %v8382_v10, %v22363_v38  ;;  %v8412_v26 = vrot.slane %v8384_v24, %v22363_v38 }
 0x396   : > { %v8426_v33 = vrot.slane %v8417_v17, %v22363_v38  ;;  %v8433_v45 = vrot.slane %v8418_v8, %v22363_v38  ;;  %v8333_v13 = vadd.f32 %v8319_v19, %v8297_v14  ;;  %v8299_v41 = vadd.f32 %v8236_v48, %v7909_v35  ;;  %v8238_v18 = vpop.f32.mrf.mxu0 }
 0x397   : > { %v8413_v15 = vcombine.high %v8391_v39, %v8391_v39  ;;  %v8414_v5 = vcombine.high %v8398_v51, %v8398_v51  ;;  %v8415_v28 = vcombine.high %v8405_v6, %v8405_v6  ;;  %v8416_v23 = vcombine.high %v8412_v26, %v8412_v26  ;;  %12132 = vst.msk [vmem:[%s17063_s26 + $0x5] ss:$8 sm:$0x7] %vm17010_vm10, %v8391_v39 }
 0x398   : > { %12133 = vst.msk [vmem:[%s17063_s26 + $0x1d] ss:$8 sm:$0x7] %vm17010_vm10, %v8405_v6  ;;  %12136 = vst.msk [vmem:[%s17063_s26 + $0x65] ss:$8 sm:$0x7] %vm17010_vm10, %v8398_v51  ;;  %v8448_v19 = vcombine.low %v8426_v33, %v8440_v53  ;;  %v8449_v7 = vcombine.high %v8426_v33, %v8440_v53  ;;  %v8450_v21 = vcombine.low %v8433_v45, %v8447_v49 }
 0x399   : > { %12137 = vst.msk [vmem:[%s17063_s26 + $0x7d] ss:$8 sm:$0x7] %vm17010_vm10, %v8412_v26  ;;  %v8451_v47 = vcombine.high %v8433_v45, %v8447_v49  ;;  %12134 = vst.msk [vmem:[%s17063_s26 + $0x35] ss:$8 sm:$0x7] %vm17010_vm10, %v8413_v15  ;;  %v8484_v30 = vcombine.low %v8332_v61, %v8333_v13  ;;  %v8485_v62 = vcombine.high %v8332_v61, %v8333_v13  ;;  %v12768_v61 = vpop.f32.mrf.mxu1 }
 0x39a   : > { %12135 = vst.msk [vmem:[%s17063_s26 + $0x4d] ss:$8 sm:$0x7] %vm17010_vm10, %v8415_v28  ;;  %12138 = vst.msk [vmem:[%s17063_s26 + $0x95] ss:$8 sm:$0x7] %vm17010_vm10, %v8414_v5  ;;  %v8300_v44 = vadd.f32 %v8238_v18, %v7911_v59  ;;  %v8458_v0 = vrot.slane %v8448_v19, %v22363_v38  ;;  %v8465_v27 = vrot.slane %v8450_v21, %v22363_v38 }
 0x39b   : > { %12139 = vst.msk [vmem:[%s17063_s26 + $0xad] ss:$8 sm:$0x7] %vm17010_vm10, %v8416_v23  ;;  %v8472_v43 = vrot.slane %v8449_v7, %v22363_v38  ;;  %v8479_v34 = vrot.slane %v8451_v47, %v22363_v38  ;;  %v8493_v1 = vrot.slane %v8484_v30, %v22363_v38  ;;  %v8500_v3 = vrot.slane %v8485_v62, %v22363_v38  ;;  %v9244_v18 = vpop.f32.mrf.mxu1 }
 0x39c   : > { %v8335_v42 = vadd.f32 %v8324_v16, %v8299_v41  ;;  %v8336_v50 = vadd.f32 %v8324_v16, %v8300_v44  ;;  %v8480_v35 = vcombine.high %v8458_v0, %v8458_v0  ;;  %v8481_v56 = vcombine.high %v8465_v27, %v8465_v27  ;;  %12140 = vst.msk [vmem:[%s17063_s26 + $0xc5] ss:$8 sm:$0x7] %vm17010_vm10, %v8458_v0 }
 0x39d   : > { %v8482_v46 = vcombine.high %v8472_v43, %v8472_v43  ;;  %v8483_v60 = vcombine.high %v8479_v34, %v8479_v34  ;;  %12141 = vst.msk [vmem:[%s17063_s26 + $0xdd] ss:$8 sm:$0x7] %vm17010_vm10, %v8472_v43  ;;  %12144 = vst.msk [vmem:[%s17063_s26 + $0x125] ss:$8 sm:$0x7] %vm17010_vm10, %v8465_v27  ;;  %v8515_v58 = vcombine.low %v8493_v1, %v20936_v25  ;;  %v12769_v5 = vpop.f32.mrf.mxu1  ;;  %v9733_v27 = vpop.permute.xlu1 %9732 }
 0x39e   : > { %12145 = vst.msk [vmem:[%s17063_s26 + $0x13d] ss:$8 sm:$0x7] %vm17010_vm10, %v8479_v34  ;;  %v20998_v9 = vpop.f32.mrf.mxu0  ;;  %v8516_v31 = vcombine.high %v8493_v1, %v20936_v25  ;;  %v8517_v36 = vcombine.low %v8500_v3, %v20939_v40  ;;  %v8518_v29 = vcombine.high %v8500_v3, %v20939_v40  ;;  %12142 = vst.msk [vmem:[%s17063_s26 + $0xf5] ss:$8 sm:$0x7] %vm17010_vm10, %v8480_v35 }
 0x39f   : > { %12143 = vst.msk [vmem:[%s17063_s26 + $0x10d] ss:$8 sm:$0x7] %vm17010_vm10, %v8482_v46  ;;  %12146 = vst.msk [vmem:[%s17063_s26 + $0x155] ss:$8 sm:$0x7] %vm17010_vm10, %v8481_v56  ;;  %v8551_v59 = vcombine.low %v8335_v42, %v8336_v50  ;;  %v8552_v12 = vcombine.high %v8335_v42, %v8336_v50  ;;  %v8525_v40 = vrot.slane %v8515_v58, %v22363_v38  ;;  %v9247_v23 = vpop.f32.mrf.mxu1 }
 0x3a0   : > { %12147 = vst.msk [vmem:[%s17063_s26 + $0x16d] ss:$8 sm:$0x7] %vm17010_vm10, %v8483_v60  ;;  %v21016_v25 = vpop.f32.mrf.mxu0  ;;  %v8532_v52 = vrot.slane %v8517_v36, %v22363_v38  ;;  %v8539_v16 = vrot.slane %v8516_v31, %v22363_v38  ;;  %v8546_v54 = vrot.slane %v8518_v29, %v22363_v38  ;;  %v8574_v32 = vrot.slane %v20944_v55, %v22363_v38 }
 0x3a1   : > { %v8581_v37 = vrot.slane %v8553_v63, %v22363_v38  ;;  %v8560_v2 = vrot.slane %v8551_v59, %v22363_v38  ;;  %v8567_v4 = vrot.slane %v8552_v12, %v22363_v38  ;;  %v8547_v49 = vcombine.high %v8525_v40, %v8525_v40  ;;  %12148 = vst.msk [vmem:[%s17063_s26 + $0x185] ss:$8 sm:$0x7] %vm17010_vm10, %v8525_v40  ;;  %v21083_v56 = vpop.permute.xlu1 %9742 }
 0x3a2   : > { %v21027_v53 = vpop.f32.mrf.mxu0  ;;  %v8548_v11 = vcombine.high %v8532_v52, %v8532_v52  ;;  %v8549_v20 = vcombine.high %v8539_v16, %v8539_v16  ;;  %v8550_v10 = vcombine.high %v8546_v54, %v8546_v54  ;;  %12149 = vst.msk [vmem:[%s17063_s26 + $0x19d] ss:$8 sm:$0x7] %vm17010_vm10, %v8539_v16  ;;  %12152 = vst.msk [vmem:[%s17063_s26 + $0x1e5] ss:$8 sm:$0x7] %vm17010_vm10, %v8532_v52  ;;  %v9738_v16 = vpop.permute.xlu0 %9737 }
 0x3a3   : > { %12153 = vst.msk [vmem:[%s17063_s26 + $0x1fd] ss:$8 sm:$0x7] %vm17010_vm10, %v8546_v54  ;;  %v8582_v55 = vcombine.low %v8560_v2, %v8574_v32  ;;  %v8583_v22 = vcombine.high %v8560_v2, %v8574_v32  ;;  %v8584_v24 = vcombine.low %v8567_v4, %v8581_v37  ;;  %v8585_v17 = vcombine.high %v8567_v4, %v8581_v37 }
 0x3a4   : > { %v21041_v8 = vpop.f32.mrf.mxu0  ;;  %12150 = vst.msk [vmem:[%s17063_s26 + $0x1b5] ss:$8 sm:$0x7] %vm17010_vm10, %v8547_v49  ;;  %12151 = vst.msk [vmem:[%s17063_s26 + $0x1cd] ss:$8 sm:$0x7] %vm17010_vm10, %v8549_v20 }
 0x3a5   : > { %12154 = vst.msk [vmem:[%s17063_s26 + $0x215] ss:$8 sm:$0x7] %vm17010_vm10, %v8548_v11  ;;  %12155 = vst.msk [vmem:[%s17063_s26 + $0x22d] ss:$8 sm:$0x7] %vm17010_vm10, %v8550_v10  ;;  %v8592_v14 = vrot.slane %v8582_v55, %v22363_v38  ;;  %v8599_v48 = vrot.slane %v8584_v24, %v22363_v38  ;;  %v8606_v39 = vrot.slane %v8583_v22, %v22363_v38 }
 0x3a6   : > { %v8613_v51 = vrot.slane %v8585_v17, %v22363_v38  ;;  %v9201_v6 = vpop.f32.mrf.mxu0 }
 0x3a7   : > { %v8614_v26 = vcombine.high %v8592_v14, %v8592_v14  ;;  %v8615_v33 = vcombine.high %v8599_v48, %v8599_v48  ;;  %v8616_v45 = vcombine.high %v8606_v39, %v8606_v39  ;;  %12156 = vst.msk [vmem:[%s17063_s26 + $0x245] ss:$8 sm:$0x7] %vm17010_vm10, %v8592_v14  ;;  %12157 = vst.msk [vmem:[%s17063_s26 + $0x25d] ss:$8 sm:$0x7] %vm17010_vm10, %v8606_v39 }
 0x3a8   : > { %v8617_v13 = vcombine.high %v8613_v51, %v8613_v51  ;;  %12160 = vst.msk [vmem:[%s17063_s26 + $0x2a5] ss:$8 sm:$0x7] %vm17010_vm10, %v8599_v48  ;;  %12161 = vst.msk [vmem:[%s17063_s26 + $0x2bd] ss:$8 sm:$0x7] %vm17010_vm10, %v8613_v51  ;;  %v9203_v41 = vpop.f32.mrf.mxu0 }
 0x3a9   : > { %12158 = vst.msk [vmem:[%s17063_s26 + $0x275] ss:$8 sm:$0x7] %vm17010_vm10, %v8614_v26  ;;  %12159 = vst.msk [vmem:[%s17063_s26 + $0x28d] ss:$8 sm:$0x7] %vm17010_vm10, %v8616_v45 }
 0x3aa   : > { %12162 = vst.msk [vmem:[%s17063_s26 + $0x2d5] ss:$8 sm:$0x7] %vm17010_vm10, %v8615_v33  ;;  %12163 = vst.msk [vmem:[%s17063_s26 + $0x2ed] ss:$8 sm:$0x7] %vm17010_vm10, %v8617_v13  ;;  %v9205_v15 = vpop.f32.mrf.mxu0 }
 0x3ac   : > { %v9207_v28 = vpop.f32.mrf.mxu0  ;;  %v12782_v21 = vpop.f32.mrf.mxu1 }
 0x3ad   : > { %v9380_v1 = vadd.f32 %v12782_v21, %v12768_v61 }
 0x3ae   : > { %v9371_v30 = vpop.f32.mrf.mxu1 }
 0x3af   : > { %v9372_v42 = vadd.f32 %v9371_v30, %v9244_v18  ;;  %v9748_v18 = vpop.permute.xlu0 %9747 }
 0x3b0   : > { %v12783_v0 = vpop.f32.mrf.mxu1 }
 0x3b1   : > { %v9383_v54 = vadd.f32 %v12783_v0, %v12769_v5 }
 0x3b2   : > { %v9318_v19 = vpop.f32.mrf.mxu0  ;;  %v9374_v34 = vpop.f32.mrf.mxu1 }
 0x3b3   : > { %v9319_v46 = vadd.f32 %v9318_v19, %v20998_v9  ;;  %v9375_v32 = vadd.f32 %v9374_v34, %v9247_v23 }
 0x3b4   : > { %v9320_v7 = vpop.f32.mrf.mxu0 }
 0x3b5   : > { %v9321_v29 = vadd.f32 %v9320_v7, %v21016_v25 }
 0x3b6   : > { %v9322_v47 = vpop.f32.mrf.mxu0 }
 0x3b7   : > { %v9323_v4 = vadd.f32 %v9322_v47, %v21027_v53 }
 0x3b8   : > { %v9324_v63 = vpop.f32.mrf.mxu0 }
 0x3b9   : > { %v9325_v9 = vadd.f32 %v9324_v63, %v21041_v8 }
 0x3ba   : > { %v9328_v62 = vpop.f32.mrf.mxu0 }
 0x3bb   : > { %v9329_v10 = vadd.f32 %v9328_v62, %v9201_v6 }
 0x3bc   : > { %v9330_v44 = vpop.f32.mrf.mxu0 }
 0x3bd   : > { %v9331_v24 = vadd.f32 %v9330_v44, %v9203_v41 }
 0x3be   : > { %v9332_v43 = vpop.f32.mrf.mxu0 }
 0x3bf   : > { %v9333_v17 = vadd.f32 %v9332_v43, %v9205_v15 }
 0x3c0   : > { %v9334_v50 = vpop.f32.mrf.mxu0 }
 0x3c1   : > { %v9335_v53 = vadd.f32 %v9334_v50, %v9207_v28 }
 0x3c4   : > { %v12796_v3 = vpop.f32.mrf.mxu1 }
 0x3c5   : > { %v9722_v35 = vadd.f32 %v12796_v3, %v9380_v1 }
 0x3c6   : > { %v9699_v60 = vpop.f32.mrf.mxu1 }
 0x3c7   : > { %v9758_v58 = vadd.f32 %v21083_v56, %v9722_v35  ;;  %v9716_v36 = vadd.f32 %v9699_v60, %v9372_v42 }
 0x3c8   : > { %v12797_v12 = vpop.f32.mrf.mxu1 }
 0x3c9   : > { %v9646_v31 = vpop.f32.mrf.mxu0  ;;  %v9752_v40 = vadd.f32 %v9733_v27, %v9716_v36  ;;  %v9910_v49 = vcombine.high %v9758_v58, %v9758_v58  ;;  %v9725_v61 = vadd.f32 %v12797_v12, %v9383_v54  ;;  %v21092_v8 = vrot.slane %v9758_v58, %v22363_v38 }
 0x3ca   : > { %v9714_v59 = vadd.f32 %v9646_v31, %v9319_v46  ;;  %v9702_v2 = vpop.f32.mrf.mxu1 }
 0x3cb   : > { %v9648_v52 = vpop.f32.mrf.mxu0  ;;  %v9776_v11 = vcombine.high %v9752_v40, %v9752_v40  ;;  %v9719_v25 = vadd.f32 %v9702_v2, %v9375_v32  ;;  %v21095_v45 = vrot.slane %v9910_v49, %v22363_v38  ;;  %v9797_v41 = vrot.slane %v9752_v40, %v22363_v38 }
 0x3cc   : > { %v9715_v37 = vadd.f32 %v9648_v52, %v9321_v29  ;;  %v9750_v55 = vadd.f32 %v9733_v27, %v9714_v59  ;;  %v21100_v19 = vadd.f32 %v9748_v18, %v9725_v61 }
 0x3cd   : > { %v9650_v20 = vpop.f32.mrf.mxu0  ;;  %v9804_v39 = vrot.slane %v9776_v11, %v22363_v38  ;;  %v9755_v33 = vadd.f32 %v9738_v16, %v9719_v25 }
 0x3ce   : > { %v9751_v22 = vadd.f32 %v9733_v27, %v9715_v37  ;;  %v9717_v14 = vadd.f32 %v9650_v20, %v9323_v4  ;;  %v9977_v37 = vcombine.high %v21100_v19, %v21100_v19 }
 0x3cf   : > { %v9652_v48 = vpop.f32.mrf.mxu0  ;;  %v9843_v23 = vcombine.high %v9755_v33, %v9755_v33  ;;  %v9864_v28 = vrot.slane %v9755_v33, %v22363_v38 }
 0x3d0   : > { %v9774_v51 = vcombine.low %v9750_v55, %v9751_v22  ;;  %v9775_v26 = vcombine.high %v9750_v55, %v9751_v22  ;;  %v9718_v6 = vadd.f32 %v9652_v48, %v9325_v9  ;;  %v9753_v7 = vadd.f32 %v9738_v16, %v9717_v14 }
 0x3d1   : > { %v9871_v0 = vrot.slane %v9843_v23, %v22363_v38 }
 0x3d2   : > { %v9656_v13 = vpop.f32.mrf.mxu0  ;;  %v9783_v15 = vrot.slane %v9774_v51, %v22363_v38  ;;  %v9790_v5 = vrot.slane %v9775_v26, %v22363_v38  ;;  %v9754_v21 = vadd.f32 %v9738_v16, %v9718_v6 }
 0x3d3   : > { %v9720_v34 = vadd.f32 %v9656_v13, %v9329_v10 }
 0x3d4   : > { %v9658_v47 = vpop.f32.mrf.mxu0  ;;  %v9805_v63 = vcombine.low %v9783_v15, %v9797_v41  ;;  %v9806_v30 = vcombine.high %v9783_v15, %v9797_v41  ;;  %v9807_v62 = vcombine.low %v9790_v5, %v9804_v39  ;;  %v9808_v44 = vcombine.high %v9790_v5, %v9804_v39 }
 0x3d5   : > { %v9841_v27 = vcombine.low %v9753_v7, %v9754_v21  ;;  %v9842_v43 = vcombine.high %v9753_v7, %v9754_v21  ;;  %v9721_v58 = vadd.f32 %v9658_v47, %v9331_v24  ;;  %v9756_v2 = vadd.f32 %v21083_v56, %v9720_v34 }
 0x3d6   : > { %v9660_v1 = vpop.f32.mrf.mxu0  ;;  %v9815_v3 = vrot.slane %v9805_v63, %v22363_v38  ;;  %v9822_v42 = vrot.slane %v9807_v62, %v22363_v38  ;;  %v9829_v50 = vrot.slane %v9806_v30, %v22363_v38  ;;  %v9836_v35 = vrot.slane %v9808_v44, %v22363_v38 }
 0x3d7   : > { %v9850_v46 = vrot.slane %v9841_v27, %v22363_v38  ;;  %v9857_v60 = vrot.slane %v9842_v43, %v22363_v38  ;;  %v9723_v31 = vadd.f32 %v9660_v1, %v9333_v17  ;;  %v9757_v4 = vadd.f32 %v21083_v56, %v9721_v58 }
 0x3d8   : > { %v9662_v36 = vpop.f32.mrf.mxu0  ;;  %v9837_v29 = vcombine.high %v9815_v3, %v9815_v3  ;;  %v9838_v59 = vcombine.high %v9822_v42, %v9822_v42  ;;  %v9839_v12 = vcombine.high %v9829_v50, %v9829_v50  ;;  %v9840_v40 = vcombine.high %v9836_v35, %v9836_v35  ;;  %12217 = vst.msk [vmem:[%s17063_s26 + $0x6] ss:$8 sm:$0x7] %vm17010_vm10, %v9815_v3 }
 0x3d9   : > { %12218 = vst.msk [vmem:[%s17063_s26 + $0x1e] ss:$8 sm:$0x7] %vm17010_vm10, %v9829_v50  ;;  %12221 = vst.msk [vmem:[%s17063_s26 + $0x66] ss:$8 sm:$0x7] %vm17010_vm10, %v9822_v42  ;;  %v9872_v52 = vcombine.low %v9850_v46, %v9864_v28  ;;  %v9873_v16 = vcombine.high %v9850_v46, %v9864_v28  ;;  %v9874_v54 = vcombine.low %v9857_v60, %v9871_v0 }
 0x3da   : > { %12222 = vst.msk [vmem:[%s17063_s26 + $0x7e] ss:$8 sm:$0x7] %vm17010_vm10, %v9836_v35  ;;  %v9875_v32 = vcombine.high %v9857_v60, %v9871_v0  ;;  %12219 = vst.msk [vmem:[%s17063_s26 + $0x36] ss:$8 sm:$0x7] %vm17010_vm10, %v9837_v29  ;;  %v9724_v9 = vadd.f32 %v9662_v36, %v9335_v53  ;;  %v9908_v55 = vcombine.low %v9756_v2, %v9757_v4 }
 0x3db   : > { %12220 = vst.msk [vmem:[%s17063_s26 + $0x4e] ss:$8 sm:$0x7] %vm17010_vm10, %v9839_v12  ;;  %12223 = vst.msk [vmem:[%s17063_s26 + $0x96] ss:$8 sm:$0x7] %vm17010_vm10, %v9838_v59  ;;  %v9882_v49 = vrot.slane %v9872_v52, %v22363_v38  ;;  %v9889_v11 = vrot.slane %v9874_v54, %v22363_v38  ;;  %v9896_v20 = vrot.slane %v9873_v16, %v22363_v38 }
 0x3dc   : > { %12224 = vst.msk [vmem:[%s17063_s26 + $0xae] ss:$8 sm:$0x7] %vm17010_vm10, %v9840_v40  ;;  %v9903_v10 = vrot.slane %v9875_v32, %v22363_v38  ;;  %v9909_v22 = vcombine.high %v9756_v2, %v9757_v4  ;;  %v9759_v25 = vadd.f32 %v9748_v18, %v9723_v31  ;;  %v9760_v24 = vadd.f32 %v9748_v18, %v9724_v9 }
 0x3dd   : > { %v9904_v56 = vcombine.high %v9882_v49, %v9882_v49  ;;  %v9905_v17 = vcombine.high %v9889_v11, %v9889_v11  ;;  %v9906_v61 = vcombine.high %v9896_v20, %v9896_v20  ;;  %12225 = vst.msk [vmem:[%s17063_s26 + $0xc6] ss:$8 sm:$0x7] %vm17010_vm10, %v9882_v49  ;;  %12226 = vst.msk [vmem:[%s17063_s26 + $0xde] ss:$8 sm:$0x7] %vm17010_vm10, %v9896_v20  ;;  %v12810_v12 = vpop.f32.mrf.mxu1 }
 0x3de   : > { %v9907_v14 = vcombine.high %v9903_v10, %v9903_v10  ;;  %12229 = vst.msk [vmem:[%s17063_s26 + $0x126] ss:$8 sm:$0x7] %vm17010_vm10, %v9889_v11  ;;  %12230 = vst.msk [vmem:[%s17063_s26 + $0x13e] ss:$8 sm:$0x7] %vm17010_vm10, %v9903_v10  ;;  %v9917_v48 = vrot.slane %v9908_v55, %v22363_v38  ;;  %v9924_v39 = vrot.slane %v9909_v22, %v22363_v38 }
 0x3df   : > { %v9975_v51 = vcombine.low %v9759_v25, %v9760_v24  ;;  %v9976_v26 = vcombine.high %v9759_v25, %v9760_v24  ;;  %12227 = vst.msk [vmem:[%s17063_s26 + $0xf6] ss:$8 sm:$0x7] %vm17010_vm10, %v9904_v56  ;;  %12228 = vst.msk [vmem:[%s17063_s26 + $0x10e] ss:$8 sm:$0x7] %vm17010_vm10, %v9906_v61  ;;  %v9998_v41 = vrot.slane %v21100_v19, %v22363_v38  ;;  %v10668_v52 = vpop.f32.mrf.mxu1 }
 0x3e0   : > { %12231 = vst.msk [vmem:[%s17063_s26 + $0x156] ss:$8 sm:$0x7] %vm17010_vm10, %v9905_v17  ;;  %12232 = vst.msk [vmem:[%s17063_s26 + $0x16e] ss:$8 sm:$0x7] %vm17010_vm10, %v9907_v14  ;;  %v9939_v33 = vcombine.low %v9917_v48, %v21092_v8  ;;  %v9940_v53 = vcombine.high %v9917_v48, %v21092_v8  ;;  %v9941_v6 = vcombine.low %v9924_v39, %v21095_v45  ;;  %v11157_v14 = vpop.permute.xlu1 %11156 }
 0x3e1   : > { %v9942_v13 = vcombine.high %v9924_v39, %v21095_v45  ;;  %v10005_v15 = vrot.slane %v9977_v37, %v22363_v38  ;;  %v9984_v5 = vrot.slane %v9975_v51, %v22363_v38  ;;  %v9991_v23 = vrot.slane %v9976_v26, %v22363_v38  ;;  %v12811_v54 = vpop.f32.mrf.mxu1 }
 0x3e2   : > { %v9949_v8 = vrot.slane %v9939_v33, %v22363_v38  ;;  %v9956_v7 = vrot.slane %v9941_v6, %v22363_v38  ;;  %v9963_v45 = vrot.slane %v9940_v53, %v22363_v38  ;;  %v11162_v53 = vpop.permute.xlu0 %11161 }
 0x3e3   : > { %v21172_v18 = vpop.f32.mrf.mxu0  ;;  %v9970_v28 = vrot.slane %v9942_v13, %v22363_v38  ;;  %v10006_v19 = vcombine.low %v9984_v5, %v9998_v41  ;;  %v10007_v47 = vcombine.high %v9984_v5, %v9998_v41  ;;  %v10008_v63 = vcombine.low %v9991_v23, %v10005_v15  ;;  %v10671_v37 = vpop.f32.mrf.mxu1 }
 0x3e4   : > { %v10009_v30 = vcombine.high %v9991_v23, %v10005_v15  ;;  %v9971_v62 = vcombine.high %v9949_v8, %v9949_v8  ;;  %v9972_v44 = vcombine.high %v9956_v7, %v9956_v7  ;;  %v9973_v0 = vcombine.high %v9963_v45, %v9963_v45  ;;  %12233 = vst.msk [vmem:[%s17063_s26 + $0x186] ss:$8 sm:$0x7] %vm17010_vm10, %v9949_v8 }
 0x3e5   : > { %v10617_v21 = vpop.f32.mrf.mxu0  ;;  %v9974_v27 = vcombine.high %v9970_v28, %v9970_v28  ;;  %12234 = vst.msk [vmem:[%s17063_s26 + $0x19e] ss:$8 sm:$0x7] %vm17010_vm10, %v9963_v45  ;;  %12237 = vst.msk [vmem:[%s17063_s26 + $0x1e6] ss:$8 sm:$0x7] %vm17010_vm10, %v9956_v7  ;;  %v10016_v34 = vrot.slane %v10006_v19, %v22363_v38  ;;  %v10023_v1 = vrot.slane %v10008_v63, %v22363_v38 }
 0x3e6   : > { %12238 = vst.msk [vmem:[%s17063_s26 + $0x1fe] ss:$8 sm:$0x7] %vm17010_vm10, %v9970_v28  ;;  %v10030_v3 = vrot.slane %v10007_v47, %v22363_v38  ;;  %v10037_v42 = vrot.slane %v10009_v30, %v22363_v38  ;;  %12235 = vst.msk [vmem:[%s17063_s26 + $0x1b6] ss:$8 sm:$0x7] %vm17010_vm10, %v9971_v62 }
 0x3e7   : > { %v10619_v43 = vpop.f32.mrf.mxu0  ;;  %12236 = vst.msk [vmem:[%s17063_s26 + $0x1ce] ss:$8 sm:$0x7] %vm17010_vm10, %v9973_v0  ;;  %12239 = vst.msk [vmem:[%s17063_s26 + $0x216] ss:$8 sm:$0x7] %vm17010_vm10, %v9972_v44  ;;  %v10038_v35 = vcombine.high %v10016_v34, %v10016_v34  ;;  %v10039_v46 = vcombine.high %v10023_v1, %v10023_v1 }
 0x3e8   : > { %12240 = vst.msk [vmem:[%s17063_s26 + $0x22e] ss:$8 sm:$0x7] %vm17010_vm10, %v9974_v27  ;;  %v10040_v60 = vcombine.high %v10030_v3, %v10030_v3  ;;  %v10041_v58 = vcombine.high %v10037_v42, %v10037_v42  ;;  %12241 = vst.msk [vmem:[%s17063_s26 + $0x246] ss:$8 sm:$0x7] %vm17010_vm10, %v10016_v34 }
 0x3e9   : > { %v10621_v50 = vpop.f32.mrf.mxu0  ;;  %12242 = vst.msk [vmem:[%s17063_s26 + $0x25e] ss:$8 sm:$0x7] %vm17010_vm10, %v10030_v3  ;;  %12245 = vst.msk [vmem:[%s17063_s26 + $0x2a6] ss:$8 sm:$0x7] %vm17010_vm10, %v10023_v1 }
 0x3ea   : > { %12246 = vst.msk [vmem:[%s17063_s26 + $0x2be] ss:$8 sm:$0x7] %vm17010_vm10, %v10037_v42  ;;  %12243 = vst.msk [vmem:[%s17063_s26 + $0x276] ss:$8 sm:$0x7] %vm17010_vm10, %v10038_v35 }
 0x3eb   : > { %v10625_v31 = vpop.f32.mrf.mxu0  ;;  %12244 = vst.msk [vmem:[%s17063_s26 + $0x28e] ss:$8 sm:$0x7] %vm17010_vm10, %v10040_v60  ;;  %12247 = vst.msk [vmem:[%s17063_s26 + $0x2d6] ss:$8 sm:$0x7] %vm17010_vm10, %v10039_v46  ;;  %v21239_v46 = vpop.permute.xlu0 %11171 }
 0x3ec   : > { %12248 = vst.msk [vmem:[%s17063_s26 + $0x2ee] ss:$8 sm:$0x7] %vm17010_vm10, %v10041_v58 }
 0x3ed   : > { %v10627_v36 = vpop.f32.mrf.mxu0 }
 0x3ef   : > { %v10629_v29 = vpop.f32.mrf.mxu0 }
 0x3f1   : > { %v10631_v59 = vpop.f32.mrf.mxu0 }
 0x3f3   : > { %v12824_v4 = vpop.f32.mrf.mxu1 }
 0x3f4   : > { %v10804_v6 = vadd.f32 %v12824_v4, %v12810_v12 }
 0x3f5   : > { %v10795_v49 = vpop.f32.mrf.mxu1 }
 0x3f6   : > { %v10796_v24 = vadd.f32 %v10795_v49, %v10668_v52 }
 0x3f7   : > { %v10742_v40 = vpop.f32.mrf.mxu0  ;;  %v12825_v20 = vpop.f32.mrf.mxu1 }
 0x3f8   : > { %v10743_v56 = vadd.f32 %v10742_v40, %v21172_v18  ;;  %v10807_v15 = vadd.f32 %v12825_v20, %v12811_v54 }
 0x3f9   : > { %v10744_v16 = vpop.f32.mrf.mxu0  ;;  %v10798_v55 = vpop.f32.mrf.mxu1 }
 0x3fa   : > { %v10745_v39 = vadd.f32 %v10744_v16, %v10617_v21  ;;  %v10799_v5 = vadd.f32 %v10798_v55, %v10671_v37 }
 0x3fb   : > { %v10746_v32 = vpop.f32.mrf.mxu0 }
 0x3fc   : > { %v10747_v13 = vadd.f32 %v10746_v32, %v10619_v43  ;;  %v21236_v43 = vpop.permute.xlu1 %11166 }
 0x3fd   : > { %v10748_v2 = vpop.f32.mrf.mxu0 }
 0x3fe   : > { %v10749_v45 = vadd.f32 %v10748_v2, %v10621_v50 }
 0x3ff   : > { %v10752_v9 = vpop.f32.mrf.mxu0 }
 0x400   : > { %v10753_v44 = vadd.f32 %v10752_v9, %v10625_v31 }
 0x401   : > { %v10754_v11 = vpop.f32.mrf.mxu0 }
 0x402   : > { %v10755_v0 = vadd.f32 %v10754_v11, %v10627_v36 }
 0x403   : > { %v10756_v10 = vpop.f32.mrf.mxu0 }
 0x404   : > { %v10757_v27 = vadd.f32 %v10756_v10, %v10629_v29 }
 0x405   : > { %v10758_v22 = vpop.f32.mrf.mxu0 }
 0x406   : > { %v10759_v1 = vadd.f32 %v10758_v22, %v10631_v59 }
 0x40b   : > { %v12838_v25 = vpop.f32.mrf.mxu1 }
 0x40c   : > { %v11070_v17 = vpop.f32.mrf.mxu0  ;;  %v11146_v28 = vadd.f32 %v12838_v25, %v10804_v6 }
 0x40d   : > { %v11123_v61 = vpop.f32.mrf.mxu1  ;;  %v11138_v51 = vadd.f32 %v11070_v17, %v10743_v56 }
 0x40e   : > { %v11140_v48 = vadd.f32 %v11123_v61, %v10796_v24  ;;  %v11072_v26 = vpop.f32.mrf.mxu0  ;;  %v21242_v60 = vadd.f32 %v21236_v43, %v11146_v28 }
 0x40f   : > { %v12839_v33 = vpop.f32.mrf.mxu1  ;;  %v11139_v23 = vadd.f32 %v11072_v26, %v10745_v39  ;;  %v11174_v47 = vadd.f32 %v11157_v14, %v11138_v51 }
 0x410   : > { %v11176_v41 = vadd.f32 %v11157_v14, %v11140_v48  ;;  %v11074_v8 = vpop.f32.mrf.mxu0  ;;  %v11149_v30 = vadd.f32 %v12839_v33, %v10807_v15 }
 0x411   : > { %v11126_v7 = vpop.f32.mrf.mxu1  ;;  %v11141_v19 = vadd.f32 %v11074_v8, %v10747_v13  ;;  %v11175_v63 = vadd.f32 %v11157_v14, %v11139_v23  ;;  %v11334_v23 = vcombine.high %v21242_v60, %v21242_v60 }
 0x412   : > { %v11200_v18 = vcombine.high %v11176_v41, %v11176_v41  ;;  %v11143_v21 = vadd.f32 %v11126_v7, %v10799_v5  ;;  %v11076_v62 = vpop.f32.mrf.mxu0  ;;  %v11221_v31 = vrot.slane %v11176_v41, %v22363_v38  ;;  %v21248_v59 = vadd.f32 %v21239_v46, %v11149_v30 }
 0x413   : > { %v11142_v34 = vadd.f32 %v11076_v62, %v10749_v45  ;;  %v11198_v42 = vcombine.low %v11174_v47, %v11175_v63  ;;  %v11199_v35 = vcombine.high %v11174_v47, %v11175_v63  ;;  %v11177_v58 = vadd.f32 %v11162_v53, %v11141_v19 }
 0x414   : > { %v11228_v3 = vrot.slane %v11200_v18, %v22363_v38  ;;  %v11080_v50 = vpop.f32.mrf.mxu0  ;;  %v11179_v12 = vadd.f32 %v11162_v53, %v11143_v21 }
 0x415   : > { %v11178_v40 = vadd.f32 %v11162_v53, %v11142_v34  ;;  %v11207_v36 = vrot.slane %v11198_v42, %v22363_v38  ;;  %v11214_v29 = vrot.slane %v11199_v35, %v22363_v38  ;;  %v11144_v37 = vadd.f32 %v11080_v50, %v10753_v44 }
 0x416   : > { %v11082_v52 = vpop.f32.mrf.mxu0  ;;  %v11267_v16 = vcombine.high %v11179_v12, %v11179_v12  ;;  %v11288_v20 = vrot.slane %v11179_v12, %v22363_v38  ;;  %v11401_v44 = vcombine.high %v21248_v59, %v21248_v59 }
 0x417   : > { %v11265_v54 = vcombine.low %v11177_v58, %v11178_v40  ;;  %v11266_v32 = vcombine.high %v11177_v58, %v11178_v40  ;;  %v11229_v2 = vcombine.low %v11207_v36, %v11221_v31  ;;  %v11230_v4 = vcombine.high %v11207_v36, %v11221_v31 }
 0x418   : > { %v11231_v9 = vcombine.low %v11214_v29, %v11228_v3  ;;  %v11232_v49 = vcombine.high %v11214_v29, %v11228_v3  ;;  %v11084_v11 = vpop.f32.mrf.mxu0  ;;  %v11295_v10 = vrot.slane %v11267_v16, %v22363_v38  ;;  %v11145_v8 = vadd.f32 %v11082_v52, %v10755_v0 }
 0x419   : > { %v11274_v55 = vrot.slane %v11265_v54, %v22363_v38  ;;  %v11281_v22 = vrot.slane %v11266_v32, %v22363_v38  ;;  %v11239_v25 = vrot.slane %v11229_v2, %v22363_v38  ;;  %v11253_v56 = vrot.slane %v11230_v4, %v22363_v38 }
 0x41a   : > { %v11246_v24 = vrot.slane %v11231_v9, %v22363_v38  ;;  %v11260_v17 = vrot.slane %v11232_v49, %v22363_v38  ;;  %v11086_v51 = vpop.f32.mrf.mxu0  ;;  %v11147_v7 = vadd.f32 %v11084_v11, %v10757_v27  ;;  %v11180_v63 = vadd.f32 %v21236_v43, %v11144_v37 }
 0x41b   : > { %v11296_v61 = vcombine.low %v11274_v55, %v11288_v20  ;;  %v11297_v14 = vcombine.high %v11274_v55, %v11288_v20  ;;  %v11298_v48 = vcombine.low %v11281_v22, %v11295_v10  ;;  %v11299_v39 = vcombine.high %v11281_v22, %v11295_v10  ;;  %12302 = vst.msk [vmem:[%s17063_s26 + $0x7] ss:$8 sm:$0x7] %vm17010_vm10, %v11239_v25 }
 0x41c   : > { %v11261_v26 = vcombine.high %v11239_v25, %v11239_v25  ;;  %v11262_v33 = vcombine.high %v11246_v24, %v11246_v24  ;;  %v11263_v53 = vcombine.high %v11253_v56, %v11253_v56  ;;  %v11264_v6 = vcombine.high %v11260_v17, %v11260_v17  ;;  %12303 = vst.msk [vmem:[%s17063_s26 + $0x1f] ss:$8 sm:$0x7] %vm17010_vm10, %v11253_v56 }
 0x41d   : > { %12306 = vst.msk [vmem:[%s17063_s26 + $0x67] ss:$8 sm:$0x7] %vm17010_vm10, %v11246_v24  ;;  %12307 = vst.msk [vmem:[%s17063_s26 + $0x7f] ss:$8 sm:$0x7] %vm17010_vm10, %v11260_v17  ;;  %v11306_v13 = vrot.slane %v11296_v61, %v22363_v38  ;;  %v11313_v41 = vrot.slane %v11298_v48, %v22363_v38  ;;  %v11320_v15 = vrot.slane %v11297_v14, %v22363_v38 }
 0x41e   : > { %v11327_v5 = vrot.slane %v11299_v39, %v22363_v38  ;;  %12304 = vst.msk [vmem:[%s17063_s26 + $0x37] ss:$8 sm:$0x7] %vm17010_vm10, %v11261_v26  ;;  %12305 = vst.msk [vmem:[%s17063_s26 + $0x4f] ss:$8 sm:$0x7] %vm17010_vm10, %v11263_v53  ;;  %v11148_v45 = vadd.f32 %v11086_v51, %v10759_v1  ;;  %v11181_v30 = vadd.f32 %v21236_v43, %v11145_v8 }
 0x41f   : > { %12308 = vst.msk [vmem:[%s17063_s26 + $0x97] ss:$8 sm:$0x7] %vm17010_vm10, %v11262_v33  ;;  %12309 = vst.msk [vmem:[%s17063_s26 + $0xaf] ss:$8 sm:$0x7] %vm17010_vm10, %v11264_v6  ;;  %v11328_v28 = vcombine.high %v11306_v13, %v11306_v13  ;;  %v11329_v18 = vcombine.high %v11313_v41, %v11313_v41  ;;  %v11330_v19 = vcombine.high %v11320_v15, %v11320_v15 }
 0x420   : > { %v11331_v47 = vcombine.high %v11327_v5, %v11327_v5  ;;  %12310 = vst.msk [vmem:[%s17063_s26 + $0xc7] ss:$8 sm:$0x7] %vm17010_vm10, %v11306_v13  ;;  %12311 = vst.msk [vmem:[%s17063_s26 + $0xdf] ss:$8 sm:$0x7] %vm17010_vm10, %v11320_v15  ;;  %v11183_v21 = vadd.f32 %v21239_v46, %v11147_v7  ;;  %v11184_v62 = vadd.f32 %v21239_v46, %v11148_v45 }
 0x421   : > { %12314 = vst.msk [vmem:[%s17063_s26 + $0x127] ss:$8 sm:$0x7] %vm17010_vm10, %v11313_v41  ;;  %12315 = vst.msk [vmem:[%s17063_s26 + $0x13f] ss:$8 sm:$0x7] %vm17010_vm10, %v11327_v5  ;;  %v11332_v0 = vcombine.low %v11180_v63, %v11181_v30  ;;  %v11333_v27 = vcombine.high %v11180_v63, %v11181_v30  ;;  %v11355_v1 = vrot.slane %v21242_v60, %v22363_v38 }
 0x422   : > { %12312 = vst.msk [vmem:[%s17063_s26 + $0xf7] ss:$8 sm:$0x7] %vm17010_vm10, %v11328_v28  ;;  %12313 = vst.msk [vmem:[%s17063_s26 + $0x10f] ss:$8 sm:$0x7] %vm17010_vm10, %v11330_v19  ;;  %v11399_v34 = vcombine.low %v11183_v21, %v11184_v62  ;;  %v11400_v43 = vcombine.high %v11183_v21, %v11184_v62  ;;  %v11362_v3 = vrot.slane %v11334_v23, %v22363_v38 }
 0x423   : > { %12316 = vst.msk [vmem:[%s17063_s26 + $0x157] ss:$8 sm:$0x7] %vm17010_vm10, %v11329_v18  ;;  %12317 = vst.msk [vmem:[%s17063_s26 + $0x16f] ss:$8 sm:$0x7] %vm17010_vm10, %v11331_v47  ;;  %v11341_v42 = vrot.slane %v11332_v0, %v22363_v38  ;;  %v11348_v35 = vrot.slane %v11333_v27, %v22363_v38  ;;  %v11422_v58 = vrot.slane %v21248_v59, %v22363_v38 }
 0x424   : > { %v11408_v50 = vrot.slane %v11399_v34, %v22363_v38  ;;  %v11415_v46 = vrot.slane %v11400_v43, %v22363_v38  ;;  %v11429_v12 = vrot.slane %v11401_v44, %v22363_v38 }
 0x425   : > { %v11363_v40 = vcombine.low %v11341_v42, %v11355_v1  ;;  %v11364_v31 = vcombine.high %v11341_v42, %v11355_v1  ;;  %v11365_v36 = vcombine.low %v11348_v35, %v11362_v3  ;;  %v11366_v29 = vcombine.high %v11348_v35, %v11362_v3 }
 0x426   : > { %v11430_v60 = vcombine.low %v11408_v50, %v11422_v58  ;;  %v11431_v52 = vcombine.high %v11408_v50, %v11422_v58  ;;  %v11432_v16 = vcombine.low %v11415_v46, %v11429_v12  ;;  %v11433_v54 = vcombine.high %v11415_v46, %v11429_v12 }
 0x427   : > { %v11373_v32 = vrot.slane %v11363_v40, %v22363_v38  ;;  %v11380_v37 = vrot.slane %v11365_v36, %v22363_v38  ;;  %v11387_v59 = vrot.slane %v11364_v31, %v22363_v38  ;;  %v11394_v2 = vrot.slane %v11366_v29, %v22363_v38 }
 0x428   : > { %v11440_v4 = vrot.slane %v11430_v60, %v22363_v38  ;;  %v11447_v9 = vrot.slane %v11432_v16, %v22363_v38  ;;  %v11454_v49 = vrot.slane %v11431_v52, %v22363_v38  ;;  %v11461_v11 = vrot.slane %v11433_v54, %v22363_v38 }
 0x429   : > { %v11395_v20 = vcombine.high %v11373_v32, %v11373_v32  ;;  %v11396_v10 = vcombine.high %v11380_v37, %v11380_v37  ;;  %v11397_v55 = vcombine.high %v11387_v59, %v11387_v59  ;;  %v11398_v22 = vcombine.high %v11394_v2, %v11394_v2  ;;  %12318 = vst.msk [vmem:[%s17063_s26 + $0x187] ss:$8 sm:$0x7] %vm17010_vm10, %v11373_v32 }
 0x42a   : > { %12319 = vst.msk [vmem:[%s17063_s26 + $0x19f] ss:$8 sm:$0x7] %vm17010_vm10, %v11387_v59  ;;  %12322 = vst.msk [vmem:[%s17063_s26 + $0x1e7] ss:$8 sm:$0x7] %vm17010_vm10, %v11380_v37  ;;  %v11462_v38 = vcombine.high %v11440_v4, %v11440_v4  ;;  %v11463_v25 = vcombine.high %v11447_v9, %v11447_v9  ;;  %v11464_v24 = vcombine.high %v11454_v49, %v11454_v49 }
 0x42b   : > { %12323 = vst.msk [vmem:[%s17063_s26 + $0x1ff] ss:$8 sm:$0x7] %vm17010_vm10, %v11394_v2  ;;  %v11465_v56 = vcombine.high %v11461_v11, %v11461_v11  ;;  %12326 = vst.msk [vmem:[%s17063_s26 + $0x247] ss:$8 sm:$0x7] %vm17010_vm10, %v11440_v4 }
 0x42c   : > { %12327 = vst.msk [vmem:[%s17063_s26 + $0x25f] ss:$8 sm:$0x7] %vm17010_vm10, %v11454_v49  ;;  %12330 = vst.msk [vmem:[%s17063_s26 + $0x2a7] ss:$8 sm:$0x7] %vm17010_vm10, %v11447_v9 }
 0x42d   : > { %12331 = vst.msk [vmem:[%s17063_s26 + $0x2bf] ss:$8 sm:$0x7] %vm17010_vm10, %v11461_v11  ;;  %12320 = vst.msk [vmem:[%s17063_s26 + $0x1b7] ss:$8 sm:$0x7] %vm17010_vm10, %v11395_v20 }
 0x42e   : > { %12321 = vst.msk [vmem:[%s17063_s26 + $0x1cf] ss:$8 sm:$0x7] %vm17010_vm10, %v11397_v55  ;;  %12324 = vst.msk [vmem:[%s17063_s26 + $0x217] ss:$8 sm:$0x7] %vm17010_vm10, %v11396_v10 }
 0x42f   : > { %12325 = vst.msk [vmem:[%s17063_s26 + $0x22f] ss:$8 sm:$0x7] %vm17010_vm10, %v11398_v22  ;;  %12328 = vst.msk [vmem:[%s17063_s26 + $0x277] ss:$8 sm:$0x7] %vm17010_vm10, %v11462_v38 }
 0x430   : > { %12329 = vst.msk [vmem:[%s17063_s26 + $0x28f] ss:$8 sm:$0x7] %vm17010_vm10, %v11464_v24  ;;  %12332 = vst.msk [vmem:[%s17063_s26 + $0x2d7] ss:$8 sm:$0x7] %vm17010_vm10, %v11463_v25 }
 0x431   : > { %12333 = vst.msk [vmem:[%s17063_s26 + $0x2ef] ss:$8 sm:$0x7] %vm17010_vm10, %v11465_v56 }
 0x432 PF: > { %s13_s12 = sadd.s32 1, %s14360_s12  }
 0x433   : > { %p10_p4 = scmp.ge.s32.totalorder %s13_s12, 4  }
 0x435   :  { %12 = sbr.rel (!%p10_p4) target bundleno = 1 (0x1), region = 398 }

</bundles_post_ra>
